<compile_context>
chip_gen: v6e
topology: v6e:2x2x1
jax: 0.10.0
libtpu: 0.0.40
codegen_flags: <defaults>
</compile_context>

<pallas_src>
import numpy as np

import jax
import jax.numpy as jnp
from jax import lax
from jax.experimental import pallas as pl
from jax.experimental.pallas import tpu as pltpu


# f32 keeps exact parity with the reference forward.  On v6e/v7x the MXU is
# bf16-native: jnp.bfloat16 here halves matmul-operand footprint and avoids
# multi-pass f32 MXU emulation at ~1e-3-level numerical deviation.
_MATMUL_DTYPE = jnp.float32


# ----------------------------------------------------------------------------
# In-kernel building blocks.  Activations are (C, H*W) values for the single
# sample handled by the current grid step.
# ----------------------------------------------------------------------------
def _gn_silu(x, gamma, beta, groups, proj, eps=1e-5):
    """GroupNorm (per-sample, biased variance, two-pass) + SiLU.  x: (C, HW).

    Statistics: XLU lane-reduce to a (C, 1) column, then tiny (C, C) x (C, 1)
    dots against the 0/1 same-group projector `proj` -- no HW-wide matmuls.
    """
    C, HW = x.shape
    inv = 1.0 / ((C // groups) * HW)
    rowsum = jnp.sum(x, axis=1, keepdims=True)                              # (C,1)
    mean_c = jnp.dot(proj, rowsum, preferred_element_type=jnp.float32) * inv
    diff = x - mean_c                                                       # lane bcast
    sqsum = jnp.sum(diff * diff, axis=1, keepdims=True)                     # (C,1)
    var_c = jnp.dot(proj, sqsum, preferred_element_type=jnp.float32) * inv
    y = diff * lax.rsqrt(var_c + eps) * gamma + beta
    return y * jax.nn.sigmoid(y)                                            # SiLU


def _conv(x, w_ref, b_col, masks_ref, cm, patch_ref):
    """KxK stride-1 conv (cross-correlation, zero padding) as ONE MXU dot.

    x:      (Cin, HW) f32 activation
    w_ref:  (Cout, K*K*Cin) lane-dense weight ref (tap-major columns)
    b_col:  (Cout, 1) bias column
    The K*K shifted + border-masked copies of x are staged into the VMEM
    scratch `patch_ref` and contracted in a single matmul.
    """
    K, pad, H, W, Cin = cm['K'], cm['pad'], cm['H'], cm['W'], cm['Cin']
    HW = H * W
    t = 0
    for kh in range(K):
        dh = kh - pad
        for kw in range(K):
            dw = kw - pad
            delta = dh * W + dw
            # shifted[p] = x[p + delta]  (static lane rotation)
            # TODO(synk): pltpu.roll would keep this on the XLU rotate path.
            shifted = x if delta == 0 else jnp.roll(x, -delta, axis=1)
            if dh == 0 and dw == 0:
                piece = shifted                                   # all-valid tap
            else:
                m = masks_ref[pl.ds(cm['mask'] + t, 1), pl.ds(0, HW)]   # (1, HW)
                piece = shifted * m
            patch_ref[pl.ds(t * Cin, Cin), pl.ds(0, HW)] = piece.astype(
                patch_ref.dtype)
            t += 1
    patch = patch_ref[pl.ds(0, K * K * Cin), pl.ds(0, HW)]
    return jnp.dot(w_ref[...], patch, preferred_element_type=jnp.float32) + b_col


def _make_encoder_kernel(layout, stem, blocks, n_in, n_out):
    """Whole-encoder fused kernel: one grid step == one sample."""
    proj_cache = {}

    def group_proj(groups, C):
        """(C, C) 0/1 same-group projector; built once per (groups, C)."""
        key = (groups, C)
        if key not in proj_cache:
            Cg = C // groups
            gi = lax.broadcasted_iota(jnp.int32, (groups, C), 0)
            ci = lax.broadcasted_iota(jnp.int32, (groups, C), 1)
            sel_gc = ((ci >= gi * Cg) & (ci < (gi + 1) * Cg)).astype(jnp.float32)
            ci2 = lax.broadcasted_iota(jnp.int32, (C, groups), 0)
            gi2 = lax.broadcasted_iota(jnp.int32, (C, groups), 1)
            sel_cg = ((ci2 >= gi2 * Cg) & (ci2 < (gi2 + 1) * Cg)).astype(jnp.float32)
            proj_cache[key] = jnp.dot(sel_cg, sel_gc,
                                      preferred_element_type=jnp.float32)
        return proj_cache[key]

    def kernel(*refs):
        in_refs = refs[:n_in]
        out_refs = refs[n_in:n_in + n_out]
        patch_ref = refs[n_in + n_out]
        masks_ref = in_refs[layout['masks']]
        vecs_ref = in_refs[layout['vecs']]

        def vec(col_len):
            col, length = col_len
            return vecs_ref[pl.ds(0, length), pl.ds(col, 1)]        # (C, 1)

        # ---- stem: 7x7 conv -------------------------------------------------
        h = in_refs[layout['x']][0]                                 # (Cin, HW)
        h = _conv(h, in_refs[stem['w']], vec(stem['b']), masks_ref, stem,
                  patch_ref)

        # ---- residual blocks -------------------------------------------------
        for bm in blocks:
            u = _gn_silu(h, vec(bm['g1']), vec(bm['be1']), bm['G1'],
                         group_proj(bm['G1'], bm['Cprev']))
            u = _conv(u, in_refs[bm['w1']], vec(bm['b1']), masks_ref, bm['c1'],
                      patch_ref)
            # condition=False -> no pa_proj; Dropout(p=0)/eval -> identity.
            u = _gn_silu(u, vec(bm['g2']), vec(bm['be2']), bm['G2'],
                         group_proj(bm['G2'], bm['Cb']))
            u = _conv(u, in_refs[bm['w2']], vec(bm['b2']), masks_ref, bm['c2'],
                      patch_ref)
            if bm['wsk'] is not None:                               # 1x1 skip conv
                skip = (jnp.dot(in_refs[bm['wsk']][...], h,
                                preferred_element_type=jnp.float32)
                        + vec(bm['bsk']))
            else:
                skip = h
            h = u + skip
            if bm['pool'] is not None:                              # avg_pool as matmul
                h = jnp.dot(h, in_refs[bm['pool']][...],
                            preferred_element_type=jnp.float32)
            if bm['out'] is not None:
                out_refs[bm['out']][0] = h.astype(out_refs[bm['out']].dtype)

    return kernel


# ----------------------------------------------------------------------------
# Host-side constant packing helpers.
# ----------------------------------------------------------------------------
def _pool_matrix(H, W, k):
    Ho, Wo = H // k, W // k
    P = np.zeros((H * W, Ho * Wo), np.float32)
    for h in range(H):
        for w in range(W):
            P[h * W + w, (h // k) * Wo + (w // k)] = 1.0 / (k * k)
    return jnp.asarray(P)


class _MaskSlab:
    """Packs all per-tap conv border masks into one (rows, maxHW) constant."""

    def __init__(self):
        self._base = {}
        self._rows = []
        self.max_hw = 0

    def taps(self, K, pad, H, W):
        key = (K, pad, H, W)
        if key not in self._base:
            self._base[key] = len(self._rows)
            hh, ww = np.meshgrid(np.arange(H), np.arange(W), indexing='ij')
            hh, ww = hh.reshape(-1), ww.reshape(-1)
            for kh in range(K):
                for kw in range(K):
                    dh, dw = kh - pad, kw - pad
                    self._rows.append(((hh + dh >= 0) & (hh + dh < H) &
                                       (ww + dw >= 0) & (ww + dw < W))
                                      .astype(np.float32))
            self.max_hw = max(self.max_hw, H * W)
        return self._base[key]

    def build(self):
        slab = np.zeros((len(self._rows), self.max_hw), np.float32)
        for i, r in enumerate(self._rows):
            slab[i, :r.shape[0]] = r
        return jnp.asarray(slab)


class _VecSlab:
    """Packs all 1-D parameters into one (maxC, ncols) constant -> one DMA."""

    def __init__(self):
        self._cols = []

    def add(self, v):
        self._cols.append(np.asarray(v, np.float32).reshape(-1))
        return (len(self._cols) - 1, self._cols[-1].shape[0])

    def build(self):
        maxc = max(c.shape[0] for c in self._cols)
        slab = np.zeros((maxc, len(self._cols)), np.float32)
        for j, c in enumerate(self._cols):
            slab[:c.shape[0], j] = c
        return jnp.asarray(slab)


def _w2d(w_hwio):
    """HWIO (K,K,Cin,Cout) -> lane-dense (Cout, K*K*Cin), tap-major columns."""
    K, _, Cin, Cout = w_hwio.shape
    return (jnp.transpose(w_hwio, (3, 0, 1, 2))
            .reshape(Cout, K * K * Cin).astype(_MATMUL_DTYPE))


# ----------------------------------------------------------------------------
# Host-side wrapper: builds kernel-layout inputs and issues ONE pallas_call.
# ----------------------------------------------------------------------------
def encoder_forward(x_nchw, params):
    """Full Encoder forward as one fused pallas_call.  x_nchw: (N, C, H, W)."""
    N, Cin, H, W = x_nchw.shape
    stem_w = params['stem_w']                          # (7, 7, Cin, Cs) HWIO
    KH, KW, _, Cs = stem_w.shape
    assert KH == KW
    pad = KH // 2

    masks = _MaskSlab()
    vecs = _VecSlab()
    consts = []                                        # 2-D lane-dense constants

    def add_c(arr):
        consts.append(arr)
        return len(consts) - 1

    stem = dict(K=KH, pad=pad, H=H, W=W, Cin=Cin,
                mask=masks.taps(KH, pad, H, W),
                w=add_c(_w2d(stem_w)),
                b=vecs.add(params['stem_b']))
    max_rows = KH * KW * Cin

    # Spatial width after every block: the module overwrites acts[res], so only
    # the LAST block at each resolution is observable -> drop the dead outputs.
    widths_after, wtmp = [], W
    for p in params['blocks']:
        if p['down'] is not None:
            wtmp //= int(p['down'])
        widths_after.append(wtmp)

    blocks, out_shapes, out_specs = [], [], []
    curH, curW = H, W
    for bi, p in enumerate(params['blocks']):
        w1, w2 = p['w1'], p['w2']
        k = w1.shape[0]
        kpad = 0 if k == 1 else 1
        Cprev, Cb = w1.shape[2], w1.shape[3]
        Cout = w2.shape[3]
        bm = dict(
            Cprev=Cprev, Cb=Cb, Cout=Cout,
            G1=p['gn1_groups'], G2=p['gn2_groups'],
            g1=vecs.add(p['gn1_g']), be1=vecs.add(p['gn1_b']),
            w1=add_c(_w2d(w1)), b1=vecs.add(p['b1']),
            g2=vecs.add(p['gn2_g']), be2=vecs.add(p['gn2_b']),
            w2=add_c(_w2d(w2)), b2=vecs.add(p['b2']),
            c1=dict(K=k, pad=kpad, H=curH, W=curW, Cin=Cprev,
                    mask=masks.taps(k, kpad, curH, curW)),
            c2=dict(K=k, pad=kpad, H=curH, W=curW, Cin=Cb,
                    mask=masks.taps(k, kpad, curH, curW)),
            wsk=None, bsk=None, pool=None, out=None,
        )
        max_rows = max(max_rows, k * k * Cprev, k * k * Cb)
        if 'wskip' in p:
            bm['wsk'] = add_c(jnp.transpose(p['wskip'][0, 0]).astype(jnp.float32))
            bm['bsk'] = vecs.add(p['bskip'])
        d = p['down']
        if d is not None:
            if isinstance(d, float):
                # TODO(synk): adaptive_avg_pool2d (float down_rate) not needed here.
                raise NotImplementedError("adaptive_avg_pool2d down-rate")
            bm['pool'] = add_c(_pool_matrix(curH, curW, int(d)))
            curH //= int(d)
            curW //= int(d)
        if widths_after[bi] not in widths_after[bi + 1:]:
            bm['out'] = len(out_shapes)
            bm['outHW'] = (curH, curW)
            out_shapes.append(
                jax.ShapeDtypeStruct((N, Cout, curH * curW), jnp.float32))
            out_specs.append(
                pl.BlockSpec((1, Cout, curH * curW), lambda n: (n, 0, 0)))
        blocks.append(bm)

    # ---- assemble the input list (x + 2 packed slabs + lane-dense weights) --
    inputs, in_specs = [], []

    def add_input(arr, spec):
        inputs.append(arr)
        in_specs.append(spec)
        return len(inputs) - 1

    def const_spec(arr):
        return pl.BlockSpec(arr.shape, lambda n: (0,) * arr.ndim)

    layout = dict(
        x=add_input(x_nchw.reshape(N, Cin, H * W).astype(jnp.float32),
                    pl.BlockSpec((1, Cin, H * W), lambda n: (n, 0, 0))))
    m_arr = masks.build()
    v_arr = vecs.build()
    layout['masks'] = add_input(m_arr, const_spec(m_arr))
    layout['vecs'] = add_input(v_arr, const_spec(v_arr))
    base = len(inputs)
    for arr in consts:
        add_input(arr, const_spec(arr))

    def fix(i):
        return None if i is None else base + i

    stem['w'] = fix(stem['w'])
    for bm in blocks:
        bm['w1'], bm['w2'] = fix(bm['w1']), fix(bm['w2'])
        bm['wsk'], bm['pool'] = fix(bm['wsk']), fix(bm['pool'])

    kernel = _make_encoder_kernel(layout, stem, blocks, len(inputs),
                                  len(out_shapes))
    outs = pl.pallas_call(
        kernel,
        out_shape=tuple(out_shapes),
        grid=(N,),
        in_specs=in_specs,
        out_specs=tuple(out_specs),
        scratch_shapes=[pltpu.VMEM((max_rows, masks.max_hw), _MATMUL_DTYPE)],
        compiler_params=pltpu.CompilerParams(
            dimension_semantics=("parallel",)),   # 2 TCs on v7x, loop elsewhere
    )(*inputs)
    if not isinstance(outs, (tuple, list)):
        outs = (outs,)

    acts = {}
    for bm in blocks:
        if bm['out'] is not None:
            Ho, Wo = bm['outHW']
            acts[Wo] = outs[bm['out']].reshape(N, bm['Cout'], Ho, Wo)
    return acts


# ----------------------------------------------------------------------------
# Encoder config / parameters (mirrors the PyTorch module's __init__)
# ----------------------------------------------------------------------------
class Args:
    enc_arch = "16b1d2,8b1"
    widths = (16, 32)
    input_channels = 3
    bottleneck = 4
    p_dropout = 0.0     # Dropout is identity at p=0 / eval
    embd_dim = 32       # unused: Encoder builds its Blocks with condition=False


def parse_encoder(args):
    stages = []
    stem = None
    for i, stage in enumerate(args.enc_arch.split(',')):
        start = stage.index('b') + 1
        end = stage.index('d') if 'd' in stage else None
        n_blocks = int(stage[start:end])
        if i == 0:
            if n_blocks == 0 and 'd' not in stage:
                # TODO(synk): stride-2 conv stem variant not exercised by this config
                stem = (args.widths[1], 2)
                continue
            stem = (args.widths[0], 1)
        stages += [(args.widths[i], None) for _ in range(n_blocks)]
        if 'd' in stage:
            down = stage[stage.index('d') + 1:]
            down = float(down) if '.' in down else int(down)
            stages += [(args.widths[i + 1], down)]
    return stem, stages


def init_params(args, key, zero_conv2=True):
    """Parameters mirroring the PyTorch module (HWIO conv weights).
    zero_conv2=True mirrors zero_module() on each block's conv2; False uses
    random weights there so the self-test also exercises that path numerically.
    """
    (stem_width, stem_stride), stages = parse_encoder(args)
    assert stem_stride == 1, "only the stride-1 stem config is exercised here"

    def nrm(k, shape, scale):
        return scale * jax.random.normal(k, shape, jnp.float32)

    keys = iter(jax.random.split(key, 64))
    params = {
        'stem_w': nrm(next(keys), (7, 7, args.input_channels, stem_width), 0.05),
        'stem_b': nrm(next(keys), (stem_width,), 0.01),
        'blocks': [],
    }
    for i, (width, d) in enumerate(stages):
        prev = stages[max(0, i - 1)][0]
        bott = prev // args.bottleneck
        p = {
            'gn1_g': (jnp.ones((prev,), jnp.float32) if zero_conv2
                      else 1.0 + nrm(next(keys), (prev,), 0.1)),
            'gn1_b': (jnp.zeros((prev,), jnp.float32) if zero_conv2
                      else nrm(next(keys), (prev,), 0.1)),
            'gn1_groups': min(32, prev // 4),
            'w1': nrm(next(keys), (3, 3, prev, bott), 0.05),
            'b1': nrm(next(keys), (bott,), 0.01),
            'gn2_g': (jnp.ones((bott,), jnp.float32) if zero_conv2
                      else 1.0 + nrm(next(keys), (bott,), 0.1)),
            'gn2_b': (jnp.zeros((bott,), jnp.float32) if zero_conv2
                      else nrm(next(keys), (bott,), 0.1)),
            'gn2_groups': min(32, bott // 4),
            # zero_module(nn.Conv2d(...)) -> weights AND bias zeroed
            'w2': (jnp.zeros((3, 3, bott, width), jnp.float32) if zero_conv2
                   else nrm(next(keys), (3, 3, bott, width), 0.05)),
            'b2': (jnp.zeros((width,), jnp.float32) if zero_conv2
                   else nrm(next(keys), (width,), 0.01)),
            'down': d,
        }
        if prev != width:
            p['wskip'] = nrm(next(keys), (1, 1, prev, width), 0.05)
            p['bskip'] = nrm(next(keys), (width,), 0.01)
        params['blocks'].append(p)
    return params


# ----------------------------------------------------------------------------
# Pure-JAX reference (NCHW) for the correctness check
# ----------------------------------------------------------------------------
def ref_conv2d(x, w_hwio, b, pad):
    w = jnp.transpose(w_hwio, (3, 2, 0, 1))   # OIHW
    out = lax.conv_general_dilated(
        x, w, (1, 1), [(pad, pad), (pad, pad)],
        dimension_numbers=('NCHW', 'OIHW', 'NCHW'))
    return out + b.reshape(1, -1, 1, 1)


def ref_gn_silu(x, g, bt, G, eps=1e-5):
    N, C, H, W = x.shape
    xg = x.reshape(N, G, C // G, H, W)
    m = xg.mean(axis=(2, 3, 4), keepdims=True)
    v = ((xg - m) ** 2).mean(axis=(2, 3, 4), keepdims=True)
    y = ((xg - m) / jnp.sqrt(v + eps)).reshape(N, C, H, W)
    y = y * g.reshape(1, -1, 1, 1) + bt.reshape(1, -1, 1, 1)
    return y * jax.nn.sigmoid(y)


def ref_pool(x, k):
    N, C, H, W = x.shape
    return x.reshape(N, C, H // k, k, W // k, k).mean(axis=(3, 5))


def ref_block_forward(x, p):
    h = ref_gn_silu(x, p['gn1_g'], p['gn1_b'], p['gn1_groups'])
    h = ref_conv2d(h, p['w1'], p['b1'], pad=1)
    h = ref_gn_silu(h, p['gn2_g'], p['gn2_b'], p['gn2_groups'])
    h = ref_conv2d(h, p['w2'], p['b2'], pad=1)
    skip = ref_conv2d(x, p['wskip'], p['bskip'], pad=0) if 'wskip' in p else x
    out = h + skip
    if p['down'] is not None:
        out = ref_pool(out, int(p['down']))
    return out


def ref_encoder_forward(x, params):
    x = ref_conv2d(x, params['stem_w'], params['stem_b'], pad=3)
    acts = {}
    for p in params['blocks']:
        x = ref_block_forward(x, p)
        acts[x.shape[-1]] = x
    return acts


# ----------------------------------------------------------------------------
if __name__ == "__main__":
    args = Args()
    key = jax.random.PRNGKey(0)
    kx, kp1, kp2 = jax.random.split(key, 3)
    # NCHW input, same layout as the PyTorch module: (2, 3, 16, 16)
    x = jax.random.normal(kx, (2, args.input_channels, 16, 16), jnp.float32)

    test_sets = [
        ("module-init", init_params(args, kp1, zero_conv2=True)),
        ("random-conv2", init_params(args, kp2, zero_conv2=False)),
    ]
    for tag, params in test_sets:
        acts = encoder_forward(x, params)
        acts = {k: jax.block_until_ready(v) for k, v in acts.items()}

        ref_acts = ref_encoder_forward(x, params)
        assert set(acts.keys()) == set(ref_acts.keys()), tag
        for k in ref_acts:
            assert acts[k].shape == ref_acts[k].shape, (tag, k)
            assert jnp.allclose(acts[k], ref_acts[k], atol=1e-3, rtol=1e-3), (tag, k)

    print("KERNEL_OK")
</pallas_src>

<mosaic_0001>
module attributes {stable_mosaic.version = 11 : i64} {
  func.func @kernel(%arg0: i32, %arg1: memref<1x3x256xf32, #tpu.memory_space<vmem>>, %arg2: memref<67x256xf32, #tpu.memory_space<vmem>>, %arg3: memref<32x20xf32, #tpu.memory_space<vmem>>, %arg4: memref<16x147xf32, #tpu.memory_space<vmem>>, %arg5: memref<4x144xf32, #tpu.memory_space<vmem>>, %arg6: memref<16x36xf32, #tpu.memory_space<vmem>>, %arg7: memref<4x144xf32, #tpu.memory_space<vmem>>, %arg8: memref<32x36xf32, #tpu.memory_space<vmem>>, %arg9: memref<32x16xf32, #tpu.memory_space<vmem>>, %arg10: memref<256x64xf32, #tpu.memory_space<vmem>>, %arg11: memref<8x288xf32, #tpu.memory_space<vmem>>, %arg12: memref<32x72xf32, #tpu.memory_space<vmem>>, %arg13: memref<1x16x256xf32, #tpu.memory_space<vmem>>, %arg14: memref<1x32x64xf32, #tpu.memory_space<vmem>>, %arg15: memref<288x256xf32, #tpu.memory_space<vmem>>) attributes {dimension_semantics = [#tpu.dimension_semantics<parallel>], iteration_bounds = array<i64: 2>, scalar_prefetch = 0 : i64, scratch_operands = 1 : i64, tpu.core_type = #tpu.core_type<tc>, window_params = [{transform_indices = @transform_0, window_bounds = array<i64: 1, 3, 256>}, {pipeline_mode = #tpu.pipeline_mode<synchronous>, transform_indices = @transform_1, window_bounds = array<i64: 67, 256>}, {pipeline_mode = #tpu.pipeline_mode<synchronous>, transform_indices = @transform_2, window_bounds = array<i64: 32, 20>}, {pipeline_mode = #tpu.pipeline_mode<synchronous>, transform_indices = @transform_3, window_bounds = array<i64: 16, 147>}, {pipeline_mode = #tpu.pipeline_mode<synchronous>, transform_indices = @transform_4, window_bounds = array<i64: 4, 144>}, {pipeline_mode = #tpu.pipeline_mode<synchronous>, transform_indices = @transform_5, window_bounds = array<i64: 16, 36>}, {pipeline_mode = #tpu.pipeline_mode<synchronous>, transform_indices = @transform_6, window_bounds = array<i64: 4, 144>}, {pipeline_mode = #tpu.pipeline_mode<synchronous>, transform_indices = @transform_7, window_bounds = array<i64: 32, 36>}, {pipeline_mode = #tpu.pipeline_mode<synchronous>, transform_indices = @transform_8, window_bounds = array<i64: 32, 16>}, {pipeline_mode = #tpu.pipeline_mode<synchronous>, transform_indices = @transform_9, window_bounds = array<i64: 256, 64>}, {pipeline_mode = #tpu.pipeline_mode<synchronous>, transform_indices = @transform_10, window_bounds = array<i64: 8, 288>}, {pipeline_mode = #tpu.pipeline_mode<synchronous>, transform_indices = @transform_11, window_bounds = array<i64: 32, 72>}, {transform_indices = @transform_12, window_bounds = array<i64: 1, 16, 256>}, {transform_indices = @transform_13, window_bounds = array<i64: 1, 32, 64>}]} {
    %c0 = arith.constant 0 : index
    %c0_0 = arith.constant 0 : index
    %c0_1 = arith.constant 0 : index
    %0 = vector.load %arg1[%c0, %c0_0, %c0_1] : memref<1x3x256xf32, #tpu.memory_space<vmem>>, vector<1x3x256xf32>
    %1 = vector.shape_cast %0 : vector<1x3x256xf32> to vector<3x256xf32>
    %c0_2 = arith.constant 0 : index
    %c0_3 = arith.constant 0 : index
    %2 = vector.load %arg3[%c0_2, %c0_3] : memref<32x20xf32, #tpu.memory_space<vmem>>, vector<16x1xf32>
    %3 = vector.extract_strided_slice %1 {offsets = [0, 205], sizes = [3, 51], strides = [1, 1]} : vector<3x256xf32> to vector<3x51xf32>
    %4 = vector.extract_strided_slice %1 {offsets = [0, 0], sizes = [3, 205], strides = [1, 1]} : vector<3x256xf32> to vector<3x205xf32>
    %5 = tpu.concatenate %3, %4 in 1 : vector<3x51xf32>, vector<3x205xf32> -> vector<3x256xf32>
    %c0_4 = arith.constant 0 : index
    %c0_5 = arith.constant 0 : index
    %6 = vector.load %arg2[%c0_4, %c0_5] : memref<67x256xf32, #tpu.memory_space<vmem>>, vector<1x256xf32>
    %7 = vector.broadcast %6 : vector<1x256xf32> to vector<3x256xf32>
    %8 = arith.mulf %5, %7 : vector<3x256xf32>
    %c0_6 = arith.constant 0 : index
    %c0_7 = arith.constant 0 : index
    %9 = vector.load %arg15[%c0_6, %c0_7] : memref<288x256xf32, #tpu.memory_space<vmem>>, vector<3x256xf32>
    tpu.vector_store %arg15[%c0_6, %c0_7], %8 {strides = array<i32>} : memref<288x256xf32, #tpu.memory_space<vmem>>, vector<3x256xf32>,
    %10 = vector.extract_strided_slice %1 {offsets = [0, 206], sizes = [3, 50], strides = [1, 1]} : vector<3x256xf32> to vector<3x50xf32>
    %11 = vector.extract_strided_slice %1 {offsets = [0, 0], sizes = [3, 206], strides = [1, 1]} : vector<3x256xf32> to vector<3x206xf32>
    %12 = tpu.concatenate %10, %11 in 1 : vector<3x50xf32>, vector<3x206xf32> -> vector<3x256xf32>
    %c1 = arith.constant 1 : index
    %c0_8 = arith.constant 0 : index
    %13 = vector.load %arg2[%c1, %c0_8] : memref<67x256xf32, #tpu.memory_space<vmem>>, vector<1x256xf32>
    %14 = vector.broadcast %13 : vector<1x256xf32> to vector<3x256xf32>
    %15 = arith.mulf %12, %14 : vector<3x256xf32>
    %c3 = arith.constant 3 : index
    %c0_9 = arith.constant 0 : index
    %16 = vector.load %arg15[%c3, %c0_9] : memref<288x256xf32, #tpu.memory_space<vmem>>, vector<3x256xf32>
    tpu.vector_store %arg15[%c3, %c0_9], %15 {strides = array<i32>} : memref<288x256xf32, #tpu.memory_space<vmem>>, vector<3x256xf32>,
    %17 = vector.extract_strided_slice %1 {offsets = [0, 207], sizes = [3, 49], strides = [1, 1]} : vector<3x256xf32> to vector<3x49xf32>
    %18 = vector.extract_strided_slice %1 {offsets = [0, 0], sizes = [3, 207], strides = [1, 1]} : vector<3x256xf32> to vector<3x207xf32>
    %19 = tpu.concatenate %17, %18 in 1 : vector<3x49xf32>, vector<3x207xf32> -> vector<3x256xf32>
    %c2 = arith.constant 2 : index
    %c0_10 = arith.constant 0 : index
    %20 = vector.load %arg2[%c2, %c0_10] : memref<67x256xf32, #tpu.memory_space<vmem>>, vector<1x256xf32>
    %21 = vector.broadcast %20 : vector<1x256xf32> to vector<3x256xf32>
    %22 = arith.mulf %19, %21 : vector<3x256xf32>
    %c6 = arith.constant 6 : index
    %c0_11 = arith.constant 0 : index
    %23 = vector.load %arg15[%c6, %c0_11] : memref<288x256xf32, #tpu.memory_space<vmem>>, vector<3x256xf32>
    tpu.vector_store %arg15[%c6, %c0_11], %22 {strides = array<i32>} : memref<288x256xf32, #tpu.memory_space<vmem>>, vector<3x256xf32>,
    %24 = vector.extract_strided_slice %1 {offsets = [0, 208], sizes = [3, 48], strides = [1, 1]} : vector<3x256xf32> to vector<3x48xf32>
    %25 = vector.extract_strided_slice %1 {offsets = [0, 0], sizes = [3, 208], strides = [1, 1]} : vector<3x256xf32> to vector<3x208xf32>
    %26 = tpu.concatenate %24, %25 in 1 : vector<3x48xf32>, vector<3x208xf32> -> vector<3x256xf32>
    %c3_12 = arith.constant 3 : index
    %c0_13 = arith.constant 0 : index
    %27 = vector.load %arg2[%c3_12, %c0_13] : memref<67x256xf32, #tpu.memory_space<vmem>>, vector<1x256xf32>
    %28 = vector.broadcast %27 : vector<1x256xf32> to vector<3x256xf32>
    %29 = arith.mulf %26, %28 : vector<3x256xf32>
    %c9 = arith.constant 9 : index
    %c0_14 = arith.constant 0 : index
    %30 = vector.load %arg15[%c9, %c0_14] : memref<288x256xf32, #tpu.memory_space<vmem>>, vector<3x256xf32>
    tpu.vector_store %arg15[%c9, %c0_14], %29 {strides = array<i32>} : memref<288x256xf32, #tpu.memory_space<vmem>>, vector<3x256xf32>,
    %31 = vector.extract_strided_slice %1 {offsets = [0, 209], sizes = [3, 47], strides = [1, 1]} : vector<3x256xf32> to vector<3x47xf32>
    %32 = vector.extract_strided_slice %1 {offsets = [0, 0], sizes = [3, 209], strides = [1, 1]} : vector<3x256xf32> to vector<3x209xf32>
    %33 = tpu.concatenate %31, %32 in 1 : vector<3x47xf32>, vector<3x209xf32> -> vector<3x256xf32>
    %c4 = arith.constant 4 : index
    %c0_15 = arith.constant 0 : index
    %34 = vector.load %arg2[%c4, %c0_15] : memref<67x256xf32, #tpu.memory_space<vmem>>, vector<1x256xf32>
    %35 = vector.broadcast %34 : vector<1x256xf32> to vector<3x256xf32>
    %36 = arith.mulf %33, %35 : vector<3x256xf32>
    %c12 = arith.constant 12 : index
    %c0_16 = arith.constant 0 : index
    %37 = vector.load %arg15[%c12, %c0_16] : memref<288x256xf32, #tpu.memory_space<vmem>>, vector<3x256xf32>
    tpu.vector_store %arg15[%c12, %c0_16], %36 {strides = array<i32>} : memref<288x256xf32, #tpu.memory_space<vmem>>, vector<3x256xf32>,
    %38 = vector.extract_strided_slice %1 {offsets = [0, 210], sizes = [3, 46], strides = [1, 1]} : vector<3x256xf32> to vector<3x46xf32>
    %39 = vector.extract_strided_slice %1 {offsets = [0, 0], sizes = [3, 210], strides = [1, 1]} : vector<3x256xf32> to vector<3x210xf32>
    %40 = tpu.concatenate %38, %39 in 1 : vector<3x46xf32>, vector<3x210xf32> -> vector<3x256xf32>
    %c5 = arith.constant 5 : index
    %c0_17 = arith.constant 0 : index
    %41 = vector.load %arg2[%c5, %c0_17] : memref<67x256xf32, #tpu.memory_space<vmem>>, vector<1x256xf32>
    %42 = vector.broadcast %41 : vector<1x256xf32> to vector<3x256xf32>
    %43 = arith.mulf %40, %42 : vector<3x256xf32>
    %c15 = arith.constant 15 : index
    %c0_18 = arith.constant 0 : index
    %44 = vector.load %arg15[%c15, %c0_18] : memref<288x256xf32, #tpu.memory_space<vmem>>, vector<3x256xf32>
    tpu.vector_store %arg15[%c15, %c0_18], %43 {strides = array<i32>} : memref<288x256xf32, #tpu.memory_space<vmem>>, vector<3x256xf32>,
    %45 = vector.extract_strided_slice %1 {offsets = [0, 211], sizes = [3, 45], strides = [1, 1]} : vector<3x256xf32> to vector<3x45xf32>
    %46 = vector.extract_strided_slice %1 {offsets = [0, 0], sizes = [3, 211], strides = [1, 1]} : vector<3x256xf32> to vector<3x211xf32>
    %47 = tpu.concatenate %45, %46 in 1 : vector<3x45xf32>, vector<3x211xf32> -> vector<3x256xf32>
    %c6_19 = arith.constant 6 : index
    %c0_20 = arith.constant 0 : index
    %48 = vector.load %arg2[%c6_19, %c0_20] : memref<67x256xf32, #tpu.memory_space<vmem>>, vector<1x256xf32>
    %49 = vector.broadcast %48 : vector<1x256xf32> to vector<3x256xf32>
    %50 = arith.mulf %47, %49 : vector<3x256xf32>
    %c18 = arith.constant 18 : index
    %c0_21 = arith.constant 0 : index
    %51 = vector.load %arg15[%c18, %c0_21] : memref<288x256xf32, #tpu.memory_space<vmem>>, vector<3x256xf32>
    tpu.vector_store %arg15[%c18, %c0_21], %50 {strides = array<i32>} : memref<288x256xf32, #tpu.memory_space<vmem>>, vector<3x256xf32>,
    %52 = vector.extract_strided_slice %1 {offsets = [0, 221], sizes = [3, 35], strides = [1, 1]} : vector<3x256xf32> to vector<3x35xf32>
    %53 = vector.extract_strided_slice %1 {offsets = [0, 0], sizes = [3, 221], strides = [1, 1]} : vector<3x256xf32> to vector<3x221xf32>
    %54 = tpu.concatenate %52, %53 in 1 : vector<3x35xf32>, vector<3x221xf32> -> vector<3x256xf32>
    %c7 = arith.constant 7 : index
    %c0_22 = arith.constant 0 : index
    %55 = vector.load %arg2[%c7, %c0_22] : memref<67x256xf32, #tpu.memory_space<vmem>>, vector<1x256xf32>
    %56 = vector.broadcast %55 : vector<1x256xf32> to vector<3x256xf32>
    %57 = arith.mulf %54, %56 : vector<3x256xf32>
    %c21 = arith.constant 21 : index
    %c0_23 = arith.constant 0 : index
    %58 = vector.load %arg15[%c21, %c0_23] : memref<288x256xf32, #tpu.memory_space<vmem>>, vector<3x256xf32>
    tpu.vector_store %arg15[%c21, %c0_23], %57 {strides = array<i32>} : memref<288x256xf32, #tpu.memory_space<vmem>>, vector<3x256xf32>,
    %59 = vector.extract_strided_slice %1 {offsets = [0, 222], sizes = [3, 34], strides = [1, 1]} : vector<3x256xf32> to vector<3x34xf32>
    %60 = vector.extract_strided_slice %1 {offsets = [0, 0], sizes = [3, 222], strides = [1, 1]} : vector<3x256xf32> to vector<3x222xf32>
    %61 = tpu.concatenate %59, %60 in 1 : vector<3x34xf32>, vector<3x222xf32> -> vector<3x256xf32>
    %c8 = arith.constant 8 : index
    %c0_24 = arith.constant 0 : index
    %62 = vector.load %arg2[%c8, %c0_24] : memref<67x256xf32, #tpu.memory_space<vmem>>, vector<1x256xf32>
    %63 = vector.broadcast %62 : vector<1x256xf32> to vector<3x256xf32>
    %64 = arith.mulf %61, %63 : vector<3x256xf32>
    %c24 = arith.constant 24 : index
    %c0_25 = arith.constant 0 : index
    %65 = vector.load %arg15[%c24, %c0_25] : memref<288x256xf32, #tpu.memory_space<vmem>>, vector<3x256xf32>
    tpu.vector_store %arg15[%c24, %c0_25], %64 {strides = array<i32>} : memref<288x256xf32, #tpu.memory_space<vmem>>, vector<3x256xf32>,
    %66 = vector.extract_strided_slice %1 {offsets = [0, 223], sizes = [3, 33], strides = [1, 1]} : vector<3x256xf32> to vector<3x33xf32>
    %67 = vector.extract_strided_slice %1 {offsets = [0, 0], sizes = [3, 223], strides = [1, 1]} : vector<3x256xf32> to vector<3x223xf32>
    %68 = tpu.concatenate %66, %67 in 1 : vector<3x33xf32>, vector<3x223xf32> -> vector<3x256xf32>
    %c9_26 = arith.constant 9 : index
    %c0_27 = arith.constant 0 : index
    %69 = vector.load %arg2[%c9_26, %c0_27] : memref<67x256xf32, #tpu.memory_space<vmem>>, vector<1x256xf32>
    %70 = vector.broadcast %69 : vector<1x256xf32> to vector<3x256xf32>
    %71 = arith.mulf %68, %70 : vector<3x256xf32>
    %c27 = arith.constant 27 : index
    %c0_28 = arith.constant 0 : index
    %72 = vector.load %arg15[%c27, %c0_28] : memref<288x256xf32, #tpu.memory_space<vmem>>, vector<3x256xf32>
    tpu.vector_store %arg15[%c27, %c0_28], %71 {strides = array<i32>} : memref<288x256xf32, #tpu.memory_space<vmem>>, vector<3x256xf32>,
    %73 = vector.extract_strided_slice %1 {offsets = [0, 224], sizes = [3, 32], strides = [1, 1]} : vector<3x256xf32> to vector<3x32xf32>
    %74 = vector.extract_strided_slice %1 {offsets = [0, 0], sizes = [3, 224], strides = [1, 1]} : vector<3x256xf32> to vector<3x224xf32>
    %75 = tpu.concatenate %73, %74 in 1 : vector<3x32xf32>, vector<3x224xf32> -> vector<3x256xf32>
    %c10 = arith.constant 10 : index
    %c0_29 = arith.constant 0 : index
    %76 = vector.load %arg2[%c10, %c0_29] : memref<67x256xf32, #tpu.memory_space<vmem>>, vector<1x256xf32>
    %77 = vector.broadcast %76 : vector<1x256xf32> to vector<3x256xf32>
    %78 = arith.mulf %75, %77 : vector<3x256xf32>
    %c30 = arith.constant 30 : index
    %c0_30 = arith.constant 0 : index
    %79 = vector.load %arg15[%c30, %c0_30] : memref<288x256xf32, #tpu.memory_space<vmem>>, vector<3x256xf32>
    tpu.vector_store %arg15[%c30, %c0_30], %78 {strides = array<i32>} : memref<288x256xf32, #tpu.memory_space<vmem>>, vector<3x256xf32>,
    %80 = vector.extract_strided_slice %1 {offsets = [0, 225], sizes = [3, 31], strides = [1, 1]} : vector<3x256xf32> to vector<3x31xf32>
    %81 = vector.extract_strided_slice %1 {offsets = [0, 0], sizes = [3, 225], strides = [1, 1]} : vector<3x256xf32> to vector<3x225xf32>
    %82 = tpu.concatenate %80, %81 in 1 : vector<3x31xf32>, vector<3x225xf32> -> vector<3x256xf32>
    %c11 = arith.constant 11 : index
    %c0_31 = arith.constant 0 : index
    %83 = vector.load %arg2[%c11, %c0_31] : memref<67x256xf32, #tpu.memory_space<vmem>>, vector<1x256xf32>
    %84 = vector.broadcast %83 : vector<1x256xf32> to vector<3x256xf32>
    %85 = arith.mulf %82, %84 : vector<3x256xf32>
    %c33 = arith.constant 33 : index
    %c0_32 = arith.constant 0 : index
    %86 = vector.load %arg15[%c33, %c0_32] : memref<288x256xf32, #tpu.memory_space<vmem>>, vector<3x256xf32>
    tpu.vector_store %arg15[%c33, %c0_32], %85 {strides = array<i32>} : memref<288x256xf32, #tpu.memory_space<vmem>>, vector<3x256xf32>,
    %87 = vector.extract_strided_slice %1 {offsets = [0, 226], sizes = [3, 30], strides = [1, 1]} : vector<3x256xf32> to vector<3x30xf32>
    %88 = vector.extract_strided_slice %1 {offsets = [0, 0], sizes = [3, 226], strides = [1, 1]} : vector<3x256xf32> to vector<3x226xf32>
    %89 = tpu.concatenate %87, %88 in 1 : vector<3x30xf32>, vector<3x226xf32> -> vector<3x256xf32>
    %c12_33 = arith.constant 12 : index
    %c0_34 = arith.constant 0 : index
    %90 = vector.load %arg2[%c12_33, %c0_34] : memref<67x256xf32, #tpu.memory_space<vmem>>, vector<1x256xf32>
    %91 = vector.broadcast %90 : vector<1x256xf32> to vector<3x256xf32>
    %92 = arith.mulf %89, %91 : vector<3x256xf32>
    %c36 = arith.constant 36 : index
    %c0_35 = arith.constant 0 : index
    %93 = vector.load %arg15[%c36, %c0_35] : memref<288x256xf32, #tpu.memory_space<vmem>>, vector<3x256xf32>
    tpu.vector_store %arg15[%c36, %c0_35], %92 {strides = array<i32>} : memref<288x256xf32, #tpu.memory_space<vmem>>, vector<3x256xf32>,
    %94 = vector.extract_strided_slice %1 {offsets = [0, 227], sizes = [3, 29], strides = [1, 1]} : vector<3x256xf32> to vector<3x29xf32>
    %95 = vector.extract_strided_slice %1 {offsets = [0, 0], sizes = [3, 227], strides = [1, 1]} : vector<3x256xf32> to vector<3x227xf32>
    %96 = tpu.concatenate %94, %95 in 1 : vector<3x29xf32>, vector<3x227xf32> -> vector<3x256xf32>
    %c13 = arith.constant 13 : index
    %c0_36 = arith.constant 0 : index
    %97 = vector.load %arg2[%c13, %c0_36] : memref<67x256xf32, #tpu.memory_space<vmem>>, vector<1x256xf32>
    %98 = vector.broadcast %97 : vector<1x256xf32> to vector<3x256xf32>
    %99 = arith.mulf %96, %98 : vector<3x256xf32>
    %c39 = arith.constant 39 : index
    %c0_37 = arith.constant 0 : index
    %100 = vector.load %arg15[%c39, %c0_37] : memref<288x256xf32, #tpu.memory_space<vmem>>, vector<3x256xf32>
    tpu.vector_store %arg15[%c39, %c0_37], %99 {strides = array<i32>} : memref<288x256xf32, #tpu.memory_space<vmem>>, vector<3x256xf32>,
    %101 = vector.extract_strided_slice %1 {offsets = [0, 237], sizes = [3, 19], strides = [1, 1]} : vector<3x256xf32> to vector<3x19xf32>
    %102 = vector.extract_strided_slice %1 {offsets = [0, 0], sizes = [3, 237], strides = [1, 1]} : vector<3x256xf32> to vector<3x237xf32>
    %103 = tpu.concatenate %101, %102 in 1 : vector<3x19xf32>, vector<3x237xf32> -> vector<3x256xf32>
    %c14 = arith.constant 14 : index
    %c0_38 = arith.constant 0 : index
    %104 = vector.load %arg2[%c14, %c0_38] : memref<67x256xf32, #tpu.memory_space<vmem>>, vector<1x256xf32>
    %105 = vector.broadcast %104 : vector<1x256xf32> to vector<3x256xf32>
    %106 = arith.mulf %103, %105 : vector<3x256xf32>
    %c42 = arith.constant 42 : index
    %c0_39 = arith.constant 0 : index
    %107 = vector.load %arg15[%c42, %c0_39] : memref<288x256xf32, #tpu.memory_space<vmem>>, vector<3x256xf32>
    tpu.vector_store %arg15[%c42, %c0_39], %106 {strides = array<i32>} : memref<288x256xf32, #tpu.memory_space<vmem>>, vector<3x256xf32>,
    %108 = vector.extract_strided_slice %1 {offsets = [0, 238], sizes = [3, 18], strides = [1, 1]} : vector<3x256xf32> to vector<3x18xf32>
    %109 = vector.extract_strided_slice %1 {offsets = [0, 0], sizes = [3, 238], strides = [1, 1]} : vector<3x256xf32> to vector<3x238xf32>
    %110 = tpu.concatenate %108, %109 in 1 : vector<3x18xf32>, vector<3x238xf32> -> vector<3x256xf32>
    %c15_40 = arith.constant 15 : index
    %c0_41 = arith.constant 0 : index
    %111 = vector.load %arg2[%c15_40, %c0_41] : memref<67x256xf32, #tpu.memory_space<vmem>>, vector<1x256xf32>
    %112 = vector.broadcast %111 : vector<1x256xf32> to vector<3x256xf32>
    %113 = arith.mulf %110, %112 : vector<3x256xf32>
    %c45 = arith.constant 45 : index
    %c0_42 = arith.constant 0 : index
    %114 = vector.load %arg15[%c45, %c0_42] : memref<288x256xf32, #tpu.memory_space<vmem>>, vector<3x256xf32>
    tpu.vector_store %arg15[%c45, %c0_42], %113 {strides = array<i32>} : memref<288x256xf32, #tpu.memory_space<vmem>>, vector<3x256xf32>,
    %115 = vector.extract_strided_slice %1 {offsets = [0, 239], sizes = [3, 17], strides = [1, 1]} : vector<3x256xf32> to vector<3x17xf32>
    %116 = vector.extract_strided_slice %1 {offsets = [0, 0], sizes = [3, 239], strides = [1, 1]} : vector<3x256xf32> to vector<3x239xf32>
    %117 = tpu.concatenate %115, %116 in 1 : vector<3x17xf32>, vector<3x239xf32> -> vector<3x256xf32>
    %c16 = arith.constant 16 : index
    %c0_43 = arith.constant 0 : index
    %118 = vector.load %arg2[%c16, %c0_43] : memref<67x256xf32, #tpu.memory_space<vmem>>, vector<1x256xf32>
    %119 = vector.broadcast %118 : vector<1x256xf32> to vector<3x256xf32>
    %120 = arith.mulf %117, %119 : vector<3x256xf32>
    %c48 = arith.constant 48 : index
    %c0_44 = arith.constant 0 : index
    %121 = vector.load %arg15[%c48, %c0_44] : memref<288x256xf32, #tpu.memory_space<vmem>>, vector<3x256xf32>
    tpu.vector_store %arg15[%c48, %c0_44], %120 {strides = array<i32>} : memref<288x256xf32, #tpu.memory_space<vmem>>, vector<3x256xf32>,
    %122 = vector.extract_strided_slice %1 {offsets = [0, 240], sizes = [3, 16], strides = [1, 1]} : vector<3x256xf32> to vector<3x16xf32>
    %123 = vector.extract_strided_slice %1 {offsets = [0, 0], sizes = [3, 240], strides = [1, 1]} : vector<3x256xf32> to vector<3x240xf32>
    %124 = tpu.concatenate %122, %123 in 1 : vector<3x16xf32>, vector<3x240xf32> -> vector<3x256xf32>
    %c17 = arith.constant 17 : index
    %c0_45 = arith.constant 0 : index
    %125 = vector.load %arg2[%c17, %c0_45] : memref<67x256xf32, #tpu.memory_space<vmem>>, vector<1x256xf32>
    %126 = vector.broadcast %125 : vector<1x256xf32> to vector<3x256xf32>
    %127 = arith.mulf %124, %126 : vector<3x256xf32>
    %c51 = arith.constant 51 : index
    %c0_46 = arith.constant 0 : index
    %128 = vector.load %arg15[%c51, %c0_46] : memref<288x256xf32, #tpu.memory_space<vmem>>, vector<3x256xf32>
    tpu.vector_store %arg15[%c51, %c0_46], %127 {strides = array<i32>} : memref<288x256xf32, #tpu.memory_space<vmem>>, vector<3x256xf32>,
    %129 = vector.extract_strided_slice %1 {offsets = [0, 241], sizes = [3, 15], strides = [1, 1]} : vector<3x256xf32> to vector<3x15xf32>
    %130 = vector.extract_strided_slice %1 {offsets = [0, 0], sizes = [3, 241], strides = [1, 1]} : vector<3x256xf32> to vector<3x241xf32>
    %131 = tpu.concatenate %129, %130 in 1 : vector<3x15xf32>, vector<3x241xf32> -> vector<3x256xf32>
    %c18_47 = arith.constant 18 : index
    %c0_48 = arith.constant 0 : index
    %132 = vector.load %arg2[%c18_47, %c0_48] : memref<67x256xf32, #tpu.memory_space<vmem>>, vector<1x256xf32>
    %133 = vector.broadcast %132 : vector<1x256xf32> to vector<3x256xf32>
    %134 = arith.mulf %131, %133 : vector<3x256xf32>
    %c54 = arith.constant 54 : index
    %c0_49 = arith.constant 0 : index
    %135 = vector.load %arg15[%c54, %c0_49] : memref<288x256xf32, #tpu.memory_space<vmem>>, vector<3x256xf32>
    tpu.vector_store %arg15[%c54, %c0_49], %134 {strides = array<i32>} : memref<288x256xf32, #tpu.memory_space<vmem>>, vector<3x256xf32>,
    %136 = vector.extract_strided_slice %1 {offsets = [0, 242], sizes = [3, 14], strides = [1, 1]} : vector<3x256xf32> to vector<3x14xf32>
    %137 = vector.extract_strided_slice %1 {offsets = [0, 0], sizes = [3, 242], strides = [1, 1]} : vector<3x256xf32> to vector<3x242xf32>
    %138 = tpu.concatenate %136, %137 in 1 : vector<3x14xf32>, vector<3x242xf32> -> vector<3x256xf32>
    %c19 = arith.constant 19 : index
    %c0_50 = arith.constant 0 : index
    %139 = vector.load %arg2[%c19, %c0_50] : memref<67x256xf32, #tpu.memory_space<vmem>>, vector<1x256xf32>
    %140 = vector.broadcast %139 : vector<1x256xf32> to vector<3x256xf32>
    %141 = arith.mulf %138, %140 : vector<3x256xf32>
    %c57 = arith.constant 57 : index
    %c0_51 = arith.constant 0 : index
    %142 = vector.load %arg15[%c57, %c0_51] : memref<288x256xf32, #tpu.memory_space<vmem>>, vector<3x256xf32>
    tpu.vector_store %arg15[%c57, %c0_51], %141 {strides = array<i32>} : memref<288x256xf32, #tpu.memory_space<vmem>>, vector<3x256xf32>,
    %143 = vector.extract_strided_slice %1 {offsets = [0, 243], sizes = [3, 13], strides = [1, 1]} : vector<3x256xf32> to vector<3x13xf32>
    %144 = vector.extract_strided_slice %1 {offsets = [0, 0], sizes = [3, 243], strides = [1, 1]} : vector<3x256xf32> to vector<3x243xf32>
    %145 = tpu.concatenate %143, %144 in 1 : vector<3x13xf32>, vector<3x243xf32> -> vector<3x256xf32>
    %c20 = arith.constant 20 : index
    %c0_52 = arith.constant 0 : index
    %146 = vector.load %arg2[%c20, %c0_52] : memref<67x256xf32, #tpu.memory_space<vmem>>, vector<1x256xf32>
    %147 = vector.broadcast %146 : vector<1x256xf32> to vector<3x256xf32>
    %148 = arith.mulf %145, %147 : vector<3x256xf32>
    %c60 = arith.constant 60 : index
    %c0_53 = arith.constant 0 : index
    %149 = vector.load %arg15[%c60, %c0_53] : memref<288x256xf32, #tpu.memory_space<vmem>>, vector<3x256xf32>
    tpu.vector_store %arg15[%c60, %c0_53], %148 {strides = array<i32>} : memref<288x256xf32, #tpu.memory_space<vmem>>, vector<3x256xf32>,
    %150 = vector.extract_strided_slice %1 {offsets = [0, 253], sizes = [3, 3], strides = [1, 1]} : vector<3x256xf32> to vector<3x3xf32>
    %151 = vector.extract_strided_slice %1 {offsets = [0, 0], sizes = [3, 253], strides = [1, 1]} : vector<3x256xf32> to vector<3x253xf32>
    %152 = tpu.concatenate %150, %151 in 1 : vector<3x3xf32>, vector<3x253xf32> -> vector<3x256xf32>
    %c21_54 = arith.constant 21 : index
    %c0_55 = arith.constant 0 : index
    %153 = vector.load %arg2[%c21_54, %c0_55] : memref<67x256xf32, #tpu.memory_space<vmem>>, vector<1x256xf32>
    %154 = vector.broadcast %153 : vector<1x256xf32> to vector<3x256xf32>
    %155 = arith.mulf %152, %154 : vector<3x256xf32>
    %c63 = arith.constant 63 : index
    %c0_56 = arith.constant 0 : index
    %156 = vector.load %arg15[%c63, %c0_56] : memref<288x256xf32, #tpu.memory_space<vmem>>, vector<3x256xf32>
    tpu.vector_store %arg15[%c63, %c0_56], %155 {strides = array<i32>} : memref<288x256xf32, #tpu.memory_space<vmem>>, vector<3x256xf32>,
    %157 = vector.extract_strided_slice %1 {offsets = [0, 254], sizes = [3, 2], strides = [1, 1]} : vector<3x256xf32> to vector<3x2xf32>
    %158 = vector.extract_strided_slice %1 {offsets = [0, 0], sizes = [3, 254], strides = [1, 1]} : vector<3x256xf32> to vector<3x254xf32>
    %159 = tpu.concatenate %157, %158 in 1 : vector<3x2xf32>, vector<3x254xf32> -> vector<3x256xf32>
    %c22 = arith.constant 22 : index
    %c0_57 = arith.constant 0 : index
    %160 = vector.load %arg2[%c22, %c0_57] : memref<67x256xf32, #tpu.memory_space<vmem>>, vector<1x256xf32>
    %161 = vector.broadcast %160 : vector<1x256xf32> to vector<3x256xf32>
    %162 = arith.mulf %159, %161 : vector<3x256xf32>
    %c66 = arith.constant 66 : index
    %c0_58 = arith.constant 0 : index
    %163 = vector.load %arg15[%c66, %c0_58] : memref<288x256xf32, #tpu.memory_space<vmem>>, vector<3x256xf32>
    tpu.vector_store %arg15[%c66, %c0_58], %162 {strides = array<i32>} : memref<288x256xf32, #tpu.memory_space<vmem>>, vector<3x256xf32>,
    %164 = vector.extract_strided_slice %1 {offsets = [0, 255], sizes = [3, 1], strides = [1, 1]} : vector<3x256xf32> to vector<3x1xf32>
    %165 = vector.extract_strided_slice %1 {offsets = [0, 0], sizes = [3, 255], strides = [1, 1]} : vector<3x256xf32> to vector<3x255xf32>
    %166 = tpu.concatenate %164, %165 in 1 : vector<3x1xf32>, vector<3x255xf32> -> vector<3x256xf32>
    %c23 = arith.constant 23 : index
    %c0_59 = arith.constant 0 : index
    %167 = vector.load %arg2[%c23, %c0_59] : memref<67x256xf32, #tpu.memory_space<vmem>>, vector<1x256xf32>
    %168 = vector.broadcast %167 : vector<1x256xf32> to vector<3x256xf32>
    %169 = arith.mulf %166, %168 : vector<3x256xf32>
    %c69 = arith.constant 69 : index
    %c0_60 = arith.constant 0 : index
    %170 = vector.load %arg15[%c69, %c0_60] : memref<288x256xf32, #tpu.memory_space<vmem>>, vector<3x256xf32>
    tpu.vector_store %arg15[%c69, %c0_60], %169 {strides = array<i32>} : memref<288x256xf32, #tpu.memory_space<vmem>>, vector<3x256xf32>,
    %c72 = arith.constant 72 : index
    %c0_61 = arith.constant 0 : index
    %171 = vector.load %arg15[%c72, %c0_61] : memref<288x256xf32, #tpu.memory_space<vmem>>, vector<3x256xf32>
    tpu.vector_store %arg15[%c72, %c0_61], %1 {strides = array<i32>} : memref<288x256xf32, #tpu.memory_space<vmem>>, vector<3x256xf32>,
    %172 = vector.extract_strided_slice %1 {offsets = [0, 1], sizes = [3, 255], strides = [1, 1]} : vector<3x256xf32> to vector<3x255xf32>
    %173 = vector.extract_strided_slice %1 {offsets = [0, 0], sizes = [3, 1], strides = [1, 1]} : vector<3x256xf32> to vector<3x1xf32>
    %174 = tpu.concatenate %172, %173 in 1 : vector<3x255xf32>, vector<3x1xf32> -> vector<3x256xf32>
    %c25 = arith.constant 25 : index
    %c0_62 = arith.constant 0 : index
    %175 = vector.load %arg2[%c25, %c0_62] : memref<67x256xf32, #tpu.memory_space<vmem>>, vector<1x256xf32>
    %176 = vector.broadcast %175 : vector<1x256xf32> to vector<3x256xf32>
    %177 = arith.mulf %174, %176 : vector<3x256xf32>
    %c75 = arith.constant 75 : index
    %c0_63 = arith.constant 0 : index
    %178 = vector.load %arg15[%c75, %c0_63] : memref<288x256xf32, #tpu.memory_space<vmem>>, vector<3x256xf32>
    tpu.vector_store %arg15[%c75, %c0_63], %177 {strides = array<i32>} : memref<288x256xf32, #tpu.memory_space<vmem>>, vector<3x256xf32>,
    %179 = vector.extract_strided_slice %1 {offsets = [0, 2], sizes = [3, 254], strides = [1, 1]} : vector<3x256xf32> to vector<3x254xf32>
    %180 = vector.extract_strided_slice %1 {offsets = [0, 0], sizes = [3, 2], strides = [1, 1]} : vector<3x256xf32> to vector<3x2xf32>
    %181 = tpu.concatenate %179, %180 in 1 : vector<3x254xf32>, vector<3x2xf32> -> vector<3x256xf32>
    %c26 = arith.constant 26 : index
    %c0_64 = arith.constant 0 : index
    %182 = vector.load %arg2[%c26, %c0_64] : memref<67x256xf32, #tpu.memory_space<vmem>>, vector<1x256xf32>
    %183 = vector.broadcast %182 : vector<1x256xf32> to vector<3x256xf32>
    %184 = arith.mulf %181, %183 : vector<3x256xf32>
    %c78 = arith.constant 78 : index
    %c0_65 = arith.constant 0 : index
    %185 = vector.load %arg15[%c78, %c0_65] : memref<288x256xf32, #tpu.memory_space<vmem>>, vector<3x256xf32>
    tpu.vector_store %arg15[%c78, %c0_65], %184 {strides = array<i32>} : memref<288x256xf32, #tpu.memory_space<vmem>>, vector<3x256xf32>,
    %186 = vector.extract_strided_slice %1 {offsets = [0, 3], sizes = [3, 253], strides = [1, 1]} : vector<3x256xf32> to vector<3x253xf32>
    %187 = vector.extract_strided_slice %1 {offsets = [0, 0], sizes = [3, 3], strides = [1, 1]} : vector<3x256xf32> to vector<3x3xf32>
    %188 = tpu.concatenate %186, %187 in 1 : vector<3x253xf32>, vector<3x3xf32> -> vector<3x256xf32>
    %c27_66 = arith.constant 27 : index
    %c0_67 = arith.constant 0 : index
    %189 = vector.load %arg2[%c27_66, %c0_67] : memref<67x256xf32, #tpu.memory_space<vmem>>, vector<1x256xf32>
    %190 = vector.broadcast %189 : vector<1x256xf32> to vector<3x256xf32>
    %191 = arith.mulf %188, %190 : vector<3x256xf32>
    %c81 = arith.constant 81 : index
    %c0_68 = arith.constant 0 : index
    %192 = vector.load %arg15[%c81, %c0_68] : memref<288x256xf32, #tpu.memory_space<vmem>>, vector<3x256xf32>
    tpu.vector_store %arg15[%c81, %c0_68], %191 {strides = array<i32>} : memref<288x256xf32, #tpu.memory_space<vmem>>, vector<3x256xf32>,
    %193 = vector.extract_strided_slice %1 {offsets = [0, 13], sizes = [3, 243], strides = [1, 1]} : vector<3x256xf32> to vector<3x243xf32>
    %194 = vector.extract_strided_slice %1 {offsets = [0, 0], sizes = [3, 13], strides = [1, 1]} : vector<3x256xf32> to vector<3x13xf32>
    %195 = tpu.concatenate %193, %194 in 1 : vector<3x243xf32>, vector<3x13xf32> -> vector<3x256xf32>
    %c28 = arith.constant 28 : index
    %c0_69 = arith.constant 0 : index
    %196 = vector.load %arg2[%c28, %c0_69] : memref<67x256xf32, #tpu.memory_space<vmem>>, vector<1x256xf32>
    %197 = vector.broadcast %196 : vector<1x256xf32> to vector<3x256xf32>
    %198 = arith.mulf %195, %197 : vector<3x256xf32>
    %c84 = arith.constant 84 : index
    %c0_70 = arith.constant 0 : index
    %199 = vector.load %arg15[%c84, %c0_70] : memref<288x256xf32, #tpu.memory_space<vmem>>, vector<3x256xf32>
    tpu.vector_store %arg15[%c84, %c0_70], %198 {strides = array<i32>} : memref<288x256xf32, #tpu.memory_space<vmem>>, vector<3x256xf32>,
    %200 = vector.extract_strided_slice %1 {offsets = [0, 14], sizes = [3, 242], strides = [1, 1]} : vector<3x256xf32> to vector<3x242xf32>
    %201 = vector.extract_strided_slice %1 {offsets = [0, 0], sizes = [3, 14], strides = [1, 1]} : vector<3x256xf32> to vector<3x14xf32>
    %202 = tpu.concatenate %200, %201 in 1 : vector<3x242xf32>, vector<3x14xf32> -> vector<3x256xf32>
    %c29 = arith.constant 29 : index
    %c0_71 = arith.constant 0 : index
    %203 = vector.load %arg2[%c29, %c0_71] : memref<67x256xf32, #tpu.memory_space<vmem>>, vector<1x256xf32>
    %204 = vector.broadcast %203 : vector<1x256xf32> to vector<3x256xf32>
    %205 = arith.mulf %202, %204 : vector<3x256xf32>
    %c87 = arith.constant 87 : index
    %c0_72 = arith.constant 0 : index
    %206 = vector.load %arg15[%c87, %c0_72] : memref<288x256xf32, #tpu.memory_space<vmem>>, vector<3x256xf32>
    tpu.vector_store %arg15[%c87, %c0_72], %205 {strides = array<i32>} : memref<288x256xf32, #tpu.memory_space<vmem>>, vector<3x256xf32>,
    %207 = vector.extract_strided_slice %1 {offsets = [0, 15], sizes = [3, 241], strides = [1, 1]} : vector<3x256xf32> to vector<3x241xf32>
    %208 = vector.extract_strided_slice %1 {offsets = [0, 0], sizes = [3, 15], strides = [1, 1]} : vector<3x256xf32> to vector<3x15xf32>
    %209 = tpu.concatenate %207, %208 in 1 : vector<3x241xf32>, vector<3x15xf32> -> vector<3x256xf32>
    %c30_73 = arith.constant 30 : index
    %c0_74 = arith.constant 0 : index
    %210 = vector.load %arg2[%c30_73, %c0_74] : memref<67x256xf32, #tpu.memory_space<vmem>>, vector<1x256xf32>
    %211 = vector.broadcast %210 : vector<1x256xf32> to vector<3x256xf32>
    %212 = arith.mulf %209, %211 : vector<3x256xf32>
    %c90 = arith.constant 90 : index
    %c0_75 = arith.constant 0 : index
    %213 = vector.load %arg15[%c90, %c0_75] : memref<288x256xf32, #tpu.memory_space<vmem>>, vector<3x256xf32>
    tpu.vector_store %arg15[%c90, %c0_75], %212 {strides = array<i32>} : memref<288x256xf32, #tpu.memory_space<vmem>>, vector<3x256xf32>,
    %214 = vector.extract_strided_slice %1 {offsets = [0, 16], sizes = [3, 240], strides = [1, 1]} : vector<3x256xf32> to vector<3x240xf32>
    %215 = vector.extract_strided_slice %1 {offsets = [0, 0], sizes = [3, 16], strides = [1, 1]} : vector<3x256xf32> to vector<3x16xf32>
    %216 = tpu.concatenate %214, %215 in 1 : vector<3x240xf32>, vector<3x16xf32> -> vector<3x256xf32>
    %c31 = arith.constant 31 : index
    %c0_76 = arith.constant 0 : index
    %217 = vector.load %arg2[%c31, %c0_76] : memref<67x256xf32, #tpu.memory_space<vmem>>, vector<1x256xf32>
    %218 = vector.broadcast %217 : vector<1x256xf32> to vector<3x256xf32>
    %219 = arith.mulf %216, %218 : vector<3x256xf32>
    %c93 = arith.constant 93 : index
    %c0_77 = arith.constant 0 : index
    %220 = vector.load %arg15[%c93, %c0_77] : memref<288x256xf32, #tpu.memory_space<vmem>>, vector<3x256xf32>
    tpu.vector_store %arg15[%c93, %c0_77], %219 {strides = array<i32>} : memref<288x256xf32, #tpu.memory_space<vmem>>, vector<3x256xf32>,
    %221 = vector.extract_strided_slice %1 {offsets = [0, 17], sizes = [3, 239], strides = [1, 1]} : vector<3x256xf32> to vector<3x239xf32>
    %222 = vector.extract_strided_slice %1 {offsets = [0, 0], sizes = [3, 17], strides = [1, 1]} : vector<3x256xf32> to vector<3x17xf32>
    %223 = tpu.concatenate %221, %222 in 1 : vector<3x239xf32>, vector<3x17xf32> -> vector<3x256xf32>
    %c32 = arith.constant 32 : index
    %c0_78 = arith.constant 0 : index
    %224 = vector.load %arg2[%c32, %c0_78] : memref<67x256xf32, #tpu.memory_space<vmem>>, vector<1x256xf32>
    %225 = vector.broadcast %224 : vector<1x256xf32> to vector<3x256xf32>
    %226 = arith.mulf %223, %225 : vector<3x256xf32>
    %c96 = arith.constant 96 : index
    %c0_79 = arith.constant 0 : index
    %227 = vector.load %arg15[%c96, %c0_79] : memref<288x256xf32, #tpu.memory_space<vmem>>, vector<3x256xf32>
    tpu.vector_store %arg15[%c96, %c0_79], %226 {strides = array<i32>} : memref<288x256xf32, #tpu.memory_space<vmem>>, vector<3x256xf32>,
    %228 = vector.extract_strided_slice %1 {offsets = [0, 18], sizes = [3, 238], strides = [1, 1]} : vector<3x256xf32> to vector<3x238xf32>
    %229 = vector.extract_strided_slice %1 {offsets = [0, 0], sizes = [3, 18], strides = [1, 1]} : vector<3x256xf32> to vector<3x18xf32>
    %230 = tpu.concatenate %228, %229 in 1 : vector<3x238xf32>, vector<3x18xf32> -> vector<3x256xf32>
    %c33_80 = arith.constant 33 : index
    %c0_81 = arith.constant 0 : index
    %231 = vector.load %arg2[%c33_80, %c0_81] : memref<67x256xf32, #tpu.memory_space<vmem>>, vector<1x256xf32>
    %232 = vector.broadcast %231 : vector<1x256xf32> to vector<3x256xf32>
    %233 = arith.mulf %230, %232 : vector<3x256xf32>
    %c99 = arith.constant 99 : index
    %c0_82 = arith.constant 0 : index
    %234 = vector.load %arg15[%c99, %c0_82] : memref<288x256xf32, #tpu.memory_space<vmem>>, vector<3x256xf32>
    tpu.vector_store %arg15[%c99, %c0_82], %233 {strides = array<i32>} : memref<288x256xf32, #tpu.memory_space<vmem>>, vector<3x256xf32>,
    %235 = vector.extract_strided_slice %1 {offsets = [0, 19], sizes = [3, 237], strides = [1, 1]} : vector<3x256xf32> to vector<3x237xf32>
    %236 = vector.extract_strided_slice %1 {offsets = [0, 0], sizes = [3, 19], strides = [1, 1]} : vector<3x256xf32> to vector<3x19xf32>
    %237 = tpu.concatenate %235, %236 in 1 : vector<3x237xf32>, vector<3x19xf32> -> vector<3x256xf32>
    %c34 = arith.constant 34 : index
    %c0_83 = arith.constant 0 : index
    %238 = vector.load %arg2[%c34, %c0_83] : memref<67x256xf32, #tpu.memory_space<vmem>>, vector<1x256xf32>
    %239 = vector.broadcast %238 : vector<1x256xf32> to vector<3x256xf32>
    %240 = arith.mulf %237, %239 : vector<3x256xf32>
    %c102 = arith.constant 102 : index
    %c0_84 = arith.constant 0 : index
    %241 = vector.load %arg15[%c102, %c0_84] : memref<288x256xf32, #tpu.memory_space<vmem>>, vector<3x256xf32>
    tpu.vector_store %arg15[%c102, %c0_84], %240 {strides = array<i32>} : memref<288x256xf32, #tpu.memory_space<vmem>>, vector<3x256xf32>,
    %242 = vector.extract_strided_slice %1 {offsets = [0, 29], sizes = [3, 227], strides = [1, 1]} : vector<3x256xf32> to vector<3x227xf32>
    %243 = vector.extract_strided_slice %1 {offsets = [0, 0], sizes = [3, 29], strides = [1, 1]} : vector<3x256xf32> to vector<3x29xf32>
    %244 = tpu.concatenate %242, %243 in 1 : vector<3x227xf32>, vector<3x29xf32> -> vector<3x256xf32>
    %c35 = arith.constant 35 : index
    %c0_85 = arith.constant 0 : index
    %245 = vector.load %arg2[%c35, %c0_85] : memref<67x256xf32, #tpu.memory_space<vmem>>, vector<1x256xf32>
    %246 = vector.broadcast %245 : vector<1x256xf32> to vector<3x256xf32>
    %247 = arith.mulf %244, %246 : vector<3x256xf32>
    %c105 = arith.constant 105 : index
    %c0_86 = arith.constant 0 : index
    %248 = vector.load %arg15[%c105, %c0_86] : memref<288x256xf32, #tpu.memory_space<vmem>>, vector<3x256xf32>
    tpu.vector_store %arg15[%c105, %c0_86], %247 {strides = array<i32>} : memref<288x256xf32, #tpu.memory_space<vmem>>, vector<3x256xf32>,
    %249 = vector.extract_strided_slice %1 {offsets = [0, 30], sizes = [3, 226], strides = [1, 1]} : vector<3x256xf32> to vector<3x226xf32>
    %250 = vector.extract_strided_slice %1 {offsets = [0, 0], sizes = [3, 30], strides = [1, 1]} : vector<3x256xf32> to vector<3x30xf32>
    %251 = tpu.concatenate %249, %250 in 1 : vector<3x226xf32>, vector<3x30xf32> -> vector<3x256xf32>
    %c36_87 = arith.constant 36 : index
    %c0_88 = arith.constant 0 : index
    %252 = vector.load %arg2[%c36_87, %c0_88] : memref<67x256xf32, #tpu.memory_space<vmem>>, vector<1x256xf32>
    %253 = vector.broadcast %252 : vector<1x256xf32> to vector<3x256xf32>
    %254 = arith.mulf %251, %253 : vector<3x256xf32>
    %c108 = arith.constant 108 : index
    %c0_89 = arith.constant 0 : index
    %255 = vector.load %arg15[%c108, %c0_89] : memref<288x256xf32, #tpu.memory_space<vmem>>, vector<3x256xf32>
    tpu.vector_store %arg15[%c108, %c0_89], %254 {strides = array<i32>} : memref<288x256xf32, #tpu.memory_space<vmem>>, vector<3x256xf32>,
    %256 = vector.extract_strided_slice %1 {offsets = [0, 31], sizes = [3, 225], strides = [1, 1]} : vector<3x256xf32> to vector<3x225xf32>
    %257 = vector.extract_strided_slice %1 {offsets = [0, 0], sizes = [3, 31], strides = [1, 1]} : vector<3x256xf32> to vector<3x31xf32>
    %258 = tpu.concatenate %256, %257 in 1 : vector<3x225xf32>, vector<3x31xf32> -> vector<3x256xf32>
    %c37 = arith.constant 37 : index
    %c0_90 = arith.constant 0 : index
    %259 = vector.load %arg2[%c37, %c0_90] : memref<67x256xf32, #tpu.memory_space<vmem>>, vector<1x256xf32>
    %260 = vector.broadcast %259 : vector<1x256xf32> to vector<3x256xf32>
    %261 = arith.mulf %258, %260 : vector<3x256xf32>
    %c111 = arith.constant 111 : index
    %c0_91 = arith.constant 0 : index
    %262 = vector.load %arg15[%c111, %c0_91] : memref<288x256xf32, #tpu.memory_space<vmem>>, vector<3x256xf32>
    tpu.vector_store %arg15[%c111, %c0_91], %261 {strides = array<i32>} : memref<288x256xf32, #tpu.memory_space<vmem>>, vector<3x256xf32>,
    %263 = vector.extract_strided_slice %1 {offsets = [0, 32], sizes = [3, 224], strides = [1, 1]} : vector<3x256xf32> to vector<3x224xf32>
    %264 = vector.extract_strided_slice %1 {offsets = [0, 0], sizes = [3, 32], strides = [1, 1]} : vector<3x256xf32> to vector<3x32xf32>
    %265 = tpu.concatenate %263, %264 in 1 : vector<3x224xf32>, vector<3x32xf32> -> vector<3x256xf32>
    %c38 = arith.constant 38 : index
    %c0_92 = arith.constant 0 : index
    %266 = vector.load %arg2[%c38, %c0_92] : memref<67x256xf32, #tpu.memory_space<vmem>>, vector<1x256xf32>
    %267 = vector.broadcast %266 : vector<1x256xf32> to vector<3x256xf32>
    %268 = arith.mulf %265, %267 : vector<3x256xf32>
    %c114 = arith.constant 114 : index
    %c0_93 = arith.constant 0 : index
    %269 = vector.load %arg15[%c114, %c0_93] : memref<288x256xf32, #tpu.memory_space<vmem>>, vector<3x256xf32>
    tpu.vector_store %arg15[%c114, %c0_93], %268 {strides = array<i32>} : memref<288x256xf32, #tpu.memory_space<vmem>>, vector<3x256xf32>,
    %270 = vector.extract_strided_slice %1 {offsets = [0, 33], sizes = [3, 223], strides = [1, 1]} : vector<3x256xf32> to vector<3x223xf32>
    %271 = vector.extract_strided_slice %1 {offsets = [0, 0], sizes = [3, 33], strides = [1, 1]} : vector<3x256xf32> to vector<3x33xf32>
    %272 = tpu.concatenate %270, %271 in 1 : vector<3x223xf32>, vector<3x33xf32> -> vector<3x256xf32>
    %c39_94 = arith.constant 39 : index
    %c0_95 = arith.constant 0 : index
    %273 = vector.load %arg2[%c39_94, %c0_95] : memref<67x256xf32, #tpu.memory_space<vmem>>, vector<1x256xf32>
    %274 = vector.broadcast %273 : vector<1x256xf32> to vector<3x256xf32>
    %275 = arith.mulf %272, %274 : vector<3x256xf32>
    %c117 = arith.constant 117 : index
    %c0_96 = arith.constant 0 : index
    %276 = vector.load %arg15[%c117, %c0_96] : memref<288x256xf32, #tpu.memory_space<vmem>>, vector<3x256xf32>
    tpu.vector_store %arg15[%c117, %c0_96], %275 {strides = array<i32>} : memref<288x256xf32, #tpu.memory_space<vmem>>, vector<3x256xf32>,
    %277 = vector.extract_strided_slice %1 {offsets = [0, 34], sizes = [3, 222], strides = [1, 1]} : vector<3x256xf32> to vector<3x222xf32>
    %278 = vector.extract_strided_slice %1 {offsets = [0, 0], sizes = [3, 34], strides = [1, 1]} : vector<3x256xf32> to vector<3x34xf32>
    %279 = tpu.concatenate %277, %278 in 1 : vector<3x222xf32>, vector<3x34xf32> -> vector<3x256xf32>
    %c40 = arith.constant 40 : index
    %c0_97 = arith.constant 0 : index
    %280 = vector.load %arg2[%c40, %c0_97] : memref<67x256xf32, #tpu.memory_space<vmem>>, vector<1x256xf32>
    %281 = vector.broadcast %280 : vector<1x256xf32> to vector<3x256xf32>
    %282 = arith.mulf %279, %281 : vector<3x256xf32>
    %c120 = arith.constant 120 : index
    %c0_98 = arith.constant 0 : index
    %283 = vector.load %arg15[%c120, %c0_98] : memref<288x256xf32, #tpu.memory_space<vmem>>, vector<3x256xf32>
    tpu.vector_store %arg15[%c120, %c0_98], %282 {strides = array<i32>} : memref<288x256xf32, #tpu.memory_space<vmem>>, vector<3x256xf32>,
    %284 = vector.extract_strided_slice %1 {offsets = [0, 35], sizes = [3, 221], strides = [1, 1]} : vector<3x256xf32> to vector<3x221xf32>
    %285 = vector.extract_strided_slice %1 {offsets = [0, 0], sizes = [3, 35], strides = [1, 1]} : vector<3x256xf32> to vector<3x35xf32>
    %286 = tpu.concatenate %284, %285 in 1 : vector<3x221xf32>, vector<3x35xf32> -> vector<3x256xf32>
    %c41 = arith.constant 41 : index
    %c0_99 = arith.constant 0 : index
    %287 = vector.load %arg2[%c41, %c0_99] : memref<67x256xf32, #tpu.memory_space<vmem>>, vector<1x256xf32>
    %288 = vector.broadcast %287 : vector<1x256xf32> to vector<3x256xf32>
    %289 = arith.mulf %286, %288 : vector<3x256xf32>
    %c123 = arith.constant 123 : index
    %c0_100 = arith.constant 0 : index
    %290 = vector.load %arg15[%c123, %c0_100] : memref<288x256xf32, #tpu.memory_space<vmem>>, vector<3x256xf32>
    tpu.vector_store %arg15[%c123, %c0_100], %289 {strides = array<i32>} : memref<288x256xf32, #tpu.memory_space<vmem>>, vector<3x256xf32>,
    %291 = vector.extract_strided_slice %1 {offsets = [0, 45], sizes = [3, 211], strides = [1, 1]} : vector<3x256xf32> to vector<3x211xf32>
    %292 = vector.extract_strided_slice %1 {offsets = [0, 0], sizes = [3, 45], strides = [1, 1]} : vector<3x256xf32> to vector<3x45xf32>
    %293 = tpu.concatenate %291, %292 in 1 : vector<3x211xf32>, vector<3x45xf32> -> vector<3x256xf32>
    %c42_101 = arith.constant 42 : index
    %c0_102 = arith.constant 0 : index
    %294 = vector.load %arg2[%c42_101, %c0_102] : memref<67x256xf32, #tpu.memory_space<vmem>>, vector<1x256xf32>
    %295 = vector.broadcast %294 : vector<1x256xf32> to vector<3x256xf32>
    %296 = arith.mulf %293, %295 : vector<3x256xf32>
    %c126 = arith.constant 126 : index
    %c0_103 = arith.constant 0 : index
    %297 = vector.load %arg15[%c126, %c0_103] : memref<288x256xf32, #tpu.memory_space<vmem>>, vector<3x256xf32>
    tpu.vector_store %arg15[%c126, %c0_103], %296 {strides = array<i32>} : memref<288x256xf32, #tpu.memory_space<vmem>>, vector<3x256xf32>,
    %298 = vector.extract_strided_slice %1 {offsets = [0, 46], sizes = [3, 210], strides = [1, 1]} : vector<3x256xf32> to vector<3x210xf32>
    %299 = vector.extract_strided_slice %1 {offsets = [0, 0], sizes = [3, 46], strides = [1, 1]} : vector<3x256xf32> to vector<3x46xf32>
    %300 = tpu.concatenate %298, %299 in 1 : vector<3x210xf32>, vector<3x46xf32> -> vector<3x256xf32>
    %c43 = arith.constant 43 : index
    %c0_104 = arith.constant 0 : index
    %301 = vector.load %arg2[%c43, %c0_104] : memref<67x256xf32, #tpu.memory_space<vmem>>, vector<1x256xf32>
    %302 = vector.broadcast %301 : vector<1x256xf32> to vector<3x256xf32>
    %303 = arith.mulf %300, %302 : vector<3x256xf32>
    %c129 = arith.constant 129 : index
    %c0_105 = arith.constant 0 : index
    %304 = vector.load %arg15[%c129, %c0_105] : memref<288x256xf32, #tpu.memory_space<vmem>>, vector<3x256xf32>
    tpu.vector_store %arg15[%c129, %c0_105], %303 {strides = array<i32>} : memref<288x256xf32, #tpu.memory_space<vmem>>, vector<3x256xf32>,
    %305 = vector.extract_strided_slice %1 {offsets = [0, 47], sizes = [3, 209], strides = [1, 1]} : vector<3x256xf32> to vector<3x209xf32>
    %306 = vector.extract_strided_slice %1 {offsets = [0, 0], sizes = [3, 47], strides = [1, 1]} : vector<3x256xf32> to vector<3x47xf32>
    %307 = tpu.concatenate %305, %306 in 1 : vector<3x209xf32>, vector<3x47xf32> -> vector<3x256xf32>
    %c44 = arith.constant 44 : index
    %c0_106 = arith.constant 0 : index
    %308 = vector.load %arg2[%c44, %c0_106] : memref<67x256xf32, #tpu.memory_space<vmem>>, vector<1x256xf32>
    %309 = vector.broadcast %308 : vector<1x256xf32> to vector<3x256xf32>
    %310 = arith.mulf %307, %309 : vector<3x256xf32>
    %c132 = arith.constant 132 : index
    %c0_107 = arith.constant 0 : index
    %311 = vector.load %arg15[%c132, %c0_107] : memref<288x256xf32, #tpu.memory_space<vmem>>, vector<3x256xf32>
    tpu.vector_store %arg15[%c132, %c0_107], %310 {strides = array<i32>} : memref<288x256xf32, #tpu.memory_space<vmem>>, vector<3x256xf32>,
    %312 = vector.extract_strided_slice %1 {offsets = [0, 48], sizes = [3, 208], strides = [1, 1]} : vector<3x256xf32> to vector<3x208xf32>
    %313 = vector.extract_strided_slice %1 {offsets = [0, 0], sizes = [3, 48], strides = [1, 1]} : vector<3x256xf32> to vector<3x48xf32>
    %314 = tpu.concatenate %312, %313 in 1 : vector<3x208xf32>, vector<3x48xf32> -> vector<3x256xf32>
    %c45_108 = arith.constant 45 : index
    %c0_109 = arith.constant 0 : index
    %315 = vector.load %arg2[%c45_108, %c0_109] : memref<67x256xf32, #tpu.memory_space<vmem>>, vector<1x256xf32>
    %316 = vector.broadcast %315 : vector<1x256xf32> to vector<3x256xf32>
    %317 = arith.mulf %314, %316 : vector<3x256xf32>
    %c135 = arith.constant 135 : index
    %c0_110 = arith.constant 0 : index
    %318 = vector.load %arg15[%c135, %c0_110] : memref<288x256xf32, #tpu.memory_space<vmem>>, vector<3x256xf32>
    tpu.vector_store %arg15[%c135, %c0_110], %317 {strides = array<i32>} : memref<288x256xf32, #tpu.memory_space<vmem>>, vector<3x256xf32>,
    %319 = vector.extract_strided_slice %1 {offsets = [0, 49], sizes = [3, 207], strides = [1, 1]} : vector<3x256xf32> to vector<3x207xf32>
    %320 = vector.extract_strided_slice %1 {offsets = [0, 0], sizes = [3, 49], strides = [1, 1]} : vector<3x256xf32> to vector<3x49xf32>
    %321 = tpu.concatenate %319, %320 in 1 : vector<3x207xf32>, vector<3x49xf32> -> vector<3x256xf32>
    %c46 = arith.constant 46 : index
    %c0_111 = arith.constant 0 : index
    %322 = vector.load %arg2[%c46, %c0_111] : memref<67x256xf32, #tpu.memory_space<vmem>>, vector<1x256xf32>
    %323 = vector.broadcast %322 : vector<1x256xf32> to vector<3x256xf32>
    %324 = arith.mulf %321, %323 : vector<3x256xf32>
    %c138 = arith.constant 138 : index
    %c0_112 = arith.constant 0 : index
    %325 = vector.load %arg15[%c138, %c0_112] : memref<288x256xf32, #tpu.memory_space<vmem>>, vector<3x256xf32>
    tpu.vector_store %arg15[%c138, %c0_112], %324 {strides = array<i32>} : memref<288x256xf32, #tpu.memory_space<vmem>>, vector<3x256xf32>,
    %326 = vector.extract_strided_slice %1 {offsets = [0, 50], sizes = [3, 206], strides = [1, 1]} : vector<3x256xf32> to vector<3x206xf32>
    %327 = vector.extract_strided_slice %1 {offsets = [0, 0], sizes = [3, 50], strides = [1, 1]} : vector<3x256xf32> to vector<3x50xf32>
    %328 = tpu.concatenate %326, %327 in 1 : vector<3x206xf32>, vector<3x50xf32> -> vector<3x256xf32>
    %c47 = arith.constant 47 : index
    %c0_113 = arith.constant 0 : index
    %329 = vector.load %arg2[%c47, %c0_113] : memref<67x256xf32, #tpu.memory_space<vmem>>, vector<1x256xf32>
    %330 = vector.broadcast %329 : vector<1x256xf32> to vector<3x256xf32>
    %331 = arith.mulf %328, %330 : vector<3x256xf32>
    %c141 = arith.constant 141 : index
    %c0_114 = arith.constant 0 : index
    %332 = vector.load %arg15[%c141, %c0_114] : memref<288x256xf32, #tpu.memory_space<vmem>>, vector<3x256xf32>
    tpu.vector_store %arg15[%c141, %c0_114], %331 {strides = array<i32>} : memref<288x256xf32, #tpu.memory_space<vmem>>, vector<3x256xf32>,
    %333 = vector.extract_strided_slice %1 {offsets = [0, 51], sizes = [3, 205], strides = [1, 1]} : vector<3x256xf32> to vector<3x205xf32>
    %334 = vector.extract_strided_slice %1 {offsets = [0, 0], sizes = [3, 51], strides = [1, 1]} : vector<3x256xf32> to vector<3x51xf32>
    %335 = tpu.concatenate %333, %334 in 1 : vector<3x205xf32>, vector<3x51xf32> -> vector<3x256xf32>
    %c48_115 = arith.constant 48 : index
    %c0_116 = arith.constant 0 : index
    %336 = vector.load %arg2[%c48_115, %c0_116] : memref<67x256xf32, #tpu.memory_space<vmem>>, vector<1x256xf32>
    %337 = vector.broadcast %336 : vector<1x256xf32> to vector<3x256xf32>
    %338 = arith.mulf %335, %337 : vector<3x256xf32>
    %c144 = arith.constant 144 : index
    %c0_117 = arith.constant 0 : index
    %339 = vector.load %arg15[%c144, %c0_117] : memref<288x256xf32, #tpu.memory_space<vmem>>, vector<3x256xf32>
    tpu.vector_store %arg15[%c144, %c0_117], %338 {strides = array<i32>} : memref<288x256xf32, #tpu.memory_space<vmem>>, vector<3x256xf32>,
    %c0_118 = arith.constant 0 : index
    %c0_119 = arith.constant 0 : index
    %340 = vector.load %arg15[%c0_118, %c0_119] : memref<288x256xf32, #tpu.memory_space<vmem>>, vector<147x256xf32>
    %c0_120 = arith.constant 0 : index
    %c0_121 = arith.constant 0 : index
    %341 = vector.load %arg4[%c0_120, %c0_121] : memref<16x147xf32, #tpu.memory_space<vmem>>, vector<16x147xf32>
    %cst = arith.constant dense<0.000000e+00> : vector<16x256xf32>
    %342 = tpu.matmul %341, %340, %cst {dimension_numbers = #tpu.dot_dimension_numbers<[1], [0], [0], [1], [0, 0, 1, 1], [], []>} : vector<16x147xf32>, vector<147x256xf32>, vector<16x256xf32> -> vector<16x256xf32>
    %343 = vector.broadcast %2 : vector<16x1xf32> to vector<16x256xf32>
    %344 = arith.addf %342, %343 : vector<16x256xf32>
    %c0_122 = arith.constant 0 : index
    %c1_123 = arith.constant 1 : index
    %345 = vector.load %arg3[%c0_122, %c1_123] : memref<32x20xf32, #tpu.memory_space<vmem>>, vector<16x1xf32>
    %c0_124 = arith.constant 0 : index
    %c2_125 = arith.constant 2 : index
    %346 = vector.load %arg3[%c0_124, %c2_125] : memref<32x20xf32, #tpu.memory_space<vmem>>, vector<16x1xf32>
    %347 = tpu.iota {dimensions = array<i32: 0>} : vector<4x16xi32>
    %348 = tpu.iota {dimensions = array<i32: 1>} : vector<4x16xi32>
    %c4_i32 = arith.constant 4 : i32
    %349 = vector.broadcast %c4_i32 : i32 to vector<4x16xi32>
    %350 = arith.muli %347, %349 : vector<4x16xi32>
    %351 = arith.cmpi sge, %348, %350 : vector<4x16xi32>
    %c1_i32 = arith.constant 1 : i32
    %352 = vector.broadcast %c1_i32 : i32 to vector<4x16xi32>
    %353 = arith.addi %347, %352 : vector<4x16xi32>
    %c4_i32_126 = arith.constant 4 : i32
    %354 = vector.broadcast %c4_i32_126 : i32 to vector<4x16xi32>
    %355 = arith.muli %353, %354 : vector<4x16xi32>
    %356 = arith.cmpi slt, %348, %355 : vector<4x16xi32>
    %357 = arith.andi %351, %356 : vector<4x16xi1>
    %358 = arith.extui %357 : vector<4x16xi1> to vector<4x16xi32>
    %359 = arith.sitofp %358 : vector<4x16xi32> to vector<4x16xf32>
    %360 = tpu.iota {dimensions = array<i32: 0>} : vector<16x4xi32>
    %361 = tpu.iota {dimensions = array<i32: 1>} : vector<16x4xi32>
    %c4_i32_127 = arith.constant 4 : i32
    %362 = vector.broadcast %c4_i32_127 : i32 to vector<16x4xi32>
    %363 = arith.muli %361, %362 : vector<16x4xi32>
    %364 = arith.cmpi sge, %360, %363 : vector<16x4xi32>
    %c1_i32_128 = arith.constant 1 : i32
    %365 = vector.broadcast %c1_i32_128 : i32 to vector<16x4xi32>
    %366 = arith.addi %361, %365 : vector<16x4xi32>
    %c4_i32_129 = arith.constant 4 : i32
    %367 = vector.broadcast %c4_i32_129 : i32 to vector<16x4xi32>
    %368 = arith.muli %366, %367 : vector<16x4xi32>
    %369 = arith.cmpi slt, %360, %368 : vector<16x4xi32>
    %370 = arith.andi %364, %369 : vector<16x4xi1>
    %371 = arith.extui %370 : vector<16x4xi1> to vector<16x4xi32>
    %372 = arith.sitofp %371 : vector<16x4xi32> to vector<16x4xf32>
    %cst_130 = arith.constant dense<0.000000e+00> : vector<16x16xf32>
    %373 = tpu.matmul %372, %359, %cst_130 {dimension_numbers = #tpu.dot_dimension_numbers<[1], [0], [0], [1], [0, 0, 1, 1], [], []>} : vector<16x4xf32>, vector<4x16xf32>, vector<16x16xf32> -> vector<16x16xf32>
    %cst_131 = arith.constant dense<0.000000e+00> : vector<16xf32>
    %374 = vector.multi_reduction <add>, %344, %cst_131 [1] : vector<16x256xf32> to vector<16xf32>
    %375 = vector.shape_cast %374 : vector<16xf32> to vector<16x1xf32>
    %cst_132 = arith.constant dense<0.000000e+00> : vector<16x1xf32>
    %376 = tpu.matmul %373, %375, %cst_132 {dimension_numbers = #tpu.dot_dimension_numbers<[1], [0], [0], [1], [0, 0, 1, 1], [], []>} : vector<16x16xf32>, vector<16x1xf32>, vector<16x1xf32> -> vector<16x1xf32>
    %cst_133 = arith.constant 9.765625E-4 : f32
    %377 = vector.broadcast %cst_133 : f32 to vector<16x1xf32>
    %378 = arith.mulf %376, %377 : vector<16x1xf32>
    %379 = vector.broadcast %378 : vector<16x1xf32> to vector<16x256xf32>
    %380 = arith.subf %344, %379 : vector<16x256xf32>
    %381 = arith.mulf %380, %380 : vector<16x256xf32>
    %cst_134 = arith.constant dense<0.000000e+00> : vector<16xf32>
    %382 = vector.multi_reduction <add>, %381, %cst_134 [1] : vector<16x256xf32> to vector<16xf32>
    %383 = vector.shape_cast %382 : vector<16xf32> to vector<16x1xf32>
    %cst_135 = arith.constant dense<0.000000e+00> : vector<16x1xf32>
    %384 = tpu.matmul %373, %383, %cst_135 {dimension_numbers = #tpu.dot_dimension_numbers<[1], [0], [0], [1], [0, 0, 1, 1], [], []>} : vector<16x16xf32>, vector<16x1xf32>, vector<16x1xf32> -> vector<16x1xf32>
    %cst_136 = arith.constant 9.765625E-4 : f32
    %385 = vector.broadcast %cst_136 : f32 to vector<16x1xf32>
    %386 = arith.mulf %384, %385 : vector<16x1xf32>
    %cst_137 = arith.constant 9.99999974E-6 : f32
    %387 = vector.broadcast %cst_137 : f32 to vector<16x1xf32>
    %388 = arith.addf %386, %387 : vector<16x1xf32>
    %389 = math.rsqrt %388 : vector<16x1xf32>
    %390 = vector.broadcast %389 : vector<16x1xf32> to vector<16x256xf32>
    %391 = arith.mulf %380, %390 : vector<16x256xf32>
    %392 = vector.broadcast %345 : vector<16x1xf32> to vector<16x256xf32>
    %393 = arith.mulf %391, %392 : vector<16x256xf32>
    %394 = vector.broadcast %346 : vector<16x1xf32> to vector<16x256xf32>
    %395 = arith.addf %393, %394 : vector<16x256xf32>
    %396 = arith.negf %395 : vector<16x256xf32>
    %397 = math.exp %396 : vector<16x256xf32>
    %cst_138 = arith.constant 1.000000e+00 : f32
    %398 = vector.broadcast %cst_138 : f32 to vector<16x256xf32>
    %399 = arith.addf %398, %397 : vector<16x256xf32>
    %400 = arith.divf %398, %399 : vector<16x256xf32>
    %401 = arith.mulf %395, %400 : vector<16x256xf32>
    %c0_139 = arith.constant 0 : index
    %c3_140 = arith.constant 3 : index
    %402 = vector.load %arg3[%c0_139, %c3_140] : memref<32x20xf32, #tpu.memory_space<vmem>>, vector<4x1xf32>
    %403 = vector.extract_strided_slice %401 {offsets = [0, 239], sizes = [16, 17], strides = [1, 1]} : vector<16x256xf32> to vector<16x17xf32>
    %404 = vector.extract_strided_slice %401 {offsets = [0, 0], sizes = [16, 239], strides = [1, 1]} : vector<16x256xf32> to vector<16x239xf32>
    %405 = tpu.concatenate %403, %404 in 1 : vector<16x17xf32>, vector<16x239xf32> -> vector<16x256xf32>
    %c49 = arith.constant 49 : index
    %c0_141 = arith.constant 0 : index
    %406 = vector.load %arg2[%c49, %c0_141] : memref<67x256xf32, #tpu.memory_space<vmem>>, vector<1x256xf32>
    %407 = vector.broadcast %406 : vector<1x256xf32> to vector<16x256xf32>
    %408 = arith.mulf %405, %407 : vector<16x256xf32>
    %c0_142 = arith.constant 0 : index
    %c0_143 = arith.constant 0 : index
    %409 = vector.load %arg15[%c0_142, %c0_143] : memref<288x256xf32, #tpu.memory_space<vmem>>, vector<16x256xf32>
    tpu.vector_store %arg15[%c0_142, %c0_143], %408 {strides = array<i32>} : memref<288x256xf32, #tpu.memory_space<vmem>>, vector<16x256xf32>,
    %410 = vector.extract_strided_slice %401 {offsets = [0, 240], sizes = [16, 16], strides = [1, 1]} : vector<16x256xf32> to vector<16x16xf32>
    %411 = vector.extract_strided_slice %401 {offsets = [0, 0], sizes = [16, 240], strides = [1, 1]} : vector<16x256xf32> to vector<16x240xf32>
    %412 = tpu.concatenate %410, %411 in 1 : vector<16x16xf32>, vector<16x240xf32> -> vector<16x256xf32>
    %c50 = arith.constant 50 : index
    %c0_144 = arith.constant 0 : index
    %413 = vector.load %arg2[%c50, %c0_144] : memref<67x256xf32, #tpu.memory_space<vmem>>, vector<1x256xf32>
    %414 = vector.broadcast %413 : vector<1x256xf32> to vector<16x256xf32>
    %415 = arith.mulf %412, %414 : vector<16x256xf32>
    %c16_145 = arith.constant 16 : index
    %c0_146 = arith.constant 0 : index
    %416 = vector.load %arg15[%c16_145, %c0_146] : memref<288x256xf32, #tpu.memory_space<vmem>>, vector<16x256xf32>
    tpu.vector_store %arg15[%c16_145, %c0_146], %415 {strides = array<i32>} : memref<288x256xf32, #tpu.memory_space<vmem>>, vector<16x256xf32>,
    %417 = vector.extract_strided_slice %401 {offsets = [0, 241], sizes = [16, 15], strides = [1, 1]} : vector<16x256xf32> to vector<16x15xf32>
    %418 = vector.extract_strided_slice %401 {offsets = [0, 0], sizes = [16, 241], strides = [1, 1]} : vector<16x256xf32> to vector<16x241xf32>
    %419 = tpu.concatenate %417, %418 in 1 : vector<16x15xf32>, vector<16x241xf32> -> vector<16x256xf32>
    %c51_147 = arith.constant 51 : index
    %c0_148 = arith.constant 0 : index
    %420 = vector.load %arg2[%c51_147, %c0_148] : memref<67x256xf32, #tpu.memory_space<vmem>>, vector<1x256xf32>
    %421 = vector.broadcast %420 : vector<1x256xf32> to vector<16x256xf32>
    %422 = arith.mulf %419, %421 : vector<16x256xf32>
    %c32_149 = arith.constant 32 : index
    %c0_150 = arith.constant 0 : index
    %423 = vector.load %arg15[%c32_149, %c0_150] : memref<288x256xf32, #tpu.memory_space<vmem>>, vector<16x256xf32>
    tpu.vector_store %arg15[%c32_149, %c0_150], %422 {strides = array<i32>} : memref<288x256xf32, #tpu.memory_space<vmem>>, vector<16x256xf32>,
    %424 = vector.extract_strided_slice %401 {offsets = [0, 255], sizes = [16, 1], strides = [1, 1]} : vector<16x256xf32> to vector<16x1xf32>
    %425 = vector.extract_strided_slice %401 {offsets = [0, 0], sizes = [16, 255], strides = [1, 1]} : vector<16x256xf32> to vector<16x255xf32>
    %426 = tpu.concatenate %424, %425 in 1 : vector<16x1xf32>, vector<16x255xf32> -> vector<16x256xf32>
    %c52 = arith.constant 52 : index
    %c0_151 = arith.constant 0 : index
    %427 = vector.load %arg2[%c52, %c0_151] : memref<67x256xf32, #tpu.memory_space<vmem>>, vector<1x256xf32>
    %428 = vector.broadcast %427 : vector<1x256xf32> to vector<16x256xf32>
    %429 = arith.mulf %426, %428 : vector<16x256xf32>
    %c48_152 = arith.constant 48 : index
    %c0_153 = arith.constant 0 : index
    %430 = vector.load %arg15[%c48_152, %c0_153] : memref<288x256xf32, #tpu.memory_space<vmem>>, vector<16x256xf32>
    tpu.vector_store %arg15[%c48_152, %c0_153], %429 {strides = array<i32>} : memref<288x256xf32, #tpu.memory_space<vmem>>, vector<16x256xf32>,
    %c64 = arith.constant 64 : index
    %c0_154 = arith.constant 0 : index
    %431 = vector.load %arg15[%c64, %c0_154] : memref<288x256xf32, #tpu.memory_space<vmem>>, vector<16x256xf32>
    tpu.vector_store %arg15[%c64, %c0_154], %401 {strides = array<i32>} : memref<288x256xf32, #tpu.memory_space<vmem>>, vector<16x256xf32>,
    %432 = vector.extract_strided_slice %401 {offsets = [0, 1], sizes = [16, 255], strides = [1, 1]} : vector<16x256xf32> to vector<16x255xf32>
    %433 = vector.extract_strided_slice %401 {offsets = [0, 0], sizes = [16, 1], strides = [1, 1]} : vector<16x256xf32> to vector<16x1xf32>
    %434 = tpu.concatenate %432, %433 in 1 : vector<16x255xf32>, vector<16x1xf32> -> vector<16x256xf32>
    %c54_155 = arith.constant 54 : index
    %c0_156 = arith.constant 0 : index
    %435 = vector.load %arg2[%c54_155, %c0_156] : memref<67x256xf32, #tpu.memory_space<vmem>>, vector<1x256xf32>
    %436 = vector.broadcast %435 : vector<1x256xf32> to vector<16x256xf32>
    %437 = arith.mulf %434, %436 : vector<16x256xf32>
    %c80 = arith.constant 80 : index
    %c0_157 = arith.constant 0 : index
    %438 = vector.load %arg15[%c80, %c0_157] : memref<288x256xf32, #tpu.memory_space<vmem>>, vector<16x256xf32>
    tpu.vector_store %arg15[%c80, %c0_157], %437 {strides = array<i32>} : memref<288x256xf32, #tpu.memory_space<vmem>>, vector<16x256xf32>,
    %439 = vector.extract_strided_slice %401 {offsets = [0, 15], sizes = [16, 241], strides = [1, 1]} : vector<16x256xf32> to vector<16x241xf32>
    %440 = vector.extract_strided_slice %401 {offsets = [0, 0], sizes = [16, 15], strides = [1, 1]} : vector<16x256xf32> to vector<16x15xf32>
    %441 = tpu.concatenate %439, %440 in 1 : vector<16x241xf32>, vector<16x15xf32> -> vector<16x256xf32>
    %c55 = arith.constant 55 : index
    %c0_158 = arith.constant 0 : index
    %442 = vector.load %arg2[%c55, %c0_158] : memref<67x256xf32, #tpu.memory_space<vmem>>, vector<1x256xf32>
    %443 = vector.broadcast %442 : vector<1x256xf32> to vector<16x256xf32>
    %444 = arith.mulf %441, %443 : vector<16x256xf32>
    %c96_159 = arith.constant 96 : index
    %c0_160 = arith.constant 0 : index
    %445 = vector.load %arg15[%c96_159, %c0_160] : memref<288x256xf32, #tpu.memory_space<vmem>>, vector<16x256xf32>
    tpu.vector_store %arg15[%c96_159, %c0_160], %444 {strides = array<i32>} : memref<288x256xf32, #tpu.memory_space<vmem>>, vector<16x256xf32>,
    %446 = vector.extract_strided_slice %401 {offsets = [0, 16], sizes = [16, 240], strides = [1, 1]} : vector<16x256xf32> to vector<16x240xf32>
    %447 = vector.extract_strided_slice %401 {offsets = [0, 0], sizes = [16, 16], strides = [1, 1]} : vector<16x256xf32> to vector<16x16xf32>
    %448 = tpu.concatenate %446, %447 in 1 : vector<16x240xf32>, vector<16x16xf32> -> vector<16x256xf32>
    %c56 = arith.constant 56 : index
    %c0_161 = arith.constant 0 : index
    %449 = vector.load %arg2[%c56, %c0_161] : memref<67x256xf32, #tpu.memory_space<vmem>>, vector<1x256xf32>
    %450 = vector.broadcast %449 : vector<1x256xf32> to vector<16x256xf32>
    %451 = arith.mulf %448, %450 : vector<16x256xf32>
    %c112 = arith.constant 112 : index
    %c0_162 = arith.constant 0 : index
    %452 = vector.load %arg15[%c112, %c0_162] : memref<288x256xf32, #tpu.memory_space<vmem>>, vector<16x256xf32>
    tpu.vector_store %arg15[%c112, %c0_162], %451 {strides = array<i32>} : memref<288x256xf32, #tpu.memory_space<vmem>>, vector<16x256xf32>,
    %453 = vector.extract_strided_slice %401 {offsets = [0, 17], sizes = [16, 239], strides = [1, 1]} : vector<16x256xf32> to vector<16x239xf32>
    %454 = vector.extract_strided_slice %401 {offsets = [0, 0], sizes = [16, 17], strides = [1, 1]} : vector<16x256xf32> to vector<16x17xf32>
    %455 = tpu.concatenate %453, %454 in 1 : vector<16x239xf32>, vector<16x17xf32> -> vector<16x256xf32>
    %c57_163 = arith.constant 57 : index
    %c0_164 = arith.constant 0 : index
    %456 = vector.load %arg2[%c57_163, %c0_164] : memref<67x256xf32, #tpu.memory_space<vmem>>, vector<1x256xf32>
    %457 = vector.broadcast %456 : vector<1x256xf32> to vector<16x256xf32>
    %458 = arith.mulf %455, %457 : vector<16x256xf32>
    %c128 = arith.constant 128 : index
    %c0_165 = arith.constant 0 : index
    %459 = vector.load %arg15[%c128, %c0_165] : memref<288x256xf32, #tpu.memory_space<vmem>>, vector<16x256xf32>
    tpu.vector_store %arg15[%c128, %c0_165], %458 {strides = array<i32>} : memref<288x256xf32, #tpu.memory_space<vmem>>, vector<16x256xf32>,
    %c0_166 = arith.constant 0 : index
    %c0_167 = arith.constant 0 : index
    %460 = vector.load %arg15[%c0_166, %c0_167] : memref<288x256xf32, #tpu.memory_space<vmem>>, vector<144x256xf32>
    %c0_168 = arith.constant 0 : index
    %c0_169 = arith.constant 0 : index
    %461 = vector.load %arg5[%c0_168, %c0_169] : memref<4x144xf32, #tpu.memory_space<vmem>>, vector<4x144xf32>
    %cst_170 = arith.constant dense<0.000000e+00> : vector<4x256xf32>
    %462 = tpu.matmul %461, %460, %cst_170 {dimension_numbers = #tpu.dot_dimension_numbers<[1], [0], [0], [1], [0, 0, 1, 1], [], []>} : vector<4x144xf32>, vector<144x256xf32>, vector<4x256xf32> -> vector<4x256xf32>
    %463 = vector.broadcast %402 : vector<4x1xf32> to vector<4x256xf32>
    %464 = arith.addf %462, %463 : vector<4x256xf32>
    %c0_171 = arith.constant 0 : index
    %c4_172 = arith.constant 4 : index
    %465 = vector.load %arg3[%c0_171, %c4_172] : memref<32x20xf32, #tpu.memory_space<vmem>>, vector<4x1xf32>
    %c0_173 = arith.constant 0 : index
    %c5_174 = arith.constant 5 : index
    %466 = vector.load %arg3[%c0_173, %c5_174] : memref<32x20xf32, #tpu.memory_space<vmem>>, vector<4x1xf32>
    %467 = tpu.iota {dimensions = array<i32: 0>} : vector<1x4xi32>
    %468 = tpu.iota {dimensions = array<i32: 1>} : vector<1x4xi32>
    %c4_i32_175 = arith.constant 4 : i32
    %469 = vector.broadcast %c4_i32_175 : i32 to vector<1x4xi32>
    %470 = arith.muli %467, %469 : vector<1x4xi32>
    %471 = arith.cmpi sge, %468, %470 : vector<1x4xi32>
    %c1_i32_176 = arith.constant 1 : i32
    %472 = vector.broadcast %c1_i32_176 : i32 to vector<1x4xi32>
    %473 = arith.addi %467, %472 : vector<1x4xi32>
    %c4_i32_177 = arith.constant 4 : i32
    %474 = vector.broadcast %c4_i32_177 : i32 to vector<1x4xi32>
    %475 = arith.muli %473, %474 : vector<1x4xi32>
    %476 = arith.cmpi slt, %468, %475 : vector<1x4xi32>
    %477 = arith.andi %471, %476 : vector<1x4xi1>
    %478 = arith.extui %477 : vector<1x4xi1> to vector<1x4xi32>
    %479 = arith.sitofp %478 : vector<1x4xi32> to vector<1x4xf32>
    %480 = tpu.iota {dimensions = array<i32: 0>} : vector<4x1xi32>
    %481 = tpu.iota {dimensions = array<i32: 1>} : vector<4x1xi32>
    %c4_i32_178 = arith.constant 4 : i32
    %482 = vector.broadcast %c4_i32_178 : i32 to vector<4x1xi32>
    %483 = arith.muli %481, %482 : vector<4x1xi32>
    %484 = arith.cmpi sge, %480, %483 : vector<4x1xi32>
    %c1_i32_179 = arith.constant 1 : i32
    %485 = vector.broadcast %c1_i32_179 : i32 to vector<4x1xi32>
    %486 = arith.addi %481, %485 : vector<4x1xi32>
    %c4_i32_180 = arith.constant 4 : i32
    %487 = vector.broadcast %c4_i32_180 : i32 to vector<4x1xi32>
    %488 = arith.muli %486, %487 : vector<4x1xi32>
    %489 = arith.cmpi slt, %480, %488 : vector<4x1xi32>
    %490 = arith.andi %484, %489 : vector<4x1xi1>
    %491 = arith.extui %490 : vector<4x1xi1> to vector<4x1xi32>
    %492 = arith.sitofp %491 : vector<4x1xi32> to vector<4x1xf32>
    %cst_181 = arith.constant dense<0.000000e+00> : vector<4x4xf32>
    %493 = tpu.matmul %492, %479, %cst_181 {dimension_numbers = #tpu.dot_dimension_numbers<[1], [0], [0], [1], [0, 0, 1, 1], [], []>} : vector<4x1xf32>, vector<1x4xf32>, vector<4x4xf32> -> vector<4x4xf32>
    %cst_182 = arith.constant dense<0.000000e+00> : vector<4xf32>
    %494 = vector.multi_reduction <add>, %464, %cst_182 [1] : vector<4x256xf32> to vector<4xf32>
    %495 = vector.shape_cast %494 : vector<4xf32> to vector<4x1xf32>
    %cst_183 = arith.constant dense<0.000000e+00> : vector<4x1xf32>
    %496 = tpu.matmul %493, %495, %cst_183 {dimension_numbers = #tpu.dot_dimension_numbers<[1], [0], [0], [1], [0, 0, 1, 1], [], []>} : vector<4x4xf32>, vector<4x1xf32>, vector<4x1xf32> -> vector<4x1xf32>
    %cst_184 = arith.constant 9.765625E-4 : f32
    %497 = vector.broadcast %cst_184 : f32 to vector<4x1xf32>
    %498 = arith.mulf %496, %497 : vector<4x1xf32>
    %499 = vector.broadcast %498 : vector<4x1xf32> to vector<4x256xf32>
    %500 = arith.subf %464, %499 : vector<4x256xf32>
    %501 = arith.mulf %500, %500 : vector<4x256xf32>
    %cst_185 = arith.constant dense<0.000000e+00> : vector<4xf32>
    %502 = vector.multi_reduction <add>, %501, %cst_185 [1] : vector<4x256xf32> to vector<4xf32>
    %503 = vector.shape_cast %502 : vector<4xf32> to vector<4x1xf32>
    %cst_186 = arith.constant dense<0.000000e+00> : vector<4x1xf32>
    %504 = tpu.matmul %493, %503, %cst_186 {dimension_numbers = #tpu.dot_dimension_numbers<[1], [0], [0], [1], [0, 0, 1, 1], [], []>} : vector<4x4xf32>, vector<4x1xf32>, vector<4x1xf32> -> vector<4x1xf32>
    %cst_187 = arith.constant 9.765625E-4 : f32
    %505 = vector.broadcast %cst_187 : f32 to vector<4x1xf32>
    %506 = arith.mulf %504, %505 : vector<4x1xf32>
    %cst_188 = arith.constant 9.99999974E-6 : f32
    %507 = vector.broadcast %cst_188 : f32 to vector<4x1xf32>
    %508 = arith.addf %506, %507 : vector<4x1xf32>
    %509 = math.rsqrt %508 : vector<4x1xf32>
    %510 = vector.broadcast %509 : vector<4x1xf32> to vector<4x256xf32>
    %511 = arith.mulf %500, %510 : vector<4x256xf32>
    %512 = vector.broadcast %465 : vector<4x1xf32> to vector<4x256xf32>
    %513 = arith.mulf %511, %512 : vector<4x256xf32>
    %514 = vector.broadcast %466 : vector<4x1xf32> to vector<4x256xf32>
    %515 = arith.addf %513, %514 : vector<4x256xf32>
    %516 = arith.negf %515 : vector<4x256xf32>
    %517 = math.exp %516 : vector<4x256xf32>
    %cst_189 = arith.constant 1.000000e+00 : f32
    %518 = vector.broadcast %cst_189 : f32 to vector<4x256xf32>
    %519 = arith.addf %518, %517 : vector<4x256xf32>
    %520 = arith.divf %518, %519 : vector<4x256xf32>
    %521 = arith.mulf %515, %520 : vector<4x256xf32>
    %c0_190 = arith.constant 0 : index
    %c6_191 = arith.constant 6 : index
    %522 = vector.load %arg3[%c0_190, %c6_191] : memref<32x20xf32, #tpu.memory_space<vmem>>, vector<16x1xf32>
    %523 = vector.extract_strided_slice %521 {offsets = [0, 239], sizes = [4, 17], strides = [1, 1]} : vector<4x256xf32> to vector<4x17xf32>
    %524 = vector.extract_strided_slice %521 {offsets = [0, 0], sizes = [4, 239], strides = [1, 1]} : vector<4x256xf32> to vector<4x239xf32>
    %525 = tpu.concatenate %523, %524 in 1 : vector<4x17xf32>, vector<4x239xf32> -> vector<4x256xf32>
    %c49_192 = arith.constant 49 : index
    %c0_193 = arith.constant 0 : index
    %526 = vector.load %arg2[%c49_192, %c0_193] : memref<67x256xf32, #tpu.memory_space<vmem>>, vector<1x256xf32>
    %527 = vector.broadcast %526 : vector<1x256xf32> to vector<4x256xf32>
    %528 = arith.mulf %525, %527 : vector<4x256xf32>
    %c0_194 = arith.constant 0 : index
    %c0_195 = arith.constant 0 : index
    %529 = vector.load %arg15[%c0_194, %c0_195] : memref<288x256xf32, #tpu.memory_space<vmem>>, vector<4x256xf32>
    tpu.vector_store %arg15[%c0_194, %c0_195], %528 {strides = array<i32>} : memref<288x256xf32, #tpu.memory_space<vmem>>, vector<4x256xf32>,
    %530 = vector.extract_strided_slice %521 {offsets = [0, 240], sizes = [4, 16], strides = [1, 1]} : vector<4x256xf32> to vector<4x16xf32>
    %531 = vector.extract_strided_slice %521 {offsets = [0, 0], sizes = [4, 240], strides = [1, 1]} : vector<4x256xf32> to vector<4x240xf32>
    %532 = tpu.concatenate %530, %531 in 1 : vector<4x16xf32>, vector<4x240xf32> -> vector<4x256xf32>
    %c50_196 = arith.constant 50 : index
    %c0_197 = arith.constant 0 : index
    %533 = vector.load %arg2[%c50_196, %c0_197] : memref<67x256xf32, #tpu.memory_space<vmem>>, vector<1x256xf32>
    %534 = vector.broadcast %533 : vector<1x256xf32> to vector<4x256xf32>
    %535 = arith.mulf %532, %534 : vector<4x256xf32>
    %c4_198 = arith.constant 4 : index
    %c0_199 = arith.constant 0 : index
    %536 = vector.load %arg15[%c4_198, %c0_199] : memref<288x256xf32, #tpu.memory_space<vmem>>, vector<4x256xf32>
    tpu.vector_store %arg15[%c4_198, %c0_199], %535 {strides = array<i32>} : memref<288x256xf32, #tpu.memory_space<vmem>>, vector<4x256xf32>,
    %537 = vector.extract_strided_slice %521 {offsets = [0, 241], sizes = [4, 15], strides = [1, 1]} : vector<4x256xf32> to vector<4x15xf32>
    %538 = vector.extract_strided_slice %521 {offsets = [0, 0], sizes = [4, 241], strides = [1, 1]} : vector<4x256xf32> to vector<4x241xf32>
    %539 = tpu.concatenate %537, %538 in 1 : vector<4x15xf32>, vector<4x241xf32> -> vector<4x256xf32>
    %c51_200 = arith.constant 51 : index
    %c0_201 = arith.constant 0 : index
    %540 = vector.load %arg2[%c51_200, %c0_201] : memref<67x256xf32, #tpu.memory_space<vmem>>, vector<1x256xf32>
    %541 = vector.broadcast %540 : vector<1x256xf32> to vector<4x256xf32>
    %542 = arith.mulf %539, %541 : vector<4x256xf32>
    %c8_202 = arith.constant 8 : index
    %c0_203 = arith.constant 0 : index
    %543 = vector.load %arg15[%c8_202, %c0_203] : memref<288x256xf32, #tpu.memory_space<vmem>>, vector<4x256xf32>
    tpu.vector_store %arg15[%c8_202, %c0_203], %542 {strides = array<i32>} : memref<288x256xf32, #tpu.memory_space<vmem>>, vector<4x256xf32>,
    %544 = vector.extract_strided_slice %521 {offsets = [0, 255], sizes = [4, 1], strides = [1, 1]} : vector<4x256xf32> to vector<4x1xf32>
    %545 = vector.extract_strided_slice %521 {offsets = [0, 0], sizes = [4, 255], strides = [1, 1]} : vector<4x256xf32> to vector<4x255xf32>
    %546 = tpu.concatenate %544, %545 in 1 : vector<4x1xf32>, vector<4x255xf32> -> vector<4x256xf32>
    %c52_204 = arith.constant 52 : index
    %c0_205 = arith.constant 0 : index
    %547 = vector.load %arg2[%c52_204, %c0_205] : memref<67x256xf32, #tpu.memory_space<vmem>>, vector<1x256xf32>
    %548 = vector.broadcast %547 : vector<1x256xf32> to vector<4x256xf32>
    %549 = arith.mulf %546, %548 : vector<4x256xf32>
    %c12_206 = arith.constant 12 : index
    %c0_207 = arith.constant 0 : index
    %550 = vector.load %arg15[%c12_206, %c0_207] : memref<288x256xf32, #tpu.memory_space<vmem>>, vector<4x256xf32>
    tpu.vector_store %arg15[%c12_206, %c0_207], %549 {strides = array<i32>} : memref<288x256xf32, #tpu.memory_space<vmem>>, vector<4x256xf32>,
    %c16_208 = arith.constant 16 : index
    %c0_209 = arith.constant 0 : index
    %551 = vector.load %arg15[%c16_208, %c0_209] : memref<288x256xf32, #tpu.memory_space<vmem>>, vector<4x256xf32>
    tpu.vector_store %arg15[%c16_208, %c0_209], %521 {strides = array<i32>} : memref<288x256xf32, #tpu.memory_space<vmem>>, vector<4x256xf32>,
    %552 = vector.extract_strided_slice %521 {offsets = [0, 1], sizes = [4, 255], strides = [1, 1]} : vector<4x256xf32> to vector<4x255xf32>
    %553 = vector.extract_strided_slice %521 {offsets = [0, 0], sizes = [4, 1], strides = [1, 1]} : vector<4x256xf32> to vector<4x1xf32>
    %554 = tpu.concatenate %552, %553 in 1 : vector<4x255xf32>, vector<4x1xf32> -> vector<4x256xf32>
    %c54_210 = arith.constant 54 : index
    %c0_211 = arith.constant 0 : index
    %555 = vector.load %arg2[%c54_210, %c0_211] : memref<67x256xf32, #tpu.memory_space<vmem>>, vector<1x256xf32>
    %556 = vector.broadcast %555 : vector<1x256xf32> to vector<4x256xf32>
    %557 = arith.mulf %554, %556 : vector<4x256xf32>
    %c20_212 = arith.constant 20 : index
    %c0_213 = arith.constant 0 : index
    %558 = vector.load %arg15[%c20_212, %c0_213] : memref<288x256xf32, #tpu.memory_space<vmem>>, vector<4x256xf32>
    tpu.vector_store %arg15[%c20_212, %c0_213], %557 {strides = array<i32>} : memref<288x256xf32, #tpu.memory_space<vmem>>, vector<4x256xf32>,
    %559 = vector.extract_strided_slice %521 {offsets = [0, 15], sizes = [4, 241], strides = [1, 1]} : vector<4x256xf32> to vector<4x241xf32>
    %560 = vector.extract_strided_slice %521 {offsets = [0, 0], sizes = [4, 15], strides = [1, 1]} : vector<4x256xf32> to vector<4x15xf32>
    %561 = tpu.concatenate %559, %560 in 1 : vector<4x241xf32>, vector<4x15xf32> -> vector<4x256xf32>
    %c55_214 = arith.constant 55 : index
    %c0_215 = arith.constant 0 : index
    %562 = vector.load %arg2[%c55_214, %c0_215] : memref<67x256xf32, #tpu.memory_space<vmem>>, vector<1x256xf32>
    %563 = vector.broadcast %562 : vector<1x256xf32> to vector<4x256xf32>
    %564 = arith.mulf %561, %563 : vector<4x256xf32>
    %c24_216 = arith.constant 24 : index
    %c0_217 = arith.constant 0 : index
    %565 = vector.load %arg15[%c24_216, %c0_217] : memref<288x256xf32, #tpu.memory_space<vmem>>, vector<4x256xf32>
    tpu.vector_store %arg15[%c24_216, %c0_217], %564 {strides = array<i32>} : memref<288x256xf32, #tpu.memory_space<vmem>>, vector<4x256xf32>,
    %566 = vector.extract_strided_slice %521 {offsets = [0, 16], sizes = [4, 240], strides = [1, 1]} : vector<4x256xf32> to vector<4x240xf32>
    %567 = vector.extract_strided_slice %521 {offsets = [0, 0], sizes = [4, 16], strides = [1, 1]} : vector<4x256xf32> to vector<4x16xf32>
    %568 = tpu.concatenate %566, %567 in 1 : vector<4x240xf32>, vector<4x16xf32> -> vector<4x256xf32>
    %c56_218 = arith.constant 56 : index
    %c0_219 = arith.constant 0 : index
    %569 = vector.load %arg2[%c56_218, %c0_219] : memref<67x256xf32, #tpu.memory_space<vmem>>, vector<1x256xf32>
    %570 = vector.broadcast %569 : vector<1x256xf32> to vector<4x256xf32>
    %571 = arith.mulf %568, %570 : vector<4x256xf32>
    %c28_220 = arith.constant 28 : index
    %c0_221 = arith.constant 0 : index
    %572 = vector.load %arg15[%c28_220, %c0_221] : memref<288x256xf32, #tpu.memory_space<vmem>>, vector<4x256xf32>
    tpu.vector_store %arg15[%c28_220, %c0_221], %571 {strides = array<i32>} : memref<288x256xf32, #tpu.memory_space<vmem>>, vector<4x256xf32>,
    %573 = vector.extract_strided_slice %521 {offsets = [0, 17], sizes = [4, 239], strides = [1, 1]} : vector<4x256xf32> to vector<4x239xf32>
    %574 = vector.extract_strided_slice %521 {offsets = [0, 0], sizes = [4, 17], strides = [1, 1]} : vector<4x256xf32> to vector<4x17xf32>
    %575 = tpu.concatenate %573, %574 in 1 : vector<4x239xf32>, vector<4x17xf32> -> vector<4x256xf32>
    %c57_222 = arith.constant 57 : index
    %c0_223 = arith.constant 0 : index
    %576 = vector.load %arg2[%c57_222, %c0_223] : memref<67x256xf32, #tpu.memory_space<vmem>>, vector<1x256xf32>
    %577 = vector.broadcast %576 : vector<1x256xf32> to vector<4x256xf32>
    %578 = arith.mulf %575, %577 : vector<4x256xf32>
    %c32_224 = arith.constant 32 : index
    %c0_225 = arith.constant 0 : index
    %579 = vector.load %arg15[%c32_224, %c0_225] : memref<288x256xf32, #tpu.memory_space<vmem>>, vector<4x256xf32>
    tpu.vector_store %arg15[%c32_224, %c0_225], %578 {strides = array<i32>} : memref<288x256xf32, #tpu.memory_space<vmem>>, vector<4x256xf32>,
    %c0_226 = arith.constant 0 : index
    %c0_227 = arith.constant 0 : index
    %580 = vector.load %arg15[%c0_226, %c0_227] : memref<288x256xf32, #tpu.memory_space<vmem>>, vector<36x256xf32>
    %c0_228 = arith.constant 0 : index
    %c0_229 = arith.constant 0 : index
    %581 = vector.load %arg6[%c0_228, %c0_229] : memref<16x36xf32, #tpu.memory_space<vmem>>, vector<16x36xf32>
    %cst_230 = arith.constant dense<0.000000e+00> : vector<16x256xf32>
    %582 = tpu.matmul %581, %580, %cst_230 {dimension_numbers = #tpu.dot_dimension_numbers<[1], [0], [0], [1], [0, 0, 1, 1], [], []>} : vector<16x36xf32>, vector<36x256xf32>, vector<16x256xf32> -> vector<16x256xf32>
    %583 = vector.broadcast %522 : vector<16x1xf32> to vector<16x256xf32>
    %584 = arith.addf %582, %583 : vector<16x256xf32>
    %585 = arith.addf %584, %344 : vector<16x256xf32>
    %c0_231 = arith.constant 0 : index
    %c0_232 = arith.constant 0 : index
    %c0_233 = arith.constant 0 : index
    %586 = vector.load %arg13[%c0_231, %c0_232, %c0_233] : memref<1x16x256xf32, #tpu.memory_space<vmem>>, vector<1x16x256xf32>
    %587 = vector.shape_cast %586 : vector<1x16x256xf32> to vector<16x256xf32>
    %588 = vector.shape_cast %585 : vector<16x256xf32> to vector<1x16x256xf32>
    tpu.vector_store %arg13[%c0_231, %c0_232, %c0_233], %588 {strides = array<i32>} : memref<1x16x256xf32, #tpu.memory_space<vmem>>, vector<1x16x256xf32>,
    %c0_234 = arith.constant 0 : index
    %c7_235 = arith.constant 7 : index
    %589 = vector.load %arg3[%c0_234, %c7_235] : memref<32x20xf32, #tpu.memory_space<vmem>>, vector<16x1xf32>
    %c0_236 = arith.constant 0 : index
    %c8_237 = arith.constant 8 : index
    %590 = vector.load %arg3[%c0_236, %c8_237] : memref<32x20xf32, #tpu.memory_space<vmem>>, vector<16x1xf32>
    %cst_238 = arith.constant dense<0.000000e+00> : vector<16xf32>
    %591 = vector.multi_reduction <add>, %585, %cst_238 [1] : vector<16x256xf32> to vector<16xf32>
    %592 = vector.shape_cast %591 : vector<16xf32> to vector<16x1xf32>
    %cst_239 = arith.constant dense<0.000000e+00> : vector<16x1xf32>
    %593 = tpu.matmul %373, %592, %cst_239 {dimension_numbers = #tpu.dot_dimension_numbers<[1], [0], [0], [1], [0, 0, 1, 1], [], []>} : vector<16x16xf32>, vector<16x1xf32>, vector<16x1xf32> -> vector<16x1xf32>
    %cst_240 = arith.constant 9.765625E-4 : f32
    %594 = vector.broadcast %cst_240 : f32 to vector<16x1xf32>
    %595 = arith.mulf %593, %594 : vector<16x1xf32>
    %596 = vector.broadcast %595 : vector<16x1xf32> to vector<16x256xf32>
    %597 = arith.subf %585, %596 : vector<16x256xf32>
    %598 = arith.mulf %597, %597 : vector<16x256xf32>
    %cst_241 = arith.constant dense<0.000000e+00> : vector<16xf32>
    %599 = vector.multi_reduction <add>, %598, %cst_241 [1] : vector<16x256xf32> to vector<16xf32>
    %600 = vector.shape_cast %599 : vector<16xf32> to vector<16x1xf32>
    %cst_242 = arith.constant dense<0.000000e+00> : vector<16x1xf32>
    %601 = tpu.matmul %373, %600, %cst_242 {dimension_numbers = #tpu.dot_dimension_numbers<[1], [0], [0], [1], [0, 0, 1, 1], [], []>} : vector<16x16xf32>, vector<16x1xf32>, vector<16x1xf32> -> vector<16x1xf32>
    %cst_243 = arith.constant 9.765625E-4 : f32
    %602 = vector.broadcast %cst_243 : f32 to vector<16x1xf32>
    %603 = arith.mulf %601, %602 : vector<16x1xf32>
    %cst_244 = arith.constant 9.99999974E-6 : f32
    %604 = vector.broadcast %cst_244 : f32 to vector<16x1xf32>
    %605 = arith.addf %603, %604 : vector<16x1xf32>
    %606 = math.rsqrt %605 : vector<16x1xf32>
    %607 = vector.broadcast %606 : vector<16x1xf32> to vector<16x256xf32>
    %608 = arith.mulf %597, %607 : vector<16x256xf32>
    %609 = vector.broadcast %589 : vector<16x1xf32> to vector<16x256xf32>
    %610 = arith.mulf %608, %609 : vector<16x256xf32>
    %611 = vector.broadcast %590 : vector<16x1xf32> to vector<16x256xf32>
    %612 = arith.addf %610, %611 : vector<16x256xf32>
    %613 = arith.negf %612 : vector<16x256xf32>
    %614 = math.exp %613 : vector<16x256xf32>
    %cst_245 = arith.constant 1.000000e+00 : f32
    %615 = vector.broadcast %cst_245 : f32 to vector<16x256xf32>
    %616 = arith.addf %615, %614 : vector<16x256xf32>
    %617 = arith.divf %615, %616 : vector<16x256xf32>
    %618 = arith.mulf %612, %617 : vector<16x256xf32>
    %c0_246 = arith.constant 0 : index
    %c9_247 = arith.constant 9 : index
    %619 = vector.load %arg3[%c0_246, %c9_247] : memref<32x20xf32, #tpu.memory_space<vmem>>, vector<4x1xf32>
    %620 = vector.extract_strided_slice %618 {offsets = [0, 239], sizes = [16, 17], strides = [1, 1]} : vector<16x256xf32> to vector<16x17xf32>
    %621 = vector.extract_strided_slice %618 {offsets = [0, 0], sizes = [16, 239], strides = [1, 1]} : vector<16x256xf32> to vector<16x239xf32>
    %622 = tpu.concatenate %620, %621 in 1 : vector<16x17xf32>, vector<16x239xf32> -> vector<16x256xf32>
    %c49_248 = arith.constant 49 : index
    %c0_249 = arith.constant 0 : index
    %623 = vector.load %arg2[%c49_248, %c0_249] : memref<67x256xf32, #tpu.memory_space<vmem>>, vector<1x256xf32>
    %624 = vector.broadcast %623 : vector<1x256xf32> to vector<16x256xf32>
    %625 = arith.mulf %622, %624 : vector<16x256xf32>
    %c0_250 = arith.constant 0 : index
    %c0_251 = arith.constant 0 : index
    %626 = vector.load %arg15[%c0_250, %c0_251] : memref<288x256xf32, #tpu.memory_space<vmem>>, vector<16x256xf32>
    tpu.vector_store %arg15[%c0_250, %c0_251], %625 {strides = array<i32>} : memref<288x256xf32, #tpu.memory_space<vmem>>, vector<16x256xf32>,
    %627 = vector.extract_strided_slice %618 {offsets = [0, 240], sizes = [16, 16], strides = [1, 1]} : vector<16x256xf32> to vector<16x16xf32>
    %628 = vector.extract_strided_slice %618 {offsets = [0, 0], sizes = [16, 240], strides = [1, 1]} : vector<16x256xf32> to vector<16x240xf32>
    %629 = tpu.concatenate %627, %628 in 1 : vector<16x16xf32>, vector<16x240xf32> -> vector<16x256xf32>
    %c50_252 = arith.constant 50 : index
    %c0_253 = arith.constant 0 : index
    %630 = vector.load %arg2[%c50_252, %c0_253] : memref<67x256xf32, #tpu.memory_space<vmem>>, vector<1x256xf32>
    %631 = vector.broadcast %630 : vector<1x256xf32> to vector<16x256xf32>
    %632 = arith.mulf %629, %631 : vector<16x256xf32>
    %c16_254 = arith.constant 16 : index
    %c0_255 = arith.constant 0 : index
    %633 = vector.load %arg15[%c16_254, %c0_255] : memref<288x256xf32, #tpu.memory_space<vmem>>, vector<16x256xf32>
    tpu.vector_store %arg15[%c16_254, %c0_255], %632 {strides = array<i32>} : memref<288x256xf32, #tpu.memory_space<vmem>>, vector<16x256xf32>,
    %634 = vector.extract_strided_slice %618 {offsets = [0, 241], sizes = [16, 15], strides = [1, 1]} : vector<16x256xf32> to vector<16x15xf32>
    %635 = vector.extract_strided_slice %618 {offsets = [0, 0], sizes = [16, 241], strides = [1, 1]} : vector<16x256xf32> to vector<16x241xf32>
    %636 = tpu.concatenate %634, %635 in 1 : vector<16x15xf32>, vector<16x241xf32> -> vector<16x256xf32>
    %c51_256 = arith.constant 51 : index
    %c0_257 = arith.constant 0 : index
    %637 = vector.load %arg2[%c51_256, %c0_257] : memref<67x256xf32, #tpu.memory_space<vmem>>, vector<1x256xf32>
    %638 = vector.broadcast %637 : vector<1x256xf32> to vector<16x256xf32>
    %639 = arith.mulf %636, %638 : vector<16x256xf32>
    %c32_258 = arith.constant 32 : index
    %c0_259 = arith.constant 0 : index
    %640 = vector.load %arg15[%c32_258, %c0_259] : memref<288x256xf32, #tpu.memory_space<vmem>>, vector<16x256xf32>
    tpu.vector_store %arg15[%c32_258, %c0_259], %639 {strides = array<i32>} : memref<288x256xf32, #tpu.memory_space<vmem>>, vector<16x256xf32>,
    %641 = vector.extract_strided_slice %618 {offsets = [0, 255], sizes = [16, 1], strides = [1, 1]} : vector<16x256xf32> to vector<16x1xf32>
    %642 = vector.extract_strided_slice %618 {offsets = [0, 0], sizes = [16, 255], strides = [1, 1]} : vector<16x256xf32> to vector<16x255xf32>
    %643 = tpu.concatenate %641, %642 in 1 : vector<16x1xf32>, vector<16x255xf32> -> vector<16x256xf32>
    %c52_260 = arith.constant 52 : index
    %c0_261 = arith.constant 0 : index
    %644 = vector.load %arg2[%c52_260, %c0_261] : memref<67x256xf32, #tpu.memory_space<vmem>>, vector<1x256xf32>
    %645 = vector.broadcast %644 : vector<1x256xf32> to vector<16x256xf32>
    %646 = arith.mulf %643, %645 : vector<16x256xf32>
    %c48_262 = arith.constant 48 : index
    %c0_263 = arith.constant 0 : index
    %647 = vector.load %arg15[%c48_262, %c0_263] : memref<288x256xf32, #tpu.memory_space<vmem>>, vector<16x256xf32>
    tpu.vector_store %arg15[%c48_262, %c0_263], %646 {strides = array<i32>} : memref<288x256xf32, #tpu.memory_space<vmem>>, vector<16x256xf32>,
    %c64_264 = arith.constant 64 : index
    %c0_265 = arith.constant 0 : index
    %648 = vector.load %arg15[%c64_264, %c0_265] : memref<288x256xf32, #tpu.memory_space<vmem>>, vector<16x256xf32>
    tpu.vector_store %arg15[%c64_264, %c0_265], %618 {strides = array<i32>} : memref<288x256xf32, #tpu.memory_space<vmem>>, vector<16x256xf32>,
    %649 = vector.extract_strided_slice %618 {offsets = [0, 1], sizes = [16, 255], strides = [1, 1]} : vector<16x256xf32> to vector<16x255xf32>
    %650 = vector.extract_strided_slice %618 {offsets = [0, 0], sizes = [16, 1], strides = [1, 1]} : vector<16x256xf32> to vector<16x1xf32>
    %651 = tpu.concatenate %649, %650 in 1 : vector<16x255xf32>, vector<16x1xf32> -> vector<16x256xf32>
    %c54_266 = arith.constant 54 : index
    %c0_267 = arith.constant 0 : index
    %652 = vector.load %arg2[%c54_266, %c0_267] : memref<67x256xf32, #tpu.memory_space<vmem>>, vector<1x256xf32>
    %653 = vector.broadcast %652 : vector<1x256xf32> to vector<16x256xf32>
    %654 = arith.mulf %651, %653 : vector<16x256xf32>
    %c80_268 = arith.constant 80 : index
    %c0_269 = arith.constant 0 : index
    %655 = vector.load %arg15[%c80_268, %c0_269] : memref<288x256xf32, #tpu.memory_space<vmem>>, vector<16x256xf32>
    tpu.vector_store %arg15[%c80_268, %c0_269], %654 {strides = array<i32>} : memref<288x256xf32, #tpu.memory_space<vmem>>, vector<16x256xf32>,
    %656 = vector.extract_strided_slice %618 {offsets = [0, 15], sizes = [16, 241], strides = [1, 1]} : vector<16x256xf32> to vector<16x241xf32>
    %657 = vector.extract_strided_slice %618 {offsets = [0, 0], sizes = [16, 15], strides = [1, 1]} : vector<16x256xf32> to vector<16x15xf32>
    %658 = tpu.concatenate %656, %657 in 1 : vector<16x241xf32>, vector<16x15xf32> -> vector<16x256xf32>
    %c55_270 = arith.constant 55 : index
    %c0_271 = arith.constant 0 : index
    %659 = vector.load %arg2[%c55_270, %c0_271] : memref<67x256xf32, #tpu.memory_space<vmem>>, vector<1x256xf32>
    %660 = vector.broadcast %659 : vector<1x256xf32> to vector<16x256xf32>
    %661 = arith.mulf %658, %660 : vector<16x256xf32>
    %c96_272 = arith.constant 96 : index
    %c0_273 = arith.constant 0 : index
    %662 = vector.load %arg15[%c96_272, %c0_273] : memref<288x256xf32, #tpu.memory_space<vmem>>, vector<16x256xf32>
    tpu.vector_store %arg15[%c96_272, %c0_273], %661 {strides = array<i32>} : memref<288x256xf32, #tpu.memory_space<vmem>>, vector<16x256xf32>,
    %663 = vector.extract_strided_slice %618 {offsets = [0, 16], sizes = [16, 240], strides = [1, 1]} : vector<16x256xf32> to vector<16x240xf32>
    %664 = vector.extract_strided_slice %618 {offsets = [0, 0], sizes = [16, 16], strides = [1, 1]} : vector<16x256xf32> to vector<16x16xf32>
    %665 = tpu.concatenate %663, %664 in 1 : vector<16x240xf32>, vector<16x16xf32> -> vector<16x256xf32>
    %c56_274 = arith.constant 56 : index
    %c0_275 = arith.constant 0 : index
    %666 = vector.load %arg2[%c56_274, %c0_275] : memref<67x256xf32, #tpu.memory_space<vmem>>, vector<1x256xf32>
    %667 = vector.broadcast %666 : vector<1x256xf32> to vector<16x256xf32>
    %668 = arith.mulf %665, %667 : vector<16x256xf32>
    %c112_276 = arith.constant 112 : index
    %c0_277 = arith.constant 0 : index
    %669 = vector.load %arg15[%c112_276, %c0_277] : memref<288x256xf32, #tpu.memory_space<vmem>>, vector<16x256xf32>
    tpu.vector_store %arg15[%c112_276, %c0_277], %668 {strides = array<i32>} : memref<288x256xf32, #tpu.memory_space<vmem>>, vector<16x256xf32>,
    %670 = vector.extract_strided_slice %618 {offsets = [0, 17], sizes = [16, 239], strides = [1, 1]} : vector<16x256xf32> to vector<16x239xf32>
    %671 = vector.extract_strided_slice %618 {offsets = [0, 0], sizes = [16, 17], strides = [1, 1]} : vector<16x256xf32> to vector<16x17xf32>
    %672 = tpu.concatenate %670, %671 in 1 : vector<16x239xf32>, vector<16x17xf32> -> vector<16x256xf32>
    %c57_278 = arith.constant 57 : index
    %c0_279 = arith.constant 0 : index
    %673 = vector.load %arg2[%c57_278, %c0_279] : memref<67x256xf32, #tpu.memory_space<vmem>>, vector<1x256xf32>
    %674 = vector.broadcast %673 : vector<1x256xf32> to vector<16x256xf32>
    %675 = arith.mulf %672, %674 : vector<16x256xf32>
    %c128_280 = arith.constant 128 : index
    %c0_281 = arith.constant 0 : index
    %676 = vector.load %arg15[%c128_280, %c0_281] : memref<288x256xf32, #tpu.memory_space<vmem>>, vector<16x256xf32>
    tpu.vector_store %arg15[%c128_280, %c0_281], %675 {strides = array<i32>} : memref<288x256xf32, #tpu.memory_space<vmem>>, vector<16x256xf32>,
    %c0_282 = arith.constant 0 : index
    %c0_283 = arith.constant 0 : index
    %677 = vector.load %arg15[%c0_282, %c0_283] : memref<288x256xf32, #tpu.memory_space<vmem>>, vector<144x256xf32>
    %c0_284 = arith.constant 0 : index
    %c0_285 = arith.constant 0 : index
    %678 = vector.load %arg7[%c0_284, %c0_285] : memref<4x144xf32, #tpu.memory_space<vmem>>, vector<4x144xf32>
    %cst_286 = arith.constant dense<0.000000e+00> : vector<4x256xf32>
    %679 = tpu.matmul %678, %677, %cst_286 {dimension_numbers = #tpu.dot_dimension_numbers<[1], [0], [0], [1], [0, 0, 1, 1], [], []>} : vector<4x144xf32>, vector<144x256xf32>, vector<4x256xf32> -> vector<4x256xf32>
    %680 = vector.broadcast %619 : vector<4x1xf32> to vector<4x256xf32>
    %681 = arith.addf %679, %680 : vector<4x256xf32>
    %c0_287 = arith.constant 0 : index
    %c10_288 = arith.constant 10 : index
    %682 = vector.load %arg3[%c0_287, %c10_288] : memref<32x20xf32, #tpu.memory_space<vmem>>, vector<4x1xf32>
    %c0_289 = arith.constant 0 : index
    %c11_290 = arith.constant 11 : index
    %683 = vector.load %arg3[%c0_289, %c11_290] : memref<32x20xf32, #tpu.memory_space<vmem>>, vector<4x1xf32>
    %cst_291 = arith.constant dense<0.000000e+00> : vector<4xf32>
    %684 = vector.multi_reduction <add>, %681, %cst_291 [1] : vector<4x256xf32> to vector<4xf32>
    %685 = vector.shape_cast %684 : vector<4xf32> to vector<4x1xf32>
    %cst_292 = arith.constant dense<0.000000e+00> : vector<4x1xf32>
    %686 = tpu.matmul %493, %685, %cst_292 {dimension_numbers = #tpu.dot_dimension_numbers<[1], [0], [0], [1], [0, 0, 1, 1], [], []>} : vector<4x4xf32>, vector<4x1xf32>, vector<4x1xf32> -> vector<4x1xf32>
    %cst_293 = arith.constant 9.765625E-4 : f32
    %687 = vector.broadcast %cst_293 : f32 to vector<4x1xf32>
    %688 = arith.mulf %686, %687 : vector<4x1xf32>
    %689 = vector.broadcast %688 : vector<4x1xf32> to vector<4x256xf32>
    %690 = arith.subf %681, %689 : vector<4x256xf32>
    %691 = arith.mulf %690, %690 : vector<4x256xf32>
    %cst_294 = arith.constant dense<0.000000e+00> : vector<4xf32>
    %692 = vector.multi_reduction <add>, %691, %cst_294 [1] : vector<4x256xf32> to vector<4xf32>
    %693 = vector.shape_cast %692 : vector<4xf32> to vector<4x1xf32>
    %cst_295 = arith.constant dense<0.000000e+00> : vector<4x1xf32>
    %694 = tpu.matmul %493, %693, %cst_295 {dimension_numbers = #tpu.dot_dimension_numbers<[1], [0], [0], [1], [0, 0, 1, 1], [], []>} : vector<4x4xf32>, vector<4x1xf32>, vector<4x1xf32> -> vector<4x1xf32>
    %cst_296 = arith.constant 9.765625E-4 : f32
    %695 = vector.broadcast %cst_296 : f32 to vector<4x1xf32>
    %696 = arith.mulf %694, %695 : vector<4x1xf32>
    %cst_297 = arith.constant 9.99999974E-6 : f32
    %697 = vector.broadcast %cst_297 : f32 to vector<4x1xf32>
    %698 = arith.addf %696, %697 : vector<4x1xf32>
    %699 = math.rsqrt %698 : vector<4x1xf32>
    %700 = vector.broadcast %699 : vector<4x1xf32> to vector<4x256xf32>
    %701 = arith.mulf %690, %700 : vector<4x256xf32>
    %702 = vector.broadcast %682 : vector<4x1xf32> to vector<4x256xf32>
    %703 = arith.mulf %701, %702 : vector<4x256xf32>
    %704 = vector.broadcast %683 : vector<4x1xf32> to vector<4x256xf32>
    %705 = arith.addf %703, %704 : vector<4x256xf32>
    %706 = arith.negf %705 : vector<4x256xf32>
    %707 = math.exp %706 : vector<4x256xf32>
    %cst_298 = arith.constant 1.000000e+00 : f32
    %708 = vector.broadcast %cst_298 : f32 to vector<4x256xf32>
    %709 = arith.addf %708, %707 : vector<4x256xf32>
    %710 = arith.divf %708, %709 : vector<4x256xf32>
    %711 = arith.mulf %705, %710 : vector<4x256xf32>
    %c0_299 = arith.constant 0 : index
    %c12_300 = arith.constant 12 : index
    %712 = vector.load %arg3[%c0_299, %c12_300] : memref<32x20xf32, #tpu.memory_space<vmem>>, vector<32x1xf32>
    %713 = vector.extract_strided_slice %711 {offsets = [0, 239], sizes = [4, 17], strides = [1, 1]} : vector<4x256xf32> to vector<4x17xf32>
    %714 = vector.extract_strided_slice %711 {offsets = [0, 0], sizes = [4, 239], strides = [1, 1]} : vector<4x256xf32> to vector<4x239xf32>
    %715 = tpu.concatenate %713, %714 in 1 : vector<4x17xf32>, vector<4x239xf32> -> vector<4x256xf32>
    %c49_301 = arith.constant 49 : index
    %c0_302 = arith.constant 0 : index
    %716 = vector.load %arg2[%c49_301, %c0_302] : memref<67x256xf32, #tpu.memory_space<vmem>>, vector<1x256xf32>
    %717 = vector.broadcast %716 : vector<1x256xf32> to vector<4x256xf32>
    %718 = arith.mulf %715, %717 : vector<4x256xf32>
    %c0_303 = arith.constant 0 : index
    %c0_304 = arith.constant 0 : index
    %719 = vector.load %arg15[%c0_303, %c0_304] : memref<288x256xf32, #tpu.memory_space<vmem>>, vector<4x256xf32>
    tpu.vector_store %arg15[%c0_303, %c0_304], %718 {strides = array<i32>} : memref<288x256xf32, #tpu.memory_space<vmem>>, vector<4x256xf32>,
    %720 = vector.extract_strided_slice %711 {offsets = [0, 240], sizes = [4, 16], strides = [1, 1]} : vector<4x256xf32> to vector<4x16xf32>
    %721 = vector.extract_strided_slice %711 {offsets = [0, 0], sizes = [4, 240], strides = [1, 1]} : vector<4x256xf32> to vector<4x240xf32>
    %722 = tpu.concatenate %720, %721 in 1 : vector<4x16xf32>, vector<4x240xf32> -> vector<4x256xf32>
    %c50_305 = arith.constant 50 : index
    %c0_306 = arith.constant 0 : index
    %723 = vector.load %arg2[%c50_305, %c0_306] : memref<67x256xf32, #tpu.memory_space<vmem>>, vector<1x256xf32>
    %724 = vector.broadcast %723 : vector<1x256xf32> to vector<4x256xf32>
    %725 = arith.mulf %722, %724 : vector<4x256xf32>
    %c4_307 = arith.constant 4 : index
    %c0_308 = arith.constant 0 : index
    %726 = vector.load %arg15[%c4_307, %c0_308] : memref<288x256xf32, #tpu.memory_space<vmem>>, vector<4x256xf32>
    tpu.vector_store %arg15[%c4_307, %c0_308], %725 {strides = array<i32>} : memref<288x256xf32, #tpu.memory_space<vmem>>, vector<4x256xf32>,
    %727 = vector.extract_strided_slice %711 {offsets = [0, 241], sizes = [4, 15], strides = [1, 1]} : vector<4x256xf32> to vector<4x15xf32>
    %728 = vector.extract_strided_slice %711 {offsets = [0, 0], sizes = [4, 241], strides = [1, 1]} : vector<4x256xf32> to vector<4x241xf32>
    %729 = tpu.concatenate %727, %728 in 1 : vector<4x15xf32>, vector<4x241xf32> -> vector<4x256xf32>
    %c51_309 = arith.constant 51 : index
    %c0_310 = arith.constant 0 : index
    %730 = vector.load %arg2[%c51_309, %c0_310] : memref<67x256xf32, #tpu.memory_space<vmem>>, vector<1x256xf32>
    %731 = vector.broadcast %730 : vector<1x256xf32> to vector<4x256xf32>
    %732 = arith.mulf %729, %731 : vector<4x256xf32>
    %c8_311 = arith.constant 8 : index
    %c0_312 = arith.constant 0 : index
    %733 = vector.load %arg15[%c8_311, %c0_312] : memref<288x256xf32, #tpu.memory_space<vmem>>, vector<4x256xf32>
    tpu.vector_store %arg15[%c8_311, %c0_312], %732 {strides = array<i32>} : memref<288x256xf32, #tpu.memory_space<vmem>>, vector<4x256xf32>,
    %734 = vector.extract_strided_slice %711 {offsets = [0, 255], sizes = [4, 1], strides = [1, 1]} : vector<4x256xf32> to vector<4x1xf32>
    %735 = vector.extract_strided_slice %711 {offsets = [0, 0], sizes = [4, 255], strides = [1, 1]} : vector<4x256xf32> to vector<4x255xf32>
    %736 = tpu.concatenate %734, %735 in 1 : vector<4x1xf32>, vector<4x255xf32> -> vector<4x256xf32>
    %c52_313 = arith.constant 52 : index
    %c0_314 = arith.constant 0 : index
    %737 = vector.load %arg2[%c52_313, %c0_314] : memref<67x256xf32, #tpu.memory_space<vmem>>, vector<1x256xf32>
    %738 = vector.broadcast %737 : vector<1x256xf32> to vector<4x256xf32>
    %739 = arith.mulf %736, %738 : vector<4x256xf32>
    %c12_315 = arith.constant 12 : index
    %c0_316 = arith.constant 0 : index
    %740 = vector.load %arg15[%c12_315, %c0_316] : memref<288x256xf32, #tpu.memory_space<vmem>>, vector<4x256xf32>
    tpu.vector_store %arg15[%c12_315, %c0_316], %739 {strides = array<i32>} : memref<288x256xf32, #tpu.memory_space<vmem>>, vector<4x256xf32>,
    %c16_317 = arith.constant 16 : index
    %c0_318 = arith.constant 0 : index
    %741 = vector.load %arg15[%c16_317, %c0_318] : memref<288x256xf32, #tpu.memory_space<vmem>>, vector<4x256xf32>
    tpu.vector_store %arg15[%c16_317, %c0_318], %711 {strides = array<i32>} : memref<288x256xf32, #tpu.memory_space<vmem>>, vector<4x256xf32>,
    %742 = vector.extract_strided_slice %711 {offsets = [0, 1], sizes = [4, 255], strides = [1, 1]} : vector<4x256xf32> to vector<4x255xf32>
    %743 = vector.extract_strided_slice %711 {offsets = [0, 0], sizes = [4, 1], strides = [1, 1]} : vector<4x256xf32> to vector<4x1xf32>
    %744 = tpu.concatenate %742, %743 in 1 : vector<4x255xf32>, vector<4x1xf32> -> vector<4x256xf32>
    %c54_319 = arith.constant 54 : index
    %c0_320 = arith.constant 0 : index
    %745 = vector.load %arg2[%c54_319, %c0_320] : memref<67x256xf32, #tpu.memory_space<vmem>>, vector<1x256xf32>
    %746 = vector.broadcast %745 : vector<1x256xf32> to vector<4x256xf32>
    %747 = arith.mulf %744, %746 : vector<4x256xf32>
    %c20_321 = arith.constant 20 : index
    %c0_322 = arith.constant 0 : index
    %748 = vector.load %arg15[%c20_321, %c0_322] : memref<288x256xf32, #tpu.memory_space<vmem>>, vector<4x256xf32>
    tpu.vector_store %arg15[%c20_321, %c0_322], %747 {strides = array<i32>} : memref<288x256xf32, #tpu.memory_space<vmem>>, vector<4x256xf32>,
    %749 = vector.extract_strided_slice %711 {offsets = [0, 15], sizes = [4, 241], strides = [1, 1]} : vector<4x256xf32> to vector<4x241xf32>
    %750 = vector.extract_strided_slice %711 {offsets = [0, 0], sizes = [4, 15], strides = [1, 1]} : vector<4x256xf32> to vector<4x15xf32>
    %751 = tpu.concatenate %749, %750 in 1 : vector<4x241xf32>, vector<4x15xf32> -> vector<4x256xf32>
    %c55_323 = arith.constant 55 : index
    %c0_324 = arith.constant 0 : index
    %752 = vector.load %arg2[%c55_323, %c0_324] : memref<67x256xf32, #tpu.memory_space<vmem>>, vector<1x256xf32>
    %753 = vector.broadcast %752 : vector<1x256xf32> to vector<4x256xf32>
    %754 = arith.mulf %751, %753 : vector<4x256xf32>
    %c24_325 = arith.constant 24 : index
    %c0_326 = arith.constant 0 : index
    %755 = vector.load %arg15[%c24_325, %c0_326] : memref<288x256xf32, #tpu.memory_space<vmem>>, vector<4x256xf32>
    tpu.vector_store %arg15[%c24_325, %c0_326], %754 {strides = array<i32>} : memref<288x256xf32, #tpu.memory_space<vmem>>, vector<4x256xf32>,
    %756 = vector.extract_strided_slice %711 {offsets = [0, 16], sizes = [4, 240], strides = [1, 1]} : vector<4x256xf32> to vector<4x240xf32>
    %757 = vector.extract_strided_slice %711 {offsets = [0, 0], sizes = [4, 16], strides = [1, 1]} : vector<4x256xf32> to vector<4x16xf32>
    %758 = tpu.concatenate %756, %757 in 1 : vector<4x240xf32>, vector<4x16xf32> -> vector<4x256xf32>
    %c56_327 = arith.constant 56 : index
    %c0_328 = arith.constant 0 : index
    %759 = vector.load %arg2[%c56_327, %c0_328] : memref<67x256xf32, #tpu.memory_space<vmem>>, vector<1x256xf32>
    %760 = vector.broadcast %759 : vector<1x256xf32> to vector<4x256xf32>
    %761 = arith.mulf %758, %760 : vector<4x256xf32>
    %c28_329 = arith.constant 28 : index
    %c0_330 = arith.constant 0 : index
    %762 = vector.load %arg15[%c28_329, %c0_330] : memref<288x256xf32, #tpu.memory_space<vmem>>, vector<4x256xf32>
    tpu.vector_store %arg15[%c28_329, %c0_330], %761 {strides = array<i32>} : memref<288x256xf32, #tpu.memory_space<vmem>>, vector<4x256xf32>,
    %763 = vector.extract_strided_slice %711 {offsets = [0, 17], sizes = [4, 239], strides = [1, 1]} : vector<4x256xf32> to vector<4x239xf32>
    %764 = vector.extract_strided_slice %711 {offsets = [0, 0], sizes = [4, 17], strides = [1, 1]} : vector<4x256xf32> to vector<4x17xf32>
    %765 = tpu.concatenate %763, %764 in 1 : vector<4x239xf32>, vector<4x17xf32> -> vector<4x256xf32>
    %c57_331 = arith.constant 57 : index
    %c0_332 = arith.constant 0 : index
    %766 = vector.load %arg2[%c57_331, %c0_332] : memref<67x256xf32, #tpu.memory_space<vmem>>, vector<1x256xf32>
    %767 = vector.broadcast %766 : vector<1x256xf32> to vector<4x256xf32>
    %768 = arith.mulf %765, %767 : vector<4x256xf32>
    %c32_333 = arith.constant 32 : index
    %c0_334 = arith.constant 0 : index
    %769 = vector.load %arg15[%c32_333, %c0_334] : memref<288x256xf32, #tpu.memory_space<vmem>>, vector<4x256xf32>
    tpu.vector_store %arg15[%c32_333, %c0_334], %768 {strides = array<i32>} : memref<288x256xf32, #tpu.memory_space<vmem>>, vector<4x256xf32>,
    %c0_335 = arith.constant 0 : index
    %c0_336 = arith.constant 0 : index
    %770 = vector.load %arg15[%c0_335, %c0_336] : memref<288x256xf32, #tpu.memory_space<vmem>>, vector<36x256xf32>
    %c0_337 = arith.constant 0 : index
    %c0_338 = arith.constant 0 : index
    %771 = vector.load %arg8[%c0_337, %c0_338] : memref<32x36xf32, #tpu.memory_space<vmem>>, vector<32x36xf32>
    %cst_339 = arith.constant dense<0.000000e+00> : vector<32x256xf32>
    %772 = tpu.matmul %771, %770, %cst_339 {dimension_numbers = #tpu.dot_dimension_numbers<[1], [0], [0], [1], [0, 0, 1, 1], [], []>} : vector<32x36xf32>, vector<36x256xf32>, vector<32x256xf32> -> vector<32x256xf32>
    %773 = vector.broadcast %712 : vector<32x1xf32> to vector<32x256xf32>
    %774 = arith.addf %772, %773 : vector<32x256xf32>
    %c0_340 = arith.constant 0 : index
    %c0_341 = arith.constant 0 : index
    %775 = vector.load %arg9[%c0_340, %c0_341] : memref<32x16xf32, #tpu.memory_space<vmem>>, vector<32x16xf32>
    %cst_342 = arith.constant dense<0.000000e+00> : vector<32x256xf32>
    %776 = tpu.matmul %775, %585, %cst_342 {dimension_numbers = #tpu.dot_dimension_numbers<[1], [0], [0], [1], [0, 0, 1, 1], [], []>} : vector<32x16xf32>, vector<16x256xf32>, vector<32x256xf32> -> vector<32x256xf32>
    %c0_343 = arith.constant 0 : index
    %c13_344 = arith.constant 13 : index
    %777 = vector.load %arg3[%c0_343, %c13_344] : memref<32x20xf32, #tpu.memory_space<vmem>>, vector<32x1xf32>
    %778 = vector.broadcast %777 : vector<32x1xf32> to vector<32x256xf32>
    %779 = arith.addf %776, %778 : vector<32x256xf32>
    %780 = arith.addf %774, %779 : vector<32x256xf32>
    %c0_345 = arith.constant 0 : index
    %c0_346 = arith.constant 0 : index
    %781 = vector.load %arg10[%c0_345, %c0_346] : memref<256x64xf32, #tpu.memory_space<vmem>>, vector<256x64xf32>
    %cst_347 = arith.constant dense<0.000000e+00> : vector<32x64xf32>
    %782 = tpu.matmul %780, %781, %cst_347 {dimension_numbers = #tpu.dot_dimension_numbers<[1], [0], [0], [1], [0, 0, 1, 1], [], []>} : vector<32x256xf32>, vector<256x64xf32>, vector<32x64xf32> -> vector<32x64xf32>
    %c0_348 = arith.constant 0 : index
    %c14_349 = arith.constant 14 : index
    %783 = vector.load %arg3[%c0_348, %c14_349] : memref<32x20xf32, #tpu.memory_space<vmem>>, vector<32x1xf32>
    %c0_350 = arith.constant 0 : index
    %c15_351 = arith.constant 15 : index
    %784 = vector.load %arg3[%c0_350, %c15_351] : memref<32x20xf32, #tpu.memory_space<vmem>>, vector<32x1xf32>
    %785 = tpu.iota {dimensions = array<i32: 0>} : vector<8x32xi32>
    %786 = tpu.iota {dimensions = array<i32: 1>} : vector<8x32xi32>
    %c4_i32_352 = arith.constant 4 : i32
    %787 = vector.broadcast %c4_i32_352 : i32 to vector<8x32xi32>
    %788 = arith.muli %785, %787 : vector<8x32xi32>
    %789 = arith.cmpi sge, %786, %788 : vector<8x32xi32>
    %c1_i32_353 = arith.constant 1 : i32
    %790 = vector.broadcast %c1_i32_353 : i32 to vector<8x32xi32>
    %791 = arith.addi %785, %790 : vector<8x32xi32>
    %c4_i32_354 = arith.constant 4 : i32
    %792 = vector.broadcast %c4_i32_354 : i32 to vector<8x32xi32>
    %793 = arith.muli %791, %792 : vector<8x32xi32>
    %794 = arith.cmpi slt, %786, %793 : vector<8x32xi32>
    %795 = arith.andi %789, %794 : vector<8x32xi1>
    %796 = arith.extui %795 : vector<8x32xi1> to vector<8x32xi32>
    %797 = arith.sitofp %796 : vector<8x32xi32> to vector<8x32xf32>
    %798 = tpu.iota {dimensions = array<i32: 0>} : vector<32x8xi32>
    %799 = tpu.iota {dimensions = array<i32: 1>} : vector<32x8xi32>
    %c4_i32_355 = arith.constant 4 : i32
    %800 = vector.broadcast %c4_i32_355 : i32 to vector<32x8xi32>
    %801 = arith.muli %799, %800 : vector<32x8xi32>
    %802 = arith.cmpi sge, %798, %801 : vector<32x8xi32>
    %c1_i32_356 = arith.constant 1 : i32
    %803 = vector.broadcast %c1_i32_356 : i32 to vector<32x8xi32>
    %804 = arith.addi %799, %803 : vector<32x8xi32>
    %c4_i32_357 = arith.constant 4 : i32
    %805 = vector.broadcast %c4_i32_357 : i32 to vector<32x8xi32>
    %806 = arith.muli %804, %805 : vector<32x8xi32>
    %807 = arith.cmpi slt, %798, %806 : vector<32x8xi32>
    %808 = arith.andi %802, %807 : vector<32x8xi1>
    %809 = arith.extui %808 : vector<32x8xi1> to vector<32x8xi32>
    %810 = arith.sitofp %809 : vector<32x8xi32> to vector<32x8xf32>
    %cst_358 = arith.constant dense<0.000000e+00> : vector<32x32xf32>
    %811 = tpu.matmul %810, %797, %cst_358 {dimension_numbers = #tpu.dot_dimension_numbers<[1], [0], [0], [1], [0, 0, 1, 1], [], []>} : vector<32x8xf32>, vector<8x32xf32>, vector<32x32xf32> -> vector<32x32xf32>
    %cst_359 = arith.constant dense<0.000000e+00> : vector<32xf32>
    %812 = vector.multi_reduction <add>, %782, %cst_359 [1] : vector<32x64xf32> to vector<32xf32>
    %813 = vector.shape_cast %812 : vector<32xf32> to vector<32x1xf32>
    %cst_360 = arith.constant dense<0.000000e+00> : vector<32x1xf32>
    %814 = tpu.matmul %811, %813, %cst_360 {dimension_numbers = #tpu.dot_dimension_numbers<[1], [0], [0], [1], [0, 0, 1, 1], [], []>} : vector<32x32xf32>, vector<32x1xf32>, vector<32x1xf32> -> vector<32x1xf32>
    %cst_361 = arith.constant 3.906250e-03 : f32
    %815 = vector.broadcast %cst_361 : f32 to vector<32x1xf32>
    %816 = arith.mulf %814, %815 : vector<32x1xf32>
    %817 = vector.broadcast %816 : vector<32x1xf32> to vector<32x64xf32>
    %818 = arith.subf %782, %817 : vector<32x64xf32>
    %819 = arith.mulf %818, %818 : vector<32x64xf32>
    %cst_362 = arith.constant dense<0.000000e+00> : vector<32xf32>
    %820 = vector.multi_reduction <add>, %819, %cst_362 [1] : vector<32x64xf32> to vector<32xf32>
    %821 = vector.shape_cast %820 : vector<32xf32> to vector<32x1xf32>
    %cst_363 = arith.constant dense<0.000000e+00> : vector<32x1xf32>
    %822 = tpu.matmul %811, %821, %cst_363 {dimension_numbers = #tpu.dot_dimension_numbers<[1], [0], [0], [1], [0, 0, 1, 1], [], []>} : vector<32x32xf32>, vector<32x1xf32>, vector<32x1xf32> -> vector<32x1xf32>
    %cst_364 = arith.constant 3.906250e-03 : f32
    %823 = vector.broadcast %cst_364 : f32 to vector<32x1xf32>
    %824 = arith.mulf %822, %823 : vector<32x1xf32>
    %cst_365 = arith.constant 9.99999974E-6 : f32
    %825 = vector.broadcast %cst_365 : f32 to vector<32x1xf32>
    %826 = arith.addf %824, %825 : vector<32x1xf32>
    %827 = math.rsqrt %826 : vector<32x1xf32>
    %828 = vector.broadcast %827 : vector<32x1xf32> to vector<32x64xf32>
    %829 = arith.mulf %818, %828 : vector<32x64xf32>
    %830 = vector.broadcast %783 : vector<32x1xf32> to vector<32x64xf32>
    %831 = arith.mulf %829, %830 : vector<32x64xf32>
    %832 = vector.broadcast %784 : vector<32x1xf32> to vector<32x64xf32>
    %833 = arith.addf %831, %832 : vector<32x64xf32>
    %834 = arith.negf %833 : vector<32x64xf32>
    %835 = math.exp %834 : vector<32x64xf32>
    %cst_366 = arith.constant 1.000000e+00 : f32
    %836 = vector.broadcast %cst_366 : f32 to vector<32x64xf32>
    %837 = arith.addf %836, %835 : vector<32x64xf32>
    %838 = arith.divf %836, %837 : vector<32x64xf32>
    %839 = arith.mulf %833, %838 : vector<32x64xf32>
    %c0_367 = arith.constant 0 : index
    %c16_368 = arith.constant 16 : index
    %840 = vector.load %arg3[%c0_367, %c16_368] : memref<32x20xf32, #tpu.memory_space<vmem>>, vector<8x1xf32>
    %841 = vector.extract_strided_slice %839 {offsets = [0, 55], sizes = [32, 9], strides = [1, 1]} : vector<32x64xf32> to vector<32x9xf32>
    %842 = vector.extract_strided_slice %839 {offsets = [0, 0], sizes = [32, 55], strides = [1, 1]} : vector<32x64xf32> to vector<32x55xf32>
    %843 = tpu.concatenate %841, %842 in 1 : vector<32x9xf32>, vector<32x55xf32> -> vector<32x64xf32>
    %c58 = arith.constant 58 : index
    %c0_369 = arith.constant 0 : index
    %844 = vector.load %arg2[%c58, %c0_369] : memref<67x256xf32, #tpu.memory_space<vmem>>, vector<1x64xf32>
    %845 = vector.broadcast %844 : vector<1x64xf32> to vector<32x64xf32>
    %846 = arith.mulf %843, %845 : vector<32x64xf32>
    %c0_370 = arith.constant 0 : index
    %c0_371 = arith.constant 0 : index
    %847 = vector.load %arg15[%c0_370, %c0_371] : memref<288x256xf32, #tpu.memory_space<vmem>>, vector<32x64xf32>
    tpu.vector_store %arg15[%c0_370, %c0_371], %846 {strides = array<i32>} : memref<288x256xf32, #tpu.memory_space<vmem>>, vector<32x64xf32>,
    %848 = vector.extract_strided_slice %839 {offsets = [0, 56], sizes = [32, 8], strides = [1, 1]} : vector<32x64xf32> to vector<32x8xf32>
    %849 = vector.extract_strided_slice %839 {offsets = [0, 0], sizes = [32, 56], strides = [1, 1]} : vector<32x64xf32> to vector<32x56xf32>
    %850 = tpu.concatenate %848, %849 in 1 : vector<32x8xf32>, vector<32x56xf32> -> vector<32x64xf32>
    %c59 = arith.constant 59 : index
    %c0_372 = arith.constant 0 : index
    %851 = vector.load %arg2[%c59, %c0_372] : memref<67x256xf32, #tpu.memory_space<vmem>>, vector<1x64xf32>
    %852 = vector.broadcast %851 : vector<1x64xf32> to vector<32x64xf32>
    %853 = arith.mulf %850, %852 : vector<32x64xf32>
    %c32_373 = arith.constant 32 : index
    %c0_374 = arith.constant 0 : index
    %854 = vector.load %arg15[%c32_373, %c0_374] : memref<288x256xf32, #tpu.memory_space<vmem>>, vector<32x64xf32>
    tpu.vector_store %arg15[%c32_373, %c0_374], %853 {strides = array<i32>} : memref<288x256xf32, #tpu.memory_space<vmem>>, vector<32x64xf32>,
    %855 = vector.extract_strided_slice %839 {offsets = [0, 57], sizes = [32, 7], strides = [1, 1]} : vector<32x64xf32> to vector<32x7xf32>
    %856 = vector.extract_strided_slice %839 {offsets = [0, 0], sizes = [32, 57], strides = [1, 1]} : vector<32x64xf32> to vector<32x57xf32>
    %857 = tpu.concatenate %855, %856 in 1 : vector<32x7xf32>, vector<32x57xf32> -> vector<32x64xf32>
    %c60_375 = arith.constant 60 : index
    %c0_376 = arith.constant 0 : index
    %858 = vector.load %arg2[%c60_375, %c0_376] : memref<67x256xf32, #tpu.memory_space<vmem>>, vector<1x64xf32>
    %859 = vector.broadcast %858 : vector<1x64xf32> to vector<32x64xf32>
    %860 = arith.mulf %857, %859 : vector<32x64xf32>
    %c64_377 = arith.constant 64 : index
    %c0_378 = arith.constant 0 : index
    %861 = vector.load %arg15[%c64_377, %c0_378] : memref<288x256xf32, #tpu.memory_space<vmem>>, vector<32x64xf32>
    tpu.vector_store %arg15[%c64_377, %c0_378], %860 {strides = array<i32>} : memref<288x256xf32, #tpu.memory_space<vmem>>, vector<32x64xf32>,
    %862 = vector.extract_strided_slice %839 {offsets = [0, 63], sizes = [32, 1], strides = [1, 1]} : vector<32x64xf32> to vector<32x1xf32>
    %863 = vector.extract_strided_slice %839 {offsets = [0, 0], sizes = [32, 63], strides = [1, 1]} : vector<32x64xf32> to vector<32x63xf32>
    %864 = tpu.concatenate %862, %863 in 1 : vector<32x1xf32>, vector<32x63xf32> -> vector<32x64xf32>
    %c61 = arith.constant 61 : index
    %c0_379 = arith.constant 0 : index
    %865 = vector.load %arg2[%c61, %c0_379] : memref<67x256xf32, #tpu.memory_space<vmem>>, vector<1x64xf32>
    %866 = vector.broadcast %865 : vector<1x64xf32> to vector<32x64xf32>
    %867 = arith.mulf %864, %866 : vector<32x64xf32>
    %c96_380 = arith.constant 96 : index
    %c0_381 = arith.constant 0 : index
    %868 = vector.load %arg15[%c96_380, %c0_381] : memref<288x256xf32, #tpu.memory_space<vmem>>, vector<32x64xf32>
    tpu.vector_store %arg15[%c96_380, %c0_381], %867 {strides = array<i32>} : memref<288x256xf32, #tpu.memory_space<vmem>>, vector<32x64xf32>,
    %c128_382 = arith.constant 128 : index
    %c0_383 = arith.constant 0 : index
    %869 = vector.load %arg15[%c128_382, %c0_383] : memref<288x256xf32, #tpu.memory_space<vmem>>, vector<32x64xf32>
    tpu.vector_store %arg15[%c128_382, %c0_383], %839 {strides = array<i32>} : memref<288x256xf32, #tpu.memory_space<vmem>>, vector<32x64xf32>,
    %870 = vector.extract_strided_slice %839 {offsets = [0, 1], sizes = [32, 63], strides = [1, 1]} : vector<32x64xf32> to vector<32x63xf32>
    %871 = vector.extract_strided_slice %839 {offsets = [0, 0], sizes = [32, 1], strides = [1, 1]} : vector<32x64xf32> to vector<32x1xf32>
    %872 = tpu.concatenate %870, %871 in 1 : vector<32x63xf32>, vector<32x1xf32> -> vector<32x64xf32>
    %c63_384 = arith.constant 63 : index
    %c0_385 = arith.constant 0 : index
    %873 = vector.load %arg2[%c63_384, %c0_385] : memref<67x256xf32, #tpu.memory_space<vmem>>, vector<1x64xf32>
    %874 = vector.broadcast %873 : vector<1x64xf32> to vector<32x64xf32>
    %875 = arith.mulf %872, %874 : vector<32x64xf32>
    %c160 = arith.constant 160 : index
    %c0_386 = arith.constant 0 : index
    %876 = vector.load %arg15[%c160, %c0_386] : memref<288x256xf32, #tpu.memory_space<vmem>>, vector<32x64xf32>
    tpu.vector_store %arg15[%c160, %c0_386], %875 {strides = array<i32>} : memref<288x256xf32, #tpu.memory_space<vmem>>, vector<32x64xf32>,
    %877 = vector.extract_strided_slice %839 {offsets = [0, 7], sizes = [32, 57], strides = [1, 1]} : vector<32x64xf32> to vector<32x57xf32>
    %878 = vector.extract_strided_slice %839 {offsets = [0, 0], sizes = [32, 7], strides = [1, 1]} : vector<32x64xf32> to vector<32x7xf32>
    %879 = tpu.concatenate %877, %878 in 1 : vector<32x57xf32>, vector<32x7xf32> -> vector<32x64xf32>
    %c64_387 = arith.constant 64 : index
    %c0_388 = arith.constant 0 : index
    %880 = vector.load %arg2[%c64_387, %c0_388] : memref<67x256xf32, #tpu.memory_space<vmem>>, vector<1x64xf32>
    %881 = vector.broadcast %880 : vector<1x64xf32> to vector<32x64xf32>
    %882 = arith.mulf %879, %881 : vector<32x64xf32>
    %c192 = arith.constant 192 : index
    %c0_389 = arith.constant 0 : index
    %883 = vector.load %arg15[%c192, %c0_389] : memref<288x256xf32, #tpu.memory_space<vmem>>, vector<32x64xf32>
    tpu.vector_store %arg15[%c192, %c0_389], %882 {strides = array<i32>} : memref<288x256xf32, #tpu.memory_space<vmem>>, vector<32x64xf32>,
    %884 = vector.extract_strided_slice %839 {offsets = [0, 8], sizes = [32, 56], strides = [1, 1]} : vector<32x64xf32> to vector<32x56xf32>
    %885 = vector.extract_strided_slice %839 {offsets = [0, 0], sizes = [32, 8], strides = [1, 1]} : vector<32x64xf32> to vector<32x8xf32>
    %886 = tpu.concatenate %884, %885 in 1 : vector<32x56xf32>, vector<32x8xf32> -> vector<32x64xf32>
    %c65 = arith.constant 65 : index
    %c0_390 = arith.constant 0 : index
    %887 = vector.load %arg2[%c65, %c0_390] : memref<67x256xf32, #tpu.memory_space<vmem>>, vector<1x64xf32>
    %888 = vector.broadcast %887 : vector<1x64xf32> to vector<32x64xf32>
    %889 = arith.mulf %886, %888 : vector<32x64xf32>
    %c224 = arith.constant 224 : index
    %c0_391 = arith.constant 0 : index
    %890 = vector.load %arg15[%c224, %c0_391] : memref<288x256xf32, #tpu.memory_space<vmem>>, vector<32x64xf32>
    tpu.vector_store %arg15[%c224, %c0_391], %889 {strides = array<i32>} : memref<288x256xf32, #tpu.memory_space<vmem>>, vector<32x64xf32>,
    %891 = vector.extract_strided_slice %839 {offsets = [0, 9], sizes = [32, 55], strides = [1, 1]} : vector<32x64xf32> to vector<32x55xf32>
    %892 = vector.extract_strided_slice %839 {offsets = [0, 0], sizes = [32, 9], strides = [1, 1]} : vector<32x64xf32> to vector<32x9xf32>
    %893 = tpu.concatenate %891, %892 in 1 : vector<32x55xf32>, vector<32x9xf32> -> vector<32x64xf32>
    %c66_392 = arith.constant 66 : index
    %c0_393 = arith.constant 0 : index
    %894 = vector.load %arg2[%c66_392, %c0_393] : memref<67x256xf32, #tpu.memory_space<vmem>>, vector<1x64xf32>
    %895 = vector.broadcast %894 : vector<1x64xf32> to vector<32x64xf32>
    %896 = arith.mulf %893, %895 : vector<32x64xf32>
    %c256 = arith.constant 256 : index
    %c0_394 = arith.constant 0 : index
    %897 = vector.load %arg15[%c256, %c0_394] : memref<288x256xf32, #tpu.memory_space<vmem>>, vector<32x64xf32>
    tpu.vector_store %arg15[%c256, %c0_394], %896 {strides = array<i32>} : memref<288x256xf32, #tpu.memory_space<vmem>>, vector<32x64xf32>,
    %c0_395 = arith.constant 0 : index
    %c0_396 = arith.constant 0 : index
    %898 = vector.load %arg15[%c0_395, %c0_396] : memref<288x256xf32, #tpu.memory_space<vmem>>, vector<288x64xf32>
    %c0_397 = arith.constant 0 : index
    %c0_398 = arith.constant 0 : index
    %899 = vector.load %arg11[%c0_397, %c0_398] : memref<8x288xf32, #tpu.memory_space<vmem>>, vector<8x288xf32>
    %cst_399 = arith.constant dense<0.000000e+00> : vector<8x64xf32>
    %900 = tpu.matmul %899, %898, %cst_399 {dimension_numbers = #tpu.dot_dimension_numbers<[1], [0], [0], [1], [0, 0, 1, 1], [], []>} : vector<8x288xf32>, vector<288x64xf32>, vector<8x64xf32> -> vector<8x64xf32>
    %901 = vector.broadcast %840 : vector<8x1xf32> to vector<8x64xf32>
    %902 = arith.addf %900, %901 : vector<8x64xf32>
    %c0_400 = arith.constant 0 : index
    %c17_401 = arith.constant 17 : index
    %903 = vector.load %arg3[%c0_400, %c17_401] : memref<32x20xf32, #tpu.memory_space<vmem>>, vector<8x1xf32>
    %c0_402 = arith.constant 0 : index
    %c18_403 = arith.constant 18 : index
    %904 = vector.load %arg3[%c0_402, %c18_403] : memref<32x20xf32, #tpu.memory_space<vmem>>, vector<8x1xf32>
    %905 = tpu.iota {dimensions = array<i32: 0>} : vector<2x8xi32>
    %906 = tpu.iota {dimensions = array<i32: 1>} : vector<2x8xi32>
    %c4_i32_404 = arith.constant 4 : i32
    %907 = vector.broadcast %c4_i32_404 : i32 to vector<2x8xi32>
    %908 = arith.muli %905, %907 : vector<2x8xi32>
    %909 = arith.cmpi sge, %906, %908 : vector<2x8xi32>
    %c1_i32_405 = arith.constant 1 : i32
    %910 = vector.broadcast %c1_i32_405 : i32 to vector<2x8xi32>
    %911 = arith.addi %905, %910 : vector<2x8xi32>
    %c4_i32_406 = arith.constant 4 : i32
    %912 = vector.broadcast %c4_i32_406 : i32 to vector<2x8xi32>
    %913 = arith.muli %911, %912 : vector<2x8xi32>
    %914 = arith.cmpi slt, %906, %913 : vector<2x8xi32>
    %915 = arith.andi %909, %914 : vector<2x8xi1>
    %916 = arith.extui %915 : vector<2x8xi1> to vector<2x8xi32>
    %917 = arith.sitofp %916 : vector<2x8xi32> to vector<2x8xf32>
    %918 = tpu.iota {dimensions = array<i32: 0>} : vector<8x2xi32>
    %919 = tpu.iota {dimensions = array<i32: 1>} : vector<8x2xi32>
    %c4_i32_407 = arith.constant 4 : i32
    %920 = vector.broadcast %c4_i32_407 : i32 to vector<8x2xi32>
    %921 = arith.muli %919, %920 : vector<8x2xi32>
    %922 = arith.cmpi sge, %918, %921 : vector<8x2xi32>
    %c1_i32_408 = arith.constant 1 : i32
    %923 = vector.broadcast %c1_i32_408 : i32 to vector<8x2xi32>
    %924 = arith.addi %919, %923 : vector<8x2xi32>
    %c4_i32_409 = arith.constant 4 : i32
    %925 = vector.broadcast %c4_i32_409 : i32 to vector<8x2xi32>
    %926 = arith.muli %924, %925 : vector<8x2xi32>
    %927 = arith.cmpi slt, %918, %926 : vector<8x2xi32>
    %928 = arith.andi %922, %927 : vector<8x2xi1>
    %929 = arith.extui %928 : vector<8x2xi1> to vector<8x2xi32>
    %930 = arith.sitofp %929 : vector<8x2xi32> to vector<8x2xf32>
    %cst_410 = arith.constant dense<0.000000e+00> : vector<8x8xf32>
    %931 = tpu.matmul %930, %917, %cst_410 {dimension_numbers = #tpu.dot_dimension_numbers<[1], [0], [0], [1], [0, 0, 1, 1], [], []>} : vector<8x2xf32>, vector<2x8xf32>, vector<8x8xf32> -> vector<8x8xf32>
    %cst_411 = arith.constant dense<0.000000e+00> : vector<8xf32>
    %932 = vector.multi_reduction <add>, %902, %cst_411 [1] : vector<8x64xf32> to vector<8xf32>
    %933 = vector.shape_cast %932 : vector<8xf32> to vector<8x1xf32>
    %cst_412 = arith.constant dense<0.000000e+00> : vector<8x1xf32>
    %934 = tpu.matmul %931, %933, %cst_412 {dimension_numbers = #tpu.dot_dimension_numbers<[1], [0], [0], [1], [0, 0, 1, 1], [], []>} : vector<8x8xf32>, vector<8x1xf32>, vector<8x1xf32> -> vector<8x1xf32>
    %cst_413 = arith.constant 3.906250e-03 : f32
    %935 = vector.broadcast %cst_413 : f32 to vector<8x1xf32>
    %936 = arith.mulf %934, %935 : vector<8x1xf32>
    %937 = vector.broadcast %936 : vector<8x1xf32> to vector<8x64xf32>
    %938 = arith.subf %902, %937 : vector<8x64xf32>
    %939 = arith.mulf %938, %938 : vector<8x64xf32>
    %cst_414 = arith.constant dense<0.000000e+00> : vector<8xf32>
    %940 = vector.multi_reduction <add>, %939, %cst_414 [1] : vector<8x64xf32> to vector<8xf32>
    %941 = vector.shape_cast %940 : vector<8xf32> to vector<8x1xf32>
    %cst_415 = arith.constant dense<0.000000e+00> : vector<8x1xf32>
    %942 = tpu.matmul %931, %941, %cst_415 {dimension_numbers = #tpu.dot_dimension_numbers<[1], [0], [0], [1], [0, 0, 1, 1], [], []>} : vector<8x8xf32>, vector<8x1xf32>, vector<8x1xf32> -> vector<8x1xf32>
    %cst_416 = arith.constant 3.906250e-03 : f32
    %943 = vector.broadcast %cst_416 : f32 to vector<8x1xf32>
    %944 = arith.mulf %942, %943 : vector<8x1xf32>
    %cst_417 = arith.constant 9.99999974E-6 : f32
    %945 = vector.broadcast %cst_417 : f32 to vector<8x1xf32>
    %946 = arith.addf %944, %945 : vector<8x1xf32>
    %947 = math.rsqrt %946 : vector<8x1xf32>
    %948 = vector.broadcast %947 : vector<8x1xf32> to vector<8x64xf32>
    %949 = arith.mulf %938, %948 : vector<8x64xf32>
    %950 = vector.broadcast %903 : vector<8x1xf32> to vector<8x64xf32>
    %951 = arith.mulf %949, %950 : vector<8x64xf32>
    %952 = vector.broadcast %904 : vector<8x1xf32> to vector<8x64xf32>
    %953 = arith.addf %951, %952 : vector<8x64xf32>
    %954 = arith.negf %953 : vector<8x64xf32>
    %955 = math.exp %954 : vector<8x64xf32>
    %cst_418 = arith.constant 1.000000e+00 : f32
    %956 = vector.broadcast %cst_418 : f32 to vector<8x64xf32>
    %957 = arith.addf %956, %955 : vector<8x64xf32>
    %958 = arith.divf %956, %957 : vector<8x64xf32>
    %959 = arith.mulf %953, %958 : vector<8x64xf32>
    %c0_419 = arith.constant 0 : index
    %c19_420 = arith.constant 19 : index
    %960 = vector.load %arg3[%c0_419, %c19_420] : memref<32x20xf32, #tpu.memory_space<vmem>>, vector<32x1xf32>
    %961 = vector.extract_strided_slice %959 {offsets = [0, 55], sizes = [8, 9], strides = [1, 1]} : vector<8x64xf32> to vector<8x9xf32>
    %962 = vector.extract_strided_slice %959 {offsets = [0, 0], sizes = [8, 55], strides = [1, 1]} : vector<8x64xf32> to vector<8x55xf32>
    %963 = tpu.concatenate %961, %962 in 1 : vector<8x9xf32>, vector<8x55xf32> -> vector<8x64xf32>
    %c58_421 = arith.constant 58 : index
    %c0_422 = arith.constant 0 : index
    %964 = vector.load %arg2[%c58_421, %c0_422] : memref<67x256xf32, #tpu.memory_space<vmem>>, vector<1x64xf32>
    %965 = vector.broadcast %964 : vector<1x64xf32> to vector<8x64xf32>
    %966 = arith.mulf %963, %965 : vector<8x64xf32>
    %c0_423 = arith.constant 0 : index
    %c0_424 = arith.constant 0 : index
    %967 = vector.load %arg15[%c0_423, %c0_424] : memref<288x256xf32, #tpu.memory_space<vmem>>, vector<8x64xf32>
    tpu.vector_store %arg15[%c0_423, %c0_424], %966 {strides = array<i32>} : memref<288x256xf32, #tpu.memory_space<vmem>>, vector<8x64xf32>,
    %968 = vector.extract_strided_slice %959 {offsets = [0, 56], sizes = [8, 8], strides = [1, 1]} : vector<8x64xf32> to vector<8x8xf32>
    %969 = vector.extract_strided_slice %959 {offsets = [0, 0], sizes = [8, 56], strides = [1, 1]} : vector<8x64xf32> to vector<8x56xf32>
    %970 = tpu.concatenate %968, %969 in 1 : vector<8x8xf32>, vector<8x56xf32> -> vector<8x64xf32>
    %c59_425 = arith.constant 59 : index
    %c0_426 = arith.constant 0 : index
    %971 = vector.load %arg2[%c59_425, %c0_426] : memref<67x256xf32, #tpu.memory_space<vmem>>, vector<1x64xf32>
    %972 = vector.broadcast %971 : vector<1x64xf32> to vector<8x64xf32>
    %973 = arith.mulf %970, %972 : vector<8x64xf32>
    %c8_427 = arith.constant 8 : index
    %c0_428 = arith.constant 0 : index
    %974 = vector.load %arg15[%c8_427, %c0_428] : memref<288x256xf32, #tpu.memory_space<vmem>>, vector<8x64xf32>
    tpu.vector_store %arg15[%c8_427, %c0_428], %973 {strides = array<i32>} : memref<288x256xf32, #tpu.memory_space<vmem>>, vector<8x64xf32>,
    %975 = vector.extract_strided_slice %959 {offsets = [0, 57], sizes = [8, 7], strides = [1, 1]} : vector<8x64xf32> to vector<8x7xf32>
    %976 = vector.extract_strided_slice %959 {offsets = [0, 0], sizes = [8, 57], strides = [1, 1]} : vector<8x64xf32> to vector<8x57xf32>
    %977 = tpu.concatenate %975, %976 in 1 : vector<8x7xf32>, vector<8x57xf32> -> vector<8x64xf32>
    %c60_429 = arith.constant 60 : index
    %c0_430 = arith.constant 0 : index
    %978 = vector.load %arg2[%c60_429, %c0_430] : memref<67x256xf32, #tpu.memory_space<vmem>>, vector<1x64xf32>
    %979 = vector.broadcast %978 : vector<1x64xf32> to vector<8x64xf32>
    %980 = arith.mulf %977, %979 : vector<8x64xf32>
    %c16_431 = arith.constant 16 : index
    %c0_432 = arith.constant 0 : index
    %981 = vector.load %arg15[%c16_431, %c0_432] : memref<288x256xf32, #tpu.memory_space<vmem>>, vector<8x64xf32>
    tpu.vector_store %arg15[%c16_431, %c0_432], %980 {strides = array<i32>} : memref<288x256xf32, #tpu.memory_space<vmem>>, vector<8x64xf32>,
    %982 = vector.extract_strided_slice %959 {offsets = [0, 63], sizes = [8, 1], strides = [1, 1]} : vector<8x64xf32> to vector<8x1xf32>
    %983 = vector.extract_strided_slice %959 {offsets = [0, 0], sizes = [8, 63], strides = [1, 1]} : vector<8x64xf32> to vector<8x63xf32>
    %984 = tpu.concatenate %982, %983 in 1 : vector<8x1xf32>, vector<8x63xf32> -> vector<8x64xf32>
    %c61_433 = arith.constant 61 : index
    %c0_434 = arith.constant 0 : index
    %985 = vector.load %arg2[%c61_433, %c0_434] : memref<67x256xf32, #tpu.memory_space<vmem>>, vector<1x64xf32>
    %986 = vector.broadcast %985 : vector<1x64xf32> to vector<8x64xf32>
    %987 = arith.mulf %984, %986 : vector<8x64xf32>
    %c24_435 = arith.constant 24 : index
    %c0_436 = arith.constant 0 : index
    %988 = vector.load %arg15[%c24_435, %c0_436] : memref<288x256xf32, #tpu.memory_space<vmem>>, vector<8x64xf32>
    tpu.vector_store %arg15[%c24_435, %c0_436], %987 {strides = array<i32>} : memref<288x256xf32, #tpu.memory_space<vmem>>, vector<8x64xf32>,
    %c32_437 = arith.constant 32 : index
    %c0_438 = arith.constant 0 : index
    %989 = vector.load %arg15[%c32_437, %c0_438] : memref<288x256xf32, #tpu.memory_space<vmem>>, vector<8x64xf32>
    tpu.vector_store %arg15[%c32_437, %c0_438], %959 {strides = array<i32>} : memref<288x256xf32, #tpu.memory_space<vmem>>, vector<8x64xf32>,
    %990 = vector.extract_strided_slice %959 {offsets = [0, 1], sizes = [8, 63], strides = [1, 1]} : vector<8x64xf32> to vector<8x63xf32>
    %991 = vector.extract_strided_slice %959 {offsets = [0, 0], sizes = [8, 1], strides = [1, 1]} : vector<8x64xf32> to vector<8x1xf32>
    %992 = tpu.concatenate %990, %991 in 1 : vector<8x63xf32>, vector<8x1xf32> -> vector<8x64xf32>
    %c63_439 = arith.constant 63 : index
    %c0_440 = arith.constant 0 : index
    %993 = vector.load %arg2[%c63_439, %c0_440] : memref<67x256xf32, #tpu.memory_space<vmem>>, vector<1x64xf32>
    %994 = vector.broadcast %993 : vector<1x64xf32> to vector<8x64xf32>
    %995 = arith.mulf %992, %994 : vector<8x64xf32>
    %c40_441 = arith.constant 40 : index
    %c0_442 = arith.constant 0 : index
    %996 = vector.load %arg15[%c40_441, %c0_442] : memref<288x256xf32, #tpu.memory_space<vmem>>, vector<8x64xf32>
    tpu.vector_store %arg15[%c40_441, %c0_442], %995 {strides = array<i32>} : memref<288x256xf32, #tpu.memory_space<vmem>>, vector<8x64xf32>,
    %997 = vector.extract_strided_slice %959 {offsets = [0, 7], sizes = [8, 57], strides = [1, 1]} : vector<8x64xf32> to vector<8x57xf32>
    %998 = vector.extract_strided_slice %959 {offsets = [0, 0], sizes = [8, 7], strides = [1, 1]} : vector<8x64xf32> to vector<8x7xf32>
    %999 = tpu.concatenate %997, %998 in 1 : vector<8x57xf32>, vector<8x7xf32> -> vector<8x64xf32>
    %c64_443 = arith.constant 64 : index
    %c0_444 = arith.constant 0 : index
    %1000 = vector.load %arg2[%c64_443, %c0_444] : memref<67x256xf32, #tpu.memory_space<vmem>>, vector<1x64xf32>
    %1001 = vector.broadcast %1000 : vector<1x64xf32> to vector<8x64xf32>
    %1002 = arith.mulf %999, %1001 : vector<8x64xf32>
    %c48_445 = arith.constant 48 : index
    %c0_446 = arith.constant 0 : index
    %1003 = vector.load %arg15[%c48_445, %c0_446] : memref<288x256xf32, #tpu.memory_space<vmem>>, vector<8x64xf32>
    tpu.vector_store %arg15[%c48_445, %c0_446], %1002 {strides = array<i32>} : memref<288x256xf32, #tpu.memory_space<vmem>>, vector<8x64xf32>,
    %1004 = vector.extract_strided_slice %959 {offsets = [0, 8], sizes = [8, 56], strides = [1, 1]} : vector<8x64xf32> to vector<8x56xf32>
    %1005 = vector.extract_strided_slice %959 {offsets = [0, 0], sizes = [8, 8], strides = [1, 1]} : vector<8x64xf32> to vector<8x8xf32>
    %1006 = tpu.concatenate %1004, %1005 in 1 : vector<8x56xf32>, vector<8x8xf32> -> vector<8x64xf32>
    %c65_447 = arith.constant 65 : index
    %c0_448 = arith.constant 0 : index
    %1007 = vector.load %arg2[%c65_447, %c0_448] : memref<67x256xf32, #tpu.memory_space<vmem>>, vector<1x64xf32>
    %1008 = vector.broadcast %1007 : vector<1x64xf32> to vector<8x64xf32>
    %1009 = arith.mulf %1006, %1008 : vector<8x64xf32>
    %c56_449 = arith.constant 56 : index
    %c0_450 = arith.constant 0 : index
    %1010 = vector.load %arg15[%c56_449, %c0_450] : memref<288x256xf32, #tpu.memory_space<vmem>>, vector<8x64xf32>
    tpu.vector_store %arg15[%c56_449, %c0_450], %1009 {strides = array<i32>} : memref<288x256xf32, #tpu.memory_space<vmem>>, vector<8x64xf32>,
    %1011 = vector.extract_strided_slice %959 {offsets = [0, 9], sizes = [8, 55], strides = [1, 1]} : vector<8x64xf32> to vector<8x55xf32>
    %1012 = vector.extract_strided_slice %959 {offsets = [0, 0], sizes = [8, 9], strides = [1, 1]} : vector<8x64xf32> to vector<8x9xf32>
    %1013 = tpu.concatenate %1011, %1012 in 1 : vector<8x55xf32>, vector<8x9xf32> -> vector<8x64xf32>
    %c66_451 = arith.constant 66 : index
    %c0_452 = arith.constant 0 : index
    %1014 = vector.load %arg2[%c66_451, %c0_452] : memref<67x256xf32, #tpu.memory_space<vmem>>, vector<1x64xf32>
    %1015 = vector.broadcast %1014 : vector<1x64xf32> to vector<8x64xf32>
    %1016 = arith.mulf %1013, %1015 : vector<8x64xf32>
    %c64_453 = arith.constant 64 : index
    %c0_454 = arith.constant 0 : index
    %1017 = vector.load %arg15[%c64_453, %c0_454] : memref<288x256xf32, #tpu.memory_space<vmem>>, vector<8x64xf32>
    tpu.vector_store %arg15[%c64_453, %c0_454], %1016 {strides = array<i32>} : memref<288x256xf32, #tpu.memory_space<vmem>>, vector<8x64xf32>,
    %c0_455 = arith.constant 0 : index
    %c0_456 = arith.constant 0 : index
    %1018 = vector.load %arg15[%c0_455, %c0_456] : memref<288x256xf32, #tpu.memory_space<vmem>>, vector<72x64xf32>
    %c0_457 = arith.constant 0 : index
    %c0_458 = arith.constant 0 : index
    %1019 = vector.load %arg12[%c0_457, %c0_458] : memref<32x72xf32, #tpu.memory_space<vmem>>, vector<32x72xf32>
    %cst_459 = arith.constant dense<0.000000e+00> : vector<32x64xf32>
    %1020 = tpu.matmul %1019, %1018, %cst_459 {dimension_numbers = #tpu.dot_dimension_numbers<[1], [0], [0], [1], [0, 0, 1, 1], [], []>} : vector<32x72xf32>, vector<72x64xf32>, vector<32x64xf32> -> vector<32x64xf32>
    %1021 = vector.broadcast %960 : vector<32x1xf32> to vector<32x64xf32>
    %1022 = arith.addf %1020, %1021 : vector<32x64xf32>
    %1023 = arith.addf %1022, %782 : vector<32x64xf32>
    %c0_460 = arith.constant 0 : index
    %c0_461 = arith.constant 0 : index
    %c0_462 = arith.constant 0 : index
    %1024 = vector.load %arg14[%c0_460, %c0_461, %c0_462] : memref<1x32x64xf32, #tpu.memory_space<vmem>>, vector<1x32x64xf32>
    %1025 = vector.shape_cast %1024 : vector<1x32x64xf32> to vector<32x64xf32>
    %1026 = vector.shape_cast %1023 : vector<32x64xf32> to vector<1x32x64xf32>
    tpu.vector_store %arg14[%c0_460, %c0_461, %c0_462], %1026 {strides = array<i32>} : memref<1x32x64xf32, #tpu.memory_space<vmem>>, vector<1x32x64xf32>,
    return
  }
  func.func @transform_0(%arg0: i32) -> (i32, i32, i32) {
    %c0_i32 = arith.constant 0 : i32
    %c0_i32_0 = arith.constant 0 : i32
    %c0_i32_1 = arith.constant 0 : i32
    return %arg0, %c0_i32, %c0_i32_0 : i32, i32, i32
  }
  func.func @transform_1(%arg0: i32) -> (i32, i32) {
    %c0_i32 = arith.constant 0 : i32
    %c0_i32_0 = arith.constant 0 : i32
    %c0_i32_1 = arith.constant 0 : i32
    return %c0_i32, %c0_i32_0 : i32, i32
  }
  func.func @transform_2(%arg0: i32) -> (i32, i32) {
    %c0_i32 = arith.constant 0 : i32
    %c0_i32_0 = arith.constant 0 : i32
    %c0_i32_1 = arith.constant 0 : i32
    return %c0_i32, %c0_i32_0 : i32, i32
  }
  func.func @transform_3(%arg0: i32) -> (i32, i32) {
    %c0_i32 = arith.constant 0 : i32
    %c0_i32_0 = arith.constant 0 : i32
    %c0_i32_1 = arith.constant 0 : i32
    return %c0_i32, %c0_i32_0 : i32, i32
  }
  func.func @transform_4(%arg0: i32) -> (i32, i32) {
    %c0_i32 = arith.constant 0 : i32
    %c0_i32_0 = arith.constant 0 : i32
    %c0_i32_1 = arith.constant 0 : i32
    return %c0_i32, %c0_i32_0 : i32, i32
  }
  func.func @transform_5(%arg0: i32) -> (i32, i32) {
    %c0_i32 = arith.constant 0 : i32
    %c0_i32_0 = arith.constant 0 : i32
    %c0_i32_1 = arith.constant 0 : i32
    return %c0_i32, %c0_i32_0 : i32, i32
  }
  func.func @transform_6(%arg0: i32) -> (i32, i32) {
    %c0_i32 = arith.constant 0 : i32
    %c0_i32_0 = arith.constant 0 : i32
    %c0_i32_1 = arith.constant 0 : i32
    return %c0_i32, %c0_i32_0 : i32, i32
  }
  func.func @transform_7(%arg0: i32) -> (i32, i32) {
    %c0_i32 = arith.constant 0 : i32
    %c0_i32_0 = arith.constant 0 : i32
    %c0_i32_1 = arith.constant 0 : i32
    return %c0_i32, %c0_i32_0 : i32, i32
  }
  func.func @transform_8(%arg0: i32) -> (i32, i32) {
    %c0_i32 = arith.constant 0 : i32
    %c0_i32_0 = arith.constant 0 : i32
    %c0_i32_1 = arith.constant 0 : i32
    return %c0_i32, %c0_i32_0 : i32, i32
  }
  func.func @transform_9(%arg0: i32) -> (i32, i32) {
    %c0_i32 = arith.constant 0 : i32
    %c0_i32_0 = arith.constant 0 : i32
    %c0_i32_1 = arith.constant 0 : i32
    return %c0_i32, %c0_i32_0 : i32, i32
  }
  func.func @transform_10(%arg0: i32) -> (i32, i32) {
    %c0_i32 = arith.constant 0 : i32
    %c0_i32_0 = arith.constant 0 : i32
    %c0_i32_1 = arith.constant 0 : i32
    return %c0_i32, %c0_i32_0 : i32, i32
  }
  func.func @transform_11(%arg0: i32) -> (i32, i32) {
    %c0_i32 = arith.constant 0 : i32
    %c0_i32_0 = arith.constant 0 : i32
    %c0_i32_1 = arith.constant 0 : i32
    return %c0_i32, %c0_i32_0 : i32, i32
  }
  func.func @transform_12(%arg0: i32) -> (i32, i32, i32) {
    %c0_i32 = arith.constant 0 : i32
    %c0_i32_0 = arith.constant 0 : i32
    %c0_i32_1 = arith.constant 0 : i32
    return %arg0, %c0_i32, %c0_i32_0 : i32, i32, i32
  }
  func.func @transform_13(%arg0: i32) -> (i32, i32, i32) {
    %c0_i32 = arith.constant 0 : i32
    %c0_i32_0 = arith.constant 0 : i32
    %c0_i32_1 = arith.constant 0 : i32
    return %arg0, %c0_i32, %c0_i32_0 : i32, i32, i32
  }
}

</mosaic_0001>

<bundles_post_ra>
// kernel: tpu_custom_call.1
= control target key start
LH: loop header
LB: loop body
LE: loop exit
PB: predicated region body
PF: predicated region fallthrough
CT: control target
= control target key end

     0   :  { %s9777_s0 = inlined_call_operand.vmem [shape: f32[2,3,256], index: 0, kind: input, shape index: {}]   ;;  %s9778_s1 = inlined_call_operand.vmem [shape: f32[67,256], index: 1, kind: input, shape index: {}]   ;;  %s9779_s2 = inlined_call_operand.vmem [shape: f32[32,20], index: 2, kind: input, shape index: {}]   ;;  %s9780_s3 = inlined_call_operand.vmem [shape: f32[16,147], index: 3, kind: input, shape index: {}]   ;;  %s9781_s4 = inlined_call_operand.vmem [shape: f32[4,144], index: 4, kind: input, shape index: {}]   ;;  %s9782_s5 = inlined_call_operand.vmem [shape: f32[16,36], index: 5, kind: input, shape index: {}]   ;;  %s9783_s6 = inlined_call_operand.vmem [shape: f32[4,144], index: 6, kind: input, shape index: {}]   ;;  %s9784_s7 = inlined_call_operand.vmem [shape: f32[32,36], index: 7, kind: input, shape index: {}]   ;;  %s9785_s8 = inlined_call_operand.vmem [shape: f32[32,16], index: 8, kind: input, shape index: {}]   ;;  %s9786_s9 = inlined_call_operand.vmem [shape: f32[256,64], index: 9, kind: input, shape index: {}]   ;;  %s9787_s10 = inlined_call_operand.vmem [shape: f32[8,288], index: 10, kind: input, shape index: {}]   ;;  %s9788_s11 = inlined_call_operand.vmem [shape: f32[32,72], index: 11, kind: input, shape index: {}]   ;;  %s9789_s12 = inlined_call_operand.hbm [shape: f32[2,16,256], index: 12, kind: output, shape index: {0}]   ;;  %s9790_s13 = inlined_call_operand.hbm [shape: f32[2,32,64], index: 13, kind: output, shape index: {1}]  }
   0x1   :  { %9843 = sst [smem:[#allocation15_spill]] %s9777_s0 }
   0x2   :  { %9844 = sst [smem:[#allocation16_spill]] %s9780_s3 }
   0x3   :  { %9845 = sst [smem:[#allocation17_spill]] %s9781_s4 }
   0x4   :  { %9846 = sst [smem:[#allocation18_spill]] %s9782_s5 }
   0x5   :  { %9847 = sst [smem:[#allocation19_spill]] %s9783_s6 }
   0x6   :  { %9848 = sst [smem:[#allocation20_spill]] %s9784_s7 }
   0x7   :  { %9849 = sst [smem:[#allocation21_spill]] %s9785_s8 }
   0x8   :  { %9850 = sst [smem:[#allocation22_spill]] %s9786_s9 }
   0x9   :  { %19 = vsyncpa [#allocation4], 0 }
   0xa   :  { %21 = vsyncpa [#allocation4 + $0x1], 0 }
   0xb   :  { %22 = vsyncpa [#allocation6], 0 }
   0xc   :  { %24 = vsyncpa [#allocation6 + $0x1], 0  ;;  %s7706_s25 = smov 0   ;;  %s7708_s26 = smov 0  }
   0xd   :  { %s7710_s27 = smov 0   ;;  %s7712_s28 = smov 0  }
   0xe LB: > { %9851 = sst [smem:[#allocation9_spill]] %s7533_s25  ;;  %s7727_s29 = sadd.s32 4294967295, %s7545_s28   ;;  %s7545_s28 = sphi %s7712_s28, %s9904_s28   ;;  %s7541_s27 = sphi %s7710_s27, %s9907_s27   ;;  %s7537_s26 = sphi %s7708_s26, %s9906_s26   ;;  %s7533_s25 = sphi %s7706_s25, %s9905_s25  }
   0xf   : > { %9852 = sst [smem:[#allocation10_spill]] %s7537_s26  ;;  %s6699_s30 = sadd.s32 4294967294, %s7545_s28  }
  0x10   : > { %9853 = sst [smem:[#allocation11_spill]] %s7541_s27  ;;  %s7731_s14 = sadd.s32 1, %s7545_s28  }
  0x11   : > { %9854 = sst [smem:[#allocation12_spill]] %s7731_s14  ;;  %s294_s15 = sadd.s32 1, %s7541_s27 }
  0x12   : > { %s291_s16 = ssub.s32 %s7545_s28, %s7731_s14  ;;  %p304_p0 = scmp.ne.s32.totalorder %s7541_s27, %s7537_s26 }
  0x13   : > { %p292_p1 = scmp.eq.s32.totalorder %s291_s16, 0  ;;  %p305_p2 = scmp.eq.s32.totalorder %s7727_s29, 1 }
  0x14   : > { %p310_p3 = scmp.ne.s32.totalorder %s7537_s26, %s7533_s25  ;;  %p311_p4 = scmp.eq.s32.totalorder %s6699_s30, 1 }
  0x15   : > { %s7742_s17 = scalar_select %p292_p1, %s7541_s27, %s294_s15  }
  0x16   : > { %p7744_p5 = por %p305_p2, %p304_p0  ;;  %p7748_p6 = por %p311_p4, %p310_p3 }
  0x17   : > { %9855 = sst [smem:[#allocation13_spill]] %s7742_s17  ;;  %p6702_p7 = scmp.ge.s32.totalorder %s7545_s28, 1 }
  0x18   : > { %s9857_s19 = scalar_select %p7748_p6, 1, 0 }
  0x19   : > { %p396_p8 = scmp.lt.s32.totalorder %s7545_s28, 3 }
  0x1a   : > { %9858 = sst [smem:[#allocation14_spill]] %s9857_s19 }
  0x1b   : > { %p397_p9 = pnand %p6702_p7, %p396_p8 }
  0x1c   : > { %p445_p10 = scmp.lt.s32.totalorder (!%p397_p9), %s7727_s29, 1  ;;  %s9859_s0 = sld [smem:[#allocation15_spill]] (!%p397_p9) }
  0x1d   : > { %400 = sbr.rel (%p397_p9) target bundleno = 9020 (0x233c), region = 68  ;;  %s7547_s30 = smov (!%p397_p9), 83  }
  0x1e   : > { %s7548_s15 = smov (!%p397_p9), 93   ;;  %s7549_s16 = smov (!%p397_p9), 97  }
  0x1f   : > { %s7552_s22 = smov (!%p397_p9), 94   ;;  %s7553_s23 = smov (!%p397_p9), 109  }
  0x20   : > { %s9860_s3 = sld [smem:[#allocation16_spill]] (!%p397_p9)  ;;  %s9825_s27 = smov (!%p397_p9), 72  }
  0x21   : > { %s9870_s4 = sld [smem:[#allocation17_spill]] (!%p397_p9)  ;;  %s9897_s25 = smov (!%p397_p9), 119  }
  0x22   : > { %s446_s20 = scalar_select %p445_p10, %s7727_s29, 1  ;;  %v467_v2 = vlaneseq  ;;  %v6747_v6 = vld [vmem:[%s9778_s1 + $0x52] ss:$8 sm:$0x3]  ;;  %vm1804_vm0 = vcmask 678912   ;;  %vm1643_vm1 = vcmask 793600  }
  0x23   : > { %v6742_v9 = vld [vmem:[%s9778_s1 + $0x45] ss:$8 sm:$0x3]  ;;  %v6746_v12 = vld [vmem:[%s9778_s1 + $0x51] ss:$8 sm:$0x3] }
  0x24   : > { %s6879_s21 = sshll.u32 %s446_s20, 3  ;;  %s7550_s20 = smov 96   ;;  %v7838_v3 = vshrl.u32 %v467_v2, 7  ;;  %v6743_v20 = vld [vmem:[%s9778_s1 + $0x46] ss:$8 sm:$0x3] }
  0x25   : > { %s449_s24 = scalar_lea.vmem %s9859_s0, %s6879_s21  ;;  %s7551_s21 = smov 95   ;;  %vm1771_vm2 = vcmask 760832   ;;  %vm1678_vm3 = vcmask 785408   ;;  %v6744_v38 = vld [vmem:[%s9778_s1 + $0x47] ss:$8 sm:$0x3] }
  0x26   : > { %v7759_v0 = vld [vmem:[%s449_s24] sm:$0x77]  ;;  %s7554_s24 = smov 99   ;;  %v7845_v4 = vsub.s32 0, %v7838_v3  ;;  %v7848_v5 = vsub.s32 1, %v7838_v3  ;;  %vm1711_vm4 = vcmask 777216  }
  0x27   : > { %1800 = vrot.lane.b32.xlu1 %v7759_v0, %s7547_s30  ;;  %1241 = vst [vmem:[#allocation2 + $0x90] sm:$0x7] %v7759_v0  ;;  %1767 = vrot.lane.b32.xlu0 %v7759_v0, %s7548_s15  ;;  %v7766_v1 = vcombine.high %v7759_v0, %v7759_v0  ;;  %v6745_v51 = vld [vmem:[%s9778_s1 + $0x50] ss:$8 sm:$0x3]  ;;  %vm1744_vm5 = vcmask 769024  }
  0x28   : > { %v1816_v10 = vrot.slane %v6747_v6, %v7845_v4  ;;  %v1820_v11 = vrot.slane %v6747_v6, %v7848_v5  ;;  %v1655_v15 = vrot.slane %v6742_v9, %v7845_v4  ;;  %v1659_v18 = vrot.slane %v6742_v9, %v7848_v5  ;;  %v6739_v62 = vld [vmem:[%s9778_s1 + $0x42] ss:$8 sm:$0x3]  ;;  %s9872_s5 = sld [smem:[#allocation18_spill]]  ;;  %s9811_s0 = smov 71  }
  0x29   : > { %1242 = vst [vmem:[#allocation2 + $0x98] sm:$0x7] %v7766_v1  ;;  %v1783_v19 = vrot.slane %v6746_v12, %v7845_v4  ;;  %v1787_v23 = vrot.slane %v6746_v12, %v7848_v5  ;;  %v1690_v28 = vrot.slane %v6743_v20, %v7845_v4  ;;  %v1694_v29 = vrot.slane %v6743_v20, %v7848_v5  ;;  %s9873_s6 = sld [smem:[#allocation19_spill]]  ;;  %s6880_s14 = sshll.u32 %s7727_s29, 9 }
  0x2a   : > { %v1723_v49 = vrot.slane %v6744_v38, %v7845_v4  ;;  %v1727_v50 = vrot.slane %v6744_v38, %v7848_v5  ;;  %v1756_v60 = vrot.slane %v6745_v51, %v7845_v4  ;;  %v1760_v61 = vrot.slane %v6745_v51, %v7848_v5  ;;  %s9874_s8 = sld [smem:[#allocation21_spill]] }
  0x2b   : > { %1639 = vrot.lane.b32.xlu0 %v7759_v0, %s7549_s16  ;;  %1802 = vrot.lane.b32.xlu1 %v7766_v1, %s7547_s30  ;;  %s7555_s30 = smov 98   ;;  %vm1542_vm6 = vcmask 891904   ;;  %vm1577_vm7 = vcmask 809984   ;;  %vm1610_vm8 = vcmask 801792   ;;  %vm1509_vm9 = vcmask 900096   ;;  %s9875_s9 = sld [smem:[#allocation22_spill]] }
  0x2c   : > { %vm1381_vm10 = vcmask 932864   ;;  %vm1416_vm11 = vcmask 924672   ;;  %vm1449_vm12 = vcmask 916480   ;;  %vm1482_vm13 = vcmask 908288   ;;  %s9876_s7 = sld [smem:[#allocation20_spill]] }
  0x2d   : > { %vm1280_vm14 = vcmask 1031168   ;;  %vm1315_vm15 = vcmask 1022976  }
  0x2f   : > { %1641 = vrot.lane.b32.xlu1 %v7766_v1, %s7549_s16  ;;  %1769 = vrot.lane.b32.xlu0 %v7766_v1, %s7548_s15  ;;  %s7556_s15 = smov 110   ;;  %s7557_s16 = smov 114  }
  0x33   : > { %1676 = vrot.lane.b32.xlu1 %v7766_v1, %s7550_s20  ;;  %1674 = vrot.lane.b32.xlu0 %v7759_v0, %s7550_s20  ;;  %s9803_s20 = smov 113  }
  0x37   : > { %1709 = vrot.lane.b32.xlu1 %v7766_v1, %s7551_s21  ;;  %1707 = vrot.lane.b32.xlu0 %v7759_v0, %s7551_s21  ;;  %s9807_s21 = smov 112  }
  0x3b   : > { %1742 = vrot.lane.b32.xlu1 %v7766_v1, %s7552_s22  ;;  %1740 = vrot.lane.b32.xlu0 %v7759_v0, %s7552_s22  ;;  %s9791_s22 = smov 111  }
  0x3f   : > { %1540 = vrot.lane.b32.xlu1 %v7766_v1, %s7553_s23  ;;  %1538 = vrot.lane.b32.xlu0 %v7759_v0, %s7553_s23  ;;  %s7561_s23 = smov 126  }
  0x43   : > { %1575 = vrot.lane.b32.xlu1 %v7766_v1, %s7554_s24  ;;  %1573 = vrot.lane.b32.xlu0 %v7759_v0, %s7554_s24  ;;  %s7562_s24 = smov 125  }
  0x47   : > { %1608 = vrot.lane.b32.xlu1 %v7766_v1, %s7555_s30  ;;  %1606 = vrot.lane.b32.xlu0 %v7759_v0, %s7555_s30  ;;  %s7563_s30 = smov 115  }
  0x4b   : > { %1507 = vrot.lane.b32.xlu1 %v7766_v1, %s7556_s15  ;;  %1505 = vrot.lane.b32.xlu0 %v7759_v0, %s7556_s15  ;;  %s9799_s15 = smov 127  }
  0x4f   : > { %1379 = vrot.lane.b32.xlu1 %v7766_v1, %s7557_s16  ;;  %1377 = vrot.lane.b32.xlu0 %v7759_v0, %s7557_s16  ;;  %s7565_s16 = smov 3  }
  0x53   : > { %1414 = vrot.lane.b32.xlu1 %v7766_v1, %s9803_s20  ;;  %1412 = vrot.lane.b32.xlu0 %v7759_v0, %s9803_s20  ;;  %s7578_s20 = smov 30  }
  0x57   : > { %1447 = vrot.lane.b32.xlu1 %v7766_v1, %s9807_s21  ;;  %1445 = vrot.lane.b32.xlu0 %v7759_v0, %s9807_s21 }
  0x5b   : > { %1480 = vrot.lane.b32.xlu1 %v7766_v1, %s9791_s22  ;;  %1478 = vrot.lane.b32.xlu0 %v7759_v0, %s9791_s22  ;;  %s9797_s22 = smov 16  }
  0x5f   : > { %1278 = vrot.lane.b32.xlu1 %v7766_v1, %s7561_s23  ;;  %1276 = vrot.lane.b32.xlu0 %v7759_v0, %s7561_s23  ;;  %s7566_s23 = smov 2  }
  0x63   : > { %1313 = vrot.lane.b32.xlu1 %v7766_v1, %s7562_s24  ;;  %1311 = vrot.lane.b32.xlu0 %v7759_v0, %s7562_s24  ;;  %s9793_s24 = smov 1  }
  0x67   : > { %1346 = vrot.lane.b32.xlu1 %v7766_v1, %s7563_s30  ;;  %1344 = vrot.lane.b32.xlu0 %v7759_v0, %s7563_s30  ;;  %s9795_s30 = smov 15  }
  0x6b   : > { %1245 = vrot.lane.b32.xlu1 %v7766_v1, %s9799_s15  ;;  %1243 = vrot.lane.b32.xlu0 %v7759_v0, %s9799_s15  ;;  %s7576_s15 = smov 32  }
  0x6f   : > { %1142 = vrot.lane.b32.xlu1 %v7759_v0, %s7565_s16  ;;  %1139 = vrot.lane.b32.xlu0 %v7766_v1, %s7565_s16  ;;  %s7569_s16 = smov 14  }
  0x73   : > { %1177 = vrot.lane.b32.xlu1 %v7759_v0, %s7566_s23  ;;  %1174 = vrot.lane.b32.xlu0 %v7766_v1, %s7566_s23  ;;  %s7570_s23 = smov 13  }
  0x77   : > { %1210 = vrot.lane.b32.xlu1 %v7759_v0, %s9793_s24  ;;  %1207 = vrot.lane.b32.xlu0 %v7766_v1, %s9793_s24  ;;  %s7572_s24 = smov 29  }
  0x7b   : > { %1041 = vrot.lane.b32.xlu1 %v7759_v0, %s9795_s30  ;;  %1038 = vrot.lane.b32.xlu0 %v7766_v1, %s9795_s30  ;;  %s7573_s30 = smov 19  }
  0x7f   : > { %1076 = vrot.lane.b32.xlu1 %v7759_v0, %s7569_s16  ;;  %1073 = vrot.lane.b32.xlu0 %v7766_v1, %s7569_s16  ;;  %s7574_s16 = smov 18  }
  0x83   : > { %1109 = vrot.lane.b32.xlu1 %v7759_v0, %s7570_s23  ;;  %1106 = vrot.lane.b32.xlu0 %v7766_v1, %s7570_s23  ;;  %s9801_s23 = smov 17  }
  0x87   : > { %1008 = vrot.lane.b32.xlu1 %v7759_v0, %s9797_s22  ;;  %1005 = vrot.lane.b32.xlu0 %v7766_v1, %s9797_s22  ;;  %s7584_s22 = smov 49  }
  0x8b   : > { %880 = vrot.lane.b32.xlu1 %v7759_v0, %s7572_s24  ;;  %877 = vrot.lane.b32.xlu0 %v7766_v1, %s7572_s24  ;;  %s7577_s24 = smov 31  }
  0x8f   : > { %915 = vrot.lane.b32.xlu1 %v7759_v0, %s7573_s30  ;;  %912 = vrot.lane.b32.xlu0 %v7766_v1, %s7573_s30  ;;  %s7581_s30 = smov 45  }
  0x93   : > { %948 = vrot.lane.b32.xlu1 %v7759_v0, %s7574_s16  ;;  %945 = vrot.lane.b32.xlu0 %v7766_v1, %s7574_s16  ;;  %s7579_s16 = smov 33  }
  0x97   : > { %981 = vrot.lane.b32.xlu1 %v7759_v0, %s9801_s23  ;;  %978 = vrot.lane.b32.xlu0 %v7766_v1, %s9801_s23  ;;  %s7583_s23 = smov 34  }
  0x99   : > { %v1801_v7 = vpop.permute.xlu1 %1800  ;;  %v1768_v8 = vpop.permute.xlu0 %1767 }
  0x9b   : > { %779 = vrot.lane.b32.xlu1 %v7759_v0, %s7576_s15  ;;  %776 = vrot.lane.b32.xlu0 %v7766_v1, %s7576_s15  ;;  %s7582_s15 = smov 35  }
  0x9d   : > { %v1640_v13 = vpop.permute.xlu0 %1639  ;;  %v1803_v14 = vpop.permute.xlu1 %1802 }
  0x9e   : > { %v1805_v16 = vsel %vm1804_vm0, %v1801_v7, %v1803_v14  ;;  %v1809_v17 = vsel %vm1804_vm0, %v1803_v14, %v1801_v7  ;;  %v1558_v14 = vrot.slane %v6739_v62, %v7848_v5  ;;  %vm1348_vm0 = vcmask 941056  }
  0x9f   : > { %v1823_v21 = vmul.f32 %v1816_v10, %v1805_v16  ;;  %v1824_v22 = vmul.f32 %v1820_v11, %v1809_v17  ;;  %814 = vrot.lane.b32.xlu1 %v7759_v0, %s7577_s24  ;;  %811 = vrot.lane.b32.xlu0 %v7766_v1, %s7577_s24  ;;  %s7580_s24 = smov 46  }
  0xa1   : > { %v1827_v24 = vrot.slane %v1823_v21, 2  ;;  %v1828_v25 = vrot.slane %v1824_v22, 2  ;;  %v1642_v26 = vpop.permute.xlu1 %1641  ;;  %v1770_v27 = vpop.permute.xlu0 %1769 }
  0xa2   : > { %v1644_v30 = vsel %vm1643_vm1, %v1640_v13, %v1642_v26  ;;  %v1648_v31 = vsel %vm1643_vm1, %v1642_v26, %v1640_v13  ;;  %v1772_v32 = vsel %vm1771_vm2, %v1768_v8, %v1770_v27  ;;  %v1776_v33 = vsel %vm1771_vm2, %v1770_v27, %v1768_v8 }
  0xa3   : > { %1831 = vst [vmem:[#allocation2 + $0x100] ss:$-12 sps:$4 sm:$0xc1] %v1827_v24   ;;  %1832 = vst [vmem:[#allocation2 + $0x108] ss:$-12 sps:$4 sm:$0xc1] %v1828_v25   ;;  %v1662_v34 = vmul.f32 %v1655_v15, %v1644_v30  ;;  %v1663_v35 = vmul.f32 %v1659_v18, %v1648_v31  ;;  %v1790_v36 = vmul.f32 %v1783_v19, %v1772_v32  ;;  %847 = vrot.lane.b32.xlu1 %v7759_v0, %s7578_s20 }
  0xa4   : > { %v1791_v37 = vmul.f32 %v1787_v23, %v1776_v33  ;;  %844 = vrot.lane.b32.xlu0 %v7766_v1, %s7578_s20  ;;  %v1554_v13 = vrot.slane %v6739_v62, %v7845_v4  ;;  %v6740_v15 = vld [vmem:[%s9778_s1 + $0x43] ss:$8 sm:$0x3]  ;;  %v6741_v24 = vld [vmem:[%s9778_s1 + $0x44] ss:$8 sm:$0x3] }
  0xa5   : > { %v1666_v39 = vrot.slane %v1662_v34, 1  ;;  %v1667_v40 = vrot.slane %v1663_v35, 1  ;;  %v1794_v41 = vrot.slane %v1790_v36, 5  ;;  %v1677_v43 = vpop.permute.xlu1 %1676  ;;  %v1675_v44 = vpop.permute.xlu0 %1674  ;;  %v1589_v22 = vrot.slane %v6740_v15, %v7845_v4  ;;  %v6738_v35 = vld [vmem:[%s9778_s1 + $0x41] ss:$8 sm:$0x3] }
  0xa6   : > { %v1795_v42 = vrot.slane %v1791_v37, 5  ;;  %v1679_v45 = vsel %vm1678_vm3, %v1675_v44, %v1677_v43  ;;  %v1683_v46 = vsel %vm1678_vm3, %v1677_v43, %v1675_v44  ;;  %v1593_v23 = vrot.slane %v6740_v15, %v7848_v5  ;;  %s7585_s20 = smov 48  }
  0xa7   : > { %1670 = vst [vmem:[#allocation2 + $0xe0] ss:$-12 sps:$4 sm:$0x83] %v1666_v39   ;;  %1671 = vst [vmem:[#allocation2 + $0xe8] ss:$-12 sps:$4 sm:$0x83] %v1667_v40   ;;  %v1697_v47 = vmul.f32 %v1690_v28, %v1679_v45  ;;  %v1698_v48 = vmul.f32 %v1694_v29, %v1683_v46  ;;  %746 = vrot.lane.b32.xlu1 %v7759_v0, %s7579_s16  ;;  %v1622_v33 = vrot.slane %v6741_v24, %v7845_v4 }
  0xa8   : > { %1798 = vst [vmem:[#allocation2 + $0xf0] sm:$0x38] %v1794_v41  ;;  %1799 = vst [vmem:[#allocation2 + $0xf8] sm:$0x38] %v1795_v42  ;;  %743 = vrot.lane.b32.xlu0 %v7766_v1, %s7579_s16  ;;  %v1626_v34 = vrot.slane %v6741_v24, %v7848_v5  ;;  %v1521_v45 = vrot.slane %v6738_v35, %v7845_v4  ;;  %s7586_s16 = smov 47   ;;  %vm1247_vm1 = vcmask 1039360  }
  0xa9   : > { %v1701_v52 = vrot.slane %v1697_v47, 6  ;;  %v1702_v53 = vrot.slane %v1698_v48, 6  ;;  %v1710_v54 = vpop.permute.xlu1 %1709  ;;  %v1708_v55 = vpop.permute.xlu0 %1707  ;;  %vm1144_vm2 = vcmask 23552   ;;  %vm9805_vm3 = vcmask 15360  }
  0xaa   : > { %v1712_v56 = vsel %vm1711_vm4, %v1708_v55, %v1710_v54  ;;  %v1716_v57 = vsel %vm1711_vm4, %v1710_v54, %v1708_v55  ;;  %vm917_vm4 = vcmask 154624  }
  0xab   : > { %1705 = vst [vmem:[#allocation2 + $0xe0] sm:$0x1c] %v1701_v52  ;;  %1706 = vst [vmem:[#allocation2 + $0xe8] sm:$0x1c] %v1702_v53  ;;  %v1730_v58 = vmul.f32 %v1723_v49, %v1712_v56  ;;  %v1731_v59 = vmul.f32 %v1727_v50, %v1716_v57  ;;  %618 = vrot.lane.b32.xlu1 %v7759_v0, %s7580_s24  ;;  %v1525_v49 = vrot.slane %v6738_v35, %v7848_v5 }
  0xac   : > { %615 = vrot.lane.b32.xlu0 %v7766_v1, %s7580_s24  ;;  %v6734_v50 = vld [vmem:[%s9778_s1 + $0x35] ss:$8 sm:$0x3]  ;;  %s7587_s24 = smov 50  }
  0xad   : > { %v1734_v63 = vrot.slane %v1730_v58, 3  ;;  %v1735_v6 = vrot.slane %v1731_v59, 3  ;;  %v1743_v7 = vpop.permute.xlu1 %1742  ;;  %v1741_v8 = vpop.permute.xlu0 %1740  ;;  %v1393_v59 = vrot.slane %v6734_v50, %v7845_v4 }
  0xae   : > { %v1745_v9 = vsel %vm1744_vm5, %v1741_v8, %v1743_v7  ;;  %v1749_v10 = vsel %vm1744_vm5, %v1743_v7, %v1741_v8  ;;  %vm1212_vm5 = vcmask 7168  }
  0xaf   : > { %1738 = vst [vmem:[#allocation2 + $0xe0] sm:$0xe0] %v1734_v63  ;;  %1739 = vst [vmem:[#allocation2 + $0xe8] sm:$0xe0] %v1735_v6  ;;  %v1763_v11 = vmul.f32 %v1756_v60, %v1745_v9  ;;  %v1764_v12 = vmul.f32 %v1760_v61, %v1749_v10  ;;  %653 = vrot.lane.b32.xlu1 %v7759_v0, %s7581_s30  ;;  %v1397_v60 = vrot.slane %v6734_v50, %v7848_v5 }
  0xb0   : > { %650 = vrot.lane.b32.xlu0 %v7766_v1, %s7581_s30  ;;  %v6735_v61 = vld [vmem:[%s9778_s1 + $0x36] ss:$8 sm:$0x3]  ;;  %s7588_s30 = smov 51  }
  0xb1   : > { %1765 = vst [vmem:[#allocation2 + $0xf0] sm:$0x7] %v1763_v11  ;;  %1766 = vst [vmem:[#allocation2 + $0xf8] sm:$0x7] %v1764_v12  ;;  %v1541_v16 = vpop.permute.xlu1 %1540  ;;  %v1539_v17 = vpop.permute.xlu0 %1538  ;;  %v1428_v12 = vrot.slane %v6735_v61, %v7845_v4 }
  0xb2   : > { %v1543_v18 = vsel %vm1542_vm6, %v1539_v17, %v1541_v16  ;;  %v1547_v19 = vsel %vm1542_vm6, %v1541_v16, %v1539_v17  ;;  %vm1043_vm6 = vcmask 121856  }
  0xb3   : > { %v1561_v20 = vmul.f32 %v1554_v13, %v1543_v18  ;;  %v1562_v21 = vmul.f32 %v1558_v14, %v1547_v19  ;;  %686 = vrot.lane.b32.xlu1 %v7759_v0, %s7582_s15  ;;  %v1432_v13 = vrot.slane %v6735_v61, %v7848_v5  ;;  %v6736_v14 = vld [vmem:[%s9778_s1 + $0x37] ss:$8 sm:$0x3] }
  0xb4   : > { %683 = vrot.lane.b32.xlu0 %v7766_v1, %s7582_s15  ;;  %s7589_s15 = smov 80  }
  0xb5   : > { %v1565_v25 = vrot.slane %v1561_v20, 2  ;;  %v1566_v26 = vrot.slane %v1562_v21, 2  ;;  %v1576_v27 = vpop.permute.xlu1 %1575  ;;  %v1574_v28 = vpop.permute.xlu0 %1573 }
  0xb6   : > { %v1578_v29 = vsel %vm1577_vm7, %v1574_v28, %v1576_v27  ;;  %v1582_v30 = vsel %vm1577_vm7, %v1576_v27, %v1574_v28  ;;  %v2058_v44 = vld [vmem:[#allocation2 + $0xe8] sm:$0xff]  ;;  %v2057_v48 = vld [vmem:[#allocation2 + $0xe0] sm:$0xff]  ;;  %vm1078_vm7 = vcmask 113664  }
  0xb7   : > { %1569 = vst [vmem:[#allocation2 + $0xd0] ss:$-12 sps:$4 sm:$0xc1] %v1565_v25   ;;  %1570 = vst [vmem:[#allocation2 + $0xd8] ss:$-12 sps:$4 sm:$0xc1] %v1566_v26   ;;  %v1596_v31 = vmul.f32 %v1589_v22, %v1578_v29  ;;  %v1597_v32 = vmul.f32 %v1593_v23, %v1582_v30  ;;  %719 = vrot.lane.b32.xlu1 %v7759_v0, %s7583_s23  ;;  %v1461_v23 = vrot.slane %v6736_v14, %v7845_v4 }
  0xb8   : > { %716 = vrot.lane.b32.xlu0 %v7766_v1, %s7583_s23  ;;  %v2060_v36 = vld [vmem:[#allocation2 + $0xf8] sm:$0xff]  ;;  %v2059_v37 = vld [vmem:[#allocation2 + $0xf0] sm:$0xff]  ;;  %v1465_v26 = vrot.slane %v6736_v14, %v7848_v5  ;;  %v6737_v27 = vld [vmem:[%s9778_s1 + $0x40] ss:$8 sm:$0x3]  ;;  %s7590_s23 = smov 79  }
  0xb9   : > { %v1600_v38 = vrot.slane %v1596_v31, 7  ;;  %v1601_v39 = vrot.slane %v1597_v32, 7  ;;  %v1609_v40 = vpop.permute.xlu1 %1608  ;;  %2094 = vmatprep.subr.mxu0 %v2060_v36  ;;  %v1607_v41 = vpop.permute.xlu0 %1606  ;;  %v1494_v36 = vrot.slane %v6737_v27, %v7845_v4 }
  0xba   : > { %v1611_v42 = vsel %vm1610_vm8, %v1607_v41, %v1609_v40  ;;  %v1615_v43 = vsel %vm1610_vm8, %v1609_v40, %v1607_v41  ;;  %2095 = vmatpush1.msra.mxu0 %v2059_v37  ;;  %v1498_v37 = vrot.slane %v6737_v27, %v7848_v5  ;;  %vm1111_vm8 = vcmask 105472  }
  0xbb   : > { %1604 = vst [vmem:[#allocation2 + $0xd0] sm:$0xe] %v1600_v38  ;;  %1605 = vst [vmem:[#allocation2 + $0xd8] sm:$0xe] %v1601_v39  ;;  %v1629_v46 = vmul.f32 %v1622_v33, %v1611_v42  ;;  %v1630_v47 = vmul.f32 %v1626_v34, %v1615_v43  ;;  %517 = vrot.lane.b32.xlu1 %v7759_v0, %s7584_s22  ;;  %2096 = vmatprep.subr.mxu0 %v2058_v44 }
  0xbc   : > { %514 = vrot.lane.b32.xlu0 %v7766_v1, %s7584_s22  ;;  %2097 = vmatpush1.msra.mxu0 %v2057_v48  ;;  %v6731_v38 = vld [vmem:[%s9778_s1 + $0x32] ss:$8 sm:$0x3]  ;;  %s7591_s22 = smov 78  }
  0xbd   : > { %v1633_v51 = vrot.slane %v1629_v46, 4  ;;  %v1634_v52 = vrot.slane %v1630_v47, 4  ;;  %v1508_v53 = vpop.permute.xlu1 %1507  ;;  %v1506_v54 = vpop.permute.xlu0 %1505  ;;  %v1292_v47 = vrot.slane %v6731_v38, %v7845_v4  ;;  %v1296_v48 = vrot.slane %v6731_v38, %v7848_v5 }
  0xbe   : > { %v1510_v55 = vsel %vm1509_vm9, %v1506_v54, %v1508_v53  ;;  %v1514_v56 = vsel %vm1509_vm9, %v1508_v53, %v1506_v54  ;;  %vm1010_vm9 = vcmask 130048  }
  0xbf   : > { %1637 = vst [vmem:[#allocation2 + $0xd0] sm:$0x70] %v1633_v51  ;;  %1638 = vst [vmem:[#allocation2 + $0xd8] sm:$0x70] %v1634_v52  ;;  %v1528_v57 = vmul.f32 %v1521_v45, %v1510_v55  ;;  %v1529_v58 = vmul.f32 %v1525_v49, %v1514_v56  ;;  %552 = vrot.lane.b32.xlu1 %v7759_v0, %s7585_s20 }
  0xc0   : > { %549 = vrot.lane.b32.xlu0 %v7766_v1, %s7585_s20  ;;  %v6732_v49 = vld [vmem:[%s9778_s1 + $0x33] ss:$8 sm:$0x3]  ;;  %s7592_s20 = smov 77  }
  0xc1   : > { %v1532_v62 = vrot.slane %v1528_v57, 5  ;;  %v1533_v63 = vrot.slane %v1529_v58, 5  ;;  %v1380_v6 = vpop.permute.xlu1 %1379  ;;  %v1378_v7 = vpop.permute.xlu0 %1377  ;;  %v1327_v56 = vrot.slane %v6732_v49, %v7845_v4  ;;  %v1331_v57 = vrot.slane %v6732_v49, %v7848_v5  ;;  %v6733_v58 = vld [vmem:[%s9778_s1 + $0x34] ss:$8 sm:$0x3]  ;;  %v2068_v49 = vld [vmem:[%s9860_s3 + $0x8] sm:$0xff] }
  0xc2   : > { %v1382_v8 = vsel %vm1381_vm10, %v1378_v7, %v1380_v6  ;;  %v1386_v9 = vsel %vm1381_vm10, %v1380_v6, %v1378_v7  ;;  %6756 = vmatprep.mubr.msk.f32.mxu0 %vm917_vm4, %v2068_v49  ;;  %vm882_vm10 = vcmask 236544  }
  0xc3   : > { %1536 = vst [vmem:[#allocation2 + $0xc0] sm:$0x38] %v1532_v62  ;;  %1537 = vst [vmem:[#allocation2 + $0xc8] sm:$0x38] %v1533_v63  ;;  %v1400_v10 = vmul.f32 %v1393_v59, %v1382_v8  ;;  %v1401_v11 = vmul.f32 %v1397_v60, %v1386_v9  ;;  %585 = vrot.lane.b32.xlu1 %v7759_v0, %s7586_s16  ;;  %v1360_v9 = vrot.slane %v6733_v58, %v7845_v4 }
  0xc4   : > { %582 = vrot.lane.b32.xlu0 %v7766_v1, %s7586_s16  ;;  %s7593_s16 = smov 82  }
  0xc5   : > { %v1404_v15 = vrot.slane %v1400_v10, 1  ;;  %v1405_v16 = vrot.slane %v1401_v11, 1  ;;  %v1415_v17 = vpop.permute.xlu1 %1414  ;;  %v1413_v18 = vpop.permute.xlu0 %1412  ;;  %v1364_v10 = vrot.slane %v6733_v58, %v7848_v5  ;;  %v6730_v11 = vld [vmem:[%s9778_s1 + $0x31] ss:$8 sm:$0x3] }
  0xc6   : > { %v1417_v19 = vsel %vm1416_vm11, %v1413_v18, %v1415_v17  ;;  %v1421_v20 = vsel %vm1416_vm11, %v1415_v17, %v1413_v18  ;;  %v2056_v21 = vld [vmem:[#allocation2 + $0xd8] sm:$0xff]  ;;  %v2055_v22 = vld [vmem:[#allocation2 + $0xd0] sm:$0xff] }
  0xc7   : > { %1408 = vst [vmem:[#allocation2 + $0xb0] ss:$-12 sps:$4 sm:$0x83] %v1404_v15   ;;  %1409 = vst [vmem:[#allocation2 + $0xb8] ss:$-12 sps:$4 sm:$0x83] %v1405_v16   ;;  %v1435_v24 = vmul.f32 %v1428_v12, %v1417_v19  ;;  %v1436_v25 = vmul.f32 %v1432_v13, %v1421_v20  ;;  %484 = vrot.lane.b32.xlu1 %v7759_v0, %s7587_s24  ;;  %2098 = vmatprep.subr.mxu0 %v2056_v21 }
  0xc8   : > { %481 = vrot.lane.b32.xlu0 %v7766_v1, %s7587_s24  ;;  %2099 = vmatpush1.msra.mxu0 %v2055_v22  ;;  %v1259_v21 = vrot.slane %v6730_v11, %v7845_v4  ;;  %s7594_s24 = smov 81  }
  0xc9   : > { %v1439_v28 = vrot.slane %v1435_v24, 6  ;;  %v1440_v29 = vrot.slane %v1436_v25, 6  ;;  %v1448_v30 = vpop.permute.xlu1 %1447  ;;  %v1446_v31 = vpop.permute.xlu0 %1445  ;;  %v1263_v25 = vrot.slane %v6730_v11, %v7848_v5 }
  0xca   : > { %v1450_v32 = vsel %vm1449_vm12, %v1446_v31, %v1448_v30  ;;  %v1454_v33 = vsel %vm1449_vm12, %v1448_v30, %v1446_v31 }
  0xcb   : > { %1443 = vst [vmem:[#allocation2 + $0xb0] sm:$0x1c] %v1439_v28  ;;  %1444 = vst [vmem:[#allocation2 + $0xb8] sm:$0x1c] %v1440_v29  ;;  %v1468_v34 = vmul.f32 %v1461_v23, %v1450_v32  ;;  %v1469_v35 = vmul.f32 %v1465_v26, %v1454_v33  ;;  %458 = vrot.lane.b32.xlu1 %v7759_v0, %s7588_s30 }
  0xcc   : > { %455 = vrot.lane.b32.xlu0 %v7766_v1, %s7588_s30  ;;  %v6727_v26 = vld [vmem:[%s9778_s1 + $0x25] ss:$8 sm:$0x3]  ;;  %s9863_s30 = smov 113  }
  0xcd   : > { %v1472_v39 = vrot.slane %v1468_v34, 3  ;;  %v1473_v40 = vrot.slane %v1469_v35, 3  ;;  %v1481_v41 = vpop.permute.xlu1 %1480  ;;  %v1479_v42 = vpop.permute.xlu0 %1478  ;;  %v1155_v35 = vrot.slane %v6727_v26, %v7845_v4 }
  0xce   : > { %v1483_v43 = vsel %vm1482_vm13, %v1479_v42, %v1481_v41  ;;  %v1487_v44 = vsel %vm1482_vm13, %v1481_v41, %v1479_v42 }
  0xcf   : > { %1476 = vst [vmem:[#allocation2 + $0xb0] sm:$0xe0] %v1472_v39  ;;  %1477 = vst [vmem:[#allocation2 + $0xb8] sm:$0xe0] %v1473_v40  ;;  %v1501_v45 = vmul.f32 %v1494_v36, %v1483_v43  ;;  %v1502_v46 = vmul.f32 %v1498_v37, %v1487_v44  ;;  %1903 = vrot.lane.b32.xlu1 %v7766_v1, %s7589_s15  ;;  %v1159_v36 = vrot.slane %v6727_v26, %v7848_v5 }
  0xd0   : > { %1901 = vrot.lane.b32.xlu0 %v7759_v0, %s7589_s15  ;;  %v6728_v37 = vld [vmem:[%s9778_s1 + $0x26] ss:$8 sm:$0x3]  ;;  %s9866_s15 = smov 15  }
  0xd1   : > { %1503 = vst [vmem:[#allocation2 + $0xc0] sm:$0x7] %v1501_v45  ;;  %1504 = vst [vmem:[#allocation2 + $0xc8] sm:$0x7] %v1502_v46  ;;  %v1279_v50 = vpop.permute.xlu1 %1278  ;;  %v1277_v51 = vpop.permute.xlu0 %1276  ;;  %v1190_v46 = vrot.slane %v6728_v37, %v7845_v4 }
  0xd2   : > { %v1281_v52 = vsel %vm1280_vm14, %v1277_v51, %v1279_v50  ;;  %v1285_v53 = vsel %vm1280_vm14, %v1279_v50, %v1277_v51  ;;  %vm950_vm14 = vcmask 146432  }
  0xd3   : > { %v1299_v54 = vmul.f32 %v1292_v47, %v1281_v52  ;;  %v1300_v55 = vmul.f32 %v1296_v48, %v1285_v53  ;;  %1938 = vrot.lane.b32.xlu1 %v7766_v1, %s7590_s23  ;;  %v1194_v47 = vrot.slane %v6728_v37, %v7848_v5  ;;  %v6729_v48 = vld [vmem:[%s9778_s1 + $0x27] ss:$8 sm:$0x3] }
  0xd4   : > { %1936 = vrot.lane.b32.xlu0 %v7759_v0, %s7590_s23  ;;  %v1223_v58 = vrot.slane %v6729_v48, %v7845_v4  ;;  %s9869_s23 = smov 111  }
  0xd5   : > { %v1303_v59 = vrot.slane %v1299_v54, 2  ;;  %v1304_v60 = vrot.slane %v1300_v55, 2  ;;  %v1314_v61 = vpop.permute.xlu1 %1313  ;;  %v1312_v62 = vpop.permute.xlu0 %1311 }
  0xd6   : > { %v1316_v63 = vsel %vm1315_vm15, %v1312_v62, %v1314_v61  ;;  %v1320_v6 = vsel %vm1315_vm15, %v1314_v61, %v1312_v62  ;;  %v2052_v20 = vld [vmem:[#allocation2 + $0xb8] sm:$0xff]  ;;  %v2051_v24 = vld [vmem:[#allocation2 + $0xb0] sm:$0xff]  ;;  %vm983_vm15 = vcmask 138240  }
  0xd7   : > { %1307 = vst [vmem:[#allocation2 + $0xa0] ss:$-12 sps:$4 sm:$0xc1] %v1303_v59   ;;  %1308 = vst [vmem:[#allocation2 + $0xa8] ss:$-12 sps:$4 sm:$0xc1] %v1304_v60   ;;  %v1334_v7 = vmul.f32 %v1327_v56, %v1316_v63  ;;  %v1335_v8 = vmul.f32 %v1331_v57, %v1320_v6  ;;  %1971 = vrot.lane.b32.xlu1 %v7766_v1, %s7591_s22  ;;  %v1227_v59 = vrot.slane %v6729_v48, %v7848_v5 }
  0xd8   : > { %1969 = vrot.lane.b32.xlu0 %v7759_v0, %s7591_s22  ;;  %v2054_v12 = vld [vmem:[#allocation2 + $0xc8] sm:$0xff]  ;;  %v2053_v13 = vld [vmem:[#allocation2 + $0xc0] sm:$0xff]  ;;  %s9865_s22 = smov 1  }
  0xd9   : > { %v1338_v14 = vrot.slane %v1334_v7, 7  ;;  %v1339_v15 = vrot.slane %v1335_v8, 7  ;;  %v1347_v16 = vpop.permute.xlu1 %1346  ;;  %2100 = vmatprep.subr.mxu0 %v2054_v12  ;;  %v1345_v17 = vpop.permute.xlu0 %1344  ;;  %v6724_v60 = vld [vmem:[%s9778_s1 + $0x22] ss:$8 sm:$0x3] }
  0xda   : > { %v1349_v18 = vsel %vm1348_vm0, %v1345_v17, %v1347_v16  ;;  %v1353_v19 = vsel %vm1348_vm0, %v1347_v16, %v1345_v17  ;;  %2101 = vmatpush1.msra.mxu0 %v2053_v13  ;;  %v1054_v11 = vrot.slane %v6724_v60, %v7845_v4  ;;  %v451_v12 = vld [vmem:[%s9779_s2] sm:$0xff]  ;;  %v7595_v16 = vmov 0   ;;  %v8041_v17 = vld [vmem:[%s9779_s2 + $0x8] sm:$0xff] }
  0xdb   : > { %1342 = vst [vmem:[#allocation2 + $0xa0] sm:$0xe] %v1338_v14  ;;  %1343 = vst [vmem:[#allocation2 + $0xa8] sm:$0xe] %v1339_v15  ;;  %v1367_v22 = vmul.f32 %v1360_v9, %v1349_v18  ;;  %v1368_v23 = vmul.f32 %v1364_v10, %v1353_v19  ;;  %2004 = vrot.lane.b32.xlu1 %v7766_v1, %s7592_s20  ;;  %2102 = vmatprep.subr.mxu0 %v2052_v20  ;;  %vm9806_vm0 = vcmask 261120  }
  0xdc   : > { %2002 = vrot.lane.b32.xlu0 %v7759_v0, %s7592_s20  ;;  %2103 = vmatpush1.msra.mxu0 %v2051_v24  ;;  %v1058_v15 = vrot.slane %v6724_v60, %v7848_v5  ;;  %v6725_v18 = vld [vmem:[%s9778_s1 + $0x23] ss:$8 sm:$0x3]  ;;  %s9868_s20 = smov 17  }
  0xdd   : > { %v1371_v27 = vrot.slane %v1367_v22, 4  ;;  %v1372_v28 = vrot.slane %v1368_v23, 4  ;;  %v1246_v29 = vpop.permute.xlu1 %1245  ;;  %v1244_v30 = vpop.permute.xlu0 %1243  ;;  %7311 = vset.pattern.permute.xlu1 %v7595_v16  ;;  %7310 = vset.pattern.permute.xlu0 %v7595_v16 }
  0xde   : > { %v1248_v31 = vsel %vm1247_vm1, %v1244_v30, %v1246_v29  ;;  %v1252_v32 = vsel %vm1247_vm1, %v1246_v29, %v1244_v30  ;;  %v6726_v29 = vld [vmem:[%s9778_s1 + $0x24] ss:$8 sm:$0x3] }
  0xdf   : > { %1375 = vst [vmem:[#allocation2 + $0xa0] sm:$0x70] %v1371_v27  ;;  %1376 = vst [vmem:[#allocation2 + $0xa8] sm:$0x70] %v1372_v28  ;;  %v1266_v33 = vmul.f32 %v1259_v21, %v1248_v31  ;;  %v1267_v34 = vmul.f32 %v1263_v25, %v1252_v32  ;;  %1837 = vrot.lane.b32.xlu1 %v7766_v1, %s7593_s16  ;;  %v1089_v27 = vrot.slane %v6725_v18, %v7845_v4 }
  0xe0   : > { %1835 = vrot.lane.b32.xlu0 %v7759_v0, %s7593_s16  ;;  %v1093_v28 = vrot.slane %v6725_v18, %v7848_v5  ;;  %s9864_s16 = smov 127  }
  0xe1   : > { %v1270_v38 = vrot.slane %v1266_v33, 5  ;;  %v1271_v39 = vrot.slane %v1267_v34, 5  ;;  %v1143_v40 = vpop.permute.xlu1 %1142  ;;  %v1140_v41 = vpop.permute.xlu0 %1139 }
  0xe2   : > { %v1145_v42 = vsel %vm1144_vm2, %v1143_v40, %v1140_v41  ;;  %v1148_v43 = vsel %vm1144_vm2, %v1140_v41, %v1143_v40  ;;  %v6723_v40 = vld [vmem:[%s9778_s1 + $0x21] ss:$8 sm:$0x3]  ;;  %vm816_vm2 = vcmask 252928  }
  0xe3   : > { %1274 = vst [vmem:[#allocation2 + $0x90] sm:$0x38] %v1270_v38  ;;  %1275 = vst [vmem:[#allocation2 + $0x98] sm:$0x38] %v1271_v39  ;;  %v1162_v44 = vmul.f32 %v1155_v35, %v1148_v43  ;;  %v1163_v45 = vmul.f32 %v1159_v36, %v1145_v42  ;;  %1870 = vrot.lane.b32.xlu1 %v7766_v1, %s7594_s24  ;;  %v1122_v38 = vrot.slane %v6726_v29, %v7845_v4 }
  0xe4   : > { %1868 = vrot.lane.b32.xlu0 %v7759_v0, %s7594_s24  ;;  %v1126_v39 = vrot.slane %v6726_v29, %v7848_v5  ;;  %s9867_s24 = smov 16  }
  0xe5   : > { %v1166_v50 = vrot.slane %v1162_v44, 1  ;;  %v1167_v51 = vrot.slane %v1163_v45, 1  ;;  %v1178_v52 = vpop.permute.xlu1 %1177  ;;  %v1175_v53 = vpop.permute.xlu0 %1174 }
  0xe6   : > { %v1180_v1 = vsel %vm9805_vm3, %v1178_v52, %v1175_v53  ;;  %v1183_v54 = vsel %vm9805_vm3, %v1175_v53, %v1178_v52  ;;  %v2050_v0 = vld [vmem:[#allocation2 + $0xa8] sm:$0xff]  ;;  %v2049_v55 = vld [vmem:[#allocation2 + $0xa0] sm:$0xff]  ;;  %v1025_v52 = vrot.slane %v6723_v40, %v7848_v5  ;;  %v6719_v53 = vld [vmem:[%s9778_s1 + $0x15] ss:$8 sm:$0x3] }
  0xe7   : > { %1170 = vst [vmem:[#allocation2 + $0x80] ss:$-12 sps:$4 sm:$0x83] %v1166_v50   ;;  %1171 = vst [vmem:[#allocation2 + $0x88] ss:$-12 sps:$4 sm:$0x83] %v1167_v51   ;;  %v1197_v56 = vmul.f32 %v1190_v46, %v1183_v54  ;;  %v1198_v57 = vmul.f32 %v1194_v47, %v1180_v1  ;;  %2104 = vmatprep.subr.mxu0 %v2050_v0  ;;  %2073 = vperm.xlu1 %7311, %v451_v12  }
  0xe8   : > { %2105 = vmatpush1.msra.mxu0 %v2049_v55  ;;  %2078 = vperm.xlu0 %7310, %v8041_v17   ;;  %v1021_v51 = vrot.slane %v6723_v40, %v7845_v4  ;;  %v893_v60 = vrot.slane %v6719_v53, %v7845_v4 }
  0xe9   : > { %v1201_v61 = vrot.slane %v1197_v56, 6  ;;  %v1202_v62 = vrot.slane %v1198_v57, 6  ;;  %v1211_v63 = vpop.permute.xlu1 %1210  ;;  %v1208_v6 = vpop.permute.xlu0 %1207 }
  0xea   : > { %v1213_v7 = vsel %vm1212_vm5, %v1211_v63, %v1208_v6  ;;  %v1216_v8 = vsel %vm1212_vm5, %v1208_v6, %v1211_v63  ;;  %v2048_v9 = vld [vmem:[#allocation2 + $0x98] sm:$0xff]  ;;  %v2047_v10 = vld [vmem:[#allocation2 + $0x90] sm:$0xff] }
  0xeb   : > { %1205 = vst [vmem:[#allocation2 + $0x80] sm:$0x1c] %v1201_v61  ;;  %1206 = vst [vmem:[#allocation2 + $0x88] sm:$0x1c] %v1202_v62  ;;  %v1230_v13 = vmul.f32 %v1223_v58, %v1216_v8  ;;  %v1231_v14 = vmul.f32 %v1227_v59, %v1213_v7  ;;  %2106 = vmatprep.subr.mxu0 %v2048_v9  ;;  %v897_v61 = vrot.slane %v6719_v53, %v7848_v5 }
  0xec   : > { %2107 = vmatpush1.msra.mxu0 %v2047_v10  ;;  %v6720_v62 = vld [vmem:[%s9778_s1 + $0x16] ss:$8 sm:$0x3] }
  0xed   : > { %v1234_v19 = vrot.slane %v1230_v13, 3  ;;  %v1235_v20 = vrot.slane %v1231_v14, 3  ;;  %v1042_v21 = vpop.permute.xlu1 %1041  ;;  %v1039_v22 = vpop.permute.xlu0 %1038  ;;  %v928_v13 = vrot.slane %v6720_v62, %v7845_v4  ;;  %v932_v14 = vrot.slane %v6720_v62, %v7848_v5 }
  0xee   : > { %v1044_v23 = vsel %vm1043_vm6, %v1042_v21, %v1039_v22  ;;  %v1047_v24 = vsel %vm1043_vm6, %v1039_v22, %v1042_v21 }
  0xef   : > { %1238 = vst [vmem:[#allocation2 + $0x80] sm:$0xe0] %v1234_v19  ;;  %1239 = vst [vmem:[#allocation2 + $0x88] sm:$0xe0] %v1235_v20  ;;  %v1061_v25 = vmul.f32 %v1054_v11, %v1047_v24  ;;  %v1062_v26 = vmul.f32 %v1058_v15, %v1044_v23 }
  0xf0   : > { %v6721_v15 = vld [vmem:[%s9778_s1 + $0x17] ss:$8 sm:$0x3] }
  0xf1   : > { %v1065_v30 = vrot.slane %v1061_v25, 2  ;;  %v1066_v31 = vrot.slane %v1062_v26, 2  ;;  %v1077_v32 = vpop.permute.xlu1 %1076  ;;  %v1074_v33 = vpop.permute.xlu0 %1073  ;;  %v965_v29 = vrot.slane %v6721_v15, %v7848_v5 }
  0xf2   : > { %v1079_v34 = vsel %vm1078_vm7, %v1077_v32, %v1074_v33  ;;  %v1082_v35 = vsel %vm1078_vm7, %v1074_v33, %v1077_v32  ;;  %vm849_vm7 = vcmask 244736  }
  0xf3   : > { %1069 = vst [vmem:[#allocation2 + $0x70] ss:$-12 sps:$4 sm:$0xc1] %v1065_v30   ;;  %1070 = vst [vmem:[#allocation2 + $0x78] ss:$-12 sps:$4 sm:$0xc1] %v1066_v31   ;;  %v1096_v36 = vmul.f32 %v1089_v27, %v1082_v35  ;;  %v1097_v37 = vmul.f32 %v1093_v28, %v1079_v34  ;;  %v961_v28 = vrot.slane %v6721_v15, %v7845_v4 }
  0xf4   : > { %v6722_v30 = vld [vmem:[%s9778_s1 + $0x20] ss:$8 sm:$0x3] }
  0xf5   : > { %v1100_v41 = vrot.slane %v1096_v36, 7  ;;  %v1101_v42 = vrot.slane %v1097_v37, 7  ;;  %v1110_v43 = vpop.permute.xlu1 %1109  ;;  %v1107_v44 = vpop.permute.xlu0 %1106  ;;  %v998_v40 = vrot.slane %v6722_v30, %v7848_v5 }
  0xf6   : > { %v1112_v45 = vsel %vm1111_vm8, %v1110_v43, %v1107_v44  ;;  %v1115_v46 = vsel %vm1111_vm8, %v1107_v44, %v1110_v43  ;;  %v2046_v47 = vld [vmem:[#allocation2 + $0x88] sm:$0xff]  ;;  %v2045_v48 = vld [vmem:[#allocation2 + $0x80] sm:$0xff]  ;;  %vm748_vm8 = vcmask 269312  }
  0xf7   : > { %1104 = vst [vmem:[#allocation2 + $0x70] sm:$0xe] %v1100_v41  ;;  %1105 = vst [vmem:[#allocation2 + $0x78] sm:$0xe] %v1101_v42  ;;  %v1129_v49 = vmul.f32 %v1122_v38, %v1115_v46  ;;  %v1130_v50 = vmul.f32 %v1126_v39, %v1112_v45  ;;  %2108 = vmatprep.subr.mxu0 %v2046_v47  ;;  %v994_v39 = vrot.slane %v6722_v30, %v7845_v4 }
  0xf8   : > { %2109 = vmatpush1.msra.mxu0 %v2045_v48  ;;  %v6716_v41 = vld [vmem:[%s9778_s1 + $0x12] ss:$8 sm:$0x3]  ;;  %v6711_v30 = vld [vmem:[%s9778_s1 + $0x5] ss:$8 sm:$0x3] }
  0xf9   : > { %v1133_v1 = vrot.slane %v1129_v49, 4  ;;  %v1134_v54 = vrot.slane %v1130_v50, 4  ;;  %v1009_v0 = vpop.permute.xlu1 %1008  ;;  %v1006_v55 = vpop.permute.xlu0 %1005  ;;  %v792_v50 = vrot.slane %v6716_v41, %v7845_v4 }
  0xfa   : > { %v1011_v56 = vsel %vm1010_vm9, %v1009_v0, %v1006_v55  ;;  %v1014_v57 = vsel %vm1010_vm9, %v1006_v55, %v1009_v0 }
  0xfb   : > { %1137 = vst [vmem:[#allocation2 + $0x70] sm:$0x70] %v1133_v1  ;;  %1138 = vst [vmem:[#allocation2 + $0x78] sm:$0x70] %v1134_v54  ;;  %v1028_v58 = vmul.f32 %v1021_v51, %v1014_v57  ;;  %v1029_v59 = vmul.f32 %v1025_v52, %v1011_v56  ;;  %v796_v51 = vrot.slane %v6716_v41, %v7848_v5 }
  0xfc   : > { %v6717_v52 = vld [vmem:[%s9778_s1 + $0x13] ss:$8 sm:$0x3]  ;;  %v6712_v41 = vld [vmem:[%s9778_s1 + $0x6] ss:$8 sm:$0x3] }
  0xfd   : > { %v1032_v63 = vrot.slane %v1028_v58, 5  ;;  %v1033_v6 = vrot.slane %v1029_v59, 5  ;;  %v881_v7 = vpop.permute.xlu1 %880  ;;  %v878_v8 = vpop.permute.xlu0 %877  ;;  %v827_v57 = vrot.slane %v6717_v52, %v7845_v4  ;;  %v831_v58 = vrot.slane %v6717_v52, %v7848_v5  ;;  %v6713_v52 = vld [vmem:[%s9778_s1 + $0x7] ss:$8 sm:$0x3] }
  0xfe   : > { %v883_v9 = vsel %vm882_vm10, %v881_v7, %v878_v8  ;;  %v886_v10 = vsel %vm882_vm10, %v878_v8, %v881_v7  ;;  %vm620_vm10 = vcmask 375808  }
  0xff   : > { %1036 = vst [vmem:[#allocation2 + $0x60] sm:$0x38] %v1032_v63  ;;  %1037 = vst [vmem:[#allocation2 + $0x68] sm:$0x38] %v1033_v6  ;;  %v900_v11 = vmul.f32 %v893_v60, %v886_v10  ;;  %v901_v12 = vmul.f32 %v897_v61, %v883_v9 }
 0x100   : > { %v6718_v63 = vld [vmem:[%s9778_s1 + $0x14] ss:$8 sm:$0x3] }
 0x101   : > { %v904_v18 = vrot.slane %v900_v11, 1  ;;  %v905_v19 = vrot.slane %v901_v12, 1  ;;  %v916_v20 = vpop.permute.xlu1 %915  ;;  %v913_v21 = vpop.permute.xlu0 %912  ;;  %v860_v10 = vrot.slane %v6718_v63, %v7845_v4  ;;  %v864_v11 = vrot.slane %v6718_v63, %v7848_v5  ;;  %v6714_v63 = vld [vmem:[%s9778_s1 + $0x10] ss:$8 sm:$0x3] }
 0x102   : > { %v918_v22 = vsel %vm917_vm4, %v916_v20, %v913_v21  ;;  %v921_v23 = vsel %vm917_vm4, %v913_v21, %v916_v20  ;;  %v2044_v24 = vld [vmem:[#allocation2 + $0x78] sm:$0xff]  ;;  %v2043_v25 = vld [vmem:[#allocation2 + $0x70] sm:$0xff] }
 0x103   : > { %908 = vst [vmem:[#allocation2 + $0x50] ss:$-12 sps:$4 sm:$0x83] %v904_v18   ;;  %909 = vst [vmem:[#allocation2 + $0x58] ss:$-12 sps:$4 sm:$0x83] %v905_v19   ;;  %v935_v26 = vmul.f32 %v928_v13, %v921_v23  ;;  %v936_v27 = vmul.f32 %v932_v14, %v918_v22  ;;  %2110 = vmatprep.subr.mxu0 %v2044_v24 }
 0x104   : > { %2111 = vmatpush1.msra.mxu0 %v2043_v25  ;;  %v6715_v19 = vld [vmem:[%s9778_s1 + $0x11] ss:$8 sm:$0x3] }
 0x105   : > { %v939_v31 = vrot.slane %v935_v26, 6  ;;  %v940_v32 = vrot.slane %v936_v27, 6  ;;  %v949_v33 = vpop.permute.xlu1 %948  ;;  %v946_v34 = vpop.permute.xlu0 %945  ;;  %v759_v27 = vrot.slane %v6715_v19, %v7845_v4 }
 0x106   : > { %v951_v35 = vsel %vm950_vm14, %v949_v33, %v946_v34  ;;  %v954_v36 = vsel %vm950_vm14, %v946_v34, %v949_v33  ;;  %vm655_vm14 = vcmask 367616  }
 0x107   : > { %943 = vst [vmem:[#allocation2 + $0x50] sm:$0x1c] %v939_v31  ;;  %944 = vst [vmem:[#allocation2 + $0x58] sm:$0x1c] %v940_v32  ;;  %v968_v37 = vmul.f32 %v961_v28, %v954_v36  ;;  %v969_v38 = vmul.f32 %v965_v29, %v951_v35  ;;  %v763_v28 = vrot.slane %v6715_v19, %v7848_v5 }
 0x109   : > { %v972_v42 = vrot.slane %v968_v37, 3  ;;  %v973_v43 = vrot.slane %v969_v38, 3  ;;  %v982_v44 = vpop.permute.xlu1 %981  ;;  %v979_v45 = vpop.permute.xlu0 %978  ;;  %v631_v38 = vrot.slane %v6711_v30, %v7845_v4 }
 0x10a   : > { %v984_v46 = vsel %vm983_vm15, %v982_v44, %v979_v45  ;;  %v987_v47 = vsel %vm983_vm15, %v979_v45, %v982_v44 }
 0x10b   : > { %976 = vst [vmem:[#allocation2 + $0x50] sm:$0xe0] %v972_v42  ;;  %977 = vst [vmem:[#allocation2 + $0x58] sm:$0xe0] %v973_v43  ;;  %v1001_v48 = vmul.f32 %v994_v39, %v987_v47  ;;  %v1002_v49 = vmul.f32 %v998_v40, %v984_v46  ;;  %v635_v39 = vrot.slane %v6711_v30, %v7848_v5 }
 0x10d   : > { %1003 = vst [vmem:[#allocation2 + $0x60] sm:$0x7] %v1001_v48  ;;  %1004 = vst [vmem:[#allocation2 + $0x68] sm:$0x7] %v1002_v49  ;;  %v780_v53 = vpop.permute.xlu1 %779  ;;  %v777_v1 = vpop.permute.xlu0 %776  ;;  %v666_v49 = vrot.slane %v6712_v41, %v7845_v4 }
 0x10e   : > { %v782_v54 = vsel %vm9806_vm0, %v780_v53, %v777_v1  ;;  %v785_v0 = vsel %vm9806_vm0, %v777_v1, %v780_v53 }
 0x10f   : > { %v799_v55 = vmul.f32 %v792_v50, %v785_v0  ;;  %v800_v56 = vmul.f32 %v796_v51, %v782_v54  ;;  %v670_v50 = vrot.slane %v6712_v41, %v7848_v5 }
 0x111   : > { %v803_v59 = vrot.slane %v799_v55, 2  ;;  %v804_v60 = vrot.slane %v800_v56, 2  ;;  %v815_v61 = vpop.permute.xlu1 %814  ;;  %v812_v62 = vpop.permute.xlu0 %811 }
 0x112   : > { %v817_v6 = vsel %vm816_vm2, %v815_v61, %v812_v62  ;;  %v820_v7 = vsel %vm816_vm2, %v812_v62, %v815_v61  ;;  %v2040_v21 = vld [vmem:[#allocation2 + $0x58] sm:$0xff]  ;;  %v2039_v24 = vld [vmem:[#allocation2 + $0x50] sm:$0xff]  ;;  %vm688_vm2 = vcmask 285696   ;;  %v703_v61 = vrot.slane %v6713_v52, %v7848_v5 }
 0x113   : > { %807 = vst [vmem:[#allocation2 + $0x40] ss:$-12 sps:$4 sm:$0xc1] %v803_v59   ;;  %808 = vst [vmem:[#allocation2 + $0x48] ss:$-12 sps:$4 sm:$0xc1] %v804_v60   ;;  %v834_v8 = vmul.f32 %v827_v57, %v820_v7  ;;  %v835_v9 = vmul.f32 %v831_v58, %v817_v6  ;;  %v699_v60 = vrot.slane %v6713_v52, %v7845_v4 }
 0x114   : > { %v2042_v12 = vld [vmem:[#allocation2 + $0x68] sm:$0xff]  ;;  %v2041_v13 = vld [vmem:[#allocation2 + $0x60] sm:$0xff] }
 0x115   : > { %v838_v14 = vrot.slane %v834_v8, 7  ;;  %v839_v15 = vrot.slane %v835_v9, 7  ;;  %v848_v18 = vpop.permute.xlu1 %847  ;;  %2112 = vmatprep.subr.mxu0 %v2042_v12 }
 0x116   : > { %v845_v20 = vpop.permute.xlu0 %844  ;;  %2113 = vmatpush1.msra.mxu0 %v2041_v13  ;;  %v732_v13 = vrot.slane %v6714_v63, %v7845_v4 }
 0x117   : > { %842 = vst [vmem:[#allocation2 + $0x40] sm:$0xe] %v838_v14  ;;  %843 = vst [vmem:[#allocation2 + $0x48] sm:$0xe] %v839_v15  ;;  %v850_v22 = vsel %vm849_vm7, %v848_v18, %v845_v20  ;;  %v853_v23 = vsel %vm849_vm7, %v845_v20, %v848_v18  ;;  %2114 = vmatprep.subr.mxu0 %v2040_v21  ;;  %vm721_vm7 = vcmask 277504   ;;  %v736_v14 = vrot.slane %v6714_v63, %v7848_v5 }
 0x118   : > { %v867_v25 = vmul.f32 %v860_v10, %v853_v23  ;;  %v868_v26 = vmul.f32 %v864_v11, %v850_v22  ;;  %2115 = vmatpush1.msra.mxu0 %v2039_v24  ;;  %v6708_v18 = vld [vmem:[%s9778_s1 + $0x2] ss:$8 sm:$0x3] }
 0x119   : > { %v747_v29 = vpop.permute.xlu1 %746 }
 0x11a   : > { %v871_v31 = vrot.slane %v867_v25, 4  ;;  %v872_v32 = vrot.slane %v868_v26, 4  ;;  %v744_v33 = vpop.permute.xlu0 %743  ;;  %v530_v26 = vrot.slane %v6708_v18, %v7845_v4 }
 0x11b   : > { %v749_v34 = vsel %vm748_vm8, %v747_v29, %v744_v33  ;;  %v752_v35 = vsel %vm748_vm8, %v744_v33, %v747_v29  ;;  %vm519_vm8 = vcmask 400384   ;;  %v6709_v29 = vld [vmem:[%s9778_s1 + $0x3] ss:$8 sm:$0x3] }
 0x11c   : > { %875 = vst [vmem:[#allocation2 + $0x40] sm:$0x70] %v871_v31  ;;  %876 = vst [vmem:[#allocation2 + $0x48] sm:$0x70] %v872_v32  ;;  %v766_v36 = vmul.f32 %v759_v27, %v752_v35  ;;  %v767_v37 = vmul.f32 %v763_v28, %v749_v34  ;;  %v534_v27 = vrot.slane %v6708_v18, %v7848_v5 }
 0x11d   : > { %v619_v40 = vpop.permute.xlu1 %618  ;;  %v565_v35 = vrot.slane %v6709_v29, %v7845_v4 }
 0x11e   : > { %v770_v42 = vrot.slane %v766_v36, 5  ;;  %v771_v43 = vrot.slane %v767_v37, 5  ;;  %v616_v44 = vpop.permute.xlu0 %615  ;;  %v569_v36 = vrot.slane %v6709_v29, %v7848_v5 }
 0x11f   : > { %v621_v45 = vsel %vm620_vm10, %v619_v40, %v616_v44  ;;  %v624_v46 = vsel %vm620_vm10, %v616_v44, %v619_v40  ;;  %vm554_vm10 = vcmask 392192  }
 0x120   : > { %774 = vst [vmem:[#allocation2 + $0x30] sm:$0x38] %v770_v42  ;;  %775 = vst [vmem:[#allocation2 + $0x38] sm:$0x38] %v771_v43  ;;  %v638_v47 = vmul.f32 %v631_v38, %v624_v46  ;;  %v639_v48 = vmul.f32 %v635_v39, %v621_v45 }
 0x121   : > { %v654_v51 = vpop.permute.xlu1 %653  ;;  %v6710_v38 = vld [vmem:[%s9778_s1 + $0x4] ss:$8 sm:$0x3] }
 0x122   : > { %v642_v53 = vrot.slane %v638_v47, 1  ;;  %v643_v1 = vrot.slane %v639_v48, 1  ;;  %v651_v54 = vpop.permute.xlu0 %650  ;;  %v598_v46 = vrot.slane %v6710_v38, %v7845_v4  ;;  %v602_v47 = vrot.slane %v6710_v38, %v7848_v5 }
 0x123   : > { %v656_v0 = vsel %vm655_vm14, %v654_v51, %v651_v54  ;;  %v659_v55 = vsel %vm655_vm14, %v651_v54, %v654_v51  ;;  %v2038_v56 = vld [vmem:[#allocation2 + $0x48] sm:$0xff]  ;;  %v2037_v57 = vld [vmem:[#allocation2 + $0x40] sm:$0xff]  ;;  %vm587_vm14 = vcmask 384000  }
 0x124   : > { %646 = vst [vmem:[#allocation2 + $0x20] ss:$-12 sps:$4 sm:$0x83] %v642_v53   ;;  %647 = vst [vmem:[#allocation2 + $0x28] ss:$-12 sps:$4 sm:$0x83] %v643_v1   ;;  %v673_v58 = vmul.f32 %v666_v49, %v659_v55  ;;  %v674_v59 = vmul.f32 %v670_v50, %v656_v0  ;;  %2116 = vmatprep.subr.mxu0 %v2038_v56 }
 0x125   : > { %2117 = vmatpush1.msra.mxu0 %v2037_v57  ;;  %v687_v62 = vpop.permute.xlu1 %686  ;;  %v6707_v51 = vld [vmem:[%s9778_s1 + $0x1] ss:$8 sm:$0x3] }
 0x126   : > { %v677_v6 = vrot.slane %v673_v58, 6  ;;  %v678_v7 = vrot.slane %v674_v59, 6  ;;  %v684_v8 = vpop.permute.xlu0 %683  ;;  %v497_v59 = vrot.slane %v6707_v51, %v7845_v4 }
 0x127   : > { %v689_v9 = vsel %vm688_vm2, %v687_v62, %v684_v8  ;;  %v692_v10 = vsel %vm688_vm2, %v684_v8, %v687_v62  ;;  %vm486_vm2 = vcmask 408576   ;;  %v465_v62 = vld [vmem:[%s9778_s1] ss:$8 sm:$0x3] }
 0x128   : > { %681 = vst [vmem:[#allocation2 + $0x20] sm:$0x1c] %v677_v6  ;;  %682 = vst [vmem:[#allocation2 + $0x28] sm:$0x1c] %v678_v7  ;;  %v706_v11 = vmul.f32 %v699_v60, %v692_v10  ;;  %v707_v12 = vmul.f32 %v703_v61, %v689_v9  ;;  %v501_v60 = vrot.slane %v6707_v51, %v7848_v5 }
 0x129   : > { %v720_v15 = vpop.permute.xlu1 %719 }
 0x12a   : > { %v710_v19 = vrot.slane %v706_v11, 3  ;;  %v711_v20 = vrot.slane %v707_v12, 3  ;;  %v717_v21 = vpop.permute.xlu0 %716  ;;  %v470_v12 = vrot.slane %v465_v62, %v7845_v4 }
 0x12b   : > { %v722_v22 = vsel %vm721_vm7, %v720_v15, %v717_v21  ;;  %v725_v23 = vsel %vm721_vm7, %v717_v21, %v720_v15  ;;  %vm460_vm7 = vcmask 416768   ;;  %v6750_v15 = vld [vmem:[%s9778_s1 + $0x55] ss:$8 sm:$0x3] }
 0x12c   : > { %714 = vst [vmem:[#allocation2 + $0x20] sm:$0xe0] %v710_v19  ;;  %715 = vst [vmem:[#allocation2 + $0x28] sm:$0xe0] %v711_v20  ;;  %v739_v24 = vmul.f32 %v732_v13, %v725_v23  ;;  %v740_v25 = vmul.f32 %v736_v14, %v722_v22  ;;  %v474_v13 = vrot.slane %v465_v62, %v7848_v5 }
 0x12d   : > { %v518_v28 = vpop.permute.xlu1 %517 }
 0x12e   : > { %741 = vst [vmem:[#allocation2 + $0x30] sm:$0x7] %v739_v24  ;;  %742 = vst [vmem:[#allocation2 + $0x38] sm:$0x7] %v740_v25  ;;  %v515_v30 = vpop.permute.xlu0 %514  ;;  %v1917_v25 = vrot.slane %v6750_v15, %v7845_v4 }
 0x12f   : > { %v520_v31 = vsel %vm519_vm8, %v518_v28, %v515_v30  ;;  %v523_v32 = vsel %vm519_vm8, %v515_v30, %v518_v28  ;;  %vm1905_vm8 = vcmask 654336   ;;  %v6751_v28 = vld [vmem:[%s9778_s1 + $0x56] ss:$8 sm:$0x3] }
 0x130   : > { %v537_v33 = vmul.f32 %v530_v26, %v523_v32  ;;  %v538_v34 = vmul.f32 %v534_v27, %v520_v31  ;;  %v1921_v26 = vrot.slane %v6750_v15, %v7848_v5 }
 0x131   : > { %v553_v37 = vpop.permute.xlu1 %552 }
 0x132   : > { %v541_v39 = vrot.slane %v537_v33, 2  ;;  %v542_v40 = vrot.slane %v538_v34, 2  ;;  %v550_v41 = vpop.permute.xlu0 %549 }
 0x133   : > { %v555_v42 = vsel %vm554_vm10, %v553_v37, %v550_v41  ;;  %v558_v43 = vsel %vm554_vm10, %v550_v41, %v553_v37  ;;  %v2034_v55 = vld [vmem:[#allocation2 + $0x28] sm:$0xff]  ;;  %v2033_v58 = vld [vmem:[#allocation2 + $0x20] sm:$0xff]  ;;  %vm1940_vm10 = vcmask 646144   ;;  %v1956_v37 = vrot.slane %v6751_v28, %v7848_v5 }
 0x134   : > { %545 = vst [vmem:[#allocation2 + $0x10] ss:$-12 sps:$4 sm:$0xc1] %v541_v39   ;;  %546 = vst [vmem:[#allocation2 + $0x18] ss:$-12 sps:$4 sm:$0xc1] %v542_v40   ;;  %v572_v44 = vmul.f32 %v565_v35, %v558_v43  ;;  %v573_v45 = vmul.f32 %v569_v36, %v555_v42  ;;  %v1952_v36 = vrot.slane %v6751_v28, %v7845_v4 }
 0x135   : > { %v586_v48 = vpop.permute.xlu1 %585  ;;  %v2036_v49 = vld [vmem:[#allocation2 + $0x38] sm:$0xff]  ;;  %v2035_v50 = vld [vmem:[#allocation2 + $0x30] sm:$0xff] }
 0x136   : > { %v576_v52 = vrot.slane %v572_v44, 7  ;;  %v577_v53 = vrot.slane %v573_v45, 7  ;;  %v583_v1 = vpop.permute.xlu0 %582  ;;  %2118 = vmatprep.subr.mxu0 %v2036_v49  ;;  %v6752_v39 = vld [vmem:[%s9778_s1 + $0x57] ss:$8 sm:$0x3] }
 0x137   : > { %v588_v54 = vsel %vm587_vm14, %v586_v48, %v583_v1  ;;  %v591_v0 = vsel %vm587_vm14, %v583_v1, %v586_v48  ;;  %2119 = vmatpush1.msra.mxu0 %v2035_v50  ;;  %vm1973_vm14 = vcmask 637952   ;;  %v1989_v48 = vrot.slane %v6752_v39, %v7848_v5 }
 0x138   : > { %580 = vst [vmem:[#allocation2 + $0x10] sm:$0xe] %v576_v52  ;;  %581 = vst [vmem:[#allocation2 + $0x18] sm:$0xe] %v577_v53  ;;  %v605_v56 = vmul.f32 %v598_v46, %v591_v0  ;;  %v606_v57 = vmul.f32 %v602_v47, %v588_v54  ;;  %2120 = vmatprep.subr.mxu0 %v2034_v55  ;;  %v1985_v47 = vrot.slane %v6752_v39, %v7845_v4 }
 0x139   : > { %2121 = vmatpush1.msra.mxu0 %v2033_v58  ;;  %v485_v61 = vpop.permute.xlu1 %484  ;;  %v6753_v52 = vld [vmem:[%s9778_s1 + $0x60] ss:$8 sm:$0x3] }
 0x13a   : > { %v609_v63 = vrot.slane %v605_v56, 4  ;;  %v610_v6 = vrot.slane %v606_v57, 4  ;;  %v482_v7 = vpop.permute.xlu0 %481  ;;  %v2018_v58 = vrot.slane %v6753_v52, %v7845_v4 }
 0x13b   : > { %v487_v8 = vsel %vm486_vm2, %v485_v61, %v482_v7  ;;  %v490_v9 = vsel %vm486_vm2, %v482_v7, %v485_v61  ;;  %vm2006_vm2 = vcmask 629760   ;;  %v6748_v61 = vld [vmem:[%s9778_s1 + $0x53] ss:$8 sm:$0x3] }
 0x13c   : > { %613 = vst [vmem:[#allocation2 + $0x10] sm:$0x70] %v609_v63  ;;  %614 = vst [vmem:[#allocation2 + $0x18] sm:$0x70] %v610_v6  ;;  %v504_v10 = vmul.f32 %v497_v59, %v490_v9  ;;  %v505_v11 = vmul.f32 %v501_v60, %v487_v8  ;;  %v2022_v59 = vrot.slane %v6753_v52, %v7848_v5  ;;  %v2069_v52 = vld [vmem:[%s9860_s3 + $0x10] sm:$0xff] }
 0x13d   : > { %v459_v14 = vpop.permute.xlu1 %458 }
 0x13e   : > { %v508_v18 = vrot.slane %v504_v10, 5  ;;  %v509_v19 = vrot.slane %v505_v11, 5  ;;  %v456_v20 = vpop.permute.xlu0 %455  ;;  %v1851_v11 = vrot.slane %v6748_v61, %v7845_v4 }
 0x13f   : > { %v461_v21 = vsel %vm460_vm7, %v459_v14, %v456_v20  ;;  %v464_v22 = vsel %vm460_vm7, %v456_v20, %v459_v14  ;;  %vm1839_vm7 = vcmask 670720   ;;  %v6749_v14 = vld [vmem:[%s9778_s1 + $0x54] ss:$8 sm:$0x3] }
 0x140   : > { %512 = vst [vmem:[#allocation2] sm:$0x38] %v508_v18  ;;  %513 = vst [vmem:[#allocation2 + $0x8] sm:$0x38] %v509_v19  ;;  %v477_v23 = vmul.f32 %v470_v12, %v464_v22  ;;  %v478_v24 = vmul.f32 %v474_v13, %v461_v21  ;;  %v1855_v12 = vrot.slane %v6748_v61, %v7848_v5 }
 0x141   : > { %v1904_v27 = vpop.permute.xlu1 %1903  ;;  %v1884_v22 = vrot.slane %v6749_v14, %v7845_v4 }
 0x142   : > { %479 = vst [vmem:[#allocation2] sm:$0x7] %v477_v23  ;;  %480 = vst [vmem:[#allocation2 + $0x8] sm:$0x7] %v478_v24  ;;  %v1902_v29 = vpop.permute.xlu0 %1901  ;;  %v1888_v23 = vrot.slane %v6749_v14, %v7848_v5 }
 0x143   : > { %v1906_v30 = vsel %vm1905_vm8, %v1902_v29, %v1904_v27  ;;  %v1910_v31 = vsel %vm1905_vm8, %v1904_v27, %v1902_v29  ;;  %v2032_v32 = vld [vmem:[#allocation2 + $0x18] sm:$0xff]  ;;  %v2031_v33 = vld [vmem:[#allocation2 + $0x10] sm:$0xff]  ;;  %vm1872_vm8 = vcmask 662528   ;;  %v2176_v29 = vand.u32 127, %v467_v2 }
 0x144   : > { %v1924_v34 = vmul.f32 %v1917_v25, %v1906_v30  ;;  %v1925_v35 = vmul.f32 %v1921_v26, %v1910_v31  ;;  %2122 = vmatprep.subr.mxu0 %v2032_v32  ;;  %v2179_v25 = vadd.s32 1, %v7838_v3 }
 0x145   : > { %2123 = vmatpush1.msra.mxu0 %v2031_v33  ;;  %v1939_v38 = vpop.permute.xlu1 %1938 }
 0x146   : > { %v1928_v40 = vrot.slane %v1924_v34, 1  ;;  %v1929_v41 = vrot.slane %v1925_v35, 1  ;;  %v1937_v42 = vpop.permute.xlu0 %1936 }
 0x147   : > { %v1941_v43 = vsel %vm1940_vm10, %v1937_v42, %v1939_v38  ;;  %v1945_v44 = vsel %vm1940_vm10, %v1939_v38, %v1937_v42  ;;  %vm2087_vm10 = vcmask 1042432   ;;  %v8196_v42 = vmul.u32 4, %v2176_v29 }
 0x148   : > { %1932 = vst [vmem:[#allocation2 + $0x110] ss:$-12 sps:$4 sm:$0x83] %v1928_v40   ;;  %1933 = vst [vmem:[#allocation2 + $0x118] ss:$-12 sps:$4 sm:$0x83] %v1929_v41   ;;  %v1959_v45 = vmul.f32 %v1952_v36, %v1941_v43  ;;  %v1960_v46 = vmul.f32 %v1956_v37, %v1945_v44 }
 0x149   : > { %v1972_v49 = vpop.permute.xlu1 %1971  ;;  %v2030_v50 = vld [vmem:[#allocation2 + $0x8] sm:$0xff]  ;;  %v2029_v51 = vld [vmem:[#allocation2] sm:$0xff]  ;;  %v2177_v36 = vmul.u32 4, %v7838_v3  ;;  %v2180_v37 = vmul.u32 4, %v2179_v25  ;;  %v2189_v40 = vadd.s32 1, %v2176_v29 }
 0x14a   : > { %v1963_v53 = vrot.slane %v1959_v45, 6  ;;  %v1964_v1 = vrot.slane %v1960_v46, 6  ;;  %v1970_v54 = vpop.permute.xlu0 %1969  ;;  %2124 = vmatprep.subr.mxu0 %v2030_v50  ;;  %v2185_v45 = vadd.s32 8, %v7838_v3 }
 0x14b   : > { %v1974_v0 = vsel %vm1973_vm14, %v1970_v54, %v1972_v49  ;;  %v1978_v55 = vsel %vm1973_vm14, %v1972_v49, %v1970_v54  ;;  %2125 = vmatpush1.msra.mxu0 %v2029_v51  ;;  %vm2178_vm14 = vcmp.ge.s32.totalorder %v2176_v29, %v2177_v36  ;;  %v8198_v43 = vmul.u32 4, %v2189_v40  ;;  %v2070_v51 = vld [vmem:[%s9860_s3 + $0x18] sm:$0xff] }
 0x14c   : > { %1967 = vst [vmem:[#allocation2 + $0x110] sm:$0x1c] %v1963_v53  ;;  %1968 = vst [vmem:[#allocation2 + $0x118] sm:$0x1c] %v1964_v1  ;;  %v1992_v56 = vmul.f32 %v1985_v47, %v1974_v0  ;;  %v1993_v57 = vmul.f32 %v1989_v48, %v1978_v55  ;;  %v2067_v48 = vld [vmem:[%s9860_s3] sm:$0xff]  ;;  %v7596_v49 = vmov 0.0   ;;  %vm2188_vm3 = vcmp.ge.s32.totalorder %v2185_v45, %v8196_v42 }
 0x14d   : > { %v2005_v60 = vpop.permute.xlu1 %2004  ;;  %vm2192_vm0 = vcmp.lt.s32.totalorder %v2185_v45, %v8198_v43  ;;  %s9871_s3 = smov 112  }
 0x14e   : > { %v1996_v62 = vrot.slane %v1992_v56, 3  ;;  %v1997_v63 = vrot.slane %v1993_v57, 3  ;;  %v2003_v6 = vpop.permute.xlu0 %2002 }
 0x14f   : > { %v2007_v7 = vsel %vm2006_vm2, %v2003_v6, %v2005_v60  ;;  %v2011_v8 = vsel %vm2006_vm2, %v2005_v60, %v2003_v6  ;;  %vm2181_vm2 = vcmp.lt.s32.totalorder %v2176_v29, %v2180_v37 }
 0x150   : > { %2000 = vst [vmem:[#allocation2 + $0x110] sm:$0xe0] %v1996_v62  ;;  %2001 = vst [vmem:[#allocation2 + $0x118] sm:$0xe0] %v1997_v63  ;;  %v2025_v9 = vmul.f32 %v2018_v58, %v2007_v7  ;;  %v2026_v10 = vmul.f32 %v2022_v59, %v2011_v8 }
 0x151   : > { %v1838_v13 = vpop.permute.xlu1 %1837 }
 0x152   : > { %2027 = vst [vmem:[#allocation2 + $0x120] sm:$0x7] %v2025_v9  ;;  %2028 = vst [vmem:[#allocation2 + $0x128] sm:$0x7] %v2026_v10  ;;  %v1836_v15 = vpop.permute.xlu0 %1835 }
 0x153   : > { %v1840_v18 = vsel %vm1839_vm7, %v1836_v15, %v1838_v13  ;;  %v1844_v19 = vsel %vm1839_vm7, %v1838_v13, %v1836_v15  ;;  %vm8200_vm7 = vmand %vm2178_vm14, %vm2181_vm2  ;;  %vm2206_vm14 = vcmask 1043456  }
 0x154   : > { %v1858_v20 = vmul.f32 %v1851_v11, %v1840_v18  ;;  %v1859_v21 = vmul.f32 %v1855_v12, %v1844_v19  ;;  %v8215_v50 = vsel %vm8200_vm7, 1.0, %v7596_v49 }
 0x155   : > { %v1871_v24 = vpop.permute.xlu1 %1870 }
 0x156   : > { %v1862_v26 = vrot.slane %v1858_v20, 7  ;;  %v1863_v27 = vrot.slane %v1859_v21, 7  ;;  %v1869_v28 = vpop.permute.xlu0 %1868 }
 0x157   : > { %v1873_v30 = vsel %vm1872_vm8, %v1869_v28, %v1871_v24  ;;  %v1877_v31 = vsel %vm1872_vm8, %v1871_v24, %v1869_v28  ;;  %v2064_v41 = vld [vmem:[#allocation2 + $0x118] sm:$0xff]  ;;  %v2063_v2 = vld [vmem:[#allocation2 + $0x110] sm:$0xff]  ;;  %vm2187_vm8 = vcmp.ge.s32.totalorder %v7838_v3, %v8196_v42 }
 0x158   : > { %1866 = vst [vmem:[#allocation2 + $0x100] sm:$0xe] %v1862_v26  ;;  %1867 = vst [vmem:[#allocation2 + $0x108] sm:$0xe] %v1863_v27  ;;  %v1891_v32 = vmul.f32 %v1884_v22, %v1873_v30  ;;  %v1892_v33 = vmul.f32 %v1888_v23, %v1877_v31  ;;  %v7597_v31 = vmov 1  }
 0x159   : > { %v2066_v34 = vld [vmem:[#allocation2 + $0x128] sm:$0x7]  ;;  %v2065_v35 = vld [vmem:[#allocation2 + $0x120] sm:$0x7] }
 0x15a   : > { %v1895_v38 = vrot.slane %v1891_v32, 4  ;;  %v1896_v39 = vrot.slane %v1892_v33, 4  ;;  %6754 = vmatprep.subr.msk.mxu0 %vm2087_vm10, %v2066_v34  ;;  %v7598_v32 = vmov 2   ;;  %v7453_v33 = vld [vmem:[%s9779_s2 + $0x8] sm:$0xff] }
 0x15b   : > { %6755 = vmatpush2.msk.msra.mxu0 %vm2087_vm10, %v2065_v35  ;;  %vm2191_vm10 = vcmp.lt.s32.totalorder %v7838_v3, %v8198_v43 }
 0x15c   : > { %1899 = vst [vmem:[#allocation2 + $0x100] sm:$0x70] %v1895_v38  ;;  %1900 = vst [vmem:[#allocation2 + $0x108] sm:$0x70] %v1896_v39  ;;  %2154 = vmatprep.subr.mxu0 %v2064_v41  ;;  %v7454_v41 = vld [vmem:[%s9779_s2] sm:$0xff] }
 0x15d   : > { %2155 = vmatpush2.msra.mxu0 %v2063_v2  ;;  %vm2193_vm2 = vmand %vm2187_vm8, %vm2191_vm10  ;;  %vm2199_vm8 = vcmask 31744  }
 0x15e   : > { %v8231_v53 = vsel %vm2193_vm2, 1.0, %v7596_v49  ;;  %vm2194_vm10 = vmand %vm2188_vm3, %vm2192_vm0  ;;  %vm2988_vm3 = vcmask 1040384   ;;  %vm3519_vm0 = vcmask 293888  }
 0x15f   : > { %v8237_v1 = vsel %vm2194_vm10, 1.0, %v7596_v49 }
 0x162   : > { %v2074_v54 = vpop.permute.xlu1 %2073 }
 0x163   : > { %v2062_v46 = vld [vmem:[#allocation2 + $0x108] sm:$0xff]  ;;  %v2061_v47 = vld [vmem:[#allocation2 + $0x100] sm:$0xff]  ;;  %v2079_v58 = vpop.permute.xlu0 %2078 }
 0x164   : > { %2156 = vmatprep.subr.mxu0 %v2062_v46 }
 0x165   : > { %2157 = vmatpush2.msra.mxu0 %v2061_v47 }
 0x166   : > { %2159 = vmatmul.mubr.f32.vlgmr.msra.gmra.mxu0 %v2067_v48  ;;  %7035 = vmatprep.subr.msk.mxu0 %vm2206_vm14, %v8215_v50 }
 0x167   : > { %6757 = vmatprep.mubr.msk.f32.mxu0 %vm917_vm4, %v2070_v51  ;;  %7036 = vmatpush3.msk.msra.mxu0 %vm2206_vm14, %v8215_v50  ;;  %vm7600_vm4 = vmmov 0  }
 0x168   : > { %7054 = vmatprep.subr.mxu0 %v7596_v49 }
 0x16a   : > { %2165 = vmatmul.mubr.f32.gmra.mxu0 %v2069_v52 }
 0x16b   : > { %7037 = vmatprep.mubr.msk.f32.mxu0 %vm2199_vm8, %v8231_v53 }
 0x16e   : > { %7038 = vmatmul.mubr.msk.f32.vlgmr.msra.gmra.mxu0 %vm2199_vm8, %v8237_v1 }
 0x16f   : > { %7055 = vmatpush3.msk.msra.mxu0 %vm2988_vm3, %v8215_v50  ;;  %7056 = vmatprep.mubr.msk.f32.mxu0 %vm7600_vm4, %v7596_v49 }
 0x170   : > { %7059 = vmatprep.subr.mxu0 %v7596_v49 }
 0x172   : > { %7057 = vmatmul.mubr.msk.f32.vlgmr.msra.gmra.mxu0 %vm1212_vm5, %v8231_v53 }
 0x173   : > { %7061 = vmatprep.mubr.msk.f32.mxu0 %vm7600_vm4, %v7596_v49 }
 0x226   : > { %v2160_v0 = vpop.f32.mrf.mxu0 }
 0x227   : > { %v8241_v56 = vadd.f32 %v2160_v0, %v2074_v54 }
 0x228   : > { %v2162_v55 = vpop.f32.mrf.mxu0 }
 0x229   : > { %v8243_v57 = vadd.f32 %v2162_v55, %v2074_v54 }
 0x22a   : > { %v2166_v59 = vpop.f32.mrf.mxu0 }
 0x22b   : > { %v2285_v60 = vadd.f32 %v8243_v57, %v8241_v56  ;;  %v8247_v62 = vadd.f32 %v2166_v59, %v2079_v58 }
 0x22c   : > { %v2168_v61 = vpop.f32.mrf.mxu0 }
 0x22d   : > { %v8249_v63 = vadd.f32 %v2168_v61, %v2079_v58  ;;  %2286 = vadd.xlane.f32.xlu0 %v2285_v60 }
 0x22e   : > { %v8253_v7 = vpop.f32.mrf.mxu0 }
 0x22f   : > { %v2288_v6 = vadd.f32 %v8249_v63, %v8247_v62 }
 0x230   : > { %v8255_v8 = vpop.f32.mrf.mxu0 }
 0x231   : > { %2289 = vadd.xlane.f32.xlu1 %v2288_v6  ;;  %7044 = vmatprep.mubr.msk.f32.mxu1 %vm1010_vm9, %v8255_v8 }
 0x2b6   : > { %v2287_v10 = vpop.xlane.xlu0 %2286 }
 0x2ba   : > { %v2290_v9 = vpop.xlane.xlu1 %2289 }
 0x2bb   : > { %7040 = vmatprep.subr.mxu1 %v2290_v9 }
 0x2bc   : > { %7041 = vmatpush3.msra.mxu1 %v2290_v9 }
 0x2bd   : > { %7042 = vmatprep.subr.mxu1 %v2287_v10 }
 0x2be   : > { %7043 = vmatpush3.msra.mxu1 %v2287_v10 }
 0x2bf   : > { %7045 = vmatmul.mubr.msk.f32.vlgmr.msra.gmra.mxu1 %vm1010_vm9, %v8253_v7 }
 0x2c0   : > { %7051 = vmatprep.mubr.msk.f32.mxu1 %vm1010_vm9, %v8255_v8 }
 0x37f   : > { %v7046_v11 = vpop.f32.mrf.mxu1 }
 0x380   : > { %v2373_v12 = vmul.f32 0.0009765625, %v7046_v11 }
 0x381   : > { %v2363_v13 = vpop.f32.mrf.mxu1 }
 0x382   : > { %v2372_v14 = vmul.f32 0.0009765625, %v2363_v13  ;;  %2381 = vperm.xlu0 %7310, %v2373_v12  }
 0x384   : > { %2376 = vperm.xlu1 %7311, %v2372_v14  }
 0x388   : > { %7312 = vset.pattern.permute.xlu1 %v7597_v31 }
 0x3fd   : > { %v2382_v15 = vpop.permute.xlu0 %2381 }
 0x3fe   : > { %v2386_v18 = vsub.f32 %v8247_v62, %v2382_v15  ;;  %v2387_v19 = vsub.f32 %v8249_v63, %v2382_v15 }
 0x3ff   : > { %v2377_v20 = vpop.permute.xlu1 %2376 }
 0x400   : > { %v2390_v21 = vmul.f32 %v2386_v18, %v2386_v18  ;;  %v2391_v22 = vmul.f32 %v2387_v19, %v2387_v19  ;;  %v2384_v23 = vsub.f32 %v8241_v56, %v2377_v20  ;;  %v2385_v24 = vsub.f32 %v8243_v57, %v2377_v20 }
 0x402   : > { %v2388_v25 = vmul.f32 %v2384_v23, %v2384_v23  ;;  %v2389_v26 = vmul.f32 %v2385_v24, %v2385_v24  ;;  %v2395_v27 = vadd.f32 %v2391_v22, %v2390_v21 }
 0x404   : > { %2396 = vadd.xlane.f32.xlu1 %v2395_v27  ;;  %v2392_v28 = vadd.f32 %v2389_v26, %v2388_v25 }
 0x406   : > { %2393 = vadd.xlane.f32.xlu0 %v2392_v28 }
 0x415   : > { %2500 = vperm.xlu1 %7312, %v8041_v17  }
 0x419   : > { %7314 = vset.pattern.permute.xlu1 %v7598_v32 }
 0x41a   : > { %2512 = vperm.xlu1 %7314, %v7453_v33  }
 0x41e   : > { %7315 = vset.pattern.permute.xlu1 %v7595_v16 }
 0x48d   : > { %v2397_v29 = vpop.xlane.xlu1 %2396 }
 0x48e   : > { %7047 = vmatprep.subr.mxu1 %v2397_v29 }
 0x48f   : > { %v2394_v30 = vpop.xlane.xlu0 %2393  ;;  %7048 = vmatpush3.msra.mxu1 %v2397_v29 }
 0x490   : > { %7049 = vmatprep.subr.mxu1 %v2394_v30 }
 0x491   : > { %7050 = vmatpush3.msra.mxu1 %v2394_v30  ;;  %v2501_v2 = vpop.permute.xlu1 %2500 }
 0x492   : > { %7052 = vmatmul.mubr.msk.f32.vlgmr.msra.gmra.mxu1 %vm1010_vm9, %v8253_v7 }
 0x495   : > { %v2513_v52 = vpop.permute.xlu1 %2512 }
 0x552   : > { %v7053_v34 = vpop.f32.mrf.mxu1 }
 0x553   : > { %v2474_v35 = vmul.f32 0.0009765625, %v7053_v34  ;;  %v8341_v34 = vld [vmem:[%s9870_s4] sm:$0xff] }
 0x554   : > { %v2464_v36 = vpop.f32.mrf.mxu1 }
 0x555   : > { %v2476_v37 = vadd.f32 1e-05, %v2474_v35  ;;  %v2473_v38 = vmul.f32 0.0009765625, %v2464_v36  ;;  %v2911_v35 = vcombine.high %v8341_v34, %v8341_v34  ;;  %v7599_v36 = vmov 3  }
 0x557   : > { %7363 = vrsqrt.f32 %v2476_v37  ;;  %v2475_v39 = vadd.f32 1e-05, %v2473_v38  ;;  %6780 = vmatprep.mubr.msk.f32.mxu1 %vm1010_vm9, %v2911_v35  ;;  %v2547_v37 = vld [vmem:[%s9779_s2] sm:$0xf] }
 0x558   : > { %v6778_v38 = vld [vmem:[%s9778_s1 + $0x70] ss:$8 sm:$0x3] }
 0x559   : > { %7365 = vrsqrt.f32 %v2475_v39  ;;  %v2814_v39 = vrot.slane %v6778_v38, %v7845_v4 }
 0x564   : > { %v7364_v40 = vpop.eup %7363 }
 0x565   : > { %2486 = vperm.xlu0 %7310, %v7364_v40   ;;  %v2818_v40 = vrot.slane %v6778_v38, %v7848_v5 }
 0x566   : > { %v7366_v17 = vpop.eup %7365 }
 0x567   : > { %2481 = vperm.xlu1 %7315, %v7366_v17  }
 0x569   : > { %7313 = vset.pattern.permute.xlu0 %v7597_v31 }
 0x56a   : > { %2495 = vperm.xlu0 %7313, %v7454_v41  }
 0x56b   : > { %7316 = vset.pattern.permute.xlu1 %v7598_v32 }
 0x56c   : > { %2508 = vperm.xlu1 %7316, %v7454_v41  }
 0x56e   : > { %7317 = vset.pattern.permute.xlu0 %v7599_v36 }
 0x570   : > { %7320 = vset.pattern.permute.xlu1 %v7595_v16 }
 0x5e0   : > { %v2487_v45 = vpop.permute.xlu0 %2486 }
 0x5e1   : > { %v2491_v46 = vmul.f32 %v2487_v45, %v2386_v18  ;;  %v2492_v47 = vmul.f32 %v2487_v45, %v2387_v19 }
 0x5e2   : > { %v2482_v59 = vpop.permute.xlu1 %2481 }
 0x5e3   : > { %v2505_v48 = vmul.f32 %v2501_v2, %v2491_v46  ;;  %v2506_v51 = vmul.f32 %v2501_v2, %v2492_v47  ;;  %v2489_v60 = vmul.f32 %v2482_v59, %v2384_v23  ;;  %v2490_v61 = vmul.f32 %v2482_v59, %v2385_v24  ;;  %v6773_v59 = vld [vmem:[%s9778_s1 + $0x62] ss:$8 sm:$0x3] }
 0x5e5   : > { %v2517_v54 = vadd.f32 %v2513_v52, %v2505_v48  ;;  %v2518_v0 = vadd.f32 %v2513_v52, %v2506_v51  ;;  %v2496_v6 = vpop.permute.xlu0 %2495 }
 0x5e6   : > { %v2503_v9 = vmul.f32 %v2496_v6, %v2489_v60  ;;  %v2504_v10 = vmul.f32 %v2496_v6, %v2490_v61  ;;  %v8389_v61 = vrot.slane %v6773_v59, %v7845_v4  ;;  %v8392_v6 = vrot.slane %v6773_v59, %v7848_v5 }
 0x5e7   : > { %v6770_v55 = vmul.f32 -1.442695, %v2517_v54  ;;  %v6771_v58 = vmul.f32 -1.442695, %v2518_v0  ;;  %v2509_v11 = vpop.permute.xlu1 %2508 }
 0x5e8   : > { %v2515_v15 = vadd.f32 %v2509_v11, %v2503_v9  ;;  %v2516_v19 = vadd.f32 %v2509_v11, %v2504_v10  ;;  %v6772_v10 = vld [vmem:[%s9778_s1 + $0x61] ss:$8 sm:$0x3] }
 0x5e9   : > { %7367 = vpow2.f32 %v6770_v55 }
 0x5ea   : > { %7369 = vpow2.f32 %v6771_v58  ;;  %v6768_v20 = vmul.f32 -1.442695, %v2515_v15  ;;  %v6769_v21 = vmul.f32 -1.442695, %v2516_v19 }
 0x5f6   : > { %v7368_v12 = vpop.eup %7367 }
 0x5f7   : > { %v7370_v13 = vpop.eup %7369  ;;  %v2533_v14 = vadd.f32 1.0, %v7368_v12 }
 0x5f8   : > { %v2534_v18 = vadd.f32 1.0, %v7370_v13 }
 0x5f9   : > { %7371 = vrcp.f32 %v2533_v14 }
 0x5fa   : > { %7373 = vrcp.f32 %v2534_v18  ;;  %v8406_v18 = vrot.slane %v6772_v10, %v7845_v4 }
 0x5fb   : > { %7375 = vpow2.f32 %v6768_v20 }
 0x5fc   : > { %7377 = vpow2.f32 %v6769_v21 }
 0x606   : > { %v7372_v22 = vpop.eup %7371 }
 0x607   : > { %v7374_v25 = vpop.eup %7373  ;;  %v8278_v23 = vmul.f32 %v7372_v22, %v2517_v54  ;;  %v6777_v22 = vld [vmem:[%s9778_s1 + $0x67] ss:$8 sm:$0x3] }
 0x608   : > { %v8280_v24 = vmul.f32 %v7374_v25, %v2518_v0  ;;  %v7376_v26 = vpop.eup %7375  ;;  %v2775_v35 = vrot.slane %v6777_v22, %v7845_v4 }
 0x609   : > { %2794 = vrot.lane.b32.xlu0 %v8278_v23, %s9807_s21  ;;  %v7378_v27 = vpop.eup %7377  ;;  %v2531_v28 = vadd.f32 1.0, %v7376_v26 }
 0x60a   : > { %2796 = vrot.lane.b32.xlu1 %v8280_v24, %s9807_s21  ;;  %v2532_v29 = vadd.f32 1.0, %v7378_v27 }
 0x60b   : > { %7379 = vrcp.f32 %v2531_v28 }
 0x60c   : > { %7381 = vrcp.f32 %v2532_v29 }
 0x60d   : > { %2755 = vrot.lane.b32.xlu0 %v8278_v23, %s9863_s30 }
 0x60e   : > { %2757 = vrot.lane.b32.xlu1 %v8280_v24, %s9863_s30 }
 0x611   : > { %2716 = vrot.lane.b32.xlu0 %v8278_v23, %s9864_s16 }
 0x612   : > { %2718 = vrot.lane.b32.xlu1 %v8280_v24, %s9864_s16 }
 0x615   : > { %2671 = vrot.lane.b32.xlu0 %v8280_v24, %s9865_s22 }
 0x616   : > { %2677 = vrot.lane.b32.xlu1 %v8278_v23, %s9865_s22 }
 0x618   : > { %v7380_v30 = vpop.eup %7379 }
 0x619   : > { %2632 = vrot.lane.b32.xlu0 %v8280_v24, %s9866_s15  ;;  %v7382_v31 = vpop.eup %7381  ;;  %v8310_v32 = vmul.f32 %v7380_v30, %v2515_v15  ;;  %v2779_v30 = vrot.slane %v6777_v22, %v7848_v5 }
 0x61a   : > { %2638 = vrot.lane.b32.xlu1 %v8278_v23, %s9866_s15  ;;  %v8312_v33 = vmul.f32 %v7382_v31, %v2516_v19  ;;  %v8409_v19 = vrot.slane %v6772_v10, %v7848_v5 }
 0x61d   : > { %2593 = vrot.lane.b32.xlu0 %v8280_v24, %s9867_s24 }
 0x61e   : > { %2599 = vrot.lane.b32.xlu1 %v8278_v23, %s9867_s24 }
 0x621   : > { %2552 = vrot.lane.b32.xlu0 %v8280_v24, %s9868_s20 }
 0x622   : > { %2560 = vrot.lane.b32.xlu1 %v8278_v23, %s9868_s20 }
 0x625   : > { %2790 = vrot.lane.b32.xlu0 %v8310_v32, %s9807_s21 }
 0x626   : > { %2792 = vrot.lane.b32.xlu1 %v8312_v33, %s9807_s21  ;;  %s8621_s21 = sand.u32 1, %s7537_s26   ;;  %s9900_s26 = smov 56  }
 0x627   : > { %s9810_s4 = sshll.u32 %s8621_s21, 5 }
 0x628   : > { %s8629_s17 = scalar_lea.vmem [#allocation3], %s9810_s4  ;;  %s9821_s4 = smov 121  }
 0x629   : > { %2751 = vrot.lane.b32.xlu0 %v8310_v32, %s9863_s30 }
 0x62a   : > { %2753 = vrot.lane.b32.xlu1 %v8312_v33, %s9863_s30 }
 0x62d   : > { %2712 = vrot.lane.b32.xlu0 %v8310_v32, %s9864_s16 }
 0x62e   : > { %2714 = vrot.lane.b32.xlu1 %v8312_v33, %s9864_s16 }
 0x631   : > { %2833 = vrot.lane.b32.xlu0 %v8278_v23, %s9869_s23 }
 0x632   : > { %2835 = vrot.lane.b32.xlu1 %v8280_v24, %s9869_s23 }
 0x635   : > { %2669 = vrot.lane.b32.xlu0 %v8312_v33, %s9865_s22 }
 0x636   : > { %2675 = vrot.lane.b32.xlu1 %v8310_v32, %s9865_s22 }
 0x639   : > { %2630 = vrot.lane.b32.xlu0 %v8312_v33, %s9866_s15 }
 0x63a   : > { %2636 = vrot.lane.b32.xlu1 %v8310_v32, %s9866_s15 }
 0x63d   : > { %2591 = vrot.lane.b32.xlu0 %v8312_v33, %s9867_s24 }
 0x63e   : > { %2597 = vrot.lane.b32.xlu1 %v8310_v32, %s9867_s24 }
 0x641   : > { %2550 = vrot.lane.b32.xlu0 %v8312_v33, %s9868_s20 }
 0x642   : > { %2558 = vrot.lane.b32.xlu1 %v8310_v32, %s9868_s20 }
 0x645   : > { %2829 = vrot.lane.b32.xlu0 %v8310_v32, %s9869_s23 }
 0x646   : > { %2831 = vrot.lane.b32.xlu1 %v8312_v33, %s9869_s23 }
 0x649   : > { %2907 = vperm.xlu0 %7317, %v2547_v37   ;;  %v6776_v37 = vld [vmem:[%s9778_s1 + $0x66] ss:$8 sm:$0x3] }
 0x64a   : > { %v2736_v59 = vrot.slane %v6776_v37, %v7845_v4 }
 0x64d   : > { %7318 = vset.pattern.permute.xlu0 %v7595_v16 }
 0x67b   : > { %v2795_v17 = vpop.permute.xlu0 %2794 }
 0x67c   : > { %v2797_v41 = vpop.permute.xlu1 %2796 }
 0x67d   : > { %v2799_v2 = vsel %vm1449_vm12, %v2795_v17, %v2797_v41  ;;  %v2807_v45 = vsel %vm1449_vm12, %v2797_v41, %v2795_v17 }
 0x67e   : > { %v2823_v46 = vmul.f32 %v2814_v39, %v2799_v2  ;;  %v2824_v47 = vmul.f32 %v2818_v40, %v2807_v45 }
 0x67f   : > { %v2756_v48 = vpop.permute.xlu0 %2755 }
 0x680   : > { %v2758_v51 = vpop.permute.xlu1 %2757  ;;  %2914 = vmatprep.subr.mxu1 %v2824_v47 }
 0x681   : > { %2915 = vmatpush1.msra.mxu1 %v2823_v46  ;;  %v2768_v36 = vsel %vm1416_vm11, %v2758_v51, %v2756_v48  ;;  %v2760_v41 = vsel %vm1416_vm11, %v2756_v48, %v2758_v51 }
 0x682   : > { %v2785_v47 = vmul.f32 %v2779_v30, %v2768_v36 }
 0x683   : > { %v2717_v52 = vpop.permute.xlu0 %2716 }
 0x684   : > { %v2719_v54 = vpop.permute.xlu1 %2718 }
 0x685   : > { %v2721_v48 = vsel %vm1247_vm1, %v2717_v52, %v2719_v54 }
 0x687   : > { %v8377_v0 = vpop.permute.xlu0 %2671 }
 0x688   : > { %v8379_v55 = vpop.permute.xlu1 %2677 }
 0x68b   : > { %v8381_v58 = vpop.permute.xlu0 %2632 }
 0x68c   : > { %v8386_v60 = vpop.permute.xlu1 %2638 }
 0x68f   : > { %v2594_v9 = vpop.permute.xlu0 %2593 }
 0x690   : > { %v2600_v11 = vpop.permute.xlu1 %2599 }
 0x691   : > { %v2602_v12 = vsel %vm1010_vm9, %v2600_v11, %v2594_v9  ;;  %v2608_v13 = vsel %vm1010_vm9, %v2594_v9, %v2600_v11  ;;  %v2740_v9 = vrot.slane %v6776_v37, %v7848_v5  ;;  %v2784_v11 = vmul.f32 %v2775_v35, %v2760_v41 }
 0x692   : > { %v8400_v14 = vmul.f32 %v8389_v61, %v2608_v13  ;;  %v8403_v15 = vmul.f32 %v8392_v6, %v2602_v12  ;;  %v2729_v12 = vsel %vm1247_vm1, %v2719_v54, %v2717_v52  ;;  %v2686_v41 = vsel %vm1212_vm5, %v8377_v0, %v8379_v55 }
 0x693   : > { %v2553_v20 = vpop.permute.xlu0 %2552 }
 0x694   : > { %2628 = vst [vmem:[#allocation2 + $0x30] sm:$0xff] %v8400_v14  ;;  %2629 = vst [vmem:[#allocation2 + $0x38] sm:$0xff] %v8403_v15  ;;  %v2561_v21 = vpop.permute.xlu1 %2560 }
 0x695   : > { %v2563_v25 = vsel %vm983_vm15, %v2561_v21, %v2553_v20  ;;  %v2569_v26 = vsel %vm983_vm15, %v2553_v20, %v2561_v21  ;;  %v2746_v21 = vmul.f32 %v2740_v9, %v2729_v12 }
 0x696   : > { %v8419_v27 = vmul.f32 %v8406_v18, %v2569_v26  ;;  %v8422_v28 = vmul.f32 %v8409_v19, %v2563_v25  ;;  %v2745_v25 = vmul.f32 %v2736_v59, %v2721_v48  ;;  %v6775_v26 = vld [vmem:[%s9778_s1 + $0x64] ss:$8 sm:$0x3] }
 0x697   : > { %v2791_v29 = vpop.permute.xlu0 %2790  ;;  %v2693_v37 = vrot.slane %v6775_v26, %v7845_v4 }
 0x698   : > { %2589 = vst [vmem:[#allocation2 + $0x10] sm:$0xff] %v8419_v27  ;;  %2590 = vst [vmem:[#allocation2 + $0x18] sm:$0xff] %v8422_v28  ;;  %v2793_v31 = vpop.permute.xlu1 %2792 }
 0x699   : > { %v2798_v38 = vsel %vm1449_vm12, %v2791_v29, %v2793_v31  ;;  %v2806_v17 = vsel %vm1449_vm12, %v2793_v31, %v2791_v29 }
 0x69a   : > { %v2821_v2 = vmul.f32 %v2814_v39, %v2798_v38  ;;  %v2822_v45 = vmul.f32 %v2818_v40, %v2806_v17  ;;  %v2680_v38 = vsel %vm1212_vm5, %v8379_v55, %v8377_v0  ;;  %v6774_v17 = vld [vmem:[%s9778_s1 + $0x63] ss:$8 sm:$0x3] }
 0x69b   : > { %v2752_v46 = vpop.permute.xlu0 %2751 }
 0x69c   : > { %v2754_v10 = vpop.permute.xlu1 %2753  ;;  %2916 = vmatprep.subr.mxu1 %v2822_v45 }
 0x69d   : > { %v2759_v13 = vsel %vm1416_vm11, %v2752_v46, %v2754_v10  ;;  %v2767_v20 = vsel %vm1416_vm11, %v2754_v10, %v2752_v46  ;;  %2917 = vmatpush1.msra.mxu1 %v2821_v2  ;;  %v2654_v46 = vrot.slane %v6774_v17, %v7845_v4  ;;  %v2641_v10 = vsel %vm1043_vm6, %v8386_v60, %v8381_v58 }
 0x69e   : > { %v2782_v39 = vmul.f32 %v2775_v35, %v2759_v13  ;;  %v2783_v40 = vmul.f32 %v2779_v30, %v2767_v20  ;;  %2918 = vmatprep.subr.mxu1 %v2785_v47  ;;  %v2697_v30 = vrot.slane %v6775_v26, %v7848_v5  ;;  %v2658_v47 = vrot.slane %v6774_v17, %v7848_v5 }
 0x69f   : > { %v2713_v51 = vpop.permute.xlu0 %2712  ;;  %2919 = vmatpush1.msra.mxu1 %v2784_v11 }
 0x6a0   : > { %v2715_v22 = vpop.permute.xlu1 %2714  ;;  %2920 = vmatprep.subr.mxu1 %v2783_v40  ;;  %v2703_v45 = vmul.f32 %v2697_v30, %v2680_v38 }
 0x6a1   : > { %v2720_v29 = vsel %vm1247_vm1, %v2713_v51, %v2715_v22  ;;  %v2728_v31 = vsel %vm1247_vm1, %v2715_v22, %v2713_v51  ;;  %2921 = vmatpush1.msra.mxu1 %v2782_v39 }
 0x6a2   : > { %v2743_v36 = vmul.f32 %v2736_v59, %v2720_v29  ;;  %v2744_v52 = vmul.f32 %v2740_v9, %v2728_v31  ;;  %2922 = vmatprep.subr.mxu1 %v2746_v21  ;;  %v2702_v9 = vmul.f32 %v2693_v37, %v2686_v41 }
 0x6a3   : > { %v8446_v54 = vpop.permute.xlu0 %2833  ;;  %2923 = vmatpush1.msra.mxu1 %v2745_v25 }
 0x6a4   : > { %v2836_v35 = vpop.permute.xlu1 %2835  ;;  %2924 = vmatprep.subr.mxu1 %v2744_v52 }
 0x6a5   : > { %2925 = vmatpush1.msra.mxu1 %v2743_v36 }
 0x6a6   : > { %2926 = vmatprep.subr.mxu1 %v8280_v24 }
 0x6a7   : > { %v2670_v2 = vpop.permute.xlu0 %2669  ;;  %2927 = vmatpush1.msra.mxu1 %v8278_v23  ;;  %v2647_v23 = vsel %vm1043_vm6, %v8381_v58, %v8386_v60  ;;  %v6779_v60 = vld [vmem:[%s9778_s1 + $0x71] ss:$8 sm:$0x3] }
 0x6a8   : > { %v2676_v59 = vpop.permute.xlu1 %2675  ;;  %2928 = vmatprep.subr.mxu1 %v8312_v33  ;;  %v2664_v33 = vmul.f32 %v2658_v47, %v2641_v10  ;;  %v2663_v20 = vmul.f32 %v2654_v46, %v2647_v23  ;;  %v2857_v31 = vrot.slane %v6779_v60, %v7848_v5  ;;  %v2853_v52 = vrot.slane %v6779_v60, %v7845_v4 }
 0x6a9   : > { %v2679_v0 = vsel %vm1212_vm5, %v2676_v59, %v2670_v2  ;;  %v2685_v24 = vsel %vm1212_vm5, %v2670_v2, %v2676_v59  ;;  %2929 = vmatpush1.msra.mxu1 %v8310_v32  ;;  %v7601_v60 = vmov 4  }
 0x6aa   : > { %v2700_v55 = vmul.f32 %v2693_v37, %v2685_v24  ;;  %v2701_v11 = vmul.f32 %v2697_v30, %v2679_v0  ;;  %2930 = vmatprep.subr.mxu1 %v2703_v45  ;;  %v2846_v30 = vsel %vm1482_vm13, %v2836_v35, %v8446_v54 }
 0x6ab   : > { %v2631_v12 = vpop.permute.xlu0 %2630  ;;  %2931 = vmatpush1.msra.mxu1 %v2702_v9  ;;  %v2863_v17 = vmul.f32 %v2857_v31, %v2846_v30 }
 0x6ac   : > { %v2637_v13 = vpop.permute.xlu1 %2636  ;;  %2932 = vmatprep.subr.mxu1 %v2701_v11 }
 0x6ad   : > { %v2640_v48 = vsel %vm1043_vm6, %v2637_v13, %v2631_v12  ;;  %v2646_v39 = vsel %vm1043_vm6, %v2631_v12, %v2637_v13  ;;  %2933 = vmatpush1.msra.mxu1 %v2700_v55 }
 0x6ae   : > { %v2661_v40 = vmul.f32 %v2654_v46, %v2646_v39  ;;  %v2662_v32 = vmul.f32 %v2658_v47, %v2640_v48  ;;  %2934 = vmatprep.subr.mxu1 %v2664_v33 }
 0x6af   : > { %v2592_v51 = vpop.permute.xlu0 %2591  ;;  %2935 = vmatpush1.msra.mxu1 %v2663_v20 }
 0x6b0   : > { %2665 = vst [vmem:[#allocation2 + $0x40] sm:$0xff] %v2661_v40  ;;  %2666 = vst [vmem:[#allocation2 + $0x48] sm:$0xff] %v2662_v32  ;;  %v2598_v58 = vpop.permute.xlu1 %2597  ;;  %2936 = vmatprep.subr.mxu1 %v2662_v32 }
 0x6b1   : > { %v2601_v21 = vsel %vm1010_vm9, %v2598_v58, %v2592_v51  ;;  %v2607_v22 = vsel %vm1010_vm9, %v2592_v51, %v2598_v58  ;;  %2937 = vmatpush1.msra.mxu1 %v2661_v40  ;;  %v2985_v58 = vld [vmem:[%s9779_s2] sm:$0xf] }
 0x6b2   : > { %v2622_v25 = vmul.f32 %v8389_v61, %v2607_v22  ;;  %v2623_v26 = vmul.f32 %v8392_v6, %v2601_v21  ;;  %2938 = vmatprep.subr.mxu1 %v8403_v15  ;;  %v2838_v15 = vsel %vm1482_vm13, %v8446_v54, %v2836_v35 }
 0x6b3   : > { %v2551_v29 = vpop.permute.xlu0 %2550  ;;  %2939 = vmatpush1.msra.mxu1 %v8400_v14  ;;  %v2862_v2 = vmul.f32 %v2853_v52, %v2838_v15 }
 0x6b4   : > { %2626 = vst [vmem:[#allocation2 + $0x20] sm:$0xff] %v2622_v25  ;;  %2627 = vst [vmem:[#allocation2 + $0x28] sm:$0xff] %v2623_v26  ;;  %v2559_v36 = vpop.permute.xlu1 %2558  ;;  %2940 = vmatprep.subr.mxu1 %v2623_v26 }
 0x6b5   : > { %v2562_v61 = vsel %vm983_vm15, %v2559_v36, %v2551_v29  ;;  %v2568_v6 = vsel %vm983_vm15, %v2551_v29, %v2559_v36  ;;  %2941 = vmatpush1.msra.mxu1 %v2622_v25 }
 0x6b6   : > { %v2583_v14 = vmul.f32 %v8406_v18, %v2568_v6  ;;  %v2584_v37 = vmul.f32 %v8409_v19, %v2562_v61  ;;  %2942 = vmatprep.subr.mxu1 %v8422_v28  ;;  %v8502_v19 = vpop.f32.mrf.mxu0 }
 0x6b7   : > { %v2830_v38 = vpop.permute.xlu0 %2829  ;;  %2943 = vmatpush1.msra.mxu1 %v8419_v27 }
 0x6b8   : > { %2587 = vst [vmem:[#allocation2] sm:$0xff] %v2583_v14  ;;  %2588 = vst [vmem:[#allocation2 + $0x8] sm:$0xff] %v2584_v37  ;;  %v2832_v41 = vpop.permute.xlu1 %2831  ;;  %2944 = vmatprep.subr.mxu1 %v2584_v37  ;;  %v7058_v27 = vpop.f32.mrf.mxu0 }
 0x6b9   : > { %v2837_v45 = vsel %vm1482_vm13, %v2830_v38, %v2832_v41  ;;  %v2845_v46 = vsel %vm1482_vm13, %v2832_v41, %v2830_v38  ;;  %2945 = vmatpush1.msra.mxu1 %v2583_v14 }
 0x6ba   : > { %v2860_v54 = vmul.f32 %v2853_v52, %v2837_v45  ;;  %v2861_v18 = vmul.f32 %v2857_v31, %v2845_v46  ;;  %2974 = vmatprep.subr.mxu1 %v2863_v17  ;;  %v7602_v31 = vmov 5  }
 0x6bb   : > { %2975 = vmatpush2.msra.mxu1 %v2862_v2 }
 0x6bc   : > { %2976 = vmatprep.subr.mxu1 %v2861_v18 }
 0x6bd   : > { %2977 = vmatpush2.msra.mxu1 %v2860_v54 }
 0x6be   : > { %2979 = vmatmul.mubr.f32.vlgmr.msra.gmra.mxu1 %v8341_v34  ;;  %7064 = vmatprep.subr.mxu1 %v7596_v49 }
 0x6bf   : > { %7066 = vmatprep.mubr.msk.f32.mxu1 %vm7600_vm4, %v7596_v49 }
 0x6c4   : > { %v2908_v28 = vpop.permute.xlu0 %2907 }
 0x77e   : > { %v2980_v35 = vpop.f32.mrf.mxu1 }
 0x77f   : > { %v2981_v47 = vadd.f32 %v2980_v35, %v2908_v28 }
 0x780   : > { %v2982_v59 = vpop.f32.mrf.mxu1 }
 0x781   : > { %v2983_v9 = vadd.f32 %v2982_v59, %v2908_v28  ;;  %v3061_v10 = vsel %vm2206_vm14, %v2981_v47, 0.0  ;;  %v8544_v59 = vld [vmem:[%s9779_s2 + $0x8] sm:$0xff] }
 0x783   : > { %v3062_v0 = vsel %vm2206_vm14, %v2983_v9, 0.0 }
 0x784   : > { %v3063_v24 = vadd.f32 %v3062_v0, %v3061_v10  ;;  %v6795_v10 = vld [vmem:[%s9778_s1 + $0x70] ss:$8 sm:$0x3] }
 0x786   : > { %3064 = vadd.xlane.f32.xlu1 %v3063_v24  ;;  %v3455_v24 = vrot.slane %v6795_v10, %v7845_v4 }
 0x80f   : > { %v3065_v34 = vpop.xlane.xlu1 %3064 }
 0x810   : > { %7060 = vmatpush3.msk.msra.mxu0 %vm2206_vm14, %v3065_v34  ;;  %v3459_v34 = vrot.slane %v6795_v10, %v7848_v5 }
 0x811   : > { %7062 = vmatmul.mubr.msk.f32.vlgmr.msra.gmra.mxu0 %vm2199_vm8, %v8502_v19 }
 0x812   : > { %3596 = vmatprep.mubr.f32.mxu0 %v7596_v49 }
 0x8d1   : > { %v3138_v23 = vpop.f32.mrf.mxu0 }
 0x8d2   : > { %v3142_v55 = vmul.f32 0.0009765625, %v3138_v23 }
 0x8d3   : > { %v7063_v11 = vpop.f32.mrf.mxu0 }
 0x8d4   : > { %3145 = vperm.xlu0 %7318, %v3142_v55  }
 0x8d8   : > { %7319 = vset.pattern.permute.xlu0 %v7601_v60 }
 0x94f   : > { %v3146_v12 = vpop.permute.xlu0 %3145 }
 0x950   : > { %v3148_v33 = vsub.f32 %v2981_v47, %v3146_v12  ;;  %v3149_v13 = vsub.f32 %v2983_v9, %v3146_v12  ;;  %v8539_v47 = vld [vmem:[%s9779_s2] sm:$0xff]  ;;  %v7603_v9 = vmov 6  }
 0x952   : > { %v3150_v20 = vmul.f32 %v3148_v33, %v3148_v33  ;;  %v3151_v48 = vmul.f32 %v3149_v13, %v3149_v13 }
 0x954   : > { %v3152_v39 = vsel %vm2206_vm14, %v3150_v20, 0.0  ;;  %v3153_v40 = vsel %vm2206_vm14, %v3151_v48, 0.0 }
 0x955   : > { %v3154_v32 = vadd.f32 %v3153_v40, %v3152_v39 }
 0x957   : > { %3155 = vadd.xlane.f32.xlu0 %v3154_v32 }
 0x96d   : > { %3242 = vperm.xlu0 %7319, %v2985_v58  }
 0x971   : > { %7323 = vset.pattern.permute.xlu0 %v7603_v9 }
 0x9e0   : > { %v3156_v51 = vpop.xlane.xlu0 %3155 }
 0x9e1   : > { %7065 = vmatpush3.msk.msra.mxu1 %vm2206_vm14, %v3156_v51 }
 0x9e2   : > { %7067 = vmatmul.mubr.msk.f32.vlgmr.msra.gmra.mxu1 %vm2199_vm8, %v8502_v19 }
 0x9e3   : > { %7073 = vmatprep.mubr.msk.f32.mxu1 %vm1010_vm9, %v8255_v8 }
 0x9e8   : > { %v3243_v52 = vpop.permute.xlu0 %3242 }
 0xaa2   : > { %v3226_v21 = vpop.f32.mrf.mxu1 }
 0xaa3   : > { %v3230_v22 = vmul.f32 0.0009765625, %v3226_v21 }
 0xaa4   : > { %v7068_v25 = vpop.f32.mrf.mxu1 }
 0xaa5   : > { %v3231_v26 = vadd.f32 1e-05, %v3230_v22  ;;  %v6793_v25 = vld [vmem:[%s9778_s1 + $0x66] ss:$8 sm:$0x3] }
 0xaa7   : > { %7383 = vrsqrt.f32 %v3231_v26 }
 0xab4   : > { %v7384_v29 = vpop.eup %7383 }
 0xab5   : > { %3235 = vperm.xlu1 %7320, %v7384_v29   ;;  %v3399_v29 = vrot.slane %v6793_v25, %v7845_v4 }
 0xab9   : > { %7321 = vset.pattern.permute.xlu1 %v7602_v31  ;;  %v3403_v31 = vrot.slane %v6793_v25, %v7848_v5 }
 0xaba   : > { %3248 = vperm.xlu1 %7321, %v2985_v58  }
 0xabe   : > { %7322 = vset.pattern.permute.xlu1 %v7603_v9 }
 0xb30   : > { %v3236_v36 = vpop.permute.xlu1 %3235 }
 0xb31   : > { %v3238_v30 = vmul.f32 %v3236_v36, %v3148_v33  ;;  %v3239_v61 = vmul.f32 %v3236_v36, %v3149_v13  ;;  %v6796_v13 = vld [vmem:[%s9778_s1 + $0x71] ss:$8 sm:$0x3] }
 0xb32   : > { %v3486_v40 = vrot.slane %v6796_v13, %v7845_v4  ;;  %v3490_v32 = vrot.slane %v6796_v13, %v7848_v5 }
 0xb33   : > { %v3245_v6 = vmul.f32 %v3243_v52, %v3238_v30  ;;  %v3246_v15 = vmul.f32 %v3243_v52, %v3239_v61 }
 0xb35   : > { %v3249_v14 = vpop.permute.xlu1 %3248 }
 0xb36   : > { %v3251_v37 = vadd.f32 %v3249_v14, %v3245_v6  ;;  %v3252_v38 = vadd.f32 %v3249_v14, %v3246_v15  ;;  %v6794_v15 = vld [vmem:[%s9778_s1 + $0x67] ss:$8 sm:$0x3] }
 0xb38   : > { %v6787_v17 = vmul.f32 -1.442695, %v3251_v37  ;;  %v6788_v41 = vmul.f32 -1.442695, %v3252_v38 }
 0xb3a   : > { %7385 = vpow2.f32 %v6787_v17 }
 0xb3b   : > { %7387 = vpow2.f32 %v6788_v41 }
 0xb47   : > { %v7386_v2 = vpop.eup %7385 }
 0xb48   : > { %v7388_v45 = vpop.eup %7387  ;;  %v3259_v46 = vadd.f32 1.0, %v7386_v2 }
 0xb49   : > { %v3260_v54 = vadd.f32 1.0, %v7388_v45  ;;  %v3430_v45 = vrot.slane %v6794_v15, %v7845_v4 }
 0xb4a   : > { %7389 = vrcp.f32 %v3259_v46  ;;  %v3434_v46 = vrot.slane %v6794_v15, %v7848_v5 }
 0xb4b   : > { %7391 = vrcp.f32 %v3260_v54  ;;  %v6792_v54 = vld [vmem:[%s9778_s1 + $0x64] ss:$8 sm:$0x3] }
 0xb4c   : > { %v3366_v10 = vrot.slane %v6792_v54, %v7845_v4 }
 0xb57   : > { %v7390_v18 = vpop.eup %7389 }
 0xb58   : > { %v7392_v27 = vpop.eup %7391  ;;  %v3265_v28 = vmul.f32 %v7390_v18, %v3251_v37 }
 0xb59   : > { %v3266_v35 = vmul.f32 %v7392_v27, %v3252_v38 }
 0xb5a   : > { %3383 = vst [vmem:[#allocation2 + $0x20] sm:$0xf] %v3265_v28  ;;  %3355 = vrot.lane.b32.xlu0 %v3265_v28, %s9865_s22  ;;  %3441 = vrot.lane.b32.xlu1 %v3265_v28, %s9871_s3 }
 0xb5b   : > { %3384 = vst [vmem:[#allocation2 + $0x28] sm:$0xf] %v3266_v35 }
 0xb5e   : > { %3299 = vrot.lane.b32.xlu0 %v3265_v28, %s9867_s24  ;;  %3443 = vrot.lane.b32.xlu1 %v3266_v35, %s9871_s3 }
 0xb62   : > { %3330 = vrot.lane.b32.xlu0 %v3265_v28, %s9866_s15  ;;  %3472 = vrot.lane.b32.xlu1 %v3265_v28, %s9869_s23 }
 0xb66   : > { %3274 = vrot.lane.b32.xlu0 %v3265_v28, %s9868_s20  ;;  %3474 = vrot.lane.b32.xlu1 %v3266_v35, %s9869_s23 }
 0xb6a   : > { %3385 = vrot.lane.b32.xlu1 %v3265_v28, %s9864_s16  ;;  %3511 = vperm.xlu0 %7323, %v8539_v47  }
 0xb6e   : > { %3387 = vrot.lane.b32.xlu1 %v3266_v35, %s9864_s16  ;;  %7325 = vset.pattern.permute.xlu0 %v7595_v16 }
 0xb72   : > { %3416 = vrot.lane.b32.xlu1 %v3265_v28, %s9863_s30 }
 0xb76   : > { %3418 = vrot.lane.b32.xlu1 %v3266_v35, %s9863_s30 }
 0xb7a   : > { %3352 = vrot.lane.b32.xlu1 %v3266_v35, %s9865_s22 }
 0xb7e   : > { %3296 = vrot.lane.b32.xlu1 %v3266_v35, %s9867_s24 }
 0xb82   : > { %3327 = vrot.lane.b32.xlu1 %v3266_v35, %s9866_s15 }
 0xb86   : > { %3270 = vrot.lane.b32.xlu1 %v3266_v35, %s9868_s20 }
 0xb8a   : > { %3516 = vperm.xlu1 %7322, %v8544_v59  }
 0xb8e   : > { %7324 = vset.pattern.permute.xlu1 %v7595_v16 }
 0xbcc   : > { %v3442_v0 = vpop.permute.xlu1 %3441  ;;  %v3356_v2 = vpop.permute.xlu0 %3355 }
 0xbd0   : > { %v3444_v23 = vpop.permute.xlu1 %3443 }
 0xbd1   : > { %v3445_v55 = vsel %vm1449_vm12, %v3442_v0, %v3444_v23  ;;  %v3449_v11 = vsel %vm1449_vm12, %v3444_v23, %v3442_v0  ;;  %v3370_v0 = vrot.slane %v6792_v54, %v7848_v5 }
 0xbd2   : > { %v3462_v12 = vmul.f32 %v3455_v24, %v3445_v55  ;;  %v3463_v33 = vmul.f32 %v3459_v34, %v3449_v11  ;;  %v6790_v24 = vld [vmem:[%s9778_s1 + $0x62] ss:$8 sm:$0x3]  ;;  %v3300_v34 = vpop.permute.xlu0 %3299 }
 0xbd3   : > { %v3310_v13 = vrot.slane %v6790_v24, %v7845_v4 }
 0xbd4   : > { %v3466_v20 = vrot.slane %v3462_v12, 4  ;;  %v3467_v48 = vrot.slane %v3463_v33, 4  ;;  %v3473_v39 = vpop.permute.xlu1 %3472 }
 0xbd6   : > { %3470 = vst [vmem:[#allocation2 + $0x30] sm:$0xf0] %v3466_v20  ;;  %3471 = vst [vmem:[#allocation2 + $0x38] sm:$0xf0] %v3467_v48  ;;  %v3314_v20 = vrot.slane %v6790_v24, %v7848_v5  ;;  %v3507_v24 = vld [vmem:[%s9872_s5] sm:$0xff] }
 0xbd7   : > { %v6791_v48 = vld [vmem:[%s9778_s1 + $0x63] ss:$8 sm:$0x3] }
 0xbd8   : > { %v3475_v51 = vpop.permute.xlu1 %3474  ;;  %v3341_v25 = vrot.slane %v6791_v48, %v7845_v4 }
 0xbd9   : > { %v3476_v58 = vsel %vm1482_vm13, %v3473_v39, %v3475_v51  ;;  %v3480_v60 = vsel %vm1482_vm13, %v3475_v51, %v3473_v39 }
 0xbda   : > { %v3493_v21 = vmul.f32 %v3486_v40, %v3476_v58  ;;  %v3494_v22 = vmul.f32 %v3490_v32, %v3480_v60  ;;  %v3331_v60 = vpop.permute.xlu0 %3330 }
 0xbdc   : > { %3495 = vst [vmem:[#allocation2 + $0x40] sm:$0xf] %v3493_v21  ;;  %3496 = vst [vmem:[#allocation2 + $0x48] sm:$0xf] %v3494_v22  ;;  %v3386_v26 = vpop.permute.xlu1 %3385 }
 0xbe0   : > { %v3388_v36 = vpop.permute.xlu1 %3387 }
 0xbe1   : > { %v3389_v52 = vsel %vm1247_vm1, %v3386_v26, %v3388_v36  ;;  %v3393_v30 = vsel %vm1247_vm1, %v3388_v36, %v3386_v26  ;;  %v3345_v26 = vrot.slane %v6791_v48, %v7848_v5  ;;  %v6789_v36 = vld [vmem:[%s9778_s1 + $0x61] ss:$8 sm:$0x3] }
 0xbe2   : > { %v3406_v61 = vmul.f32 %v3399_v29, %v3389_v52  ;;  %v3407_v6 = vmul.f32 %v3403_v31, %v3393_v30 }
 0xbe3   : > { %v3506_v14 = vld [vmem:[#allocation2 + $0x48] sm:$0xf]  ;;  %v3505_v37 = vld [vmem:[#allocation2 + $0x40] sm:$0xf] }
 0xbe4   : > { %v3410_v38 = vrot.slane %v3406_v61, 4  ;;  %v3411_v17 = vrot.slane %v3407_v6, 4  ;;  %6797 = vmatprep.subr.msk.mxu0 %vm2206_vm14, %v3506_v14  ;;  %v3417_v41 = vpop.permute.xlu1 %3416 }
 0xbe5   : > { %6798 = vmatpush1.msk.msra.mxu0 %vm2206_vm14, %v3505_v37 }
 0xbe6   : > { %3414 = vst [vmem:[#allocation2 + $0x20] sm:$0xf0] %v3410_v38  ;;  %3415 = vst [vmem:[#allocation2 + $0x28] sm:$0xf0] %v3411_v17 }
 0xbe8   : > { %v3419_v18 = vpop.permute.xlu1 %3418 }
 0xbe9   : > { %v3420_v27 = vsel %vm1416_vm11, %v3417_v41, %v3419_v18  ;;  %v3424_v28 = vsel %vm1416_vm11, %v3419_v18, %v3417_v41  ;;  %v3285_v41 = vrot.slane %v6789_v36, %v7845_v4 }
 0xbea   : > { %v3437_v35 = vmul.f32 %v3430_v45, %v3420_v27  ;;  %v3438_v9 = vmul.f32 %v3434_v46, %v3424_v28  ;;  %v3275_v45 = vpop.permute.xlu0 %3274 }
 0xbec   : > { %3439 = vst [vmem:[#allocation2 + $0x30] sm:$0xf] %v3437_v35  ;;  %3440 = vst [vmem:[#allocation2 + $0x38] sm:$0xf] %v3438_v9  ;;  %v3353_v23 = vpop.permute.xlu1 %3352 }
 0xbed   : > { %v3357_v55 = vsel %vm1212_vm5, %v3356_v2, %v3353_v23  ;;  %v3360_v11 = vsel %vm1212_vm5, %v3353_v23, %v3356_v2  ;;  %v3502_v14 = vld [vmem:[#allocation2 + $0x28] sm:$0xff]  ;;  %v3501_v17 = vld [vmem:[#allocation2 + $0x20] sm:$0xff]  ;;  %v3289_v2 = vrot.slane %v6789_v36, %v7848_v5 }
 0xbee   : > { %v3373_v12 = vmul.f32 %v3366_v10, %v3360_v11  ;;  %v3374_v33 = vmul.f32 %v3370_v0, %v3357_v55  ;;  %v3512_v23 = vpop.permute.xlu0 %3511 }
 0xbf0   : > { %v3377_v39 = vrot.slane %v3373_v12, 4  ;;  %v3378_v40 = vrot.slane %v3374_v33, 4  ;;  %v3297_v32 = vpop.permute.xlu1 %3296 }
 0xbf1   : > { %v3301_v51 = vsel %vm1010_vm9, %v3300_v34, %v3297_v32  ;;  %v3304_v58 = vsel %vm1010_vm9, %v3297_v32, %v3300_v34  ;;  %v3508_v34 = vld [vmem:[%s9872_s5 + $0x8] sm:$0xff]  ;;  %s9813_s5 = smov 7  }
 0xbf2   : > { %3381 = vst [vmem:[#allocation2 + $0x10] sm:$0xf0] %v3377_v39  ;;  %3382 = vst [vmem:[#allocation2 + $0x18] sm:$0xf0] %v3378_v40  ;;  %v3317_v21 = vmul.f32 %v3310_v13, %v3304_v58  ;;  %v3318_v22 = vmul.f32 %v3314_v20, %v3301_v51 }
 0xbf3   : > { %v3504_v29 = vld [vmem:[#allocation2 + $0x38] sm:$0xff]  ;;  %v3503_v31 = vld [vmem:[#allocation2 + $0x30] sm:$0xff] }
 0xbf4   : > { %v3321_v52 = vrot.slane %v3317_v21, 4  ;;  %v3322_v30 = vrot.slane %v3318_v22, 4  ;;  %3556 = vmatprep.subr.mxu0 %v3504_v29  ;;  %v3328_v61 = vpop.permute.xlu1 %3327 }
 0xbf5   : > { %v3332_v6 = vsel %vm1043_vm6, %v3331_v60, %v3328_v61  ;;  %v3335_v15 = vsel %vm1043_vm6, %v3328_v61, %v3331_v60  ;;  %3557 = vmatpush1.msra.mxu0 %v3503_v31 }
 0xbf6   : > { %3325 = vst [vmem:[#allocation2] sm:$0xf0] %v3321_v52  ;;  %3326 = vst [vmem:[#allocation2 + $0x8] sm:$0xf0] %v3322_v30  ;;  %v3348_v37 = vmul.f32 %v3341_v25, %v3335_v15  ;;  %v3349_v38 = vmul.f32 %v3345_v26, %v3332_v6  ;;  %3558 = vmatprep.subr.mxu0 %v3502_v14 }
 0xbf7   : > { %3559 = vmatpush1.msra.mxu0 %v3501_v17 }
 0xbf8   : > { %3350 = vst [vmem:[#allocation2 + $0x10] sm:$0xf] %v3348_v37  ;;  %3351 = vst [vmem:[#allocation2 + $0x18] sm:$0xf] %v3349_v38  ;;  %v3271_v46 = vpop.permute.xlu1 %3270 }
 0xbf9   : > { %v3276_v54 = vsel %vm983_vm15, %v3275_v45, %v3271_v46  ;;  %v3279_v18 = vsel %vm983_vm15, %v3271_v46, %v3275_v45  ;;  %v7605_v45 = vmov 8  }
 0xbfa   : > { %v3292_v27 = vmul.f32 %v3285_v41, %v3279_v18  ;;  %v3293_v28 = vmul.f32 %v3289_v2, %v3276_v54  ;;  %v7604_v2 = vmov 7  }
 0xbfc   : > { %3294 = vst [vmem:[#allocation2] sm:$0xf] %v3292_v27  ;;  %3295 = vst [vmem:[#allocation2 + $0x8] sm:$0xf] %v3293_v28 }
 0xbff   : > { %v3500_v35 = vld [vmem:[#allocation2 + $0x18] sm:$0xff]  ;;  %v3499_v9 = vld [vmem:[#allocation2 + $0x10] sm:$0xff] }
 0xc00   : > { %3560 = vmatprep.subr.mxu0 %v3500_v35 }
 0xc01   : > { %3561 = vmatpush1.msra.mxu0 %v3499_v9 }
 0xc03   : > { %v3498_v10 = vld [vmem:[#allocation2 + $0x8] sm:$0xff]  ;;  %v3497_v0 = vld [vmem:[#allocation2] sm:$0xff] }
 0xc04   : > { %3562 = vmatprep.subr.mxu0 %v3498_v10 }
 0xc05   : > { %3563 = vmatpush1.msra.mxu0 %v3497_v0  ;;  %v3517_v33 = vpop.permute.xlu1 %3516 }
 0xc06   : > { %6799 = vmatmul.mubr.msk.f32.vlgmr.msra.gmra.mxu0 %vm3519_vm0, %v3507_v24  ;;  %7083 = vmatprep.subr.mxu0 %v7596_v49 }
 0xc07   : > { %3602 = vmatprep.mubr.f32.mxu0 %v7596_v49 }
 0xc0a   : > { %6800 = vmatmul.mubr.msk.f32.gmra.mxu0 %vm3519_vm0, %v3508_v34 }
 0xc0b   : > { %7085 = vmatprep.mubr.msk.f32.mxu0 %vm7600_vm4, %v7596_v49 }
 0xcc6   : > { %v3598_v55 = vpop.f32.mrf.mxu0 }
 0xcc7   : > { %v3599_v11 = vadd.f32 %v3598_v55, %v3512_v23 }
 0xcc8   : > { %v3600_v12 = vpop.f32.mrf.mxu0 }
 0xcc9   : > { %v8625_v13 = vadd.f32 %v3599_v11, %v8241_v56  ;;  %v3601_v20 = vadd.f32 %v3600_v12, %v3512_v23 }
 0xcca   : > { %v3604_v48 = vpop.f32.mrf.mxu0 }
 0xccb   : > { %3613 = vst [vmem:[%s8629_s17] sm:$0xff] %v8625_v13  ;;  %v8634_v39 = vadd.f32 %v3601_v20, %v8243_v57  ;;  %v3605_v40 = vadd.f32 %v3604_v48, %v3517_v33 }
 0xccc   : > { %v3606_v32 = vpop.f32.mrf.mxu0 }
 0xccd   : > { %3614 = vst [vmem:[%s8629_s17 + $0x8] sm:$0xff] %v8634_v39  ;;  %v8639_v56 = vadd.f32 %v3605_v40, %v8247_v62  ;;  %v3607_v51 = vadd.f32 %v3606_v32, %v3517_v33  ;;  %v3619_v58 = vadd.f32 %v8634_v39, %v8625_v13 }
 0xccf   : > { %3615 = vst [vmem:[%s8629_s17 + $0x10] sm:$0xff] %v8639_v56  ;;  %v8646_v60 = vadd.f32 %v3607_v51, %v8249_v63  ;;  %3620 = vadd.xlane.f32.xlu0 %v3619_v58 }
 0xcd1   : > { %3616 = vst [vmem:[%s8629_s17 + $0x18] sm:$0xff] %v8646_v60  ;;  %v3622_v57 = vadd.f32 %v8646_v60, %v8639_v56 }
 0xcd3   : > { %3623 = vadd.xlane.f32.xlu1 %v3622_v57 }
 0xd58   : > { %v3621_v62 = vpop.xlane.xlu0 %3620 }
 0xd5c   : > { %v3624_v21 = vpop.xlane.xlu1 %3623 }
 0xd5d   : > { %7069 = vmatprep.subr.mxu1 %v3624_v21 }
 0xd5e   : > { %7070 = vmatpush3.msra.mxu1 %v3624_v21 }
 0xd5f   : > { %7071 = vmatprep.subr.mxu1 %v3621_v62 }
 0xd60   : > { %7072 = vmatpush3.msra.mxu1 %v3621_v62 }
 0xd61   : > { %7074 = vmatmul.mubr.msk.f32.vlgmr.msra.gmra.mxu1 %vm1010_vm9, %v8253_v7 }
 0xd62   : > { %7080 = vmatprep.mubr.msk.f32.mxu1 %vm1010_vm9, %v8255_v8 }
 0xe21   : > { %v7075_v63 = vpop.f32.mrf.mxu1 }
 0xe22   : > { %v3701_v22 = vmul.f32 0.0009765625, %v7075_v63 }
 0xe23   : > { %v3691_v25 = vpop.f32.mrf.mxu1 }
 0xe24   : > { %v3700_v26 = vmul.f32 0.0009765625, %v3691_v25  ;;  %3709 = vperm.xlu1 %7324, %v3701_v22  }
 0xe26   : > { %3704 = vperm.xlu0 %7325, %v3700_v26  }
 0xe28   : > { %7326 = vset.pattern.permute.xlu1 %v7604_v2 }
 0xe2a   : > { %7327 = vset.pattern.permute.xlu0 %v7604_v2  ;;  %v8741_v2 = vld [vmem:[%s9873_s6] sm:$0xff]  ;;  %s9819_s6 = smov 57  }
 0xe9f   : > { %v3710_v29 = vpop.permute.xlu1 %3709 }
 0xea0   : > { %v3714_v31 = vsub.f32 %v8639_v56, %v3710_v29  ;;  %v3715_v36 = vsub.f32 %v8646_v60, %v3710_v29 }
 0xea1   : > { %v3705_v52 = vpop.permute.xlu0 %3704 }
 0xea2   : > { %v3718_v30 = vmul.f32 %v3714_v31, %v3714_v31  ;;  %v3719_v61 = vmul.f32 %v3715_v36, %v3715_v36  ;;  %v3712_v6 = vsub.f32 %v8625_v13, %v3705_v52  ;;  %v3713_v15 = vsub.f32 %v8634_v39, %v3705_v52 }
 0xea4   : > { %v3716_v14 = vmul.f32 %v3712_v6, %v3712_v6  ;;  %v3717_v8 = vmul.f32 %v3713_v15, %v3713_v15  ;;  %v3723_v37 = vadd.f32 %v3719_v61, %v3718_v30 }
 0xea6   : > { %3724 = vadd.xlane.f32.xlu1 %v3723_v37  ;;  %v3720_v38 = vadd.f32 %v3717_v8, %v3716_v14 }
 0xea8   : > { %3721 = vadd.xlane.f32.xlu0 %v3720_v38 }
 0xeb7   : > { %3828 = vperm.xlu1 %7326, %v8544_v59  }
 0xebb   : > { %7328 = vset.pattern.permute.xlu1 %v7605_v45 }
 0xebc   : > { %3840 = vperm.xlu1 %7328, %v8544_v59  }
 0xebe   : > { %3823 = vperm.xlu0 %7327, %v8539_v47  }
 0xec0   : > { %7329 = vset.pattern.permute.xlu1 %v7595_v16 }
 0xec2   : > { %7333 = vset.pattern.permute.xlu0 %v7595_v16 }
 0xf2f   : > { %v3725_v17 = vpop.xlane.xlu1 %3724 }
 0xf30   : > { %7076 = vmatprep.subr.mxu1 %v3725_v17 }
 0xf31   : > { %7077 = vmatpush3.msra.mxu1 %v3725_v17  ;;  %v3722_v41 = vpop.xlane.xlu0 %3721 }
 0xf32   : > { %7078 = vmatprep.subr.mxu1 %v3722_v41 }
 0xf33   : > { %7079 = vmatpush3.msra.mxu1 %v3722_v41  ;;  %v3829_v10 = vpop.permute.xlu1 %3828 }
 0xf34   : > { %7081 = vmatmul.mubr.msk.f32.vlgmr.msra.gmra.mxu1 %vm1010_vm9, %v8253_v7 }
 0xf37   : > { %v3841_v0 = vpop.permute.xlu1 %3840 }
 0xf39   : > { %v3824_v12 = vpop.permute.xlu0 %3823 }
 0xff4   : > { %v7082_v46 = vpop.f32.mrf.mxu1 }
 0xff5   : > { %v3802_v54 = vmul.f32 0.0009765625, %v7082_v46  ;;  %v7606_v46 = vmov 9  }
 0xff6   : > { %v3792_v18 = vpop.f32.mrf.mxu1 }
 0xff7   : > { %v3804_v27 = vadd.f32 1e-05, %v3802_v54  ;;  %v3801_v7 = vmul.f32 0.0009765625, %v3792_v18  ;;  %v3875_v54 = vld [vmem:[%s9779_s2] sm:$0xf] }
 0xff8   : > { %v6815_v18 = vld [vmem:[%s9778_s1 + $0x70] ss:$8 sm:$0x3] }
 0xff9   : > { %7393 = vrsqrt.f32 %v3804_v27  ;;  %v3803_v28 = vadd.f32 1e-05, %v3801_v7  ;;  %v8760_v7 = vrot.slane %v6815_v18, %v7845_v4 }
 0xffb   : > { %7395 = vrsqrt.f32 %v3803_v28  ;;  %v8763_v28 = vrot.slane %v6815_v18, %v7848_v5 }
0x1006   : > { %v7394_v35 = vpop.eup %7393 }
0x1007   : > { %3814 = vperm.xlu1 %7329, %v7394_v35  }
0x1008   : > { %v7396_v9 = vpop.eup %7395 }
0x100b   : > { %3809 = vperm.xlu1 %7329, %v7396_v9  }
0x100f   : > { %7330 = vset.pattern.permute.xlu1 %v7605_v45  ;;  %v4231_v45 = vcombine.high %v8741_v2, %v8741_v2 }
0x1010   : > { %3836 = vperm.xlu1 %7330, %v8539_v47  }
0x1011   : > { %6817 = vmatprep.mubr.msk.f32.mxu1 %vm1010_vm9, %v4231_v45  ;;  %v6810_v45 = vld [vmem:[%s9778_s1 + $0x62] ss:$8 sm:$0x3] }
0x1014   : > { %7331 = vset.pattern.permute.xlu1 %v7606_v46 }
0x1082   : > { %v3815_v59 = vpop.permute.xlu1 %3814 }
0x1083   : > { %v3819_v24 = vmul.f32 %v3815_v59, %v3714_v31  ;;  %v3820_v34 = vmul.f32 %v3815_v59, %v3715_v36 }
0x1085   : > { %v3833_v23 = vmul.f32 %v3829_v10, %v3819_v24  ;;  %v3834_v55 = vmul.f32 %v3829_v10, %v3820_v34  ;;  %v6814_v24 = vld [vmem:[%s9778_s1 + $0x67] ss:$8 sm:$0x3] }
0x1086   : > { %v3810_v11 = vpop.permute.xlu1 %3809 }
0x1087   : > { %v3845_v33 = vadd.f32 %v3841_v0, %v3833_v23  ;;  %v3846_v20 = vadd.f32 %v3841_v0, %v3834_v55  ;;  %v3817_v48 = vmul.f32 %v3810_v11, %v3712_v6  ;;  %v3818_v40 = vmul.f32 %v3810_v11, %v3713_v15 }
0x1088   : > { %v8773_v55 = vrot.slane %v6814_v24, %v7845_v4  ;;  %v8776_v11 = vrot.slane %v6814_v24, %v7848_v5 }
0x1089   : > { %v6807_v32 = vmul.f32 -1.442695, %v3845_v33  ;;  %v6808_v51 = vmul.f32 -1.442695, %v3846_v20  ;;  %v3831_v58 = vmul.f32 %v3824_v12, %v3817_v48  ;;  %v3832_v57 = vmul.f32 %v3824_v12, %v3818_v40 }
0x108a   : > { %v6813_v12 = vld [vmem:[%s9778_s1 + $0x66] ss:$8 sm:$0x3] }
0x108b   : > { %7397 = vpow2.f32 %v6807_v32  ;;  %v3837_v21 = vpop.permute.xlu1 %3836 }
0x108c   : > { %7399 = vpow2.f32 %v6808_v51  ;;  %v3843_v47 = vadd.f32 %v3837_v21, %v3831_v58  ;;  %v3844_v62 = vadd.f32 %v3837_v21, %v3832_v57  ;;  %v8790_v58 = vrot.slane %v6813_v12, %v7845_v4  ;;  %v6812_v21 = vld [vmem:[%s9778_s1 + $0x64] ss:$8 sm:$0x3] }
0x108d   : > { %v8793_v57 = vrot.slane %v6813_v12, %v7848_v5 }
0x108e   : > { %v6805_v63 = vmul.f32 -1.442695, %v3843_v47  ;;  %v6806_v22 = vmul.f32 -1.442695, %v3844_v62 }
0x1090   : > { %7401 = vpow2.f32 %v6805_v63 }
0x1091   : > { %7403 = vpow2.f32 %v6806_v22 }
0x1098   : > { %v7398_v25 = vpop.eup %7397 }
0x1099   : > { %v7400_v26 = vpop.eup %7399  ;;  %v3861_v29 = vadd.f32 1.0, %v7398_v25 }
0x109a   : > { %v3862_v31 = vadd.f32 1.0, %v7400_v26  ;;  %v8809_v26 = vrot.slane %v6812_v21, %v7845_v4 }
0x109b   : > { %7405 = vrcp.f32 %v3861_v29  ;;  %v8812_v29 = vrot.slane %v6812_v21, %v7848_v5 }
0x109c   : > { %7407 = vrcp.f32 %v3862_v31  ;;  %v6811_v31 = vld [vmem:[%s9778_s1 + $0x63] ss:$8 sm:$0x3] }
0x109d   : > { %v7402_v36 = vpop.eup %7401 }
0x109e   : > { %v7404_v52 = vpop.eup %7403  ;;  %v3859_v30 = vadd.f32 1.0, %v7402_v36 }
0x109f   : > { %v3860_v61 = vadd.f32 1.0, %v7404_v52 }
0x10a0   : > { %7409 = vrcp.f32 %v3859_v30 }
0x10a1   : > { %7411 = vrcp.f32 %v3860_v61 }
0x10a8   : > { %v7406_v6 = vpop.eup %7405 }
0x10a9   : > { %v7408_v15 = vpop.eup %7407  ;;  %v8668_v14 = vmul.f32 %v7406_v6, %v3845_v33 }
0x10aa   : > { %v8670_v8 = vmul.f32 %v7408_v15, %v3846_v20 }
0x10ab   : > { %4034 = vst [vmem:[#allocation2 + $0x90] sm:$0xff] %v8668_v14  ;;  %4116 = vrot.lane.b32.xlu1 %v8668_v14, %s9871_s3 }
0x10ac   : > { %4035 = vst [vmem:[#allocation2 + $0x98] sm:$0xff] %v8670_v8  ;;  %4042 = vrot.lane.b32.xlu0 %v8670_v8, %s9864_s16 }
0x10ad   : > { %v7410_v37 = vpop.eup %7409 }
0x10ae   : > { %v7412_v38 = vpop.eup %7411  ;;  %v8678_v17 = vmul.f32 %v7410_v37, %v3843_v47  ;;  %v8828_v37 = vrot.slane %v6811_v31, %v7845_v4 }
0x10af   : > { %v8680_v41 = vmul.f32 %v7412_v38, %v3844_v62  ;;  %4118 = vrot.lane.b32.xlu1 %v8670_v8, %s9871_s3  ;;  %v8831_v38 = vrot.slane %v6811_v31, %v7848_v5 }
0x10b0   : > { %4032 = vst [vmem:[#allocation2 + $0x80] sm:$0xff] %v8678_v17  ;;  %4002 = vrot.lane.b32.xlu0 %v8668_v14, %s9865_s22 }
0x10b1   : > { %4033 = vst [vmem:[#allocation2 + $0x88] sm:$0xff] %v8680_v41 }
0x10b3   : > { %4078 = vrot.lane.b32.xlu1 %v8668_v14, %s9863_s30 }
0x10b4   : > { %3964 = vrot.lane.b32.xlu0 %v8668_v14, %s9866_s15 }
0x10b7   : > { %4080 = vrot.lane.b32.xlu1 %v8670_v8, %s9863_s30 }
0x10b8   : > { %3926 = vrot.lane.b32.xlu0 %v8668_v14, %s9867_s24 }
0x10bb   : > { %4040 = vrot.lane.b32.xlu1 %v8668_v14, %s9864_s16 }
0x10bc   : > { %3888 = vrot.lane.b32.xlu0 %v8668_v14, %s9868_s20 }
0x10bf   : > { %3996 = vrot.lane.b32.xlu1 %v8670_v8, %s9865_s22 }
0x10c0   : > { %4038 = vrot.lane.b32.xlu0 %v8680_v41, %s9864_s16 }
0x10c3   : > { %3958 = vrot.lane.b32.xlu1 %v8670_v8, %s9866_s15 }
0x10c4   : > { %4156 = vrot.lane.b32.xlu0 %v8670_v8, %s9869_s23 }
0x10c7   : > { %3920 = vrot.lane.b32.xlu1 %v8670_v8, %s9867_s24 }
0x10c8   : > { %4000 = vrot.lane.b32.xlu0 %v8678_v17, %s9865_s22 }
0x10cb   : > { %3880 = vrot.lane.b32.xlu1 %v8670_v8, %s9868_s20 }
0x10cc   : > { %3962 = vrot.lane.b32.xlu0 %v8678_v17, %s9866_s15 }
0x10cf   : > { %4112 = vrot.lane.b32.xlu1 %v8678_v17, %s9871_s3 }
0x10d0   : > { %3924 = vrot.lane.b32.xlu0 %v8678_v17, %s9867_s24 }
0x10d3   : > { %4114 = vrot.lane.b32.xlu1 %v8680_v41, %s9871_s3 }
0x10d4   : > { %3886 = vrot.lane.b32.xlu0 %v8678_v17, %s9868_s20 }
0x10d7   : > { %4074 = vrot.lane.b32.xlu1 %v8678_v17, %s9863_s30 }
0x10d8   : > { %4152 = vrot.lane.b32.xlu0 %v8680_v41, %s9869_s23 }
0x10db   : > { %4076 = vrot.lane.b32.xlu1 %v8680_v41, %s9863_s30 }
0x10df   : > { %4036 = vrot.lane.b32.xlu1 %v8678_v17, %s9864_s16 }
0x10e3   : > { %4154 = vrot.lane.b32.xlu1 %v8668_v14, %s9869_s23 }
0x10e7   : > { %3994 = vrot.lane.b32.xlu1 %v8680_v41, %s9865_s22 }
0x10eb   : > { %3956 = vrot.lane.b32.xlu1 %v8680_v41, %s9866_s15 }
0x10ef   : > { %3918 = vrot.lane.b32.xlu1 %v8680_v41, %s9867_s24 }
0x10f3   : > { %3878 = vrot.lane.b32.xlu1 %v8680_v41, %s9868_s20 }
0x10f7   : > { %4150 = vrot.lane.b32.xlu1 %v8678_v17, %s9869_s23 }
0x10fb   : > { %4227 = vperm.xlu1 %7331, %v3875_v54  }
0x10ff   : > { %7332 = vset.pattern.permute.xlu1 %v7595_v16 }
0x111d   : > { %v4117_v27 = vpop.permute.xlu1 %4116 }
0x111e   : > { %v4043_v34 = vpop.permute.xlu0 %4042 }
0x1121   : > { %v4119_v35 = vpop.permute.xlu1 %4118 }
0x1122   : > { %v4121_v9 = vsel %vm1449_vm12, %v4117_v27, %v4119_v35  ;;  %v4129_v10 = vsel %vm1449_vm12, %v4119_v35, %v4117_v27  ;;  %v4003_v40 = vpop.permute.xlu0 %4002 }
0x1123   : > { %v4144_v0 = vmul.f32 %v8760_v7, %v4121_v9  ;;  %v4145_v59 = vmul.f32 %v8763_v28, %v4129_v10  ;;  %v8847_v10 = vrot.slane %v6810_v45, %v7845_v4 }
0x1125   : > { %4148 = vst [vmem:[#allocation2 + $0xf0] sm:$0xff] %v4144_v0  ;;  %4149 = vst [vmem:[#allocation2 + $0xf8] sm:$0xff] %v4145_v59  ;;  %v4079_v23 = vpop.permute.xlu1 %4078  ;;  %4234 = vmatprep.subr.mxu1 %v4145_v59  ;;  %v6809_v59 = vld [vmem:[%s9778_s1 + $0x61] ss:$8 sm:$0x3] }
0x1126   : > { %4235 = vmatpush1.msra.mxu1 %v4144_v0  ;;  %v3965_v36 = vpop.permute.xlu0 %3964  ;;  %v8850_v0 = vrot.slane %v6810_v45, %v7848_v5 }
0x1129   : > { %v4081_v33 = vpop.permute.xlu1 %4080 }
0x112a   : > { %v4083_v20 = vsel %vm1416_vm11, %v4079_v23, %v4081_v33  ;;  %v4091_v48 = vsel %vm1416_vm11, %v4081_v33, %v4079_v23  ;;  %v3927_v27 = vpop.permute.xlu0 %3926 }
0x112b   : > { %v8784_v32 = vmul.f32 %v8773_v55, %v4083_v20  ;;  %v8787_v51 = vmul.f32 %v8776_v11, %v4091_v48  ;;  %v8866_v20 = vrot.slane %v6809_v59, %v7845_v4  ;;  %v8869_v48 = vrot.slane %v6809_v59, %v7848_v5 }
0x112d   : > { %4110 = vst [vmem:[#allocation2 + $0xd0] sm:$0xff] %v8784_v32  ;;  %4111 = vst [vmem:[#allocation2 + $0xd8] sm:$0xff] %v8787_v51  ;;  %v4041_v47 = vpop.permute.xlu1 %4040 }
0x112e   : > { %v4045_v62 = vsel %vm1247_vm1, %v4041_v47, %v4043_v34  ;;  %v4053_v63 = vsel %vm1247_vm1, %v4043_v34, %v4041_v47 }
0x112f   : > { %v8803_v22 = vmul.f32 %v8790_v58, %v4045_v62  ;;  %v8806_v25 = vmul.f32 %v8793_v57, %v4053_v63 }
0x1131   : > { %4072 = vst [vmem:[#allocation2 + $0xb0] sm:$0xff] %v8803_v22  ;;  %4073 = vst [vmem:[#allocation2 + $0xb8] sm:$0xff] %v8806_v25  ;;  %v3997_v52 = vpop.permute.xlu1 %3996 }
0x1132   : > { %v4005_v30 = vsel %vm1212_vm5, %v4003_v40, %v3997_v52  ;;  %v4011_v61 = vsel %vm1212_vm5, %v3997_v52, %v4003_v40  ;;  %v3889_v40 = vpop.permute.xlu0 %3888 }
0x1133   : > { %v8822_v6 = vmul.f32 %v8809_v26, %v4011_v61  ;;  %v8825_v15 = vmul.f32 %v8812_v29, %v4005_v30 }
0x1135   : > { %4030 = vst [vmem:[#allocation2 + $0x70] sm:$0xff] %v8822_v6  ;;  %4031 = vst [vmem:[#allocation2 + $0x78] sm:$0xff] %v8825_v15  ;;  %v3959_v46 = vpop.permute.xlu1 %3958 }
0x1136   : > { %v3967_v54 = vsel %vm1043_vm6, %v3965_v36, %v3959_v46  ;;  %v3973_v18 = vsel %vm1043_vm6, %v3959_v46, %v3965_v36  ;;  %v4039_v52 = vpop.permute.xlu0 %4038 }
0x1137   : > { %v8841_v35 = vmul.f32 %v8828_v37, %v3973_v18  ;;  %v8844_v9 = vmul.f32 %v8831_v38, %v3967_v54 }
0x1139   : > { %3992 = vst [vmem:[#allocation2 + $0x50] sm:$0xff] %v8841_v35  ;;  %3993 = vst [vmem:[#allocation2 + $0x58] sm:$0xff] %v8844_v9  ;;  %v3921_v24 = vpop.permute.xlu1 %3920 }
0x113a   : > { %v3929_v34 = vsel %vm1010_vm9, %v3927_v27, %v3921_v24  ;;  %v3935_v23 = vsel %vm1010_vm9, %v3921_v24, %v3927_v27  ;;  %v4157_v27 = vpop.permute.xlu0 %4156 }
0x113b   : > { %v8860_v12 = vmul.f32 %v8847_v10, %v3935_v23  ;;  %v8863_v33 = vmul.f32 %v8850_v0, %v3929_v34 }
0x113d   : > { %3954 = vst [vmem:[#allocation2 + $0x30] sm:$0xff] %v8860_v12  ;;  %3955 = vst [vmem:[#allocation2 + $0x38] sm:$0xff] %v8863_v33  ;;  %v3881_v21 = vpop.permute.xlu1 %3880 }
0x113e   : > { %v3891_v47 = vsel %vm983_vm15, %v3889_v40, %v3881_v21  ;;  %v3897_v62 = vsel %vm983_vm15, %v3881_v21, %v3889_v40  ;;  %v4001_v40 = vpop.permute.xlu0 %4000 }
0x113f   : > { %v8876_v63 = vmul.f32 %v8866_v20, %v3897_v62  ;;  %v8879_v31 = vmul.f32 %v8869_v48, %v3891_v47 }
0x1141   : > { %3916 = vst [vmem:[#allocation2 + $0x10] sm:$0xff] %v8876_v63  ;;  %3917 = vst [vmem:[#allocation2 + $0x18] sm:$0xff] %v8879_v31  ;;  %v4113_v36 = vpop.permute.xlu1 %4112 }
0x1145   : > { %v4115_v30 = vpop.permute.xlu1 %4114 }
0x1146   : > { %v4120_v61 = vsel %vm1449_vm12, %v4113_v36, %v4115_v30  ;;  %v4128_v45 = vsel %vm1449_vm12, %v4115_v30, %v4113_v36 }
0x1147   : > { %v4142_v46 = vmul.f32 %v8760_v7, %v4120_v61  ;;  %v4143_v54 = vmul.f32 %v8763_v28, %v4128_v45  ;;  %v6816_v28 = vld [vmem:[%s9778_s1 + $0x71] ss:$8 sm:$0x3] }
0x1148   : > { %v8904_v62 = vrot.slane %v6816_v28, %v7848_v5 }
0x1149   : > { %4146 = vst [vmem:[#allocation2 + $0xe0] sm:$0xff] %v4142_v46  ;;  %4147 = vst [vmem:[#allocation2 + $0xe8] sm:$0xff] %v4143_v54  ;;  %v4075_v18 = vpop.permute.xlu1 %4074  ;;  %4236 = vmatprep.subr.mxu1 %v4143_v54 }
0x114a   : > { %4237 = vmatpush1.msra.mxu1 %v4142_v46 }
0x114b   : > { %4238 = vmatprep.subr.mxu1 %v8787_v51 }
0x114c   : > { %4239 = vmatpush1.msra.mxu1 %v8784_v32 }
0x114d   : > { %v4077_v59 = vpop.permute.xlu1 %4076 }
0x114e   : > { %v4082_v24 = vsel %vm1416_vm11, %v4075_v18, %v4077_v59  ;;  %v4090_v34 = vsel %vm1416_vm11, %v4077_v59, %v4075_v18 }
0x114f   : > { %v4104_v23 = vmul.f32 %v8773_v55, %v4082_v24  ;;  %v4105_v7 = vmul.f32 %v8776_v11, %v4090_v34  ;;  %v8901_v11 = vrot.slane %v6816_v28, %v7845_v4 }
0x1151   : > { %4108 = vst [vmem:[#allocation2 + $0xc0] sm:$0xff] %v4104_v23  ;;  %4109 = vst [vmem:[#allocation2 + $0xc8] sm:$0xff] %v4105_v7  ;;  %v4037_v21 = vpop.permute.xlu1 %4036  ;;  %4240 = vmatprep.subr.mxu1 %v4105_v7 }
0x1152   : > { %v4044_v32 = vsel %vm1247_vm1, %v4037_v21, %v4039_v52  ;;  %v4052_v51 = vsel %vm1247_vm1, %v4039_v52, %v4037_v21  ;;  %4241 = vmatpush1.msra.mxu1 %v4104_v23 }
0x1153   : > { %v4066_v47 = vmul.f32 %v8790_v58, %v4044_v32  ;;  %v4067_v55 = vmul.f32 %v8793_v57, %v4052_v51  ;;  %4242 = vmatprep.subr.mxu1 %v8806_v25  ;;  %v3963_v57 = vpop.permute.xlu0 %3962 }
0x1154   : > { %4243 = vmatpush1.msra.mxu1 %v8803_v22 }
0x1155   : > { %4070 = vst [vmem:[#allocation2 + $0xa0] sm:$0xff] %v4066_v47  ;;  %4071 = vst [vmem:[#allocation2 + $0xa8] sm:$0xff] %v4067_v55  ;;  %v4155_v36 = vpop.permute.xlu1 %4154  ;;  %4244 = vmatprep.subr.mxu1 %v4067_v55 }
0x1156   : > { %v4159_v52 = vsel %vm1482_vm13, %v4155_v36, %v4157_v27  ;;  %v4167_v58 = vsel %vm1482_vm13, %v4157_v27, %v4155_v36  ;;  %4245 = vmatpush1.msra.mxu1 %v4066_v47 }
0x1157   : > { %v4182_v30 = vmul.f32 %v8901_v11, %v4159_v52  ;;  %v4183_v61 = vmul.f32 %v8904_v62, %v4167_v58  ;;  %4246 = vmatprep.subr.mxu1 %v8670_v8 }
0x1158   : > { %4247 = vmatpush1.msra.mxu1 %v8668_v14  ;;  %v3925_v14 = vpop.permute.xlu0 %3924 }
0x1159   : > { %4186 = vst [vmem:[#allocation2 + $0x110] sm:$0xff] %v4182_v30  ;;  %4187 = vst [vmem:[#allocation2 + $0x118] sm:$0xff] %v4183_v61  ;;  %v3995_v22 = vpop.permute.xlu1 %3994  ;;  %4248 = vmatprep.subr.mxu1 %v8680_v41 }
0x115a   : > { %v4004_v25 = vsel %vm1212_vm5, %v4001_v40, %v3995_v22  ;;  %v4010_v45 = vsel %vm1212_vm5, %v3995_v22, %v4001_v40  ;;  %4249 = vmatpush1.msra.mxu1 %v8678_v17 }
0x115b   : > { %v4024_v46 = vmul.f32 %v8809_v26, %v4010_v45  ;;  %v4025_v54 = vmul.f32 %v8812_v29, %v4004_v25  ;;  %4250 = vmatprep.subr.mxu1 %v8825_v15 }
0x115c   : > { %4251 = vmatpush1.msra.mxu1 %v8822_v6  ;;  %v3887_v27 = vpop.permute.xlu0 %3886 }
0x115d   : > { %4028 = vst [vmem:[#allocation2 + $0x60] sm:$0xff] %v4024_v46  ;;  %4029 = vst [vmem:[#allocation2 + $0x68] sm:$0xff] %v4025_v54  ;;  %v3957_v8 = vpop.permute.xlu1 %3956  ;;  %4252 = vmatprep.subr.mxu1 %v4025_v54 }
0x115e   : > { %v3966_v41 = vsel %vm1043_vm6, %v3963_v57, %v3957_v8  ;;  %v3972_v18 = vsel %vm1043_vm6, %v3957_v8, %v3963_v57  ;;  %4253 = vmatpush1.msra.mxu1 %v4024_v46  ;;  %v4305_v57 = vld [vmem:[%s9779_s2] sm:$0xf] }
0x115f   : > { %v3986_v17 = vmul.f32 %v8828_v37, %v3972_v18  ;;  %v3987_v26 = vmul.f32 %v8831_v38, %v3966_v41  ;;  %4254 = vmatprep.subr.mxu1 %v8844_v9 }
0x1160   : > { %4255 = vmatpush1.msra.mxu1 %v8841_v35 }
0x1161   : > { %3990 = vst [vmem:[#allocation2 + $0x40] sm:$0xff] %v3986_v17  ;;  %3991 = vst [vmem:[#allocation2 + $0x48] sm:$0xff] %v3987_v26  ;;  %v3919_v29 = vpop.permute.xlu1 %3918  ;;  %4256 = vmatprep.subr.mxu1 %v3987_v26 }
0x1162   : > { %v3928_v6 = vsel %vm1010_vm9, %v3925_v14, %v3919_v29  ;;  %v3934_v15 = vsel %vm1010_vm9, %v3919_v29, %v3925_v14  ;;  %4257 = vmatpush1.msra.mxu1 %v3986_v17 }
0x1163   : > { %v3948_v59 = vmul.f32 %v8847_v10, %v3934_v15  ;;  %v3949_v37 = vmul.f32 %v8850_v0, %v3928_v6  ;;  %4258 = vmatprep.subr.mxu1 %v8863_v33  ;;  %v4153_v10 = vpop.permute.xlu0 %4152 }
0x1164   : > { %4259 = vmatpush1.msra.mxu1 %v8860_v12 }
0x1165   : > { %3952 = vst [vmem:[#allocation2 + $0x20] sm:$0xff] %v3948_v59  ;;  %3953 = vst [vmem:[#allocation2 + $0x28] sm:$0xff] %v3949_v37  ;;  %v3879_v38 = vpop.permute.xlu1 %3878  ;;  %4260 = vmatprep.subr.mxu1 %v3949_v37 }
0x1166   : > { %v3890_v35 = vsel %vm983_vm15, %v3887_v27, %v3879_v38  ;;  %v3896_v9 = vsel %vm983_vm15, %v3879_v38, %v3887_v27  ;;  %4261 = vmatpush1.msra.mxu1 %v3948_v59 }
0x1167   : > { %v3910_v24 = vmul.f32 %v8866_v20, %v3896_v9  ;;  %v3911_v34 = vmul.f32 %v8869_v48, %v3890_v35  ;;  %4262 = vmatprep.subr.mxu1 %v8879_v31 }
0x1168   : > { %4263 = vmatpush1.msra.mxu1 %v8876_v63 }
0x1169   : > { %3914 = vst [vmem:[#allocation2] sm:$0xff] %v3910_v24  ;;  %3915 = vst [vmem:[#allocation2 + $0x8] sm:$0xff] %v3911_v34  ;;  %v4151_v0 = vpop.permute.xlu1 %4150  ;;  %4264 = vmatprep.subr.mxu1 %v3911_v34 }
0x116a   : > { %v4158_v12 = vsel %vm1482_vm13, %v4151_v0, %v4153_v10  ;;  %v4166_v33 = vsel %vm1482_vm13, %v4153_v10, %v4151_v0  ;;  %4265 = vmatpush1.msra.mxu1 %v3910_v24  ;;  %v4882_v0 = vld [vmem:[%s9874_s8] sm:$0xff] }
0x116b   : > { %v4180_v23 = vmul.f32 %v8901_v11, %v4158_v12  ;;  %v4181_v20 = vmul.f32 %v8904_v62, %v4166_v33  ;;  %4294 = vmatprep.subr.mxu1 %v4183_v61  ;;  %v7608_v61 = vmov 11   ;;  %v4883_v12 = vld [vmem:[%s9874_s8 + $0x8] sm:$0xff]  ;;  %v4884_v33 = vld [vmem:[%s9874_s8 + $0x10] sm:$0xff] }
0x116c   : > { %4295 = vmatpush2.msra.mxu1 %v4182_v30  ;;  %v7607_v30 = vmov 10  }
0x116d   : > { %4184 = vst [vmem:[#allocation2 + $0x100] sm:$0xff] %v4180_v23  ;;  %4185 = vst [vmem:[#allocation2 + $0x108] sm:$0xff] %v4181_v20  ;;  %4296 = vmatprep.subr.mxu1 %v4181_v20  ;;  %v9005_v20 = vld [vmem:[%s9779_s2] sm:$0xff] }
0x116e   : > { %4297 = vmatpush2.msra.mxu1 %v4180_v23  ;;  %v4885_v23 = vld [vmem:[%s9874_s8 + $0x18] sm:$0xff]  ;;  %s9838_s8 = smov 55  }
0x116f   : > { %4299 = vmatmul.mubr.f32.vlgmr.msra.gmra.mxu1 %v8741_v2  ;;  %4950 = vmatprep.subr.mxu1 %v8646_v60 }
0x1170   : > { %4951 = vmatpush1.msra.mxu1 %v8639_v56  ;;  %4986 = vmatprep.mubr.f32.mxu1 %v7596_v49 }
0x1171   : > { %4952 = vmatprep.subr.mxu1 %v8634_v39 }
0x1172   : > { %4953 = vmatpush1.msra.mxu1 %v8625_v13 }
0x1173   : > { %6838 = vmatmul.mubr.msk.f32.vlgmr.msra.gmra.mxu1 %vm1010_vm9, %v4882_v0 }
0x1174   : > { %4992 = vmatprep.mubr.f32.mxu1 %v7596_v49 }
0x1176   : > { %v4228_v48 = vpop.permute.xlu1 %4227 }
0x1177   : > { %6839 = vmatmul.mubr.msk.f32.gmra.mxu1 %vm1010_vm9, %v4883_v12 }
0x1178   : > { %4998 = vmatprep.mubr.f32.mxu1 %v7596_v49 }
0x117b   : > { %6840 = vmatmul.mubr.msk.f32.gmra.mxu1 %vm1010_vm9, %v4884_v33 }
0x117c   : > { %5004 = vmatprep.mubr.f32.mxu1 %v7596_v49 }
0x117f   : > { %6841 = vmatmul.mubr.msk.f32.gmra.mxu1 %vm1010_vm9, %v4885_v23 }
0x122f   : > { %v4300_v63 = vpop.f32.mrf.mxu1 }
0x1230   : > { %v4301_v31 = vadd.f32 %v4300_v63, %v4228_v48  ;;  %v7610_v63 = vmov 13  }
0x1231   : > { %v4302_v7 = vpop.f32.mrf.mxu1 }
0x1232   : > { %v4303_v28 = vadd.f32 %v4302_v7, %v4228_v48  ;;  %v4306_v40 = vsel %vm2206_vm14, %v4301_v31, 0.0  ;;  %v7609_v48 = vmov 12   ;;  %v5034_v7 = vld [vmem:[%s9875_s9 + $0x78] sm:$0xff] }
0x1234   : > { %v4307_v21 = vsel %vm2206_vm14, %v4303_v28, 0.0 }
0x1235   : > { %v4308_v2 = vadd.f32 %v4307_v21, %v4306_v40  ;;  %v9021_v40 = vld [vmem:[%s9779_s2 + $0x8] sm:$0xff]  ;;  %v5033_v21 = vld [vmem:[%s9875_s9 + $0x70] sm:$0xff] }
0x1237   : > { %4309 = vadd.xlane.f32.xlu0 %v4308_v2  ;;  %v5048_v2 = vld [vmem:[%s9875_s9 + $0xe8] sm:$0xff] }
0x12c0   : > { %v4310_v60 = vpop.xlane.xlu0 %4309 }
0x12c1   : > { %7084 = vmatpush3.msk.msra.mxu0 %vm2206_vm14, %v4310_v60  ;;  %v9033_v60 = vld [vmem:[%s9779_s2 + $0x10] sm:$0xff] }
0x12c2   : > { %7086 = vmatmul.mubr.msk.f32.vlgmr.msra.gmra.mxu0 %vm2199_vm8, %v8502_v19  ;;  %7088 = vmatprep.subr.mxu0 %v7596_v49 }
0x12c3   : > { %7090 = vmatprep.mubr.msk.f32.mxu0 %vm7600_vm4, %v7596_v49 }
0x1382   : > { %v4380_v13 = vpop.f32.mrf.mxu0 }
0x1383   : > { %v4384_v39 = vmul.f32 0.0009765625, %v4380_v13  ;;  %v5032_v13 = vld [vmem:[%s9875_s9 + $0x68] sm:$0xff] }
0x1384   : > { %v7087_v56 = vpop.f32.mrf.mxu0 }
0x1385   : > { %4387 = vperm.xlu1 %7332, %v4384_v39   ;;  %v5047_v39 = vld [vmem:[%s9875_s9 + $0xe0] sm:$0xff]  ;;  %v9045_v56 = vld [vmem:[%s9779_s2 + $0x18] sm:$0xff] }
0x1389   : > { %7334 = vset.pattern.permute.xlu1 %v7607_v30  ;;  %v5026_v30 = vld [vmem:[%s9875_s9 + $0x38] sm:$0xff] }
0x1400   : > { %v4388_v32 = vpop.permute.xlu1 %4387 }
0x1401   : > { %v4390_v51 = vsub.f32 %v4301_v31, %v4388_v32  ;;  %v4391_v47 = vsub.f32 %v4303_v28, %v4388_v32  ;;  %v5050_v31 = vld [vmem:[%s9875_s9 + $0xf8] sm:$0xff]  ;;  %v5049_v28 = vld [vmem:[%s9875_s9 + $0xf0] sm:$0xff]  ;;  %v5031_v32 = vld [vmem:[%s9875_s9 + $0x60] sm:$0xff] }
0x1402   : > { %6911 = vmatprep.subr.mxu1 %v5050_v31 }
0x1403   : > { %v4392_v55 = vmul.f32 %v4390_v51, %v4390_v51  ;;  %v4393_v11 = vmul.f32 %v4391_v47, %v4391_v47  ;;  %6912 = vmatpush3.msra.mxu1 %v5034_v7  ;;  %v6829_v7 = vld [vmem:[%s9778_s1 + $0x67] ss:$8 sm:$0x3] }
0x1404   : > { %6913 = vmatprep.subr.mxu1 %v5049_v28 }
0x1405   : > { %v4394_v62 = vsel %vm2206_vm14, %v4392_v55, 0.0  ;;  %v4395_v36 = vsel %vm2206_vm14, %v4393_v11, 0.0  ;;  %6914 = vmatpush3.msra.mxu1 %v5033_v21  ;;  %v5045_v55 = vld [vmem:[%s9875_s9 + $0xd0] sm:$0xff] }
0x1406   : > { %v4396_v52 = vadd.f32 %v4395_v36, %v4394_v62  ;;  %6915 = vmatprep.subr.mxu1 %v5048_v2  ;;  %v5029_v11 = vld [vmem:[%s9875_s9 + $0x50] sm:$0xff]  ;;  %v5044_v62 = vld [vmem:[%s9875_s9 + $0xc8] sm:$0xff] }
0x1407   : > { %6916 = vmatpush3.msra.mxu1 %v5032_v13  ;;  %v5028_v36 = vld [vmem:[%s9875_s9 + $0x48] sm:$0xff] }
0x1408   : > { %4397 = vadd.xlane.f32.xlu1 %v4396_v52  ;;  %6917 = vmatprep.subr.mxu1 %v5047_v39  ;;  %v5043_v52 = vld [vmem:[%s9875_s9 + $0xc0] sm:$0xff] }
0x1409   : > { %6918 = vmatpush3.msra.mxu1 %v5031_v32 }
0x1419   : > { %4484 = vperm.xlu1 %7334, %v4305_v57  }
0x141d   : > { %7335 = vset.pattern.permute.xlu1 %v7608_v61  ;;  %v5041_v61 = vld [vmem:[%s9875_s9 + $0xb0] sm:$0xff] }
0x141e   : > { %4490 = vperm.xlu1 %7335, %v4305_v57   ;;  %v5042_v57 = vld [vmem:[%s9875_s9 + $0xb8] sm:$0xff] }
0x1422   : > { %7336 = vset.pattern.permute.xlu1 %v7609_v48 }
0x1491   : > { %v4398_v58 = vpop.xlane.xlu1 %4397 }
0x1492   : > { %7089 = vmatpush3.msk.msra.mxu0 %vm2206_vm14, %v4398_v58  ;;  %v5027_v58 = vld [vmem:[%s9875_s9 + $0x40] sm:$0xff] }
0x1493   : > { %7091 = vmatmul.mubr.msk.f32.vlgmr.msra.gmra.mxu0 %vm2199_vm8, %v8502_v19 }
0x1494   : > { %4857 = vmatprep.mubr.f32.mxu0 %v7596_v49 }
0x1495   : > { %v4485_v19 = vpop.permute.xlu1 %4484 }
0x1499   : > { %v4491_v18 = vpop.permute.xlu1 %4490 }
0x1553   : > { %v4468_v22 = vpop.f32.mrf.mxu0 }
0x1554   : > { %v4472_v25 = vmul.f32 0.0009765625, %v4468_v22  ;;  %v5025_v22 = vld [vmem:[%s9875_s9 + $0x30] sm:$0xff] }
0x1555   : > { %v7092_v45 = vpop.f32.mrf.mxu0 }
0x1556   : > { %v4473_v46 = vadd.f32 1e-05, %v4472_v25  ;;  %v5040_v25 = vld [vmem:[%s9875_s9 + $0xa8] sm:$0xff] }
0x1557   : > { %v5024_v45 = vld [vmem:[%s9875_s9 + $0x28] sm:$0xff] }
0x1558   : > { %7413 = vrsqrt.f32 %v4473_v46  ;;  %v5039_v46 = vld [vmem:[%s9875_s9 + $0xa0] sm:$0xff] }
0x1565   : > { %v7414_v54 = vpop.eup %7413 }
0x1566   : > { %4477 = vperm.xlu0 %7333, %v7414_v54   ;;  %v5023_v54 = vld [vmem:[%s9875_s9 + $0x20] sm:$0xff] }
0x156a   : > { %7337 = vset.pattern.permute.xlu0 %v7610_v63 }
0x15e1   : > { %v4478_v14 = vpop.permute.xlu0 %4477 }
0x15e2   : > { %v4480_v8 = vmul.f32 %v4478_v14, %v4390_v51  ;;  %v4481_v41 = vmul.f32 %v4478_v14, %v4391_v47  ;;  %v5046_v51 = vld [vmem:[%s9875_s9 + $0xd8] sm:$0xff] }
0x15e3   : > { %v5030_v47 = vld [vmem:[%s9875_s9 + $0x58] sm:$0xff]  ;;  %6919 = vmatprep.subr.mxu1 %v5046_v51  ;;  %v4674_v51 = vrot.slane %v6829_v7, %v7845_v4 }
0x15e4   : > { %v4487_v17 = vmul.f32 %v4485_v19, %v4480_v8  ;;  %v4488_v26 = vmul.f32 %v4485_v19, %v4481_v41  ;;  %6920 = vmatpush3.msra.mxu1 %v5030_v47  ;;  %v5038_v19 = vld [vmem:[%s9875_s9 + $0x98] sm:$0xff]  ;;  %v4678_v47 = vrot.slane %v6829_v7, %v7848_v5 }
0x15e5   : > { %6921 = vmatprep.subr.mxu1 %v5045_v55  ;;  %v6830_v14 = vld [vmem:[%s9778_s1 + $0x70] ss:$8 sm:$0x3]  ;;  %v6827_v55 = vld [vmem:[%s9778_s1 + $0x64] ss:$8 sm:$0x3] }
0x15e6   : > { %v4493_v29 = vadd.f32 %v4491_v18, %v4487_v17  ;;  %v4494_v6 = vadd.f32 %v4491_v18, %v4488_v26  ;;  %6922 = vmatpush3.msra.mxu1 %v5029_v11  ;;  %v4699_v18 = vrot.slane %v6830_v14, %v7845_v4  ;;  %v4703_v17 = vrot.slane %v6830_v14, %v7848_v5  ;;  %v6831_v26 = vld [vmem:[%s9778_s1 + $0x71] ss:$8 sm:$0x3] }
0x15e7   : > { %6923 = vmatprep.subr.mxu1 %v5044_v62 }
0x15e8   : > { %v6822_v15 = vmul.f32 -1.442695, %v4493_v29  ;;  %v6823_v27 = vmul.f32 -1.442695, %v4494_v6  ;;  %6924 = vmatpush3.msra.mxu1 %v5028_v36 }
0x15e9   : > { %6925 = vmatprep.subr.mxu1 %v5043_v52 }
0x15ea   : > { %7415 = vpow2.f32 %v6822_v15  ;;  %6926 = vmatpush3.msra.mxu1 %v5027_v58 }
0x15eb   : > { %7417 = vpow2.f32 %v6823_v27  ;;  %6927 = vmatprep.subr.mxu1 %v5042_v57 }
0x15ec   : > { %6928 = vmatpush3.msra.mxu1 %v5026_v30 }
0x15ed   : > { %6929 = vmatprep.subr.mxu1 %v5041_v61  ;;  %v4610_v61 = vrot.slane %v6827_v55, %v7845_v4 }
0x15ee   : > { %6930 = vmatpush3.msra.mxu1 %v5025_v22  ;;  %v4614_v22 = vrot.slane %v6827_v55, %v7848_v5 }
0x15ef   : > { %6931 = vmatprep.subr.mxu1 %v5040_v25  ;;  %v6825_v25 = vld [vmem:[%s9778_s1 + $0x62] ss:$8 sm:$0x3] }
0x15f0   : > { %6932 = vmatpush3.msra.mxu1 %v5024_v45 }
0x15f1   : > { %6933 = vmatprep.subr.mxu1 %v5039_v46 }
0x15f2   : > { %6934 = vmatpush3.msra.mxu1 %v5023_v54 }
0x15f3   : > { %6935 = vmatprep.subr.mxu1 %v5038_v19 }
0x15f7   : > { %v7416_v59 = vpop.eup %7415 }
0x15f8   : > { %v7418_v37 = vpop.eup %7417  ;;  %v4501_v38 = vadd.f32 1.0, %v7416_v59 }
0x15f9   : > { %v4502_v35 = vadd.f32 1.0, %v7418_v37 }
0x15fa   : > { %7419 = vrcp.f32 %v4501_v38  ;;  %v4730_v38 = vrot.slane %v6831_v26, %v7845_v4 }
0x15fb   : > { %7421 = vrcp.f32 %v4502_v35  ;;  %v4734_v35 = vrot.slane %v6831_v26, %v7848_v5  ;;  %v4558_v26 = vrot.slane %v6825_v25, %v7848_v5 }
0x1607   : > { %v7420_v9 = vpop.eup %7419 }
0x1608   : > { %v7422_v24 = vpop.eup %7421  ;;  %v4507_v34 = vmul.f32 %v7420_v9, %v4493_v29  ;;  %v6828_v9 = vld [vmem:[%s9778_s1 + $0x66] ss:$8 sm:$0x3] }
0x1609   : > { %v4508_v10 = vmul.f32 %v7422_v24, %v4494_v6  ;;  %v4647_v31 = vrot.slane %v6828_v9, %v7848_v5 }
0x160a   : > { %4627 = vst [vmem:[#allocation2 + $0x20] sm:$0xf] %v4507_v34  ;;  %4685 = vrot.lane.b32.xlu1 %v4507_v34, %s9871_s3 }
0x160b   : > { %4628 = vst [vmem:[#allocation2 + $0x28] sm:$0xf] %v4508_v10  ;;  %4718 = vrot.lane.b32.xlu0 %v4508_v10, %s9869_s23 }
0x160e   : > { %4687 = vrot.lane.b32.xlu1 %v4508_v10, %s9871_s3  ;;  %s9823_s3 = smov 8  }
0x160f   : > { %4631 = vrot.lane.b32.xlu0 %v4508_v10, %s9864_s16 }
0x1612   : > { %4716 = vrot.lane.b32.xlu1 %v4507_v34, %s9869_s23  ;;  %s9833_s23 = smov 56  }
0x1613   : > { %4662 = vrot.lane.b32.xlu0 %v4508_v10, %s9863_s30 }
0x1616   : > { %4629 = vrot.lane.b32.xlu1 %v4507_v34, %s9864_s16 }
0x1617   : > { %4599 = vrot.lane.b32.xlu0 %v4507_v34, %s9865_s22 }
0x161a   : > { %4660 = vrot.lane.b32.xlu1 %v4507_v34, %s9863_s30  ;;  %s9829_s30 = smov 65  }
0x161b   : > { %4543 = vrot.lane.b32.xlu0 %v4507_v34, %s9867_s24 }
0x161e   : > { %4596 = vrot.lane.b32.xlu1 %v4508_v10, %s9865_s22 }
0x161f   : > { %4574 = vrot.lane.b32.xlu0 %v4507_v34, %s9866_s15 }
0x1622   : > { %4540 = vrot.lane.b32.xlu1 %v4508_v10, %s9867_s24 }
0x1623   : > { %4518 = vrot.lane.b32.xlu0 %v4507_v34, %s9868_s20 }
0x1626   : > { %4571 = vrot.lane.b32.xlu1 %v4508_v10, %s9866_s15  ;;  %s9831_s15 = smov 63  }
0x1627   : > { %4892 = vperm.xlu0 %7337, %v9005_v20  }
0x162a   : > { %4514 = vrot.lane.b32.xlu1 %v4508_v10, %s9868_s20  ;;  %s9827_s20 = smov 120  }
0x162b   : > { %7339 = vset.pattern.permute.xlu0 %v7609_v48 }
0x162c   : > { %4767 = vperm.xlu0 %7339, %v9033_v60  }
0x162e   : > { %4757 = vperm.xlu1 %7336, %v9005_v20  }
0x1630   : > { %7341 = vset.pattern.permute.xlu0 %v7610_v63 }
0x1631   : > { %4907 = vperm.xlu0 %7341, %v9045_v56  }
0x1632   : > { %4762 = vperm.xlu1 %7336, %v9021_v40  }
0x1635   : > { %7343 = vset.pattern.permute.xlu0 %v7595_v16 }
0x1636   : > { %7338 = vset.pattern.permute.xlu1 %v7610_v63  ;;  %v4643_v63 = vrot.slane %v6828_v9, %v7845_v4 }
0x1637   : > { %4897 = vperm.xlu1 %7338, %v9021_v40  }
0x163b   : > { %4902 = vperm.xlu1 %7338, %v9033_v60  }
0x163f   : > { %7340 = vset.pattern.permute.xlu1 %v7609_v48 }
0x1640   : > { %4772 = vperm.xlu1 %7340, %v9045_v56  }
0x1644   : > { %7342 = vset.pattern.permute.xlu1 %v7595_v16 }
0x167c   : > { %v4686_v8 = vpop.permute.xlu1 %4685 }
0x167d   : > { %v4719_v41 = vpop.permute.xlu0 %4718 }
0x1680   : > { %v4688_v29 = vpop.permute.xlu1 %4687 }
0x1681   : > { %v4632_v6 = vpop.permute.xlu0 %4631  ;;  %v4689_v15 = vsel %vm1449_vm12, %v4686_v8, %v4688_v29  ;;  %v4693_v27 = vsel %vm1449_vm12, %v4688_v29, %v4686_v8  ;;  %v6826_v29 = vld [vmem:[%s9778_s1 + $0x63] ss:$8 sm:$0x3] }
0x1682   : > { %v4706_v59 = vmul.f32 %v4699_v18, %v4689_v15  ;;  %v4707_v37 = vmul.f32 %v4703_v17, %v4693_v27  ;;  %v4554_v17 = vrot.slane %v6825_v25, %v7845_v4  ;;  %v5037_v25 = vld [vmem:[%s9875_s9 + $0x90] sm:$0xff] }
0x1684   : > { %v4710_v24 = vrot.slane %v4706_v59, 4  ;;  %v4711_v34 = vrot.slane %v4707_v37, 4  ;;  %v4717_v10 = vpop.permute.xlu1 %4716 }
0x1685   : > { %v4663_v0 = vpop.permute.xlu0 %4662  ;;  %v4720_v12 = vsel %vm1482_vm13, %v4717_v10, %v4719_v41  ;;  %v4724_v33 = vsel %vm1482_vm13, %v4719_v41, %v4717_v10 }
0x1686   : > { %4714 = vst [vmem:[#allocation2 + $0x30] sm:$0xf0] %v4710_v24  ;;  %4715 = vst [vmem:[#allocation2 + $0x38] sm:$0xf0] %v4711_v34  ;;  %v4737_v23 = vmul.f32 %v4730_v38, %v4720_v12  ;;  %v4738_v48 = vmul.f32 %v4734_v35, %v4724_v33  ;;  %v4585_v24 = vrot.slane %v6826_v29, %v7845_v4 }
0x1687   : > { %v4589_v34 = vrot.slane %v6826_v29, %v7848_v5  ;;  %v6824_v12 = vld [vmem:[%s9778_s1 + $0x61] ss:$8 sm:$0x3] }
0x1688   : > { %4739 = vst [vmem:[#allocation2 + $0x40] sm:$0xf] %v4737_v23  ;;  %4740 = vst [vmem:[#allocation2 + $0x48] sm:$0xf] %v4738_v48  ;;  %v4630_v28 = vpop.permute.xlu1 %4629 }
0x1689   : > { %v4633_v21 = vsel %vm1247_vm1, %v4630_v28, %v4632_v6  ;;  %v4637_v2 = vsel %vm1247_vm1, %v4632_v6, %v4630_v28  ;;  %v4600_v13 = vpop.permute.xlu0 %4599 }
0x168a   : > { %v4650_v39 = vmul.f32 %v4643_v63, %v4633_v21  ;;  %v4651_v32 = vmul.f32 %v4647_v31, %v4637_v2 }
0x168c   : > { %v4654_v11 = vrot.slane %v4650_v39, 4  ;;  %v4655_v62 = vrot.slane %v4651_v32, 4  ;;  %v4661_v36 = vpop.permute.xlu1 %4660  ;;  %v4533_v39 = vrot.slane %v6824_v12, %v7848_v5  ;;  %v4751_v5 = vld [vmem:[%s9876_s7] sm:$0xff] }
0x168d   : > { %v4664_v52 = vsel %vm1416_vm11, %v4661_v36, %v4663_v0  ;;  %v4668_v58 = vsel %vm1416_vm11, %v4663_v0, %v4661_v36  ;;  %v4544_v54 = vpop.permute.xlu0 %4543  ;;  %vm5148_vm11 = vcmask 64512  }
0x168e   : > { %4658 = vst [vmem:[#allocation2 + $0x20] sm:$0xf0] %v4654_v11  ;;  %4659 = vst [vmem:[#allocation2 + $0x28] sm:$0xf0] %v4655_v62  ;;  %v4681_v57 = vmul.f32 %v4674_v51, %v4664_v52  ;;  %v4682_v30 = vmul.f32 %v4678_v47, %v4668_v58 }
0x168f   : > { %v4750_v45 = vld [vmem:[#allocation2 + $0x48] sm:$0xf]  ;;  %v4749_v46 = vld [vmem:[#allocation2 + $0x40] sm:$0xf] }
0x1690   : > { %4683 = vst [vmem:[#allocation2 + $0x30] sm:$0xf] %v4681_v57  ;;  %4684 = vst [vmem:[#allocation2 + $0x38] sm:$0xf] %v4682_v30  ;;  %6832 = vmatprep.subr.msk.mxu0 %vm2206_vm14, %v4750_v45  ;;  %v4597_v19 = vpop.permute.xlu1 %4596  ;;  %v4752_v57 = vld [vmem:[%s9876_s7 + $0x8] sm:$0xff]  ;;  %v4753_v30 = vld [vmem:[%s9876_s7 + $0x10] sm:$0xff] }
0x1691   : > { %v4601_v14 = vsel %vm1212_vm5, %v4600_v13, %v4597_v19  ;;  %v4604_v8 = vsel %vm1212_vm5, %v4597_v19, %v4600_v13  ;;  %6833 = vmatpush1.msk.msra.mxu0 %vm2206_vm14, %v4749_v46  ;;  %v4575_v38 = vpop.permute.xlu0 %4574  ;;  %v4529_v13 = vrot.slane %v6824_v12, %v7845_v4  ;;  %v5021_v45 = vld [vmem:[%s9875_s9 + $0x10] sm:$0xff]  ;;  %v5036_v46 = vld [vmem:[%s9875_s9 + $0x88] sm:$0xff]  ;;  %v5035_v19 = vld [vmem:[%s9875_s9 + $0x80] sm:$0xff]  ;;  %vm9877_vm14 = vcmask 261120  }
0x1692   : > { %v4617_v41 = vmul.f32 %v4610_v61, %v4604_v8  ;;  %v4618_v18 = vmul.f32 %v4614_v22, %v4601_v14  ;;  %v4754_v61 = vld [vmem:[%s9876_s7 + $0x18] sm:$0xff]  ;;  %v5019_v14 = vld [vmem:[%s9875_s9] sm:$0xff]  ;;  %v5136_v8 = vadd.s32 16, %v7838_v3  ;;  %vm9878_vm2 = vmmov %vm9877_vm14  ;;  %s9893_s7 = smov 120  }
0x1693   : > { %v5022_v22 = vld [vmem:[%s9875_s9 + $0x18] sm:$0xff]  ;;  %vm9879_vm8 = vmmov %vm9878_vm2 }
0x1694   : > { %v4621_v6 = vrot.slane %v4617_v41, 4  ;;  %v4622_v15 = vrot.slane %v4618_v18, 4  ;;  %v4541_v27 = vpop.permute.xlu1 %4540  ;;  %6936 = vmatpush3.msra.mxu1 %v5022_v22  ;;  %v5137_v41 = vadd.s32 24, %v7838_v3  ;;  %v7611_v18 = vmov 1.0   ;;  %vm9880_vm10 = vmmov %vm9878_vm2 }
0x1695   : > { %v4545_v59 = vsel %vm1010_vm9, %v4544_v54, %v4541_v27  ;;  %v4548_v37 = vsel %vm1010_vm9, %v4541_v27, %v4544_v54  ;;  %v4746_v7 = vld [vmem:[#allocation2 + $0x28] sm:$0xff]  ;;  %v4745_v2 = vld [vmem:[#allocation2 + $0x20] sm:$0xff]  ;;  %v4519_v32 = vpop.permute.xlu0 %4518  ;;  %6937 = vmatprep.subr.mxu1 %v5037_v25  ;;  %vm5138_vm12 = vcmp.ge.s32.totalorder %v5136_v8, %v8196_v42  ;;  %vm5140_vm13 = vcmp.lt.s32.totalorder %v5136_v8, %v8198_v43  ;;  %vm9881_vm3 = vmmov %vm9878_vm2 }
0x1696   : > { %4625 = vst [vmem:[#allocation2 + $0x10] sm:$0xf0] %v4621_v6  ;;  %4626 = vst [vmem:[#allocation2 + $0x18] sm:$0xf0] %v4622_v15  ;;  %v4561_v35 = vmul.f32 %v4554_v17, %v4548_v37  ;;  %v4562_v9 = vmul.f32 %v4558_v26, %v4545_v59  ;;  %6938 = vmatpush3.msra.mxu1 %v5021_v45  ;;  %v5020_v54 = vld [vmem:[%s9875_s9 + $0x8] sm:$0xff]  ;;  %vm5139_vm1 = vcmp.ge.s32.totalorder %v5137_v41, %v8196_v42  ;;  %v4988_v17 = vpop.f32.mrf.mxu1  ;;  %s9840_s9 = smov 119  }
0x1697   : > { %v4748_v10 = vld [vmem:[#allocation2 + $0x38] sm:$0xff]  ;;  %v4747_v0 = vld [vmem:[#allocation2 + $0x30] sm:$0xff]  ;;  %6939 = vmatprep.subr.mxu1 %v5036_v46  ;;  %vm5142_vm9 = vmand %vm5138_vm12, %vm5140_vm13 }
0x1698   : > { %v4565_v33 = vrot.slane %v4561_v35, 4  ;;  %v4566_v23 = vrot.slane %v4562_v9, 4  ;;  %4817 = vmatprep.subr.mxu0 %v4748_v10  ;;  %v4572_v48 = vpop.permute.xlu1 %4571  ;;  %6940 = vmatpush3.msra.mxu1 %v5020_v54  ;;  %v6842_v3 = vsel %vm5142_vm9, 1.0, %v7596_v49  ;;  %v4990_v29 = vpop.f32.mrf.mxu1  ;;  %vm5691_vm9 = vcmask 56320  }
0x1699   : > { %v4576_v63 = vsel %vm1043_vm6, %v4575_v38, %v4572_v48  ;;  %v4579_v31 = vsel %vm1043_vm6, %v4572_v48, %v4575_v38  ;;  %4818 = vmatpush1.msra.mxu0 %v4747_v0  ;;  %6941 = vmatprep.subr.mxu1 %v5035_v19  ;;  %vm5141_vm6 = vcmp.lt.s32.totalorder %v5137_v41, %v8198_v43 }
0x169a   : > { %4569 = vst [vmem:[#allocation2] sm:$0xf0] %v4565_v33  ;;  %4570 = vst [vmem:[#allocation2 + $0x8] sm:$0xf0] %v4566_v23  ;;  %v4592_v28 = vmul.f32 %v4585_v24, %v4579_v31  ;;  %v4593_v21 = vmul.f32 %v4589_v34, %v4576_v63  ;;  %4819 = vmatprep.subr.mxu0 %v4746_v7  ;;  %6942 = vmatpush3.msra.mxu1 %v5019_v14  ;;  %v4994_v6 = vpop.f32.mrf.mxu1 }
0x169b   : > { %4820 = vmatpush1.msra.mxu0 %v4745_v2 }
0x169c   : > { %4594 = vst [vmem:[#allocation2 + $0x10] sm:$0xf] %v4592_v28  ;;  %4595 = vst [vmem:[#allocation2 + $0x18] sm:$0xf] %v4593_v21  ;;  %v4515_v51 = vpop.permute.xlu1 %4514  ;;  %v4996_v15 = vpop.f32.mrf.mxu1 }
0x169d   : > { %v4520_v47 = vsel %vm983_vm15, %v4519_v32, %v4515_v51  ;;  %v4523_v55 = vsel %vm983_vm15, %v4515_v51, %v4519_v32  ;;  %vm5143_vm15 = vmand %vm5139_vm1, %vm5141_vm6  ;;  %vm5846_vm1 = vcmask 457728   ;;  %vm5808_vm6 = vcmask 465920  }
0x169e   : > { %v4536_v11 = vmul.f32 %v4529_v13, %v4523_v55  ;;  %v4537_v62 = vmul.f32 %v4533_v39, %v4520_v47  ;;  %v6843_v44 = vsel %vm5143_vm15, 1.0, %v7596_v49  ;;  %v5000_v35 = vpop.f32.mrf.mxu1  ;;  %vm5770_vm15 = vcmask 515072  }
0x16a0   : > { %4538 = vst [vmem:[#allocation2] sm:$0xf] %v4536_v11  ;;  %4539 = vst [vmem:[#allocation2 + $0x8] sm:$0xf] %v4537_v62  ;;  %v5002_v63 = vpop.f32.mrf.mxu1 }
0x16a2   : > { %v4893_v43 = vpop.permute.xlu0 %4892  ;;  %v5006_v2 = vpop.f32.mrf.mxu1 }
0x16a3   : > { %v4744_v36 = vld [vmem:[#allocation2 + $0x18] sm:$0xff]  ;;  %v4743_v52 = vld [vmem:[#allocation2 + $0x10] sm:$0xff]  ;;  %v4991_v9 = vadd.f32 %v4990_v29, %v4893_v43 }
0x16a4   : > { %4821 = vmatprep.subr.mxu0 %v4744_v36 }
0x16a5   : > { %4822 = vmatpush1.msra.mxu0 %v4743_v52 }
0x16a7   : > { %v4742_v4 = vld [vmem:[#allocation2 + $0x8] sm:$0xff]  ;;  %v4741_v58 = vld [vmem:[#allocation2] sm:$0xff]  ;;  %v4768_v0 = vpop.permute.xlu0 %4767 }
0x16a8   : > { %4823 = vmatprep.subr.mxu0 %v4742_v4  ;;  %v5008_v4 = vpop.f32.mrf.mxu1 }
0x16a9   : > { %4824 = vmatpush1.msra.mxu0 %v4741_v58  ;;  %v4758_v26 = vpop.permute.xlu1 %4757 }
0x16aa   : > { %6834 = vmatmul.mubr.msk.f32.vlgmr.msra.gmra.mxu0 %vm3519_vm0, %v4751_v5  ;;  %7093 = vmatprep.subr.msk.mxu0 %vm8200_vm7, %v7611_v18 }
0x16ab   : > { %4863 = vmatprep.mubr.f32.mxu0 %v7596_v49  ;;  %7094 = vmatpush3.msk.msra.mxu0 %vm8200_vm7, %v7611_v18  ;;  %vm5244_vm7 = vcmask 523264  }
0x16ac   : > { %v4908_v11 = vpop.permute.xlu0 %4907 }
0x16ad   : > { %v4763_v42 = vpop.permute.xlu1 %4762  ;;  %v5007_v5 = vadd.f32 %v5006_v2, %v4908_v11  ;;  %v5009_v22 = vadd.f32 %v5008_v4, %v4908_v11 }
0x16ae   : > { %6835 = vmatmul.mubr.msk.f32.gmra.mxu0 %vm3519_vm0, %v4752_v57 }
0x16af   : > { %4869 = vmatprep.mubr.f32.mxu0 %v7596_v49 }
0x16b2   : > { %6836 = vmatmul.mubr.msk.f32.gmra.mxu0 %vm3519_vm0, %v4753_v30  ;;  %v4898_v59 = vpop.permute.xlu1 %4897 }
0x16b3   : > { %4875 = vmatprep.mubr.f32.mxu0 %v7596_v49  ;;  %v4995_v33 = vadd.f32 %v4994_v6, %v4898_v59  ;;  %v4997_v31 = vadd.f32 %v4996_v15, %v4898_v59 }
0x16b6   : > { %6837 = vmatmul.mubr.msk.f32.gmra.mxu0 %vm3519_vm0, %v4754_v61  ;;  %v4903_v28 = vpop.permute.xlu1 %4902  ;;  %vm9882_vm0 = vmmov %vm9878_vm2 }
0x16b7   : > { %7095 = vmatprep.mubr.msk.f32.mxu0 %vm5148_vm11, %v8231_v53  ;;  %v5003_v47 = vadd.f32 %v5002_v63, %v4903_v28  ;;  %v5001_v36 = vadd.f32 %v5000_v35, %v4903_v28  ;;  %vm9883_vm12 = vmmov %vm9882_vm0 }
0x16b8   : > { %vm9884_vm13 = vmmov %vm9882_vm0 }
0x16ba   : > { %7096 = vmatmul.mubr.msk.f32.vlgmr.msra.gmra.mxu0 %vm5148_vm11, %v8237_v1  ;;  %v4989_v1 = vadd.f32 %v4988_v17, %v4893_v43 }
0x16bb   : > { %7098 = vmatprep.mubr.msk.f32.mxu0 %vm5148_vm11, %v6842_v3  ;;  %v4773_v62 = vpop.permute.xlu1 %4772 }
0x16be   : > { %7099 = vmatmul.mubr.msk.f32.gmra.mxu0 %vm5148_vm11, %v6843_v44 }
0x176a   : > { %v4859_v27 = vpop.f32.mrf.mxu0 }
0x176b   : > { %v4860_v37 = vadd.f32 %v4859_v27, %v4758_v26 }
0x176c   : > { %v4861_v38 = vpop.f32.mrf.mxu0 }
0x176d   : > { %v4862_v24 = vadd.f32 %v4861_v38, %v4758_v26  ;;  %v5011_v12 = vadd.f32 %v4989_v1, %v4860_v37 }
0x176e   : > { %v4865_v34 = vpop.f32.mrf.mxu0 }
0x176f   : > { %v5012_v10 = vadd.f32 %v4991_v9, %v4862_v24  ;;  %v4866_v23 = vadd.f32 %v4865_v34, %v4763_v42 }
0x1770   : > { %v4867_v48 = vpop.f32.mrf.mxu0 }
0x1771   : > { %v4868_v7 = vadd.f32 %v4867_v48, %v4763_v42  ;;  %5115 = vmatprep.mubr.f32.mxu1 %v5012_v10  ;;  %v5013_v39 = vadd.f32 %v4995_v33, %v4866_v23 }
0x1772   : > { %v4871_v21 = vpop.f32.mrf.mxu0  ;;  %5116 = vmatmul.mubr.f32.vlgmr.msra.gmra.mxu1 %v5011_v12 }
0x1773   : > { %v5014_v13 = vadd.f32 %v4997_v31, %v4868_v7  ;;  %v4872_v32 = vadd.f32 %v4871_v21, %v4768_v0 }
0x1774   : > { %v4873_v51 = vpop.f32.mrf.mxu0 }
0x1775   : > { %v4874_v55 = vadd.f32 %v4873_v51, %v4768_v0  ;;  %5120 = vmatprep.mubr.f32.mxu1 %v5014_v13  ;;  %v5015_v61 = vadd.f32 %v5001_v36, %v4872_v32 }
0x1776   : > { %v4877_v52 = vpop.f32.mrf.mxu0  ;;  %5121 = vmatmul.mubr.f32.gmra.mxu1 %v5013_v39 }
0x1777   : > { %v5016_v58 = vadd.f32 %v5003_v47, %v4874_v55  ;;  %v4878_v57 = vadd.f32 %v4877_v52, %v4773_v62 }
0x1778   : > { %v4879_v30 = vpop.f32.mrf.mxu0 }
0x1779   : > { %v4880_v25 = vadd.f32 %v4879_v30, %v4773_v62  ;;  %5125 = vmatprep.mubr.f32.mxu1 %v5016_v58  ;;  %v5017_v46 = vadd.f32 %v5007_v5, %v4878_v57  ;;  %v7612_v5 = vmov 14  }
0x177a   : > { %5126 = vmatmul.mubr.f32.gmra.mxu1 %v5015_v61  ;;  %v9239_v59 = vpop.f32.mrf.mxu0 }
0x177b   : > { %v5018_v45 = vadd.f32 %v5009_v22, %v4880_v25  ;;  %v7613_v25 = vmov 15  }
0x177c   : > { %v5225_v1 = vpop.f32.mrf.mxu0 }
0x177d   : > { %5130 = vmatprep.mubr.f32.mxu1 %v5018_v45  ;;  %7109 = vmatprep.mubr.msk.f32.mxu0 %vm9877_vm14, %v5225_v1  ;;  %vm5616_vm14 = vcmask 72704  }
0x177e   : > { %5131 = vmatmul.mubr.f32.gmra.mxu1 %v5017_v46  ;;  %v9242_v35 = vpop.f32.mrf.mxu0 }
0x1780   : > { %v5235_v34 = vpop.f32.mrf.mxu0 }
0x1832   : > { %v6943_v54 = vpop.f32.mrf.mxu1 }
0x1834   : > { %v6944_v19 = vpop.f32.mrf.mxu1 }
0x1835   : > { %v9225_v17 = vadd.f32 %v6944_v19, %v6943_v54 }
0x1836   : > { %v6946_v14 = vpop.f32.mrf.mxu1 }
0x1837   : > { %v5245_v43 = vsel %vm5244_vm7, %v9225_v17, 0.0 }
0x1838   : > { %v6947_v8 = vpop.f32.mrf.mxu1 }
0x1839   : > { %v9231_v42 = vadd.f32 %v6947_v8, %v6946_v14 }
0x183a   : > { %v6949_v41 = vpop.f32.mrf.mxu1 }
0x183b   : > { %v5248_v27 = vsel %vm5244_vm7, %v9231_v42, 0.0 }
0x183c   : > { %v6950_v18 = vpop.f32.mrf.mxu1 }
0x183d   : > { %v9223_v3 = vadd.f32 %v6950_v18, %v6949_v41 }
0x183e   : > { %v6952_v44 = vpop.f32.mrf.mxu1 }
0x183f   : > { %v5251_v26 = vsel %vm5244_vm7, %v9223_v3, 0.0 }
0x1840   : > { %v6953_v29 = vpop.f32.mrf.mxu1  ;;  %5252 = vadd.xlane.f32.xlu0 %v5251_v26 }
0x1841   : > { %v9229_v6 = vadd.f32 %v6953_v29, %v6952_v44 }
0x1843   : > { %v5254_v15 = vsel %vm5244_vm7, %v9229_v6, 0.0 }
0x1844   : > { %5255 = vadd.xlane.f32.xlu1 %v5254_v15  ;;  %5246 = vadd.xlane.f32.xlu0 %v5245_v43 }
0x1848   : > { %5249 = vadd.xlane.f32.xlu1 %v5248_v27 }
0x18c9   : > { %v5253_v37 = vpop.xlane.xlu0 %5252 }
0x18cd   : > { %v5256_v38 = vpop.xlane.xlu1 %5255  ;;  %v5247_v24 = vpop.xlane.xlu0 %5246 }
0x18ce   : > { %7101 = vmatprep.subr.mxu0 %v5256_v38 }
0x18cf   : > { %7102 = vmatpush3.msra.mxu0 %v5256_v38 }
0x18d0   : > { %7103 = vmatprep.subr.mxu0 %v5253_v37 }
0x18d1   : > { %7104 = vmatpush3.msra.mxu0 %v5253_v37  ;;  %v5250_v9 = vpop.xlane.xlu1 %5249 }
0x18d2   : > { %7105 = vmatprep.subr.mxu0 %v5250_v9 }
0x18d3   : > { %7106 = vmatpush3.msra.mxu0 %v5250_v9 }
0x18d4   : > { %7107 = vmatprep.subr.mxu0 %v5247_v24 }
0x18d5   : > { %7108 = vmatpush3.msra.mxu0 %v5247_v24 }
0x18d6   : > { %7110 = vmatmul.mubr.msk.f32.vlgmr.msra.gmra.mxu0 %vm9878_vm2, %v9239_v59  ;;  %vm5884_vm2 = vcmask 449536  }
0x18d7   : > { %7112 = vmatprep.mubr.msk.f32.mxu0 %vm9879_vm8, %v5235_v34  ;;  %vm6088_vm8 = vcmask 1041408  }
0x18da   : > { %7113 = vmatmul.mubr.msk.f32.gmra.mxu0 %vm9880_vm10, %v9242_v35  ;;  %vm9898_vm10 = vmmov %vm9882_vm0 }
0x18db   : > { %7123 = vmatprep.mubr.msk.f32.mxu0 %vm9881_vm3, %v5225_v1  ;;  %vm9899_vm3 = vcmask 15360  }
0x1996   : > { %v7111_v10 = vpop.f32.mrf.mxu0 }
0x1997   : > { %v5355_v63 = vmul.f32 0.00390625, %v7111_v10 }
0x1998   : > { %v5335_v0 = vpop.f32.mrf.mxu0 }
0x1999   : > { %v5354_v31 = vmul.f32 0.00390625, %v5335_v0 }
0x199a   : > { %v7114_v12 = vpop.f32.mrf.mxu0 }
0x199b   : > { %v5357_v33 = vmul.f32 0.00390625, %v7114_v12 }
0x199c   : > { %v5345_v23 = vpop.f32.mrf.mxu0 }
0x199d   : > { %v5356_v48 = vmul.f32 0.00390625, %v5345_v23  ;;  %5375 = vperm.xlu1 %7342, %v5357_v33  }
0x199f   : > { %5370 = vperm.xlu0 %7343, %v5356_v48  }
0x19a1   : > { %5365 = vperm.xlu1 %7342, %v5355_v63  }
0x19a3   : > { %7347 = vset.pattern.permute.xlu0 %v7613_v25 }
0x19a5   : > { %5360 = vperm.xlu1 %7342, %v5354_v31  }
0x19a9   : > { %7344 = vset.pattern.permute.xlu1 %v7612_v5 }
0x1a18   : > { %v5376_v7 = vpop.permute.xlu1 %5375 }
0x1a19   : > { %v9251_v28 = vsub.f32 %v9229_v6, %v5376_v7 }
0x1a1a   : > { %v5371_v21 = vpop.permute.xlu0 %5370 }
0x1a1b   : > { %v9254_v2 = vsub.f32 %v9223_v3, %v5371_v21  ;;  %v5385_v13 = vmul.f32 %v9251_v28, %v9251_v28 }
0x1a1c   : > { %v5366_v39 = vpop.permute.xlu1 %5365 }
0x1a1d   : > { %v5384_v32 = vmul.f32 %v9254_v2, %v9254_v2  ;;  %v9261_v51 = vsub.f32 %v9231_v42, %v5366_v39  ;;  %v5395_v47 = vsel %vm5244_vm7, %v5385_v13, 0.0 }
0x1a1e   : > { %5396 = vadd.xlane.f32.xlu1 %v5395_v47 }
0x1a1f   : > { %v5392_v55 = vsel %vm5244_vm7, %v5384_v32, 0.0  ;;  %v5383_v11 = vmul.f32 %v9261_v51, %v9261_v51 }
0x1a20   : > { %v5361_v62 = vpop.permute.xlu1 %5360  ;;  %5393 = vadd.xlane.f32.xlu0 %v5392_v55 }
0x1a21   : > { %v9268_v36 = vsub.f32 %v9225_v17, %v5361_v62  ;;  %v5389_v52 = vsel %vm5244_vm7, %v5383_v11, 0.0 }
0x1a22   : > { %5390 = vadd.xlane.f32.xlu1 %v5389_v52 }
0x1a23   : > { %v5382_v4 = vmul.f32 %v9268_v36, %v9268_v36 }
0x1a25   : > { %v5386_v58 = vsel %vm5244_vm7, %v5382_v4, 0.0 }
0x1a26   : > { %5387 = vadd.xlane.f32.xlu1 %v5386_v58 }
0x1a36   : > { %5548 = vperm.xlu0 %7347, %v9033_v60  }
0x1a37   : > { %5532 = vperm.xlu1 %7344, %v9045_v56  }
0x1a3a   : > { %7349 = vset.pattern.permute.xlu0 %v7595_v16 }
0x1a3b   : > { %5528 = vperm.xlu1 %7344, %v9033_v60  }
0x1a3f   : > { %7345 = vset.pattern.permute.xlu1 %v7613_v25 }
0x1a40   : > { %5552 = vperm.xlu1 %7345, %v9045_v56  }
0x1a44   : > { %7346 = vset.pattern.permute.xlu1 %v7612_v5 }
0x1a45   : > { %5524 = vperm.xlu1 %7346, %v9021_v40  }
0x1a49   : > { %7348 = vset.pattern.permute.xlu1 %v7595_v16 }
0x1aa7   : > { %v5397_v57 = vpop.xlane.xlu1 %5396 }
0x1aa8   : > { %7115 = vmatprep.subr.mxu0 %v5397_v57 }
0x1aa9   : > { %7116 = vmatpush3.msra.mxu0 %v5397_v57  ;;  %v5394_v30 = vpop.xlane.xlu0 %5393 }
0x1aaa   : > { %7117 = vmatprep.subr.mxu0 %v5394_v30 }
0x1aab   : > { %v5391_v61 = vpop.xlane.xlu1 %5390  ;;  %7118 = vmatpush3.msra.mxu0 %v5394_v30 }
0x1aac   : > { %7119 = vmatprep.subr.mxu0 %v5391_v61 }
0x1aad   : > { %7120 = vmatpush3.msra.mxu0 %v5391_v61 }
0x1aaf   : > { %v5388_v22 = vpop.xlane.xlu1 %5387 }
0x1ab0   : > { %7121 = vmatprep.subr.mxu0 %v5388_v22 }
0x1ab1   : > { %7122 = vmatpush3.msra.mxu0 %v5388_v22 }
0x1ab2   : > { %7124 = vmatmul.mubr.msk.f32.vlgmr.msra.gmra.mxu0 %vm9882_vm0, %v9239_v59  ;;  %7129 = vmatprep.subr.mxu0 %v7596_v49 }
0x1ab3   : > { %7126 = vmatprep.mubr.msk.f32.mxu0 %vm9883_vm12, %v5235_v34  ;;  %v5533_v59 = vpop.permute.xlu1 %5532 }
0x1ab6   : > { %7127 = vmatmul.mubr.msk.f32.gmra.mxu0 %vm9884_vm13, %v9242_v35  ;;  %v5549_v35 = vpop.permute.xlu0 %5548 }
0x1ab7   : > { %7137 = vmatprep.mubr.msk.f32.mxu0 %vm7600_vm4, %v7596_v49  ;;  %v5529_v1 = vpop.permute.xlu1 %5528 }
0x1abb   : > { %v5553_v37 = vpop.permute.xlu1 %5552 }
0x1ac0   : > { %v5525_v38 = vpop.permute.xlu1 %5524 }
0x1b72   : > { %v7125_v45 = vpop.f32.mrf.mxu0 }
0x1b73   : > { %v5484_v46 = vmul.f32 0.00390625, %v7125_v45 }
0x1b74   : > { %v5464_v54 = vpop.f32.mrf.mxu0 }
0x1b75   : > { %v5488_v19 = vadd.f32 1e-05, %v5484_v46  ;;  %v5483_v14 = vmul.f32 0.00390625, %v5464_v54 }
0x1b76   : > { %v7128_v8 = vpop.f32.mrf.mxu0 }
0x1b77   : > { %7423 = vrsqrt.f32 %v5488_v19  ;;  %v5487_v41 = vadd.f32 1e-05, %v5483_v14  ;;  %v5486_v18 = vmul.f32 0.00390625, %v7128_v8  ;;  %v9432_v14 = vld [vmem:[%s9778_s1 + $0x81] ss:$0 sm:$0xff] }
0x1b78   : > { %v5474_v44 = vpop.f32.mrf.mxu0 }
0x1b79   : > { %7425 = vrsqrt.f32 %v5487_v41  ;;  %v5490_v56 = vadd.f32 1e-05, %v5486_v18  ;;  %v5485_v60 = vmul.f32 0.00390625, %v5474_v44  ;;  %v5935_v18 = vld [vmem:[%s9787_s10 + $0x8] sm:$0xff] }
0x1b7a   : > { %6009 = vmatprep.mubr.f32.mxu1 %v5935_v18 }
0x1b7b   : > { %7427 = vrsqrt.f32 %v5490_v56  ;;  %v5489_v26 = vadd.f32 1e-05, %v5485_v60  ;;  %v9446_v60 = vld [vmem:[%s9778_s1 + $0x75] ss:$0 sm:$0xff] }
0x1b7d   : > { %7429 = vrsqrt.f32 %v5489_v26 }
0x1b84   : > { %v7424_v29 = vpop.eup %7423 }
0x1b85   : > { %5502 = vperm.xlu1 %7348, %v7424_v29  }
0x1b86   : > { %v7426_v15 = vpop.eup %7425 }
0x1b87   : > { %5497 = vperm.xlu0 %7349, %v7426_v15  }
0x1b88   : > { %v7428_v43 = vpop.eup %7427 }
0x1b89   : > { %5512 = vperm.xlu1 %7348, %v7428_v43  }
0x1b8a   : > { %v7430_v27 = vpop.eup %7429 }
0x1b8b   : > { %5507 = vperm.xlu0 %7349, %v7430_v27   ;;  %v9458_v27 = vld [vmem:[%s9778_s1 + $0x80] ss:$0 sm:$0xff] }
0x1b8d   : > { %7350 = vset.pattern.permute.xlu1 %v7612_v5 }
0x1b8e   : > { %5520 = vperm.xlu1 %7350, %v9005_v20  }
0x1b8f   : > { %7352 = vset.pattern.permute.xlu0 %v7613_v25 }
0x1b90   : > { %5540 = vperm.xlu0 %7352, %v9005_v20  }
0x1b92   : > { %7351 = vset.pattern.permute.xlu1 %v7613_v25 }
0x1b93   : > { %5544 = vperm.xlu1 %7351, %v9021_v40  }
0x1b94   : > { %7355 = vset.pattern.permute.xlu0 %v7595_v16 }
0x1c00   : > { %v5503_v9 = vpop.permute.xlu1 %5502 }
0x1c01   : > { %v5516_v40 = vmul.f32 %v5503_v9, %v9261_v51  ;;  %v7628_v9 = vmov 16  }
0x1c02   : > { %v5498_v24 = vpop.permute.xlu0 %5497  ;;  %7353 = vset.pattern.permute.xlu1 %v7628_v9 }
0x1c03   : > { %v5515_v20 = vmul.f32 %v5498_v24, %v9268_v36  ;;  %v5536_v47 = vmul.f32 %v5525_v38, %v5516_v40  ;;  %v9475_v24 = vld [vmem:[%s9779_s2] sm:$0xff] }
0x1c04   : > { %v5513_v34 = vpop.permute.xlu1 %5512 }
0x1c05   : > { %v5518_v10 = vmul.f32 %v5513_v34, %v9251_v28 }
0x1c06   : > { %v5508_v0 = vpop.permute.xlu0 %5507 }
0x1c07   : > { %v5538_v12 = vmul.f32 %v5533_v59, %v5518_v10  ;;  %v5517_v33 = vmul.f32 %v5508_v0, %v9254_v2 }
0x1c09   : > { %v5558_v23 = vadd.f32 %v5553_v37, %v5538_v12  ;;  %v5537_v48 = vmul.f32 %v5529_v1, %v5517_v33  ;;  %v5521_v63 = vpop.permute.xlu1 %5520  ;;  %v9484_v33 = vld [vmem:[%s9778_s1 + $0x77] ss:$0 sm:$0xff] }
0x1c0a   : > { %v5535_v31 = vmul.f32 %v5521_v63, %v5515_v20  ;;  %v9493_v63 = vld [vmem:[%s9778_s1 + $0x73] ss:$0 sm:$0xff] }
0x1c0b   : > { %v6860_v7 = vmul.f32 -1.442695, %v5558_v23  ;;  %v5557_v21 = vadd.f32 %v5549_v35, %v5537_v48  ;;  %v5541_v13 = vpop.permute.xlu0 %5540  ;;  %v9470_v35 = vld [vmem:[%s9778_s1 + $0x74] ss:$0 sm:$0xff] }
0x1c0c   : > { %v5555_v39 = vadd.f32 %v5541_v13, %v5535_v31 }
0x1c0d   : > { %7431 = vpow2.f32 %v6860_v7  ;;  %v6859_v32 = vmul.f32 -1.442695, %v5557_v21 }
0x1c0e   : > { %v6857_v28 = vmul.f32 -1.442695, %v5555_v39  ;;  %v5545_v55 = vpop.permute.xlu1 %5544 }
0x1c0f   : > { %7433 = vpow2.f32 %v6859_v32  ;;  %v5556_v11 = vadd.f32 %v5545_v55, %v5536_v47 }
0x1c10   : > { %7435 = vpow2.f32 %v6857_v28 }
0x1c11   : > { %v6858_v2 = vmul.f32 -1.442695, %v5556_v11 }
0x1c13   : > { %7437 = vpow2.f32 %v6858_v2 }
0x1c1a   : > { %v7432_v62 = vpop.eup %7431 }
0x1c1b   : > { %v5574_v51 = vadd.f32 1.0, %v7432_v62 }
0x1c1c   : > { %v7434_v36 = vpop.eup %7433 }
0x1c1d   : > { %v7436_v52 = vpop.eup %7435  ;;  %7439 = vrcp.f32 %v5574_v51  ;;  %v5573_v4 = vadd.f32 1.0, %v7434_v36 }
0x1c1e   : > { %v5571_v58 = vadd.f32 1.0, %v7436_v52 }
0x1c1f   : > { %7441 = vrcp.f32 %v5573_v4 }
0x1c20   : > { %v7438_v5 = vpop.eup %7437  ;;  %7443 = vrcp.f32 %v5571_v58 }
0x1c21   : > { %v5572_v57 = vadd.f32 1.0, %v7438_v5 }
0x1c23   : > { %7445 = vrcp.f32 %v5572_v57 }
0x1c2a   : > { %v7440_v30 = vpop.eup %7439 }
0x1c2b   : > { %v9297_v61 = vmul.f32 %v7440_v30, %v5558_v23 }
0x1c2c   : > { %v7442_v22 = vpop.eup %7441 }
0x1c2d   : > { %v7444_v25 = vpop.eup %7443  ;;  %5745 = vst.msk [vmem:[#allocation2 + $0x130] sm:$0xff] %vm5244_vm7, %v9297_v61  ;;  %v9301_v45 = vmul.f32 %v7442_v22, %v5557_v21 }
0x1c2e   : > { %v9303_v46 = vmul.f32 %v7444_v25, %v5555_v39  ;;  %v9501_v39 = vld [vmem:[%s9778_s1 + $0x72] ss:$0 sm:$0xff] }
0x1c2f   : > { %5744 = vst.msk [vmem:[#allocation2 + $0x120] sm:$0xff] %vm5244_vm7, %v9301_v45 }
0x1c30   : > { %v7446_v54 = vpop.eup %7445  ;;  %5742 = vst.msk [vmem:[#allocation2 + $0x100] sm:$0xff] %vm5244_vm7, %v9303_v46 }
0x1c31   : > { %v9309_v19 = vmul.f32 %v7446_v54, %v5556_v11 }
0x1c33   : > { %5743 = vst.msk [vmem:[#allocation2 + $0x110] sm:$0xff] %vm5244_vm7, %v9309_v19  ;;  %5824 = vrot.lane.b32.xlu1 %v9309_v19, %s9827_s20  ;;  %5836 = vrot.lane.b32.xlu0 %v9309_v19, %s9833_s23 }
0x1c37   : > { %5707 = vrot.lane.b32.xlu1 %v9309_v19, %s9829_s30  ;;  %5719 = vrot.lane.b32.xlu0 %v9309_v19, %s9865_s22 }
0x1c3b   : > { %5786 = vrot.lane.b32.xlu1 %v9309_v19, %s9821_s4  ;;  %5798 = vrot.lane.b32.xlu0 %v9309_v19, %s9819_s6 }
0x1c3f   : > { %5669 = vrot.lane.b32.xlu1 %v9309_v19, %s9811_s0  ;;  %5681 = vrot.lane.b32.xlu0 %v9309_v19, %s9813_s5  ;;  %s9815_s0 = smov 73   ;;  %s9817_s5 = smov 9  }
0x1c43   : > { %5748 = vrot.lane.b32.xlu1 %v9309_v19, %s9864_s16  ;;  %5760 = vrot.lane.b32.xlu0 %v9309_v19, %s9831_s15 }
0x1c47   : > { %5632 = vrot.lane.b32.xlu1 %v9309_v19, %s9825_s27  ;;  %5644 = vrot.lane.b32.xlu0 %v9309_v19, %s9823_s3 }
0x1c4b   : > { %5594 = vrot.lane.b32.xlu1 %v9309_v19, %s9815_s0  ;;  %5606 = vrot.lane.b32.xlu0 %v9309_v19, %s9817_s5  ;;  %s9885_s0 = smov 7   ;;  %s9886_s5 = smov 71  }
0x1c4f   : > { %5834 = vrot.lane.b32.xlu0 %v9303_v46, %s9833_s23  ;;  %5822 = vrot.lane.b32.xlu1 %v9303_v46, %s9827_s20 }
0x1c53   : > { %5717 = vrot.lane.b32.xlu0 %v9303_v46, %s9865_s22  ;;  %5705 = vrot.lane.b32.xlu1 %v9303_v46, %s9829_s30 }
0x1c57   : > { %5796 = vrot.lane.b32.xlu0 %v9303_v46, %s9819_s6  ;;  %5784 = vrot.lane.b32.xlu1 %v9303_v46, %s9821_s4  ;;  %s9887_s6 = smov 9   ;;  %s9888_s4 = smov 73  }
0x1c5b   : > { %5679 = vrot.lane.b32.xlu0 %v9303_v46, %s9885_s0  ;;  %5667 = vrot.lane.b32.xlu1 %v9303_v46, %s9886_s5 }
0x1c5f   : > { %5758 = vrot.lane.b32.xlu0 %v9303_v46, %s9831_s15  ;;  %5746 = vrot.lane.b32.xlu1 %v9303_v46, %s9864_s16 }
0x1c63   : > { %5642 = vrot.lane.b32.xlu0 %v9303_v46, %s9823_s3  ;;  %5630 = vrot.lane.b32.xlu1 %v9303_v46, %s9825_s27  ;;  %s9889_s3 = smov 57   ;;  %s9890_s27 = smov 121  }
0x1c67   : > { %5604 = vrot.lane.b32.xlu0 %v9303_v46, %s9887_s6  ;;  %5592 = vrot.lane.b32.xlu1 %v9303_v46, %s9888_s4 }
0x1c6b   : > { %5840 = vrot.lane.b32.xlu0 %v9297_v61, %s9833_s23  ;;  %5828 = vrot.lane.b32.xlu1 %v9297_v61, %s9827_s20  ;;  %s9891_s20 = smov 8  }
0x1c6f   : > { %5723 = vrot.lane.b32.xlu0 %v9297_v61, %s9865_s22  ;;  %5711 = vrot.lane.b32.xlu1 %v9297_v61, %s9829_s30  ;;  %s9892_s30 = smov 72  }
0x1c73   : > { %5802 = vrot.lane.b32.xlu0 %v9297_v61, %s9889_s3  ;;  %5790 = vrot.lane.b32.xlu1 %v9297_v61, %s9890_s27 }
0x1c77   : > { %5685 = vrot.lane.b32.xlu0 %v9297_v61, %s9885_s0  ;;  %5673 = vrot.lane.b32.xlu1 %v9297_v61, %s9886_s5 }
0x1c7b   : > { %5764 = vrot.lane.b32.xlu0 %v9297_v61, %s9831_s15  ;;  %5752 = vrot.lane.b32.xlu1 %v9297_v61, %s9864_s16  ;;  %s9894_s15 = smov 65  }
0x1c7f   : > { %5648 = vrot.lane.b32.xlu0 %v9297_v61, %s9891_s20  ;;  %5636 = vrot.lane.b32.xlu1 %v9297_v61, %s9892_s30 }
0x1c83   : > { %5610 = vrot.lane.b32.xlu0 %v9297_v61, %s9887_s6  ;;  %5598 = vrot.lane.b32.xlu1 %v9297_v61, %s9888_s4 }
0x1c87   : > { %5838 = vrot.lane.b32.xlu0 %v9301_v45, %s9833_s23  ;;  %5826 = vrot.lane.b32.xlu1 %v9301_v45, %s9893_s7  ;;  %s9895_s23 = smov 63  }
0x1c8b   : > { %5721 = vrot.lane.b32.xlu0 %v9301_v45, %s9865_s22  ;;  %5709 = vrot.lane.b32.xlu1 %v9301_v45, %s9894_s15 }
0x1c8f   : > { %5800 = vrot.lane.b32.xlu0 %v9301_v45, %s9889_s3  ;;  %5788 = vrot.lane.b32.xlu1 %v9301_v45, %s9890_s27 }
0x1c93   : > { %5683 = vrot.lane.b32.xlu0 %v9301_v45, %s9885_s0  ;;  %5671 = vrot.lane.b32.xlu1 %v9301_v45, %s9886_s5 }
0x1c97   : > { %5762 = vrot.lane.b32.xlu0 %v9301_v45, %s9895_s23  ;;  %5750 = vrot.lane.b32.xlu1 %v9301_v45, %s9864_s16 }
0x1c9b   : > { %5646 = vrot.lane.b32.xlu0 %v9301_v45, %s9891_s20  ;;  %5634 = vrot.lane.b32.xlu1 %v9301_v45, %s9892_s30 }
0x1c9f   : > { %5878 = vrot.lane.b32.xlu0 %v9297_v61, %s9838_s8  ;;  %5866 = vrot.lane.b32.xlu1 %v9297_v61, %s9840_s9  ;;  %s9896_s9 = smov 55  }
0x1ca3   : > { %5608 = vrot.lane.b32.xlu0 %v9301_v45, %s9887_s6  ;;  %5596 = vrot.lane.b32.xlu1 %v9301_v45, %s9888_s4 }
0x1ca5   : > { %v5825_v8 = vpop.permute.xlu1 %5824  ;;  %v5837_v41 = vpop.permute.xlu0 %5836 }
0x1ca6   : > { %v5848_v44 = vsel %vm5846_vm1, %v5825_v8, %v5837_v41 }
0x1ca7   : > { %v5853_v56 = vmul.f32 %v9432_v14, %v5848_v44  ;;  %5874 = vrot.lane.b32.xlu0 %v9309_v19, %s9896_s9  ;;  %5862 = vrot.lane.b32.xlu1 %v9309_v19, %s9897_s25 }
0x1ca9   : > { %5857 = vst.msk [vmem:[#allocation2 + $0x1d0] sm:$0xff] %vm5244_vm7, %v5853_v56  ;;  %v5708_v26 = vpop.permute.xlu1 %5707  ;;  %v5720_v29 = vpop.permute.xlu0 %5719 }
0x1caa   : > { %v5730_v15 = vsel %vm1212_vm5, %v5708_v26, %v5720_v29 }
0x1cab   : > { %v5735_v43 = vmul.f32 %v9446_v60, %v5730_v15  ;;  %5876 = vrot.lane.b32.xlu0 %v9301_v45, %s9896_s9  ;;  %5864 = vrot.lane.b32.xlu1 %v9301_v45, %s9897_s25 }
0x1cad   : > { %5739 = vst.msk [vmem:[#allocation2 + $0xd0] sm:$0xff] %vm5244_vm7, %v5735_v43  ;;  %v5787_v59 = vpop.permute.xlu1 %5786  ;;  %v5799_v1 = vpop.permute.xlu0 %5798 }
0x1cae   : > { %v5810_v37 = vsel %vm5808_vm6, %v5787_v59, %v5799_v1 }
0x1caf   : > { %v5815_v38 = vmul.f32 %v9458_v27, %v5810_v37  ;;  %5872 = vrot.lane.b32.xlu0 %v9303_v46, %s9896_s9  ;;  %5860 = vrot.lane.b32.xlu1 %v9303_v46, %s9897_s25 }
0x1cb1   : > { %5819 = vst.msk [vmem:[#allocation2 + $0x190] sm:$0xff] %vm5244_vm7, %v5815_v38  ;;  %v5670_v34 = vpop.permute.xlu1 %5669  ;;  %v5682_v10 = vpop.permute.xlu0 %5681 }
0x1cb2   : > { %v5693_v0 = vsel %vm5691_vm9, %v5670_v34, %v5682_v10 }
0x1cb3   : > { %v5698_v12 = vmul.f32 %v9470_v35, %v5693_v0  ;;  %5939 = vperm.xlu1 %7353, %v9475_v24  }
0x1cb5   : > { %5702 = vst.msk [vmem:[#allocation2 + $0x90] sm:$0xff] %vm5244_vm7, %v5698_v12  ;;  %v5749_v20 = vpop.permute.xlu1 %5748  ;;  %v5761_v40 = vpop.permute.xlu0 %5760 }
0x1cb6   : > { %v5772_v23 = vsel %vm5770_vm15, %v5749_v20, %v5761_v40 }
0x1cb7   : > { %v5777_v48 = vmul.f32 %v9484_v33, %v5772_v23  ;;  %7354 = vset.pattern.permute.xlu1 %v7595_v16 }
0x1cb9   : > { %5781 = vst.msk [vmem:[#allocation2 + $0x150] sm:$0xff] %vm5244_vm7, %v5777_v48  ;;  %v5633_v31 = vpop.permute.xlu1 %5632  ;;  %v5645_v7 = vpop.permute.xlu0 %5644 }
0x1cba   : > { %v5655_v21 = vsel %vm5148_vm11, %v5633_v31, %v5645_v7 }
0x1cbb   : > { %v5660_v13 = vmul.f32 %v9493_v63, %v5655_v21 }
0x1cbd   : > { %5664 = vst.msk [vmem:[#allocation2 + $0x50] sm:$0xff] %vm5244_vm7, %v5660_v13  ;;  %v5595_v16 = vpop.permute.xlu1 %5594  ;;  %v5607_v32 = vpop.permute.xlu0 %5606 }
0x1cbe   : > { %v5618_v47 = vsel %vm5616_vm14, %v5595_v16, %v5607_v32 }
0x1cbf   : > { %v5623_v28 = vmul.f32 %v9501_v39, %v5618_v47 }
0x1cc1   : > { %5627 = vst.msk [vmem:[#allocation2 + $0x10] sm:$0xff] %vm5244_vm7, %v5623_v28  ;;  %v5823_v55 = vpop.permute.xlu1 %5822  ;;  %v5835_v11 = vpop.permute.xlu0 %5834 }
0x1cc2   : > { %v5847_v2 = vsel %vm5846_vm1, %v5823_v55, %v5835_v11 }
0x1cc3   : > { %v5852_v62 = vmul.f32 %v9432_v14, %v5847_v2 }
0x1cc5   : > { %5856 = vst.msk [vmem:[#allocation2 + $0x1c0] sm:$0xff] %vm5244_vm7, %v5852_v62  ;;  %v5706_v51 = vpop.permute.xlu1 %5705  ;;  %v5718_v36 = vpop.permute.xlu0 %5717 }
0x1cc6   : > { %v5729_v52 = vsel %vm1212_vm5, %v5706_v51, %v5718_v36 }
0x1cc7   : > { %v5734_v4 = vmul.f32 %v9446_v60, %v5729_v52 }
0x1cc9   : > { %5738 = vst.msk [vmem:[#allocation2 + $0xc0] sm:$0xff] %vm5244_vm7, %v5734_v4  ;;  %v5785_v58 = vpop.permute.xlu1 %5784  ;;  %v5797_v5 = vpop.permute.xlu0 %5796 }
0x1cca   : > { %v5809_v57 = vsel %vm5808_vm6, %v5785_v58, %v5797_v5 }
0x1ccb   : > { %v5814_v30 = vmul.f32 %v9458_v27, %v5809_v57 }
0x1ccd   : > { %5818 = vst.msk [vmem:[#allocation2 + $0x180] sm:$0xff] %vm5244_vm7, %v5814_v30  ;;  %v5668_v61 = vpop.permute.xlu1 %5667  ;;  %v5680_v22 = vpop.permute.xlu0 %5679 }
0x1cce   : > { %v5692_v25 = vsel %vm5691_vm9, %v5668_v61, %v5680_v22 }
0x1ccf   : > { %v5697_v45 = vmul.f32 %v9470_v35, %v5692_v25 }
0x1cd1   : > { %5701 = vst.msk [vmem:[#allocation2 + $0x80] sm:$0xff] %vm5244_vm7, %v5697_v45  ;;  %v5747_v46 = vpop.permute.xlu1 %5746  ;;  %v5759_v54 = vpop.permute.xlu0 %5758 }
0x1cd2   : > { %v5771_v19 = vsel %vm5770_vm15, %v5747_v46, %v5759_v54 }
0x1cd3   : > { %v5776_v8 = vmul.f32 %v9484_v33, %v5771_v19 }
0x1cd5   : > { %5780 = vst.msk [vmem:[#allocation2 + $0x140] sm:$0xff] %vm5244_vm7, %v5776_v8  ;;  %v5631_v41 = vpop.permute.xlu1 %5630  ;;  %v5643_v18 = vpop.permute.xlu0 %5642 }
0x1cd6   : > { %v5654_v44 = vsel %vm5148_vm11, %v5631_v41, %v5643_v18 }
0x1cd7   : > { %v5659_v56 = vmul.f32 %v9493_v63, %v5654_v44 }
0x1cd9   : > { %5663 = vst.msk [vmem:[#allocation2 + $0x40] sm:$0xff] %vm5244_vm7, %v5659_v56  ;;  %v5593_v26 = vpop.permute.xlu1 %5592  ;;  %v5605_v29 = vpop.permute.xlu0 %5604 }
0x1cda   : > { %v5617_v15 = vsel %vm5616_vm14, %v5593_v26, %v5605_v29 }
0x1cdb   : > { %v5622_v43 = vmul.f32 %v9501_v39, %v5617_v15 }
0x1cdd   : > { %5626 = vst.msk [vmem:[#allocation2] sm:$0xff] %vm5244_vm7, %v5622_v43  ;;  %v5829_v59 = vpop.permute.xlu1 %5828  ;;  %v5841_v1 = vpop.permute.xlu0 %5840 }
0x1cde   : > { %v5850_v37 = vsel %vm5846_vm1, %v5829_v59, %v5841_v1  ;;  %v5927_v1 = vld [vmem:[#allocation2 + $0x1d0] sm:$0xff] }
0x1cdf   : > { %v5855_v38 = vmul.f32 %v9432_v14, %v5850_v37 }
0x1ce1   : > { %5859 = vst.msk [vmem:[#allocation2 + $0x1f0] sm:$0xff] %vm5244_vm7, %v5855_v38  ;;  %v5712_v9 = vpop.permute.xlu1 %5711  ;;  %v5724_v34 = vpop.permute.xlu0 %5723  ;;  %v5911_v38 = vld [vmem:[#allocation2 + $0xd0] sm:$0xff] }
0x1ce2   : > { %v5732_v10 = vsel %vm1212_vm5, %v5712_v9, %v5724_v34  ;;  %v5926_v34 = vld [vmem:[#allocation2 + $0x1c0] sm:$0xff] }
0x1ce3   : > { %v5737_v0 = vmul.f32 %v9446_v60, %v5732_v10  ;;  %v5910_v10 = vld [vmem:[#allocation2 + $0xc0] sm:$0xff] }
0x1ce5   : > { %5741 = vst.msk [vmem:[#allocation2 + $0xf0] sm:$0xff] %vm5244_vm7, %v5737_v0  ;;  %v5791_v12 = vpop.permute.xlu1 %5790  ;;  %v5803_v20 = vpop.permute.xlu0 %5802 }
0x1ce6   : > { %v5812_v40 = vsel %vm5808_vm6, %v5791_v12, %v5803_v20 }
0x1ce7   : > { %v5817_v23 = vmul.f32 %v9458_v27, %v5812_v40 }
0x1ce8   : > { %v5929_v48 = vld [vmem:[#allocation2 + $0x1f0] sm:$0xff] }
0x1ce9   : > { %5821 = vst.msk [vmem:[#allocation2 + $0x1b0] sm:$0xff] %vm5244_vm7, %v5817_v23  ;;  %v5674_v31 = vpop.permute.xlu1 %5673  ;;  %6976 = vmatprep.subr.mxu1 %v5929_v48  ;;  %v5686_v7 = vpop.permute.xlu0 %5685 }
0x1cea   : > { %v5695_v21 = vsel %vm5691_vm9, %v5674_v31, %v5686_v7 }
0x1ceb   : > { %v5700_v13 = vmul.f32 %v9470_v35, %v5695_v21  ;;  %v9569_v21 = vld [vmem:[%s9778_s1 + $0x82] ss:$0 sm:$0xff] }
0x1cec   : > { %v5913_v16 = vld [vmem:[#allocation2 + $0xf0] sm:$0xff] }
0x1ced   : > { %5704 = vst.msk [vmem:[#allocation2 + $0xb0] sm:$0xff] %vm5244_vm7, %v5700_v13  ;;  %v5753_v32 = vpop.permute.xlu1 %5752  ;;  %6977 = vmatpush3.msra.mxu1 %v5913_v16  ;;  %v5765_v47 = vpop.permute.xlu0 %5764 }
0x1cee   : > { %v5774_v28 = vsel %vm5770_vm15, %v5753_v32, %v5765_v47  ;;  %v5923_v32 = vld [vmem:[#allocation2 + $0x190] sm:$0xff] }
0x1cef   : > { %v5779_v55 = vmul.f32 %v9484_v33, %v5774_v28  ;;  %v5907_v28 = vld [vmem:[#allocation2 + $0x90] sm:$0xff] }
0x1cf0   : > { %v5925_v20 = vld [vmem:[#allocation2 + $0x1b0] sm:$0xff] }
0x1cf1   : > { %5783 = vst.msk [vmem:[#allocation2 + $0x170] sm:$0xff] %vm5244_vm7, %v5779_v55  ;;  %v5637_v11 = vpop.permute.xlu1 %5636  ;;  %v5649_v2 = vpop.permute.xlu0 %5648 }
0x1cf2   : > { %v5657_v62 = vsel %vm5148_vm11, %v5637_v11, %v5649_v2  ;;  %v5922_v11 = vld [vmem:[#allocation2 + $0x180] sm:$0xff] }
0x1cf3   : > { %v5662_v51 = vmul.f32 %v9493_v63, %v5657_v62  ;;  %v5906_v2 = vld [vmem:[#allocation2 + $0x80] sm:$0xff] }
0x1cf4   : > { %v5909_v23 = vld [vmem:[#allocation2 + $0xb0] sm:$0xff] }
0x1cf5   : > { %5666 = vst.msk [vmem:[#allocation2 + $0x70] sm:$0xff] %vm5244_vm7, %v5662_v51  ;;  %v5599_v36 = vpop.permute.xlu1 %5598  ;;  %v5611_v52 = vpop.permute.xlu0 %5610 }
0x1cf6   : > { %v5620_v4 = vsel %vm5616_vm14, %v5599_v36, %v5611_v52 }
0x1cf7   : > { %v5625_v58 = vmul.f32 %v9501_v39, %v5620_v4 }
0x1cf8   : > { %v5921_v36 = vld [vmem:[#allocation2 + $0x170] sm:$0xff] }
0x1cf9   : > { %5629 = vst.msk [vmem:[#allocation2 + $0x30] sm:$0xff] %vm5244_vm7, %v5625_v58  ;;  %v5827_v5 = vpop.permute.xlu1 %5826  ;;  %v5839_v57 = vpop.permute.xlu0 %5838 }
0x1cfa   : > { %v5849_v30 = vsel %vm5846_vm1, %v5827_v5, %v5839_v57 }
0x1cfb   : > { %v5854_v61 = vmul.f32 %v9432_v14, %v5849_v30 }
0x1cfc   : > { %v5905_v4 = vld [vmem:[#allocation2 + $0x70] sm:$0xff] }
0x1cfd   : > { %5858 = vst.msk [vmem:[#allocation2 + $0x1e0] sm:$0xff] %vm5244_vm7, %v5854_v61  ;;  %v5710_v22 = vpop.permute.xlu1 %5709  ;;  %v5722_v25 = vpop.permute.xlu0 %5721 }
0x1cfe   : > { %v5731_v45 = vsel %vm1212_vm5, %v5710_v22, %v5722_v25  ;;  %v5919_v22 = vld [vmem:[#allocation2 + $0x150] sm:$0xff] }
0x1cff   : > { %v5736_v46 = vmul.f32 %v9446_v60, %v5731_v45  ;;  %v5903_v45 = vld [vmem:[#allocation2 + $0x50] sm:$0xff] }
0x1d01   : > { %5740 = vst.msk [vmem:[#allocation2 + $0xe0] sm:$0xff] %vm5244_vm7, %v5736_v46  ;;  %v5789_v54 = vpop.permute.xlu1 %5788  ;;  %v5801_v19 = vpop.permute.xlu0 %5800 }
0x1d02   : > { %v5811_v8 = vsel %vm5808_vm6, %v5789_v54, %v5801_v19  ;;  %v5918_v54 = vld [vmem:[#allocation2 + $0x140] sm:$0xff] }
0x1d03   : > { %v5816_v41 = vmul.f32 %v9458_v27, %v5811_v8  ;;  %v5902_v19 = vld [vmem:[#allocation2 + $0x40] sm:$0xff] }
0x1d04   : > { %v5928_v18 = vld [vmem:[#allocation2 + $0x1e0] sm:$0xff] }
0x1d05   : > { %5820 = vst.msk [vmem:[#allocation2 + $0x1a0] sm:$0xff] %vm5244_vm7, %v5816_v41  ;;  %v5672_v44 = vpop.permute.xlu1 %5671  ;;  %6978 = vmatprep.subr.mxu1 %v5928_v18  ;;  %v5684_v56 = vpop.permute.xlu0 %5683 }
0x1d06   : > { %v5694_v26 = vsel %vm5691_vm9, %v5672_v44, %v5684_v56  ;;  %v5917_v44 = vld [vmem:[#allocation2 + $0x130] sm:$0xff] }
0x1d07   : > { %v5699_v29 = vmul.f32 %v9470_v35, %v5694_v26  ;;  %v5901_v26 = vld [vmem:[#allocation2 + $0x30] sm:$0xff] }
0x1d08   : > { %v5912_v15 = vld [vmem:[#allocation2 + $0xe0] sm:$0xff] }
0x1d09   : > { %5703 = vst.msk [vmem:[#allocation2 + $0xa0] sm:$0xff] %vm5244_vm7, %v5699_v29  ;;  %v5751_v43 = vpop.permute.xlu1 %5750  ;;  %6979 = vmatpush3.msra.mxu1 %v5912_v15  ;;  %v5763_v59 = vpop.permute.xlu0 %5762  ;;  %v5916_v15 = vld [vmem:[#allocation2 + $0x120] sm:$0xff] }
0x1d0a   : > { %v5773_v37 = vsel %vm5770_vm15, %v5751_v43, %v5763_v59  ;;  %6980 = vmatprep.subr.mxu1 %v5927_v1 }
0x1d0b   : > { %v5778_v9 = vmul.f32 %v9484_v33, %v5773_v37  ;;  %6981 = vmatpush3.msra.mxu1 %v5911_v38  ;;  %v5915_v37 = vld [vmem:[#allocation2 + $0x110] sm:$0xff] }
0x1d0c   : > { %6982 = vmatprep.subr.mxu1 %v5926_v34  ;;  %v5924_v31 = vld [vmem:[#allocation2 + $0x1a0] sm:$0xff] }
0x1d0d   : > { %5782 = vst.msk [vmem:[#allocation2 + $0x160] sm:$0xff] %vm5244_vm7, %v5778_v9  ;;  %v5635_v0 = vpop.permute.xlu1 %5634  ;;  %6983 = vmatpush3.msra.mxu1 %v5910_v10  ;;  %v5647_v12 = vpop.permute.xlu0 %5646  ;;  %v5899_v9 = vld [vmem:[#allocation2 + $0x10] sm:$0xff]  ;;  %v5914_v10 = vld [vmem:[#allocation2 + $0x100] sm:$0xff] }
0x1d0e   : > { %v5656_v40 = vsel %vm5148_vm11, %v5635_v0, %v5647_v12  ;;  %6984 = vmatprep.subr.mxu1 %v5925_v20  ;;  %v5934_v0 = vld [vmem:[%s9787_s10] sm:$0xff] }
0x1d0f   : > { %v5661_v48 = vmul.f32 %v9493_v63, %v5656_v40  ;;  %6985 = vmatpush3.msra.mxu1 %v5909_v23  ;;  %v5898_v12 = vld [vmem:[#allocation2] sm:$0xff]  ;;  %v5936_v23 = vld [vmem:[%s9787_s10 + $0x10] sm:$0xff] }
0x1d10   : > { %6986 = vmatprep.subr.mxu1 %v5924_v31  ;;  %v5908_v7 = vld [vmem:[#allocation2 + $0xa0] sm:$0xff] }
0x1d11   : > { %5665 = vst.msk [vmem:[#allocation2 + $0x60] sm:$0xff] %vm5244_vm7, %v5661_v48  ;;  %v5867_v13 = vpop.permute.xlu1 %5866  ;;  %6987 = vmatpush3.msra.mxu1 %v5908_v7  ;;  %v5879_v16 = vpop.permute.xlu0 %5878 }
0x1d12   : > { %v5888_v47 = vsel %vm5884_vm2, %v5867_v13, %v5879_v16  ;;  %6988 = vmatprep.subr.mxu1 %v5923_v32 }
0x1d13   : > { %v5893_v55 = vmul.f32 %v9569_v21, %v5888_v47  ;;  %6989 = vmatpush3.msra.mxu1 %v5907_v28 }
0x1d14   : > { %6990 = vmatprep.subr.mxu1 %v5922_v11  ;;  %v5920_v5 = vld [vmem:[#allocation2 + $0x160] sm:$0xff] }
0x1d15   : > { %5897 = vst.msk [vmem:[#allocation2 + $0x230] sm:$0xff] %vm5244_vm7, %v5893_v55  ;;  %v5597_v62 = vpop.permute.xlu1 %5596  ;;  %6991 = vmatpush3.msra.mxu1 %v5906_v2  ;;  %v5609_v51 = vpop.permute.xlu0 %5608 }
0x1d16   : > { %v5619_v52 = vsel %vm5616_vm14, %v5597_v62, %v5609_v51  ;;  %6992 = vmatprep.subr.mxu1 %v5921_v36 }
0x1d17   : > { %v5624_v58 = vmul.f32 %v9501_v39, %v5619_v52  ;;  %6993 = vmatpush3.msra.mxu1 %v5905_v4 }
0x1d18   : > { %6994 = vmatprep.subr.mxu1 %v5920_v5  ;;  %v5904_v57 = vld [vmem:[#allocation2 + $0x60] sm:$0xff] }
0x1d19   : > { %5628 = vst.msk [vmem:[#allocation2 + $0x20] sm:$0xff] %vm5244_vm7, %v5624_v58  ;;  %v5863_v30 = vpop.permute.xlu1 %5862  ;;  %6995 = vmatpush3.msra.mxu1 %v5904_v57  ;;  %v5875_v61 = vpop.permute.xlu0 %5874 }
0x1d1a   : > { %v5886_v25 = vsel %vm5884_vm2, %v5863_v30, %v5875_v61  ;;  %6996 = vmatprep.subr.mxu1 %v5919_v22  ;;  %v7629_v30 = vmov 17   ;;  %v7630_v61 = vmov 18  }
0x1d1b   : > { %v5891_v46 = vmul.f32 %v9569_v21, %v5886_v25  ;;  %6997 = vmatpush3.msra.mxu1 %v5903_v45 }
0x1d1c   : > { %6998 = vmatprep.subr.mxu1 %v5918_v54  ;;  %v5933_v8 = vld [vmem:[#allocation2 + $0x230] sm:$0xff] }
0x1d1d   : > { %5895 = vst.msk [vmem:[#allocation2 + $0x210] sm:$0xff] %vm5244_vm7, %v5891_v46  ;;  %v5865_v41 = vpop.permute.xlu1 %5864  ;;  %6999 = vmatpush3.msra.mxu1 %v5902_v19  ;;  %7130 = vmatpush3.msra.mxu0 %v5933_v8  ;;  %v5877_v18 = vpop.permute.xlu0 %5876 }
0x1d1e   : > { %v5887_v56 = vsel %vm5884_vm2, %v5865_v41, %v5877_v18  ;;  %7000 = vmatprep.subr.mxu1 %v5917_v44  ;;  %7131 = vmatprep.subr.mxu0 %v7596_v49 }
0x1d1f   : > { %v5892_v29 = vmul.f32 %v9569_v21, %v5887_v56  ;;  %7001 = vmatpush3.msra.mxu1 %v5901_v26 }
0x1d20   : > { %7002 = vmatprep.subr.mxu1 %v5916_v15  ;;  %v5900_v43 = vld [vmem:[#allocation2 + $0x20] sm:$0xff] }
0x1d21   : > { %5896 = vst.msk [vmem:[#allocation2 + $0x220] sm:$0xff] %vm5244_vm7, %v5892_v29  ;;  %v5861_v59 = vpop.permute.xlu1 %5860  ;;  %7003 = vmatpush3.msra.mxu1 %v5900_v43  ;;  %v5873_v1 = vpop.permute.xlu0 %5872 }
0x1d22   : > { %v5885_v38 = vsel %vm5884_vm2, %v5861_v59, %v5873_v1  ;;  %7004 = vmatprep.subr.mxu1 %v5915_v37  ;;  %v6440_v59 = vld [vmem:[%s9788_s11] sm:$0xff]  ;;  %v6346_v1 = vld [vmem:[%s9779_s2 + $0x8] sm:$0xff]  ;;  %v7631_v37 = vmov 19  }
0x1d23   : > { %v5890_v34 = vmul.f32 %v9569_v21, %v5885_v38  ;;  %7005 = vmatpush3.msra.mxu1 %v5899_v9  ;;  %v6347_v38 = vld [vmem:[%s9779_s2 + $0x10] sm:$0xff]  ;;  %v6348_v9 = vld [vmem:[%s9779_s2 + $0x18] sm:$0xff] }
0x1d24   : > { %7006 = vmatprep.subr.mxu1 %v5914_v10  ;;  %v5931_v40 = vld [vmem:[#allocation2 + $0x210] sm:$0xff] }
0x1d25   : > { %5894 = vst.msk [vmem:[#allocation2 + $0x200] sm:$0xff] %vm5244_vm7, %v5890_v34  ;;  %7007 = vmatpush3.msra.mxu1 %v5898_v12 }
0x1d26   : > { %6010 = vmatmul.mubr.f32.vlgmr.msra.gmra.mxu1 %v5934_v0 }
0x1d28   : > { %v5932_v20 = vld [vmem:[#allocation2 + $0x220] sm:$0xff] }
0x1d29   : > { %7132 = vmatpush3.msra.mxu0 %v5932_v20 }
0x1d2a   : > { %7133 = vmatprep.subr.mxu0 %v7596_v49 }
0x1d2b   : > { %7134 = vmatpush3.msra.mxu0 %v5931_v40 }
0x1d2c   : > { %7135 = vmatprep.subr.mxu0 %v7596_v49  ;;  %v5930_v48 = vld [vmem:[#allocation2 + $0x200] sm:$0xff] }
0x1d2d   : > { %7136 = vmatpush3.msra.mxu0 %v5930_v48 }
0x1d2e   : > { %7138 = vmatmul.mubr.msk.f32.vlgmr.msra.gmra.mxu0 %vm9898_vm10, %v5936_v23  ;;  %7140 = vmatprep.subr.mxu0 %v7596_v49  ;;  %v5940_v16 = vpop.permute.xlu1 %5939 }
0x1d2f   : > { %7141 = vmatpush3.msk.msra.mxu0 %vm6088_vm8, %v8215_v50  ;;  %7142 = vmatprep.mubr.msk.f32.mxu0 %vm7600_vm4, %v7596_v49 }
0x1d30   : > { %7145 = vmatprep.subr.mxu0 %v7596_v49 }
0x1d32   : > { %7143 = vmatmul.mubr.msk.f32.vlgmr.msra.gmra.mxu0 %vm9899_vm3, %v8231_v53 }
0x1d33   : > { %7147 = vmatprep.mubr.msk.f32.mxu0 %vm7600_vm4, %v7596_v49 }
0x1de6   : > { %v7008_v31 = vpop.f32.mrf.mxu1 }
0x1de8   : > { %v7009_v7 = vpop.f32.mrf.mxu1 }
0x1de9   : > { %v7010_v13 = vadd.f32 %v7009_v7, %v7008_v31 }
0x1deb   : > { %v6012_v32 = vadd.f32 %v7010_v13, %v5940_v16 }
0x1dee   : > { %v6081_v47 = vpop.f32.mrf.mxu0 }
0x1def   : > { %v6082_v28 = vadd.f32 %v6081_v47, %v6012_v32 }
0x1df0   : > { %v7139_v55 = vpop.f32.mrf.mxu0 }
0x1df1   : > { %v6161_v50 = vsel %vm5244_vm7, %v6082_v28, 0.0 }
0x1df2   : > { %6162 = vadd.xlane.f32.xlu0 %v6161_v50  ;;  %v6157_v11 = vpop.f32.mrf.mxu0 }
0x1df4   : > { %v7144_v2 = vpop.f32.mrf.mxu0 }
0x1e7b   : > { %v6163_v62 = vpop.xlane.xlu0 %6162 }
0x1e7c   : > { %7146 = vmatpush3.msra.mxu0 %v6163_v62 }
0x1e7d   : > { %7148 = vmatmul.mubr.msk.f32.vlgmr.msra.gmra.mxu0 %vm5148_vm11, %v6157_v11  ;;  %7150 = vmatprep.subr.mxu0 %v7596_v49 }
0x1e7e   : > { %7152 = vmatprep.mubr.msk.f32.mxu0 %vm7600_vm4, %v7596_v49  ;;  %vm6464_vm4 = vcmask 588800  }
0x1f3d   : > { %v6233_v53 = vpop.f32.mrf.mxu0 }
0x1f3e   : > { %v6237_v51 = vmul.f32 0.00390625, %v6233_v53 }
0x1f3f   : > { %v7149_v36 = vpop.f32.mrf.mxu0 }
0x1f40   : > { %6240 = vperm.xlu1 %7354, %v6237_v51  }
0x1f44   : > { %7356 = vset.pattern.permute.xlu1 %v7629_v30 }
0x1fbb   : > { %v6241_v52 = vpop.permute.xlu1 %6240 }
0x1fbc   : > { %v6243_v4 = vsub.f32 %v6082_v28, %v6241_v52 }
0x1fbe   : > { %v6244_v58 = vmul.f32 %v6243_v4, %v6243_v4 }
0x1fc0   : > { %v6245_v5 = vsel %vm5244_vm7, %v6244_v58, 0.0 }
0x1fc1   : > { %6246 = vadd.xlane.f32.xlu1 %v6245_v5 }
0x1fd2   : > { %6329 = vperm.xlu1 %7356, %v9475_v24  }
0x1fd6   : > { %7357 = vset.pattern.permute.xlu1 %v7630_v61 }
0x1fd7   : > { %6334 = vperm.xlu1 %7357, %v9475_v24  }
0x1fdb   : > { %7358 = vset.pattern.permute.xlu1 %v7631_v37 }
0x204a   : > { %v6247_v57 = vpop.xlane.xlu1 %6246 }
0x204b   : > { %7151 = vmatpush3.msra.mxu0 %v6247_v57 }
0x204c   : > { %7153 = vmatmul.mubr.msk.f32.vlgmr.msra.gmra.mxu0 %vm5148_vm11, %v6157_v11 }
0x204d   : > { %7173 = vmatprep.mubr.msk.f32.mxu0 %vm6464_vm4, %v6440_v59 }
0x204e   : > { %v6330_v54 = vpop.permute.xlu1 %6329 }
0x2052   : > { %v6335_v41 = vpop.permute.xlu1 %6334 }
0x210c   : > { %v6314_v49 = vpop.f32.mrf.mxu0 }
0x210d   : > { %v6318_v22 = vmul.f32 0.00390625, %v6314_v49 }
0x210e   : > { %v7154_v25 = vpop.f32.mrf.mxu0 }
0x210f   : > { %v6319_v45 = vadd.f32 1e-05, %v6318_v22 }
0x2111   : > { %7447 = vrsqrt.f32 %v6319_v45  ;;  %v6441_v45 = vld [vmem:[%s9788_s11 + $0x8] sm:$0xff] }
0x211e   : > { %v7448_v46 = vpop.eup %7447 }
0x211f   : > { %6323 = vperm.xlu0 %7355, %v7448_v46   ;;  %v6443_v46 = vld [vmem:[%s9788_s11 + $0x18] sm:$0xff] }
0x2123   : > { %7359 = vset.pattern.permute.xlu0 %v7631_v37 }
0x219a   : > { %v6324_v19 = vpop.permute.xlu0 %6323 }
0x219b   : > { %v6326_v8 = vmul.f32 %v6324_v19, %v6243_v4 }
0x219d   : > { %v6332_v18 = vmul.f32 %v6330_v54, %v6326_v8 }
0x219f   : > { %v6337_v44 = vadd.f32 %v6335_v41, %v6332_v18 }
0x21a1   : > { %v6866_v56 = vmul.f32 -1.442695, %v6337_v44 }
0x21a3   : > { %7449 = vpow2.f32 %v6866_v56 }
0x21b0   : > { %v7450_v26 = vpop.eup %7449 }
0x21b1   : > { %v6341_v29 = vadd.f32 1.0, %v7450_v26 }
0x21b3   : > { %7451 = vrcp.f32 %v6341_v29 }
0x21c0   : > { %v7452_v15 = vpop.eup %7451 }
0x21c1   : > { %v6344_v43 = vmul.f32 %v7452_v15, %v6337_v44 }
0x21c3   : > { %6390 = vst.msk [vmem:[#allocation2 + $0x40] sm:$0xff] %vm5244_vm7, %v6344_v43  ;;  %6414 = vrot.lane.b32.xlu0 %v6344_v43, %s9900_s26  ;;  %6421 = vrot.lane.b32.xlu1 %v6344_v43, %s9897_s25  ;;  %s9688_s26 = scalar_lea.hbm %s9789_s12, %s6880_s14 }
0x21c7   : > { %6404 = vrot.lane.b32.xlu0 %v6344_v43, %s9889_s3  ;;  %6424 = vrot.lane.b32.xlu1 %v6344_v43, %s9896_s9  ;;  %s6589_s9 = sshll.u32 %s8629_s17, 4  ;;  %s9691_s9 = int_to_ptr.vmem [resolvable:$true] %s6589_s9 }
0x21c8   : > { %s7455_s25 = scalar_lea.vmem %s9691_s9, 512 }
0x21c9   : > { %p7456_p11 = scmp.ne.s32.totalorder %s9691_s9, %s7455_s25 }
0x21cb   : > { %6394 = vrot.lane.b32.xlu0 %v6344_v43, %s9895_s23  ;;  %6411 = vrot.lane.b32.xlu1 %v6344_v43, %s9893_s7  ;;  %s6571_s7 = scalar_lea.sflag [#allocation4], %s8621_s21  ;;  %p7457_p12 = pnand %p7456_p11, %p7744_p5 }
0x21cd   : > { %p7458_p13 = pneg %p7457_p12 }
0x21cf   : > { %6383 = vrot.lane.b32.xlu0 %v6344_v43, %s9865_s22  ;;  %6401 = vrot.lane.b32.xlu1 %v6344_v43, %s9890_s27 }
0x21d3   : > { %6373 = vrot.lane.b32.xlu0 %v6344_v43, %s9885_s0  ;;  %6391 = vrot.lane.b32.xlu1 %v6344_v43, %s9864_s16  ;;  %s7632_s16 = smov [#allocation3]  }
0x21d4   : > { %s7459_s22 = sshll.u32 %s7632_s16, 4  ;;  %s7460_s22 = int_to_ptr.vmem [resolvable:$false] %s7459_s22 }
0x21d5   : > { %s7461_s23 = scalar_lea.vmem %s7460_s22, 1024  ;;  %p7462_p0 = scmp.lt.s32.totalorder %s9691_s9, %s7460_s22 }
0x21d6   : > { %p7463_p1 = scmp.lt.s32.totalorder %s7461_s23, %s7455_s25 }
0x21d7   : > { %6363 = vrot.lane.b32.xlu0 %v6344_v43, %s9891_s20  ;;  %6380 = vrot.lane.b32.xlu1 %v6344_v43, %s9894_s15 }
0x21d8   : > { %p7464_p2 = por %p7463_p1, %p7462_p0 }
0x21da   : > { %p7465_p3 = pnand %p7464_p2, %p7458_p13 }
0x21db   : > { %6353 = vrot.lane.b32.xlu0 %v6344_v43, %s9887_s6  ;;  %6370 = vrot.lane.b32.xlu1 %v6344_v43, %s9886_s5 }
0x21df   : > { %6360 = vrot.lane.b32.xlu1 %v6344_v43, %s9892_s30  ;;  %6451 = vperm.xlu0 %7359, %v6346_v1  }
0x21e3   : > { %6350 = vrot.lane.b32.xlu1 %v6344_v43, %s9888_s4 }
0x21e7   : > { %6446 = vperm.xlu1 %7358, %v9475_v24  }
0x21eb   : > { %6456 = vperm.xlu1 %7358, %v6347_v38  }
0x21ef   : > { %6461 = vperm.xlu1 %7358, %v6348_v9  }
0x2235   : > { %v6415_v34 = vpop.permute.xlu0 %6414  ;;  %v6422_v10 = vpop.permute.xlu1 %6421 }
0x2239   : > { %v6405_v0 = vpop.permute.xlu0 %6404  ;;  %v6425_v12 = vpop.permute.xlu1 %6424 }
0x223a   : > { %v6427_v20 = vsel %vm5884_vm2, %v6422_v10, %v6425_v12 }
0x223b   : > { %v6429_v40 = vmul.f32 %v6427_v20, %v9569_v21 }
0x223d   : > { %6430 = vst.msk [vmem:[#allocation2 + $0x80] sm:$0xff] %vm5244_vm7, %v6429_v40  ;;  %v6395_v24 = vpop.permute.xlu0 %6394  ;;  %v6412_v23 = vpop.permute.xlu1 %6411 }
0x223e   : > { %v6417_v48 = vsel %vm5846_vm1, %v6412_v23, %v6415_v34 }
0x223f   : > { %v6419_v31 = vmul.f32 %v6417_v48, %v9432_v14 }
0x2241   : > { %6420 = vst.msk [vmem:[#allocation2 + $0x70] sm:$0xff] %vm5244_vm7, %v6419_v31  ;;  %v6402_v7 = vpop.permute.xlu1 %6401  ;;  %v6384_v16 = vpop.permute.xlu0 %6383 }
0x2242   : > { %v6407_v13 = vsel %vm5808_vm6, %v6402_v7, %v6405_v0 }
0x2243   : > { %v6409_v32 = vmul.f32 %v6407_v13, %v9458_v27 }
0x2244   : > { %v6439_v47 = vld [vmem:[#allocation2 + $0x80] sm:$0xff] }
0x2245   : > { %6410 = vst.msk [vmem:[#allocation2 + $0x60] sm:$0xff] %vm5244_vm7, %v6409_v32  ;;  %7155 = vmatprep.subr.mxu0 %v6439_v47  ;;  %v6392_v21 = vpop.permute.xlu1 %6391  ;;  %v6374_v14 = vpop.permute.xlu0 %6373 }
0x2246   : > { %v6397_v28 = vsel %vm5770_vm15, %v6392_v21, %v6395_v24  ;;  %7156 = vmatpush3.msra.mxu0 %v6439_v47 }
0x2247   : > { %v6399_v55 = vmul.f32 %v6397_v28, %v9484_v33 }
0x2248   : > { %v6438_v50 = vld [vmem:[#allocation2 + $0x70] sm:$0xff] }
0x2249   : > { %6400 = vst.msk [vmem:[#allocation2 + $0x50] sm:$0xff] %vm5244_vm7, %v6399_v55  ;;  %7157 = vmatprep.subr.mxu0 %v6438_v50  ;;  %v6381_v11 = vpop.permute.xlu1 %6380  ;;  %v6364_v33 = vpop.permute.xlu0 %6363 }
0x224a   : > { %v6386_v2 = vsel %vm1212_vm5, %v6381_v11, %v6384_v16  ;;  %7158 = vmatpush3.msra.mxu0 %v6438_v50 }
0x224b   : > { %v6388_v27 = vmul.f32 %v6386_v2, %v9446_v60  ;;  %v6435_v60 = vld [vmem:[#allocation2 + $0x40] sm:$0xff] }
0x224c   : > { %v6437_v62 = vld [vmem:[#allocation2 + $0x60] sm:$0xff] }
0x224d   : > { %6389 = vst.msk [vmem:[#allocation2 + $0x30] sm:$0xff] %vm5244_vm7, %v6388_v27  ;;  %7159 = vmatprep.subr.mxu0 %v6437_v62  ;;  %v6371_v53 = vpop.permute.xlu1 %6370  ;;  %v6354_v30 = vpop.permute.xlu0 %6353 }
0x224e   : > { %v6376_v51 = vsel %vm5691_vm9, %v6371_v53, %v6374_v14  ;;  %7160 = vmatpush3.msra.mxu0 %v6437_v62 }
0x224f   : > { %v6378_v36 = vmul.f32 %v6376_v51, %v9470_v35 }
0x2250   : > { %v6436_v52 = vld [vmem:[#allocation2 + $0x50] sm:$0xff] }
0x2251   : > { %6379 = vst.msk [vmem:[#allocation2 + $0x20] sm:$0xff] %vm5244_vm7, %v6378_v36  ;;  %7161 = vmatprep.subr.mxu0 %v6436_v52  ;;  %v6361_v4 = vpop.permute.xlu1 %6360 }
0x2252   : > { %v6366_v58 = vsel %vm5148_vm11, %v6361_v4, %v6364_v33  ;;  %7162 = vmatpush3.msra.mxu0 %v6436_v52 }
0x2253   : > { %v6368_v5 = vmul.f32 %v6366_v58, %v9493_v63  ;;  %7163 = vmatprep.subr.mxu0 %v6435_v60 }
0x2254   : > { %7164 = vmatpush3.msra.mxu0 %v6435_v60  ;;  %v6434_v57 = vld [vmem:[#allocation2 + $0x30] sm:$0xff] }
0x2255   : > { %6369 = vst.msk [vmem:[#allocation2 + $0x10] sm:$0xff] %vm5244_vm7, %v6368_v5  ;;  %v6351_v61 = vpop.permute.xlu1 %6350  ;;  %7165 = vmatprep.subr.mxu0 %v6434_v57 }
0x2256   : > { %v6356_v35 = vsel %vm5616_vm14, %v6351_v61, %v6354_v30  ;;  %7166 = vmatpush3.msra.mxu0 %v6434_v57 }
0x2257   : > { %v6358_v49 = vmul.f32 %v6356_v35, %v9501_v39  ;;  %v6442_v39 = vld [vmem:[%s9788_s11 + $0x10] sm:$0xff] }
0x2258   : > { %v6433_v22 = vld [vmem:[#allocation2 + $0x20] sm:$0xff] }
0x2259   : > { %6359 = vst.msk [vmem:[#allocation2] sm:$0xff] %vm5244_vm7, %v6358_v49  ;;  %7167 = vmatprep.subr.mxu0 %v6433_v22 }
0x225a   : > { %7168 = vmatpush3.msra.mxu0 %v6433_v22 }
0x225c   : > { %v6432_v63 = vld [vmem:[#allocation2 + $0x10] sm:$0xff] }
0x225d   : > { %7169 = vmatprep.subr.mxu0 %v6432_v63 }
0x225e   : > { %7170 = vmatpush3.msra.mxu0 %v6432_v63 }
0x2260   : > { %v6431_v25 = vld [vmem:[#allocation2] sm:$0xff] }
0x2261   : > { %7171 = vmatprep.subr.mxu0 %v6431_v25 }
0x2262   : > { %7172 = vmatpush3.msra.mxu0 %v6431_v25 }
0x2263   : > { %7174 = vmatmul.mubr.msk.f32.vlgmr.msra.gmra.mxu0 %vm6464_vm4, %v6441_v45 }
0x2264   : > { %7176 = vmatprep.mubr.msk.f32.mxu0 %vm6464_vm4, %v6442_v39 }
0x2267   : > { %7177 = vmatmul.mubr.msk.f32.gmra.mxu0 %vm6464_vm4, %v6443_v46 }
0x2268   : > { %7468 = shalt.err (!%p7465_p3)
}
0x2269   : > { %s7469_s17 = scalar_lea.hbm %s9688_s26, 512  ;;  %s7473_s4 = scalar_lea.hbm %s9789_s12, 1024 }
0x226a   : > { %p7470_p4 = scmp.ne.s32.totalorder %s9688_s26, %s7469_s17  ;;  %p7474_p9 = scmp.lt.s32.totalorder %s9688_s26, %s9789_s12 }
0x226b   : > { %p7475_p10 = scmp.lt.s32.totalorder %s7473_s4, %s7469_s17 }
0x226c   : > { %p7471_p7 = pnand %p7470_p4, %p7744_p5 }
0x226d   : > { %p7476_p11 = por %p7475_p10, %p7474_p9 }
0x226e   : > { %p7472_p8 = pneg %p7471_p7 }
0x2270   : > { %p7477_p12 = pnand %p7476_p11, %p7472_p8 }
0x2272   : > { %7480 = shalt.err (!%p7477_p12)
}
0x2273   : > { %s7633_s15 = smov 256   ;;  %v6447_v54 = vpop.permute.xlu1 %6446  ;;  %v6452_v19 = vpop.permute.xlu0 %6451  ;;  %s9901_s27 = sshll.u32 %s8621_s21, 5 }
0x2274   : > { %7179 = dma.vmem_to_hbm [thread:$0]  (%p7744_p5), %s9691_s9, 512, %s9688_s26, %s6571_s7, %s7633_s15, %s7633_s15, %s9867_s24  }
0x2275   : > { %s444_s3 = scalar_lea.vmem [#allocation5], %s9901_s27  ;;  %s9729_s26 = scalar_lea.hbm %s9790_s13, %s6880_s14 }
0x2276   : > { %s6605_s24 = sshll.u32 %s444_s3, 4  ;;  %s6576_s9 = scalar_lea.sflag [#allocation6], %s8621_s21  ;;  %s9733_s24 = int_to_ptr.vmem [resolvable:$true] %s6605_s24 }
0x2277   : > { %v6457_v8 = vpop.permute.xlu1 %6456  ;;  %s7481_s7 = scalar_lea.vmem %s9733_s24, 512  ;;  %s7634_s29 = smov [#allocation5]  }
0x2278   : > { %p7482_p13 = scmp.ne.s32.totalorder %s9733_s24, %s7481_s7  ;;  %s7485_s14 = sshll.u32 %s7634_s29, 4  ;;  %s7486_s14 = int_to_ptr.vmem [resolvable:$false] %s7485_s14 }
0x2279   : > { %s7487_s25 = scalar_lea.vmem %s7486_s14, 1024  ;;  %p7488_p2 = scmp.lt.s32.totalorder %s9733_s24, %s7486_s14 }
0x227a   : > { %p7483_p0 = pnand %p7482_p13, %p7744_p5  ;;  %p7489_p3 = scmp.lt.s32.totalorder %s7487_s25, %s7481_s7 }
0x227b   : > { %v6462_v29 = vpop.permute.xlu1 %6461 }
0x227c   : > { %p7484_p1 = pneg %p7483_p0  ;;  %p7490_p4 = por %p7489_p3, %p7488_p2 }
0x227e   : > { %p7491_p7 = pnand %p7490_p4, %p7484_p1 }
0x2323   : > { %v7175_v41 = vpop.f32.mrf.mxu0 }
0x2324   : > { %v6549_v18 = vadd.f32 %v7175_v41, %v6452_v19 }
0x2325   : > { %v6543_v44 = vpop.f32.mrf.mxu0 }
0x2326   : > { %v6563_v56 = vadd.f32 %v9231_v42, %v6549_v18  ;;  %v6544_v26 = vadd.f32 %v6543_v44, %v6447_v54 }
0x2327   : > { %v7178_v15 = vpop.f32.mrf.mxu0 }
0x2328   : > { %6567 = vst.msk [vmem:[%s444_s3 + $0x8] sm:$0xff] %vm5244_vm7, %v6563_v56  ;;  %v6562_v43 = vadd.f32 %v9225_v17, %v6544_v26  ;;  %v6559_v59 = vadd.f32 %v7178_v15, %v6462_v29 }
0x2329   : > { %v6553_v1 = vpop.f32.mrf.mxu0 }
0x232a   : > { %6566 = vst.msk [vmem:[%s444_s3] sm:$0xff] %vm5244_vm7, %v6562_v43  ;;  %v6565_v37 = vadd.f32 %v9229_v6, %v6559_v59  ;;  %v6554_v38 = vadd.f32 %v6553_v1, %v6457_v8 }
0x232c   : > { %6569 = vst.msk [vmem:[%s444_s3 + $0x18] sm:$0xff] %vm5244_vm7, %v6565_v37  ;;  %v6564_v42 = vadd.f32 %v9223_v3, %v6554_v38 }
0x232e   : > { %6568 = vst.msk [vmem:[%s444_s3 + $0x10] sm:$0xff] %vm5244_vm7, %v6564_v42 }
0x232f   : > { %7494 = shalt.err (!%p7491_p7)
}
0x2330   : > { %s7495_s16 = scalar_lea.hbm %s9729_s26, 512  ;;  %s7499_s17 = scalar_lea.hbm %s9790_s13, 1024 }
0x2331   : > { %p7496_p8 = scmp.ne.s32.totalorder %s9729_s26, %s7495_s16  ;;  %p7500_p11 = scmp.lt.s32.totalorder %s9729_s26, %s9790_s13 }
0x2332   : > { %p7501_p12 = scmp.lt.s32.totalorder %s7499_s17, %s7495_s16 }
0x2333   : > { %p7497_p9 = pnand %p7496_p8, %p7744_p5 }
0x2334   : > { %p7502_p13 = por %p7501_p12, %p7500_p11 }
0x2335   : > { %p7498_p10 = pneg %p7497_p9 }
0x2337   : > { %p7503_p0 = pnand %p7502_p13, %p7498_p10 }
0x2339   : > { %7506 = shalt.err (!%p7503_p0)
}
0x233a   : > { %s7635_s4 = smov 128  }
0x233b   : > { %7180 = dma.vmem_to_hbm [thread:$0]  (%p7744_p5), %s9733_s24, 512, %s9729_s26, %s6576_s9, %s7635_s4, %s7635_s4, %s9891_s20  }
0x233c PF: > { %s9902_s0 = sld [smem:[#allocation9_spill]]  ;;  %p7190_p1 = scmp.ge.s32.totalorder %s7545_s28, 2 }
0x233e   : > { %p7184_p2 = pnand %p7190_p1, %p7748_p6 }
0x2340   : > { %p7185_p3 = pneg %p7184_p2 }
0x2342   : > { %s6620_s15 = sand.u32 1, %s9902_s0  }
0x2343   : > { %s6621_s27 = scalar_lea.sflag [#allocation4], %s6620_s15 }
0x2344   : > { %7524 = dma.done.wait (%p7185_p3), %s6621_s27, 512  }
0x2345   : > { %7526 = vsyncadd (%p7185_p3), %s6621_s27, 4294966784  ;;  %s6630_s3 = scalar_lea.sflag [#allocation6], %s6620_s15 }
0x2346   : > { %7528 = dma.done.wait (%p7185_p3), %s6630_s3, 512  }
0x2347   : > { %7530 = vsyncadd (%p7185_p3), %s6630_s3, 4294966784  ;;  %s9904_s28 = sld [smem:[#allocation12_spill]] }
0x2348   : > { %s9905_s25 = sld [smem:[#allocation10_spill]] }
0x2349   : > { %s9906_s26 = sld [smem:[#allocation11_spill]] }
0x234a   : > { %s9907_s27 = sld [smem:[#allocation13_spill]] }
0x234d   : > { %p27_p5 = scmp.ge.s32.totalorder %s9904_s28, 4  }
0x234f   :  { %29 = sbr.rel (!%p27_p5) target bundleno = 14 (0xe), region = 175 }
0x2354   :  { %6635 = vsyncpa [#allocation4], 1 }
0x2355   :  { %6637 = vsyncpa [#allocation4 + $0x1], 1 }
0x2356   :  { %6638 = vsyncpa [#allocation6], 1 }
0x2357   :  { %6640 = vsyncpa [#allocation6 + $0x1], 1 }

</bundles_post_ra>
